<compile_context>
chip_gen: v7x
topology: tpu7x:2x2x1
jax: 0.10.0
libtpu: 0.0.40
codegen_flags: <defaults>
</compile_context>

<pallas_src>
import jax
import jax.numpy as jnp
from jax.experimental import pallas as pl
from jax.experimental.pallas import tpu as pltpu

EPS = 1e-3


def _has_second_tensorcore():
    """True only for chips where a 'parallel' grid axis engages a 2nd TensorCore (v7x).
    Conservative: any failure -> False (single block, always correct)."""
    try:
        kind = jax.devices()[0].device_kind.lower()
    except Exception:
        return False
    return ("v7" in kind) or ("7x" in kind)


def _fused_add_conv1x1_bn_kernel(a_ref, b_ref, w_ref, gb_ref, o_ref):
    # a_ref, b_ref : (Cin, M)  float32, shared across Cout blocks
    # w_ref        : (BC, Cin) float32, this block's conv weights
    # gb_ref       : (BC, 2)   float32, [:, 0] = gamma, [:, 1] = beta
    # o_ref        : (BC, M)   float32
    x = a_ref[...] + b_ref[...]                                      # elementwise add (VPU)
    w = w_ref[...]
    y = jnp.dot(w, x, preferred_element_type=jnp.float32)            # 1x1 conv == matmul (MXU)

    m = y.shape[1]                                                   # true M (block == full dim)
    inv_m = 1.0 / m
    # Batch mean over M via linearity: reduce x (Cin, M) instead of y (Cout, M).
    sum_x = jnp.sum(x, axis=1, keepdims=True)                        # (Cin, 1)
    mean = jnp.dot(w, sum_x, preferred_element_type=jnp.float32) * inv_m   # (BC, 1)
    ex2 = jnp.sum(y * y, axis=1, keepdims=True) * inv_m              # (BC, 1)
    var = jnp.maximum(ex2 - mean * mean, 0.0)                        # biased variance, clamped

    gb = gb_ref[...]                                                 # (BC, 2)
    gamma = gb[:, 0:1]
    beta = gb[:, 1:2]
    scale = gamma * jax.lax.rsqrt(var + EPS)                         # (BC, 1)
    shift = beta - mean * scale                                      # (BC, 1)
    o_ref[...] = y * scale + shift


def fused_add_conv1x1_bn(x129, x114, conv_w, gamma, beta):
    """x129, x114: (N, Cin, H, W) NCHW float32.
    conv_w: (Cout, Cin, 1, 1). gamma, beta: (Cout,).
    Returns (N, Cout, H, W) NCHW float32."""
    N, Cin, H, W = x129.shape
    Cout = conv_w.shape[0]
    M = N * H * W

    if N == 1:
        # Zero-copy: (1, Cin, H, W) -> (Cin, M)
        a = x129.reshape(Cin, M)
        b = x114.reshape(Cin, M)
    else:
        # General-N fallback (real transpose; BN stats stay per-channel over N*H*W).
        a = jnp.transpose(x129, (1, 0, 2, 3)).reshape(Cin, M)
        b = jnp.transpose(x114, (1, 0, 2, 3)).reshape(Cin, M)

    w = conv_w.reshape(Cout, Cin)                    # natural PyTorch layout, no transpose
    gb = jnp.stack([gamma, beta], axis=-1)           # (Cout, 2): one contiguous array

    # Generation-aware blocking: the kernel is overhead-bound (~40 MFLOP), so one
    # grid step on single-TC chips; split Cout in two only where a 2nd TC exists.
    n_blocks = 1
    if _has_second_tensorcore() and Cout % 2 == 0 and (Cout // 2) % 8 == 0:
        n_blocks = 2
    bc = Cout // n_blocks

    cost = pl.CostEstimate(
        flops=2 * M * Cin * Cout + 2 * Cin * Cout + 2 * M * Cin + 4 * M * Cout,
        transcendentals=Cout,
        bytes_accessed=(2 * M * Cin + Cin * Cout + 2 * Cout + M * Cout) * 4,
    )

    out_t = pl.pallas_call(
        _fused_add_conv1x1_bn_kernel,
        out_shape=jax.ShapeDtypeStruct((Cout, M), jnp.float32),
        grid_spec=pltpu.PrefetchScalarGridSpec(
            num_scalar_prefetch=0,
            grid=(n_blocks,),
            in_specs=[
                pl.BlockSpec((Cin, M), lambda j: (0, 0)),    # a (shared, grid-invariant)
                pl.BlockSpec((Cin, M), lambda j: (0, 0)),    # b (shared, grid-invariant)
                pl.BlockSpec((bc, Cin), lambda j: (j, 0)),   # weight block
                pl.BlockSpec((bc, 2), lambda j: (j, 0)),     # packed gamma/beta block
            ],
            out_specs=pl.BlockSpec((bc, M), lambda j: (j, 0)),
        ),
        compiler_params=pltpu.CompilerParams(
            dimension_semantics=("parallel",),
            vmem_limit_bytes=32 << 20,
        ),
        cost_estimate=cost,
    )(a, b, w, gb)

    if N == 1:
        # Zero-copy: (Cout, M) -> (1, Cout, H, W)
        return out_t.reshape(1, Cout, H, W)
    return jnp.transpose(out_t.reshape(Cout, N, H, W), (1, 0, 2, 3))


def _reference(x129, x114, conv_w, gamma, beta):
    x = x129 + x114
    y = jax.lax.conv_general_dilated(
        x, conv_w, window_strides=(1, 1), padding="VALID",
        dimension_numbers=("NCHW", "OIHW", "NCHW"))
    mean = jnp.mean(y, axis=(0, 2, 3), keepdims=True)
    var = jnp.mean((y - mean) ** 2, axis=(0, 2, 3), keepdims=True)
    yn = (y - mean) * jax.lax.rsqrt(var + EPS)
    return yn * gamma.reshape(1, -1, 1, 1) + beta.reshape(1, -1, 1, 1)


if __name__ == "__main__":
    key = jax.random.PRNGKey(0)
    k1, k2, k3, k4, k5 = jax.random.split(key, 5)

    # Shapes from the original module.
    N, Cin, H, W, Cout = 1, 160, 14, 14, 640
    x129 = jax.random.normal(k1, (N, Cin, H, W), dtype=jnp.float32)
    x114 = jax.random.normal(k2, (N, Cin, H, W), dtype=jnp.float32)
    conv_w = jax.random.normal(k3, (Cout, Cin, 1, 1), dtype=jnp.float32) * 0.05
    gamma = 1.0 + 0.1 * jax.random.normal(k4, (Cout,), dtype=jnp.float32)
    beta = 0.1 * jax.random.normal(k5, (Cout,), dtype=jnp.float32)

    out = fused_add_conv1x1_bn(x129, x114, conv_w, gamma, beta)
    out = jax.block_until_ready(out)

    ref = _reference(x129, x114, conv_w, gamma, beta)
    assert out.shape == (N, Cout, H, W)
    assert jnp.allclose(out, ref, atol=1e-3, rtol=1e-3), \
        f"max abs err = {jnp.max(jnp.abs(out - ref))}"
    print("KERNEL_OK")
</pallas_src>

<mosaic_0001>
module attributes {stable_mosaic.version = 11 : i64} {
  func.func @_fused_add_conv1x1_bn_kernel(%arg0: i32, %arg1: memref<160x196xf32, #tpu.memory_space<vmem>>, %arg2: memref<160x196xf32, #tpu.memory_space<vmem>>, %arg3: memref<640x160xf32, #tpu.memory_space<vmem>>, %arg4: memref<640x2xf32, #tpu.memory_space<vmem>>, %arg5: memref<640x196xf32, #tpu.memory_space<vmem>>) attributes {dimension_semantics = [#tpu.dimension_semantics<parallel>], iteration_bounds = array<i64: 1>, scalar_prefetch = 0 : i64, scratch_operands = 0 : i64, tpu.core_type = #tpu.core_type<tc>, window_params = [{pipeline_mode = #tpu.pipeline_mode<synchronous>, transform_indices = @transform_0, window_bounds = array<i64: 160, 196>}, {pipeline_mode = #tpu.pipeline_mode<synchronous>, transform_indices = @transform_1, window_bounds = array<i64: 160, 196>}, {transform_indices = @transform_2, window_bounds = array<i64: 640, 160>}, {transform_indices = @transform_3, window_bounds = array<i64: 640, 2>}, {transform_indices = @transform_4, window_bounds = array<i64: 640, 196>}]} {
    %c0 = arith.constant 0 : index
    %c0_0 = arith.constant 0 : index
    %0 = vector.load %arg1[%c0, %c0_0] : memref<160x196xf32, #tpu.memory_space<vmem>>, vector<160x196xf32>
    %c0_1 = arith.constant 0 : index
    %c0_2 = arith.constant 0 : index
    %1 = vector.load %arg2[%c0_1, %c0_2] : memref<160x196xf32, #tpu.memory_space<vmem>>, vector<160x196xf32>
    %2 = arith.addf %0, %1 : vector<160x196xf32>
    %c0_3 = arith.constant 0 : index
    %c0_4 = arith.constant 0 : index
    %3 = vector.load %arg3[%c0_3, %c0_4] : memref<640x160xf32, #tpu.memory_space<vmem>>, vector<640x160xf32>
    %cst = arith.constant dense<0.000000e+00> : vector<640x196xf32>
    %4 = tpu.matmul %3, %2, %cst {dimension_numbers = #tpu.dot_dimension_numbers<[1], [0], [0], [1], [0, 0, 1, 1], [], []>} : vector<640x160xf32>, vector<160x196xf32>, vector<640x196xf32> -> vector<640x196xf32>
    %cst_5 = arith.constant dense<0.000000e+00> : vector<160xf32>
    %5 = vector.multi_reduction <add>, %2, %cst_5 [1] : vector<160x196xf32> to vector<160xf32>
    %6 = vector.shape_cast %5 : vector<160xf32> to vector<160x1xf32>
    %cst_6 = arith.constant dense<0.000000e+00> : vector<640x1xf32>
    %7 = tpu.matmul %3, %6, %cst_6 {dimension_numbers = #tpu.dot_dimension_numbers<[1], [0], [0], [1], [0, 0, 1, 1], [], []>} : vector<640x160xf32>, vector<160x1xf32>, vector<640x1xf32> -> vector<640x1xf32>
    %cst_7 = arith.constant 0.00510204071 : f32
    %8 = vector.broadcast %cst_7 : f32 to vector<640x1xf32>
    %9 = arith.mulf %7, %8 : vector<640x1xf32>
    %10 = arith.mulf %4, %4 : vector<640x196xf32>
    %cst_8 = arith.constant dense<0.000000e+00> : vector<640xf32>
    %11 = vector.multi_reduction <add>, %10, %cst_8 [1] : vector<640x196xf32> to vector<640xf32>
    %12 = vector.shape_cast %11 : vector<640xf32> to vector<640x1xf32>
    %cst_9 = arith.constant 0.00510204071 : f32
    %13 = vector.broadcast %cst_9 : f32 to vector<640x1xf32>
    %14 = arith.mulf %12, %13 : vector<640x1xf32>
    %15 = arith.mulf %9, %9 : vector<640x1xf32>
    %16 = arith.subf %14, %15 : vector<640x1xf32>
    %cst_10 = arith.constant 0.000000e+00 : f32
    %17 = vector.broadcast %cst_10 : f32 to vector<640x1xf32>
    %18 = arith.maximumf %16, %17 : vector<640x1xf32>
    %c0_11 = arith.constant 0 : index
    %c0_12 = arith.constant 0 : index
    %19 = vector.load %arg4[%c0_11, %c0_12] : memref<640x2xf32, #tpu.memory_space<vmem>>, vector<640x2xf32>
    %20 = vector.extract_strided_slice %19 {offsets = [0, 0], sizes = [640, 1], strides = [1, 1]} : vector<640x2xf32> to vector<640x1xf32>
    %21 = vector.extract_strided_slice %19 {offsets = [0, 1], sizes = [640, 1], strides = [1, 1]} : vector<640x2xf32> to vector<640x1xf32>
    %cst_13 = arith.constant 1.000000e-03 : f32
    %22 = vector.broadcast %cst_13 : f32 to vector<640x1xf32>
    %23 = arith.addf %18, %22 : vector<640x1xf32>
    %24 = math.rsqrt %23 : vector<640x1xf32>
    %25 = arith.mulf %20, %24 : vector<640x1xf32>
    %26 = arith.mulf %9, %25 : vector<640x1xf32>
    %27 = arith.subf %21, %26 : vector<640x1xf32>
    %28 = vector.broadcast %25 : vector<640x1xf32> to vector<640x196xf32>
    %29 = arith.mulf %4, %28 : vector<640x196xf32>
    %30 = vector.broadcast %27 : vector<640x1xf32> to vector<640x196xf32>
    %31 = arith.addf %29, %30 : vector<640x196xf32>
    %c0_14 = arith.constant 0 : index
    %c0_15 = arith.constant 0 : index
    %32 = vector.load %arg5[%c0_14, %c0_15] : memref<640x196xf32, #tpu.memory_space<vmem>>, vector<640x196xf32>
    tpu.vector_store %arg5[%c0_14, %c0_15], %31 {strides = array<i32>} : memref<640x196xf32, #tpu.memory_space<vmem>>, vector<640x196xf32>,
    return
  }
  func.func @transform_0(%arg0: i32) -> (i32, i32) {
    %c0_i32 = arith.constant 0 : i32
    %c0_i32_0 = arith.constant 0 : i32
    %c0_i32_1 = arith.constant 0 : i32
    return %c0_i32, %c0_i32_0 : i32, i32
  }
  func.func @transform_1(%arg0: i32) -> (i32, i32) {
    %c0_i32 = arith.constant 0 : i32
    %c0_i32_0 = arith.constant 0 : i32
    %c0_i32_1 = arith.constant 0 : i32
    return %c0_i32, %c0_i32_0 : i32, i32
  }
  func.func @transform_2(%arg0: i32) -> (i32, i32) {
    %c0_i32 = arith.constant 0 : i32
    %c0_i32_0 = arith.constant 0 : i32
    return %arg0, %c0_i32 : i32, i32
  }
  func.func @transform_3(%arg0: i32) -> (i32, i32) {
    %c0_i32 = arith.constant 0 : i32
    %c0_i32_0 = arith.constant 0 : i32
    return %arg0, %c0_i32 : i32, i32
  }
  func.func @transform_4(%arg0: i32) -> (i32, i32) {
    %c0_i32 = arith.constant 0 : i32
    %c0_i32_0 = arith.constant 0 : i32
    return %arg0, %c0_i32 : i32, i32
  }
}

</mosaic_0001>

<bundles_post_ra>
// kernel: tpu_custom_call.1
= control target key start
LH: loop header
LB: loop body
LE: loop exit
PB: predicated region body
PF: predicated region fallthrough
CT: control target
= control target key end

     0   :  { %vm1083_vm0 = vcmask 556032   ;;  %vm297_vm1 = vcmask 261120   ;;  %s5155_s17 = smov 1   ;;  %s10037_s0 = inlined_call_operand.vmem [shape: f32[160,196], index: 0, kind: input, shape index: {}]   ;;  %s10038_s1 = inlined_call_operand.vmem [shape: f32[160,196], index: 1, kind: input, shape index: {}]   ;;  %s10039_s2 = inlined_call_operand.vmem [shape: f32[640,160], index: 2, kind: input, shape index: {}]   ;;  %s10040_s3 = inlined_call_operand.vmem [shape: f32[640,2], index: 3, kind: input, shape index: {}]   ;;  %s10041_s4 = inlined_call_operand.vmem [shape: f32[640,196], index: 4, kind: output, shape index: {}]  }
   0x1   :  { %v18_v0 = vld [vmem:[%s10037_s0 + $0x8] sm:$0xff]  ;;  %v20_v1 = vld [vmem:[%s10037_s0 + $0x18] sm:$0xff]  ;;  %v17_v5 = vld [vmem:[%s10037_s0] sm:$0xff] }
   0x2   :  { %v58_v2 = vld [vmem:[%s10038_s1 + $0x8] sm:$0xff]  ;;  %v60_v3 = vld [vmem:[%s10038_s1 + $0x18] sm:$0xff]  ;;  %v57_v6 = vld [vmem:[%s10038_s1] sm:$0xff] }
   0x3   :  { %v98_v4 = vadd.f32 %v58_v2, %v18_v0  ;;  %v100_v7 = vadd.f32 %v60_v3, %v20_v1  ;;  %v97_v8 = vadd.f32 %v57_v6, %v17_v5  ;;  %v19_v9 = vld [vmem:[%s10037_s0 + $0x10] sm:$0xff]  ;;  %v22_v11 = vld [vmem:[%s10037_s0 + $0x28] sm:$0xff]  ;;  %v24_v14 = vld [vmem:[%s10037_s0 + $0x38] sm:$0xff] }
   0x4   :  { %v59_v10 = vld [vmem:[%s10038_s1 + $0x10] sm:$0xff]  ;;  %v62_v15 = vld [vmem:[%s10038_s1 + $0x28] sm:$0xff]  ;;  %v64_v16 = vld [vmem:[%s10038_s1 + $0x38] sm:$0xff] }
   0x5   :  { %v1084_v12 = vsel %vm1083_vm0, %v98_v4, 0.0  ;;  %v99_v13 = vadd.f32 %v59_v10, %v19_v9  ;;  %v4753_v17 = vpack.c.bf16 %v100_v7, %v98_v4  ;;  %v102_v19 = vadd.f32 %v62_v15, %v22_v11  ;;  %v21_v21 = vld [vmem:[%s10037_s0 + $0x20] sm:$0xff]  ;;  %v23_v23 = vld [vmem:[%s10037_s0 + $0x30] sm:$0xff]  ;;  %v26_v28 = vld [vmem:[%s10037_s0 + $0x48] sm:$0xff] }
   0x6   :  { %v1085_v18 = vadd.f32 %v1084_v12, %v97_v8  ;;  %v104_v20 = vadd.f32 %v64_v16, %v24_v14  ;;  %v61_v22 = vld [vmem:[%s10038_s1 + $0x20] sm:$0xff]  ;;  %v1088_v26 = vsel %vm1083_vm0, %v100_v7, 0.0  ;;  %v63_v27 = vld [vmem:[%s10038_s1 + $0x30] sm:$0xff]  ;;  %v28_v29 = vld [vmem:[%s10037_s0 + $0x58] sm:$0xff] }
   0x7   :  { %v4755_v24 = vpack.c.bf16 %v99_v13, %v97_v8  ;;  %v101_v25 = vadd.f32 %v61_v22, %v21_v21  ;;  %4754 = vmatprep.subr.bf16.mxu0 %v4753_v17  ;;  %v1092_v31 = vsel %vm1083_vm0, %v102_v19, 0.0  ;;  %v1089_v32 = vadd.f32 %v1088_v26, %v99_v13  ;;  %v66_v34 = vld [vmem:[%s10038_s1 + $0x48] sm:$0xff]  ;;  %v68_v35 = vld [vmem:[%s10038_s1 + $0x58] sm:$0xff]  ;;  %v25_v36 = vld [vmem:[%s10037_s0 + $0x40] sm:$0xff] }
   0x8   :  { %1086 = vadd.xlane.f32.xlu0 %v1085_v18  ;;  %v4757_v30 = vpack.c.bf16 %v104_v20, %v102_v19  ;;  %v103_v33 = vadd.f32 %v63_v27, %v23_v23  ;;  %v106_v38 = vadd.f32 %v66_v34, %v26_v28  ;;  %v108_v39 = vadd.f32 %v68_v35, %v28_v29  ;;  %v27_v41 = vld [vmem:[%s10037_s0 + $0x50] sm:$0xff]  ;;  %v65_v42 = vld [vmem:[%s10038_s1 + $0x40] sm:$0xff]  ;;  %v30_v47 = vld [vmem:[%s10037_s0 + $0x68] sm:$0xff] }
   0x9   :  { %4756 = vmatpush1.bf16.msra.mxu0 %v4755_v24  ;;  %v1093_v37 = vadd.f32 %v1092_v31, %v101_v25  ;;  %v1096_v40 = vsel %vm1083_vm0, %v104_v20, 0.0  ;;  %v67_v43 = vld [vmem:[%s10038_s1 + $0x50] sm:$0xff]  ;;  %v105_v45 = vadd.f32 %v65_v42, %v25_v36  ;;  %v32_v48 = vld [vmem:[%s10037_s0 + $0x78] sm:$0xff]  ;;  %v70_v49 = vld [vmem:[%s10038_s1 + $0x68] sm:$0xff] }
   0xa   :  { %4758 = vmatprep.subr.bf16.mxu0 %v4757_v30  ;;  %v4759_v44 = vpack.c.bf16 %v103_v33, %v101_v25  ;;  %v107_v46 = vadd.f32 %v67_v43, %v27_v41  ;;  %v4761_v50 = vpack.c.bf16 %v108_v39, %v106_v38  ;;  %v1097_v51 = vadd.f32 %v1096_v40, %v103_v33  ;;  %v72_v52 = vld [vmem:[%s10038_s1 + $0x78] sm:$0xff]  ;;  %v29_v55 = vld [vmem:[%s10037_s0 + $0x60] sm:$0xff]  ;;  %v31_v56 = vld [vmem:[%s10037_s0 + $0x70] sm:$0xff] }
   0xb   :  { %1094 = vadd.xlane.f32.xlu1 %v1093_v37  ;;  %v110_v53 = vadd.f32 %v70_v49, %v30_v47  ;;  %v1100_v54 = vsel %vm1083_vm0, %v106_v38, 0.0  ;;  %v112_v57 = vadd.f32 %v72_v52, %v32_v48  ;;  %v1104_v58 = vsel %vm1083_vm0, %v108_v39, 0.0  ;;  %v69_v60 = vld [vmem:[%s10038_s1 + $0x60] sm:$0xff]  ;;  %v71_v61 = vld [vmem:[%s10038_s1 + $0x70] sm:$0xff]  ;;  %v34_v62 = vld [vmem:[%s10037_s0 + $0x88] sm:$0xff] }
   0xc   :  { %1090 = vadd.xlane.f32.xlu0 %v1089_v32  ;;  %v1101_v59 = vadd.f32 %v1100_v54, %v105_v45  ;;  %v4763_v63 = vpack.c.bf16 %v107_v46, %v105_v45  ;;  %v109_v0 = vadd.f32 %v69_v60, %v29_v55  ;;  %v111_v1 = vadd.f32 %v71_v61, %v31_v56  ;;  %v36_v2 = vld [vmem:[%s10037_s0 + $0x98] sm:$0xff]  ;;  %v74_v3 = vld [vmem:[%s10038_s1 + $0x88] sm:$0xff]  ;;  %v33_v9 = vld [vmem:[%s10037_s0 + $0x80] sm:$0xff] }
   0xd   :  { %4760 = vmatpush1.bf16.msra.mxu0 %v4759_v44  ;;  %v76_v4 = vld [vmem:[%s10038_s1 + $0x98] sm:$0xff]  ;;  %v1108_v5 = vsel %vm1083_vm0, %v110_v53, 0.0  ;;  %v4765_v6 = vpack.c.bf16 %v112_v57, %v110_v53  ;;  %v114_v7 = vadd.f32 %v74_v3, %v34_v62  ;;  %v35_v10 = vld [vmem:[%s10037_s0 + $0x90] sm:$0xff]  ;;  %v73_v11 = vld [vmem:[%s10038_s1 + $0x80] sm:$0xff]  ;;  %v1105_v12 = vadd.f32 %v1104_v58, %v107_v46 }
   0xe   :  { %4762 = vmatprep.subr.bf16.mxu0 %v4761_v50  ;;  %v116_v8 = vadd.f32 %v76_v4, %v36_v2  ;;  %v75_v13 = vld [vmem:[%s10038_s1 + $0x90] sm:$0xff]  ;;  %v38_v14 = vld [vmem:[%s10037_s0 + $0xa8] sm:$0xff]  ;;  %v40_v15 = vld [vmem:[%s10037_s0 + $0xb8] sm:$0xff]  ;;  %v1112_v16 = vsel %vm1083_vm0, %v112_v57, 0.0  ;;  %v1109_v17 = vadd.f32 %v1108_v5, %v109_v0  ;;  %v4767_v20 = vpack.c.bf16 %v111_v1, %v109_v0 }
   0xf   :  { %1098 = vadd.xlane.f32.xlu1 %v1097_v51  ;;  %v78_v18 = vld [vmem:[%s10038_s1 + $0xa8] sm:$0xff]  ;;  %v80_v19 = vld [vmem:[%s10038_s1 + $0xb8] sm:$0xff]  ;;  %v113_v21 = vadd.f32 %v73_v11, %v33_v9  ;;  %v115_v22 = vadd.f32 %v75_v13, %v35_v10  ;;  %v1116_v23 = vsel %vm1083_vm0, %v114_v7, 0.0  ;;  %v37_v24 = vld [vmem:[%s10037_s0 + $0xa0] sm:$0xff]  ;;  %v1113_v32 = vadd.f32 %v1112_v16, %v111_v1 }
  0x10   :  { %1102 = vadd.xlane.f32.xlu0 %v1101_v59  ;;  %v39_v25 = vld [vmem:[%s10037_s0 + $0xb0] sm:$0xff]  ;;  %v4769_v26 = vpack.c.bf16 %v116_v8, %v114_v7  ;;  %v118_v27 = vadd.f32 %v78_v18, %v38_v14  ;;  %v120_v28 = vadd.f32 %v80_v19, %v40_v15  ;;  %v77_v29 = vld [vmem:[%s10038_s1 + $0xa0] sm:$0xff]  ;;  %v42_v31 = vld [vmem:[%s10037_s0 + $0xc8] sm:$0xff]  ;;  %v1120_v36 = vsel %vm1083_vm0, %v116_v8, 0.0 }
  0x11   :  { %4764 = vmatpush1.bf16.msra.mxu0 %v4763_v63  ;;  %v79_v30 = vld [vmem:[%s10038_s1 + $0xb0] sm:$0xff]  ;;  %v44_v33 = vld [vmem:[%s10037_s0 + $0xd8] sm:$0xff]  ;;  %v82_v34 = vld [vmem:[%s10038_s1 + $0xc8] sm:$0xff]  ;;  %v1117_v37 = vadd.f32 %v1116_v23, %v113_v21  ;;  %v4771_v39 = vpack.c.bf16 %v115_v22, %v113_v21  ;;  %v117_v40 = vadd.f32 %v77_v29, %v37_v24  ;;  %v1121_v50 = vadd.f32 %v1120_v36, %v115_v22 }
  0x12   :  { %4766 = vmatprep.subr.bf16.mxu0 %v4765_v6  ;;  %v84_v35 = vld [vmem:[%s10038_s1 + $0xd8] sm:$0xff]  ;;  %v41_v38 = vld [vmem:[%s10037_s0 + $0xc0] sm:$0xff]  ;;  %v119_v41 = vadd.f32 %v79_v30, %v39_v25  ;;  %v1124_v42 = vsel %vm1083_vm0, %v118_v27, 0.0  ;;  %v43_v43 = vld [vmem:[%s10037_s0 + $0xd0] sm:$0xff]  ;;  %v4773_v46 = vpack.c.bf16 %v120_v28, %v118_v27  ;;  %v122_v47 = vadd.f32 %v82_v34, %v42_v31 }
  0x13   :  { %1106 = vadd.xlane.f32.xlu1 %v1105_v12  ;;  %v81_v44 = vld [vmem:[%s10038_s1 + $0xc0] sm:$0xff]  ;;  %v83_v45 = vld [vmem:[%s10038_s1 + $0xd0] sm:$0xff]  ;;  %v124_v48 = vadd.f32 %v84_v35, %v44_v33  ;;  %v46_v49 = vld [vmem:[%s10037_s0 + $0xe8] sm:$0xff]  ;;  %v1128_v54 = vsel %vm1083_vm0, %v120_v28, 0.0  ;;  %v1125_v55 = vadd.f32 %v1124_v42, %v117_v40  ;;  %v5153_v23 = vmov 0.0|0.0  }
  0x14   :  { %1110 = vadd.xlane.f32.xlu0 %v1109_v17  ;;  %v48_v51 = vld [vmem:[%s10037_s0 + $0xf8] sm:$0xff]  ;;  %v86_v52 = vld [vmem:[%s10038_s1 + $0xe8] sm:$0xff]  ;;  %v121_v56 = vadd.f32 %v81_v44, %v41_v38  ;;  %v123_v57 = vadd.f32 %v83_v45, %v43_v43  ;;  %v4775_v58 = vpack.c.bf16 %v119_v41, %v117_v40  ;;  %v1132_v59 = vsel %vm1083_vm0, %v122_v47, 0.0  ;;  %v45_v60 = vld [vmem:[%s10037_s0 + $0xe0] sm:$0xff]  ;;  %4793 = vmatprep.subr.bf16.mxu1 %v5153_v23 }
  0x15   :  { %4768 = vmatpush1.bf16.msra.mxu0 %v4767_v20  ;;  %v88_v53 = vld [vmem:[%s10038_s1 + $0xf8] sm:$0xff]  ;;  %v47_v61 = vld [vmem:[%s10037_s0 + $0xf0] sm:$0xff]  ;;  %v4777_v62 = vpack.c.bf16 %v124_v48, %v122_v47  ;;  %v126_v63 = vadd.f32 %v86_v52, %v46_v49  ;;  %v85_v1 = vld [vmem:[%s10038_s1 + $0xe0] sm:$0xff]  ;;  %v1129_v4 = vadd.f32 %v1128_v54, %v119_v41  ;;  %v1136_v9 = vsel %vm1083_vm0, %v124_v48, 0.0 }
  0x16   :  { %4770 = vmatprep.subr.bf16.mxu0 %v4769_v26  ;;  %v128_v0 = vadd.f32 %v88_v53, %v48_v51  ;;  %v87_v2 = vld [vmem:[%s10038_s1 + $0xf0] sm:$0xff]  ;;  %v50_v3 = vld [vmem:[%s10037_s0 + $0x108] sm:$0xff]  ;;  %v52_v5 = vld [vmem:[%s10037_s0 + $0x118] sm:$0xff]  ;;  %v4779_v8 = vpack.c.bf16 %v123_v57, %v121_v56  ;;  %v1133_v10 = vadd.f32 %v1132_v59, %v121_v56  ;;  %v125_v12 = vadd.f32 %v85_v1, %v45_v60 }
  0x17   :  { %1114 = vadd.xlane.f32.xlu1 %v1113_v32  ;;  %v90_v6 = vld [vmem:[%s10038_s1 + $0x108] sm:$0xff]  ;;  %v92_v7 = vld [vmem:[%s10038_s1 + $0x118] sm:$0xff]  ;;  %v127_v13 = vadd.f32 %v87_v2, %v47_v61  ;;  %v1140_v14 = vsel %vm1083_vm0, %v126_v63, 0.0  ;;  %v49_v15 = vld [vmem:[%s10037_s0 + $0x100] sm:$0xff]  ;;  %v1137_v24 = vadd.f32 %v1136_v9, %v123_v57 }
  0x18   :  { %1118 = vadd.xlane.f32.xlu0 %v1117_v37  ;;  %v138_v11 = vld [vmem:[%s10039_s2 + $0x8] sm:$0xff]  ;;  %v51_v16 = vld [vmem:[%s10037_s0 + $0x110] sm:$0xff]  ;;  %v4781_v17 = vpack.c.bf16 %v128_v0, %v126_v63  ;;  %v130_v18 = vadd.f32 %v90_v6, %v50_v3  ;;  %v132_v19 = vadd.f32 %v92_v7, %v52_v5  ;;  %v89_v20 = vld [vmem:[%s10038_s1 + $0x100] sm:$0xff]  ;;  %v1144_v28 = vsel %vm1083_vm0, %v128_v0, 0.0 }
  0x19   :  { %4772 = vmatpush1.bf16.msra.mxu0 %v4771_v39  ;;  %4593 = vmatprep.mubr.msk.f32.mxu0 %vm297_vm1, %v138_v11  ;;  %v91_v21 = vld [vmem:[%s10038_s1 + $0x110] sm:$0xff]  ;;  %v54_v22 = vld [vmem:[%s10037_s0 + $0x128] sm:$0xff]  ;;  %v56_v25 = vld [vmem:[%s10037_s0 + $0x138] sm:$0xff]  ;;  %v1141_v29 = vadd.f32 %v1140_v14, %v125_v12  ;;  %v4783_v30 = vpack.c.bf16 %v127_v13, %v125_v12  ;;  %v129_v31 = vadd.f32 %v89_v20, %v49_v15 }
  0x1a   :  { %4774 = vmatprep.subr.bf16.mxu0 %v4773_v46  ;;  %v94_v26 = vld [vmem:[%s10038_s1 + $0x128] sm:$0xff]  ;;  %v96_v27 = vld [vmem:[%s10038_s1 + $0x138] sm:$0xff]  ;;  %4673 = vmatprep.mubr.msk.f32.mxu1 %vm297_vm1, %v138_v11  ;;  %v131_v32 = vadd.f32 %v91_v21, %v51_v16  ;;  %v1148_v33 = vsel %vm1083_vm0, %v130_v18, 0.0  ;;  %v53_v34 = vld [vmem:[%s10037_s0 + $0x120] sm:$0xff]  ;;  %v4785_v35 = vpack.c.bf16 %v132_v19, %v130_v18  ;;  %v1145_v41 = vadd.f32 %v1144_v28, %v127_v13 }
  0x1b   :  { %1122 = vadd.xlane.f32.xlu1 %v1121_v50  ;;  %v134_v36 = vadd.f32 %v94_v26, %v54_v22  ;;  %v136_v37 = vadd.f32 %v96_v27, %v56_v25  ;;  %v55_v38 = vld [vmem:[%s10037_s0 + $0x130] sm:$0xff]  ;;  %v93_v39 = vld [vmem:[%s10038_s1 + $0x120] sm:$0xff]  ;;  %v1152_v42 = vsel %vm1083_vm0, %v132_v19, 0.0  ;;  %v1149_v43 = vadd.f32 %v1148_v33, %v129_v31  ;;  %v5469_v57 = vld [vmem:[%s10039_s2 + $0x28] sm:$0xff] }
  0x1c   :  { %1126 = vadd.xlane.f32.xlu0 %v1125_v55  ;;  %v95_v40 = vld [vmem:[%s10038_s1 + $0x130] sm:$0xff]  ;;  %v4787_v44 = vpack.c.bf16 %v131_v32, %v129_v31  ;;  %v133_v45 = vadd.f32 %v93_v39, %v53_v34  ;;  %v1153_v49 = vadd.f32 %v1152_v42, %v131_v32  ;;  %v5451_v54 = vld [vmem:[%s10039_s2] sm:$0xff]  ;;  %v5456_v55 = vld [vmem:[%s10039_s2 + $0x18] sm:$0xff] }
  0x1d   :  { %4776 = vmatpush1.bf16.msra.mxu0 %v4775_v58  ;;  %v135_v46 = vadd.f32 %v95_v40, %v55_v38  ;;  %v1156_v47 = vsel %vm1083_vm0, %v134_v36, 0.0  ;;  %v4789_v48 = vpack.c.bf16 %v136_v37, %v134_v36  ;;  %v1160_v50 = vsel %vm1083_vm0, %v136_v37, 0.0  ;;  %v5464_v56 = vld [vmem:[%s10039_s2 + $0x10] sm:$0xff]  ;;  %v5477_v58 = vld [vmem:[%s10039_s2 + $0x20] sm:$0xff]  ;;  %v5482_v59 = vld [vmem:[%s10039_s2 + $0x38] sm:$0xff] }
  0x1e   :  { %4778 = vmatprep.subr.bf16.mxu0 %v4777_v62  ;;  %v1157_v51 = vadd.f32 %v1156_v47, %v133_v45  ;;  %v5490_v60 = vld [vmem:[%s10039_s2 + $0x30] sm:$0xff]  ;;  %v5495_v61 = vld [vmem:[%s10039_s2 + $0x48] sm:$0xff]  ;;  %v5503_v62 = vld [vmem:[%s10039_s2 + $0x40] sm:$0xff] }
  0x1f   :  { %1130 = vadd.xlane.f32.xlu1 %v1129_v4  ;;  %v4791_v52 = vpack.c.bf16 %v135_v46, %v133_v45  ;;  %v1161_v53 = vadd.f32 %v1160_v50, %v135_v46  ;;  %v5508_v63 = vld [vmem:[%s10039_s2 + $0x58] sm:$0xff]  ;;  %v5516_v0 = vld [vmem:[%s10039_s2 + $0x50] sm:$0xff]  ;;  %v5521_v1 = vld [vmem:[%s10039_s2 + $0x68] sm:$0xff] }
  0x20   :  { %1134 = vadd.xlane.f32.xlu0 %v1133_v10  ;;  %v5529_v2 = vld [vmem:[%s10039_s2 + $0x60] sm:$0xff]  ;;  %v5534_v3 = vld [vmem:[%s10039_s2 + $0x78] sm:$0xff]  ;;  %v5542_v4 = vld [vmem:[%s10039_s2 + $0x70] sm:$0xff] }
  0x21   :  { %4780 = vmatpush1.bf16.msra.mxu0 %v4779_v8  ;;  %v5547_v5 = vld [vmem:[%s10039_s2 + $0x88] sm:$0xff]  ;;  %v5555_v6 = vld [vmem:[%s10039_s2 + $0x80] sm:$0xff]  ;;  %v5560_v7 = vld [vmem:[%s10039_s2 + $0x98] sm:$0xff] }
  0x22   :  { %4782 = vmatprep.subr.bf16.mxu0 %v4781_v17  ;;  %v5568_v8 = vld [vmem:[%s10039_s2 + $0x90] sm:$0xff]  ;;  %v5573_v9 = vld [vmem:[%s10039_s2 + $0xa8] sm:$0xff]  ;;  %v5581_v10 = vld [vmem:[%s10039_s2 + $0xa0] sm:$0xff] }
  0x23   :  { %1138 = vadd.xlane.f32.xlu1 %v1137_v24  ;;  %v5586_v11 = vld [vmem:[%s10039_s2 + $0xb8] sm:$0xff]  ;;  %v5594_v12 = vld [vmem:[%s10039_s2 + $0xb0] sm:$0xff]  ;;  %v5599_v13 = vld [vmem:[%s10039_s2 + $0xc8] sm:$0xff] }
  0x24   :  { %1142 = vadd.xlane.f32.xlu0 %v1141_v29  ;;  %v5607_v14 = vld [vmem:[%s10039_s2 + $0xc0] sm:$0xff]  ;;  %v5612_v15 = vld [vmem:[%s10039_s2 + $0xd8] sm:$0xff]  ;;  %v5620_v16 = vld [vmem:[%s10039_s2 + $0xd0] sm:$0xff] }
  0x25   :  { %4784 = vmatpush1.bf16.msra.mxu0 %v4783_v30  ;;  %v5625_v17 = vld [vmem:[%s10039_s2 + $0xe8] sm:$0xff]  ;;  %v5633_v18 = vld [vmem:[%s10039_s2 + $0xe0] sm:$0xff]  ;;  %v5638_v19 = vld [vmem:[%s10039_s2 + $0xf8] sm:$0xff] }
  0x26   :  { %4786 = vmatprep.subr.bf16.mxu0 %v4785_v35  ;;  %v5646_v20 = vld [vmem:[%s10039_s2 + $0xf0] sm:$0xff]  ;;  %v5651_v21 = vld [vmem:[%s10039_s2 + $0x108] sm:$0xff]  ;;  %v5659_v22 = vld [vmem:[%s10039_s2 + $0x100] sm:$0xff] }
  0x27   :  { %1146 = vadd.xlane.f32.xlu1 %v1145_v41  ;;  %v5664_v24 = vld [vmem:[%s10039_s2 + $0x118] sm:$0xff]  ;;  %v5672_v25 = vld [vmem:[%s10039_s2 + $0x110] sm:$0xff]  ;;  %v5677_v26 = vld [vmem:[%s10039_s2 + $0x128] sm:$0xff] }
  0x28   :  { %1150 = vadd.xlane.f32.xlu0 %v1149_v43  ;;  %v5685_v27 = vld [vmem:[%s10039_s2 + $0x120] sm:$0xff]  ;;  %v5690_v28 = vld [vmem:[%s10039_s2 + $0x138] sm:$0xff]  ;;  %v5698_v29 = vld [vmem:[%s10039_s2 + $0x130] sm:$0xff] }
  0x29   :  { %4788 = vmatpush1.bf16.msra.mxu0 %v4787_v44  ;;  %v5703_v30 = vld [vmem:[%s10039_s2 + $0x148] sm:$0xff]  ;;  %v5711_v31 = vld [vmem:[%s10039_s2 + $0x140] sm:$0xff]  ;;  %v5716_v32 = vld [vmem:[%s10039_s2 + $0x158] sm:$0xff] }
  0x2a   :  { %4790 = vmatprep.subr.bf16.mxu0 %v4789_v48  ;;  %v5724_v33 = vld [vmem:[%s10039_s2 + $0x150] sm:$0xff]  ;;  %v5729_v34 = vld [vmem:[%s10039_s2 + $0x168] sm:$0xff]  ;;  %v5737_v35 = vld [vmem:[%s10039_s2 + $0x160] sm:$0xff] }
  0x2b   :  { %1154 = vadd.xlane.f32.xlu1 %v1153_v49  ;;  %v5742_v36 = vld [vmem:[%s10039_s2 + $0x178] sm:$0xff]  ;;  %v5750_v37 = vld [vmem:[%s10039_s2 + $0x170] sm:$0xff]  ;;  %v5755_v38 = vld [vmem:[%s10039_s2 + $0x188] sm:$0xff] }
  0x2c   :  { %1158 = vadd.xlane.f32.xlu0 %v1157_v51  ;;  %v5763_v39 = vld [vmem:[%s10039_s2 + $0x180] sm:$0xff]  ;;  %v5768_v40 = vld [vmem:[%s10039_s2 + $0x198] sm:$0xff]  ;;  %v5776_v41 = vld [vmem:[%s10039_s2 + $0x190] sm:$0xff] }
  0x2d   :  { %4792 = vmatpush1.bf16.msra.mxu0 %v4791_v52  ;;  %v5781_v42 = vld [vmem:[%s10039_s2 + $0x1a8] sm:$0xff]  ;;  %v5789_v44 = vld [vmem:[%s10039_s2 + $0x1a0] sm:$0xff]  ;;  %v5794_v45 = vld [vmem:[%s10039_s2 + $0x1b8] sm:$0xff] }
  0x2e   :  { %v5802_v48 = vld [vmem:[%s10039_s2 + $0x1b0] sm:$0xff]  ;;  %v5807_v50 = vld [vmem:[%s10039_s2 + $0x1c8] sm:$0xff] }
  0x2f   :  { %1162 = vadd.xlane.f32.xlu1 %v1161_v53  ;;  %10250 = vst [vmem:[#allocation2_spill] sm:$0xff] %v5802_v48  ;;  %10251 = vst [vmem:[#allocation3_spill] sm:$0xff] %v5807_v50  ;;  %v5815_v53 = vld [vmem:[%s10039_s2 + $0x1c0] sm:$0xff] }
  0x30   :  { %603 = vmatmul.mubr.f32.vlgmr.msra.gmra.mrb[0].mxu0 %v5451_v54  ;;  %10252 = vst [vmem:[#allocation4_spill] sm:$0xff] %v5815_v53 }
  0x31   :  { %4594 = vmatprep.mubr.msk.f32.mxu0 %vm297_vm1, %v5456_v55 }
  0x34   :  { %609 = vmatmul.mubr.f32.gmra.mrb[2].mxu0 %v5464_v56 }
  0x35   :  { %4595 = vmatprep.mubr.msk.f32.mxu0 %vm297_vm1, %v5469_v57 }
  0x38   :  { %615 = vmatmul.mubr.f32.gmra.mrb[4].mxu0 %v5477_v58 }
  0x39   :  { %4596 = vmatprep.mubr.msk.f32.mxu0 %vm297_vm1, %v5482_v59 }
  0x3c   :  { %621 = vmatmul.mubr.f32.gmra.mrb[6].mxu0 %v5490_v60 }
  0x3d   :  { %4597 = vmatprep.mubr.msk.f32.mxu0 %vm297_vm1, %v5495_v61 }
  0x40   :  { %627 = vmatmul.mubr.f32.gmra.mrb[8].mxu0 %v5503_v62 }
  0x41   :  { %4598 = vmatprep.mubr.msk.f32.mxu0 %vm297_vm1, %v5508_v63 }
  0x44   :  { %633 = vmatmul.mubr.f32.gmra.mrb[10].mxu0 %v5516_v0 }
  0x45   :  { %4599 = vmatprep.mubr.msk.f32.mxu0 %vm297_vm1, %v5521_v1 }
  0x48   :  { %639 = vmatmul.mubr.f32.gmra.mrb[12].mxu0 %v5529_v2 }
  0x49   :  { %4600 = vmatprep.mubr.msk.f32.mxu0 %vm297_vm1, %v5534_v3 }
  0x4c   :  { %645 = vmatmul.mubr.f32.gmra.mrb[14].mxu0 %v5542_v4 }
  0x4d   :  { %4601 = vmatprep.mubr.msk.f32.mxu0 %vm297_vm1, %v5547_v5 }
  0x50   :  { %651 = vmatmul.mubr.f32.gmra.mrb[16].mxu0 %v5555_v6 }
  0x51   :  { %4602 = vmatprep.mubr.msk.f32.mxu0 %vm297_vm1, %v5560_v7 }
  0x54   :  { %657 = vmatmul.mubr.f32.gmra.mrb[18].mxu0 %v5568_v8 }
  0x55   :  { %4603 = vmatprep.mubr.msk.f32.mxu0 %vm297_vm1, %v5573_v9 }
  0x58   :  { %663 = vmatmul.mubr.f32.gmra.mrb[20].mxu0 %v5581_v10 }
  0x59   :  { %4604 = vmatprep.mubr.msk.f32.mxu0 %vm297_vm1, %v5586_v11 }
  0x5c   :  { %669 = vmatmul.mubr.f32.gmra.mrb[22].mxu0 %v5594_v12 }
  0x5d   :  { %4605 = vmatprep.mubr.msk.f32.mxu0 %vm297_vm1, %v5599_v13 }
  0x60   :  { %675 = vmatmul.mubr.f32.gmra.mrb[24].mxu0 %v5607_v14 }
  0x61   :  { %4606 = vmatprep.mubr.msk.f32.mxu0 %vm297_vm1, %v5612_v15 }
  0x64   :  { %681 = vmatmul.mubr.f32.gmra.mrb[26].mxu0 %v5620_v16 }
  0x65   :  { %4607 = vmatprep.mubr.msk.f32.mxu0 %vm297_vm1, %v5625_v17 }
  0x68   :  { %687 = vmatmul.mubr.f32.gmra.mrb[28].mxu0 %v5633_v18 }
  0x69   :  { %4608 = vmatprep.mubr.msk.f32.mxu0 %vm297_vm1, %v5638_v19 }
  0x6c   :  { %693 = vmatmul.mubr.f32.gmra.mrb[30].mxu0 %v5646_v20 }
  0x6d   :  { %4609 = vmatprep.mubr.msk.f32.mxu0 %vm297_vm1, %v5651_v21 }
  0x70   :  { %699 = vmatmul.mubr.f32.gmra.mrb[32].mxu0 %v5659_v22 }
  0x71   :  { %4610 = vmatprep.mubr.msk.f32.mxu0 %vm297_vm1, %v5664_v24 }
  0x74   :  { %705 = vmatmul.mubr.f32.gmra.mrb[34].mxu0 %v5672_v25 }
  0x75   :  { %4611 = vmatprep.mubr.msk.f32.mxu0 %vm297_vm1, %v5677_v26 }
  0x78   :  { %711 = vmatmul.mubr.f32.gmra.mrb[36].mxu0 %v5685_v27 }
  0x79   :  { %4612 = vmatprep.mubr.msk.f32.mxu0 %vm297_vm1, %v5690_v28 }
  0x7c   :  { %717 = vmatmul.mubr.f32.gmra.mrb[38].mxu0 %v5698_v29 }
  0x7d   :  { %4613 = vmatprep.mubr.msk.f32.mxu0 %vm297_vm1, %v5703_v30 }
  0x80   :  { %723 = vmatmul.mubr.f32.gmra.mrb[40].mxu0 %v5711_v31 }
  0x81   :  { %4614 = vmatprep.mubr.msk.f32.mxu0 %vm297_vm1, %v5716_v32 }
  0x84   :  { %729 = vmatmul.mubr.f32.gmra.mrb[42].mxu0 %v5724_v33 }
  0x85   :  { %4615 = vmatprep.mubr.msk.f32.mxu0 %vm297_vm1, %v5729_v34 }
  0x88   :  { %735 = vmatmul.mubr.f32.gmra.mrb[44].mxu0 %v5737_v35 }
  0x89   :  { %4616 = vmatprep.mubr.msk.f32.mxu0 %vm297_vm1, %v5742_v36 }
  0x8c   :  { %741 = vmatmul.mubr.f32.gmra.mrb[46].mxu0 %v5750_v37 }
  0x8d   :  { %4617 = vmatprep.mubr.msk.f32.mxu0 %vm297_vm1, %v5755_v38 }
  0x90   :  { %747 = vmatmul.mubr.f32.gmra.mrb[48].mxu0 %v5763_v39 }
  0x91   :  { %4618 = vmatprep.mubr.msk.f32.mxu0 %vm297_vm1, %v5768_v40 }
  0x94   :  { %753 = vmatmul.mubr.f32.gmra.mrb[50].mxu0 %v5776_v41 }
  0x95   :  { %v1087_v43 = vpop.xlane.xlu0 %1086  ;;  %4619 = vmatprep.mubr.msk.f32.mxu0 %vm297_vm1, %v5781_v42 }
  0x98   :  { %759 = vmatmul.mubr.f32.gmra.mrb[52].mxu0 %v5789_v44  ;;  %v1095_v46 = vpop.xlane.xlu1 %1094 }
  0x99   :  { %v1091_v47 = vpop.xlane.xlu0 %1090  ;;  %4620 = vmatprep.mubr.msk.f32.mxu0 %vm297_vm1, %v5794_v45 }
  0x9a   :  { %v4794_v49 = vpack.c.bf16 %v1091_v47, %v1087_v43  ;;  %v5821_v47 = vld [vmem:[%s10039_s2 + $0x1d8] sm:$0xff] }
  0x9b   :  { %10253 = vst [vmem:[#allocation5_spill] sm:$0xff] %v5821_v47 }
  0x9c   :  { %765 = vmatmul.mubr.f32.gmra.mrb[54].mxu0 %v5802_v48  ;;  %4795 = vmatpush1.bf16.msra.mxu1 %v4794_v49  ;;  %v1099_v51 = vpop.xlane.xlu1 %1098  ;;  %v5835_v48 = vld [vmem:[%s10039_s2 + $0x1e8] sm:$0xff] }
  0x9d   :  { %v4797_v52 = vpack.c.bf16 %v1099_v51, %v1095_v46  ;;  %4621 = vmatprep.mubr.msk.f32.mxu0 %vm297_vm1, %v5807_v50  ;;  %4796 = vmatprep.subr.bf16.mxu1 %v5153_v23  ;;  %v1103_v43 = vpop.xlane.xlu0 %1102  ;;  %v5829_v51 = vld [vmem:[%s10039_s2 + $0x1d0] sm:$0xff]  ;;  %10255 = vst [vmem:[#allocation7_spill] sm:$0xff] %v5835_v48 }
  0x9e   :  { %10254 = vst [vmem:[#allocation6_spill] sm:$0xff] %v5829_v51 }
  0xa0   :  { %771 = vmatmul.mubr.f32.gmra.mrb[56].mxu0 %v5815_v53  ;;  %4798 = vmatpush1.bf16.msra.mxu1 %v4797_v52  ;;  %v1107_v46 = vpop.xlane.xlu1 %1106  ;;  %v5849_v53 = vld [vmem:[%s10039_s2 + $0x1f8] sm:$0xff] }
  0xa1   :  { %v4800_v49 = vpack.c.bf16 %v1107_v46, %v1103_v43  ;;  %4622 = vmatprep.mubr.msk.f32.mxu0 %vm297_vm1, %v5821_v47  ;;  %4799 = vmatprep.subr.bf16.mxu1 %v5153_v23  ;;  %v1111_v50 = vpop.xlane.xlu0 %1110  ;;  %v5843_v46 = vld [vmem:[%s10039_s2 + $0x1e0] sm:$0xff]  ;;  %10257 = vst [vmem:[#allocation9_spill] sm:$0xff] %v5849_v53 }
  0xa2   :  { %10256 = vst [vmem:[#allocation8_spill] sm:$0xff] %v5843_v46 }
  0xa4   :  { %777 = vmatmul.mubr.f32.gmra.mrb[58].mxu0 %v5829_v51  ;;  %4801 = vmatpush1.bf16.msra.mxu1 %v4800_v49  ;;  %v1115_v52 = vpop.xlane.xlu1 %1114  ;;  %v5863_v51 = vld [vmem:[%s10039_s2 + $0x208] sm:$0xff] }
  0xa5   :  { %v4803_v43 = vpack.c.bf16 %v1115_v52, %v1111_v50  ;;  %4623 = vmatprep.mubr.msk.f32.mxu0 %vm297_vm1, %v5835_v48  ;;  %4802 = vmatprep.subr.bf16.mxu1 %v5153_v23  ;;  %v1119_v47 = vpop.xlane.xlu0 %1118  ;;  %v5857_v52 = vld [vmem:[%s10039_s2 + $0x1f0] sm:$0xff]  ;;  %10259 = vst [vmem:[#allocation11_spill] sm:$0xff] %v5863_v51 }
  0xa6   :  { %10258 = vst [vmem:[#allocation10_spill] sm:$0xff] %v5857_v52 }
  0xa8   :  { %783 = vmatmul.mubr.f32.gmra.mrb[60].mxu0 %v5843_v46  ;;  %4804 = vmatpush1.bf16.msra.mxu1 %v4803_v43  ;;  %v1123_v50 = vpop.xlane.xlu1 %1122  ;;  %v5877_v46 = vld [vmem:[%s10039_s2 + $0x218] sm:$0xff] }
  0xa9   :  { %v4806_v49 = vpack.c.bf16 %v1123_v50, %v1119_v47  ;;  %4624 = vmatprep.mubr.msk.f32.mxu0 %vm297_vm1, %v5849_v53  ;;  %4805 = vmatprep.subr.bf16.mxu1 %v5153_v23  ;;  %v1127_v48 = vpop.xlane.xlu0 %1126  ;;  %v5871_v50 = vld [vmem:[%s10039_s2 + $0x200] sm:$0xff]  ;;  %10261 = vst [vmem:[#allocation13_spill] sm:$0xff] %v5877_v46 }
  0xaa   :  { %10260 = vst [vmem:[#allocation12_spill] sm:$0xff] %v5871_v50 }
  0xac   :  { %789 = vmatmul.mubr.f32.gmra.mrb[62].mxu0 %v5857_v52  ;;  %4807 = vmatpush1.bf16.msra.mxu1 %v4806_v49  ;;  %v1131_v47 = vpop.xlane.xlu1 %1130  ;;  %v5891_v52 = vld [vmem:[%s10039_s2 + $0x228] sm:$0xff] }
  0xad   :  { %v4809_v43 = vpack.c.bf16 %v1131_v47, %v1127_v48  ;;  %4625 = vmatprep.mubr.msk.f32.mxu0 %vm297_vm1, %v5863_v51  ;;  %4808 = vmatprep.subr.bf16.mxu1 %v5153_v23  ;;  %v1135_v53 = vpop.xlane.xlu0 %1134  ;;  %v5885_v47 = vld [vmem:[%s10039_s2 + $0x210] sm:$0xff]  ;;  %10263 = vst [vmem:[#allocation15_spill] sm:$0xff] %v5891_v52 }
  0xae   :  { %10262 = vst [vmem:[#allocation14_spill] sm:$0xff] %v5885_v47 }
  0xb0   :  { %795 = vmatmul.mubr.f32.gmra.mrb[64].mxu0 %v5871_v50  ;;  %4810 = vmatpush1.bf16.msra.mxu1 %v4809_v43  ;;  %v1139_v48 = vpop.xlane.xlu1 %1138  ;;  %v5905_v50 = vld [vmem:[%s10039_s2 + $0x238] sm:$0xff] }
  0xb1   :  { %v4812_v49 = vpack.c.bf16 %v1139_v48, %v1135_v53  ;;  %4626 = vmatprep.mubr.msk.f32.mxu0 %vm297_vm1, %v5877_v46  ;;  %4811 = vmatprep.subr.bf16.mxu1 %v5153_v23  ;;  %v1143_v51 = vpop.xlane.xlu0 %1142  ;;  %v5899_v48 = vld [vmem:[%s10039_s2 + $0x220] sm:$0xff]  ;;  %10264 = vst [vmem:[#allocation16_spill] sm:$0xff] %v5905_v50 }
  0xb4   :  { %801 = vmatmul.mubr.f32.gmra.mrb[66].mxu0 %v5885_v47  ;;  %4813 = vmatpush1.bf16.msra.mxu1 %v4812_v49  ;;  %v1147_v53 = vpop.xlane.xlu1 %1146  ;;  %v5919_v47 = vld [vmem:[%s10039_s2 + $0x248] sm:$0xff] }
  0xb5   :  { %v4815_v43 = vpack.c.bf16 %v1147_v53, %v1143_v51  ;;  %4627 = vmatprep.mubr.msk.f32.mxu0 %vm297_vm1, %v5891_v52  ;;  %4814 = vmatprep.subr.bf16.mxu1 %v5153_v23  ;;  %v1151_v46 = vpop.xlane.xlu0 %1150  ;;  %v5913_v53 = vld [vmem:[%s10039_s2 + $0x230] sm:$0xff] }
  0xb8   :  { %807 = vmatmul.mubr.f32.gmra.mrb[68].mxu0 %v5899_v48  ;;  %4816 = vmatpush1.bf16.msra.mxu1 %v4815_v43  ;;  %v1155_v51 = vpop.xlane.xlu1 %1154 }
  0xb9   :  { %v4818_v49 = vpack.c.bf16 %v1155_v51, %v1151_v46  ;;  %4628 = vmatprep.mubr.msk.f32.mxu0 %vm297_vm1, %v5905_v50  ;;  %4817 = vmatprep.subr.bf16.mxu1 %v5153_v23  ;;  %v1159_v52 = vpop.xlane.xlu0 %1158  ;;  %v5927_v51 = vld [vmem:[%s10039_s2 + $0x240] sm:$0xff]  ;;  %v5933_v50 = vld [vmem:[%s10039_s2 + $0x258] sm:$0xff] }
  0xbc   :  { %813 = vmatmul.mubr.f32.gmra.mrb[70].mxu0 %v5913_v53  ;;  %4819 = vmatpush1.bf16.msra.mxu1 %v4818_v49  ;;  %v1163_v46 = vpop.xlane.xlu1 %1162  ;;  %v5957_v49 = vld [vmem:[%s10039_s2 + $0x260] sm:$0xff] }
  0xbd   :  { %v4821_v43 = vpack.c.bf16 %v1163_v46, %v1159_v52  ;;  %4629 = vmatprep.mubr.msk.f32.mxu0 %vm297_vm1, %v5919_v47  ;;  %4820 = vmatprep.subr.bf16.mxu1 %v5153_v23  ;;  %v5941_v52 = vld [vmem:[%s10039_s2 + $0x250] sm:$0xff]  ;;  %v5946_v23 = vld [vmem:[%s10039_s2 + $0x268] sm:$0xff]  ;;  %v5962_v46 = vld [vmem:[%s10039_s2 + $0x278] sm:$0xff] }
  0xc0   :  { %819 = vmatmul.mubr.f32.gmra.mrb[72].mxu0 %v5927_v51  ;;  %4822 = vmatpush1.bf16.msra.mxu1 %v4821_v43 }
  0xc1   :  { %4630 = vmatprep.mubr.msk.f32.mxu0 %vm297_vm1, %v5933_v50 }
  0xc3   :  { %1229 = vmatmul.mubr.f32.vlgmr.msra.gmra.mrb[0].mxu1 %v5451_v54  ;;  %v5973_v54 = vld [vmem:[%s10039_s2 + $0x270] sm:$0xff] }
  0xc4   :  { %825 = vmatmul.mubr.f32.gmra.mrb[74].mxu0 %v5941_v52  ;;  %4674 = vmatprep.mubr.msk.f32.mxu1 %vm297_vm1, %v5456_v55  ;;  %v5978_v55 = vld [vmem:[%s10039_s2 + $0x288] sm:$0xff] }
  0xc5   :  { %4631 = vmatprep.mubr.msk.f32.mxu0 %vm297_vm1, %v5946_v23 }
  0xc7   :  { %1234 = vmatmul.mubr.f32.gmra.mrb[2].mxu1 %v5464_v56  ;;  %v5989_v56 = vld [vmem:[%s10039_s2 + $0x280] sm:$0xff] }
  0xc8   :  { %831 = vmatmul.mubr.f32.gmra.mrb[76].mxu0 %v5957_v49  ;;  %4675 = vmatprep.mubr.msk.f32.mxu1 %vm297_vm1, %v5469_v57  ;;  %v5994_v57 = vld [vmem:[%s10039_s2 + $0x298] sm:$0xff] }
  0xc9   :  { %4632 = vmatprep.mubr.msk.f32.mxu0 %vm297_vm1, %v5962_v46 }
  0xcb   :  { %1239 = vmatmul.mubr.f32.gmra.mrb[4].mxu1 %v5477_v58  ;;  %v6005_v58 = vld [vmem:[%s10039_s2 + $0x290] sm:$0xff] }
  0xcc   :  { %837 = vmatmul.mubr.f32.gmra.mrb[78].mxu0 %v5973_v54  ;;  %4676 = vmatprep.mubr.msk.f32.mxu1 %vm297_vm1, %v5482_v59  ;;  %v6010_v59 = vld [vmem:[%s10039_s2 + $0x2a8] sm:$0xff] }
  0xcd   :  { %4633 = vmatprep.mubr.msk.f32.mxu0 %vm297_vm1, %v5978_v55 }
  0xcf   :  { %1244 = vmatmul.mubr.f32.gmra.mrb[6].mxu1 %v5490_v60  ;;  %v6021_v60 = vld [vmem:[%s10039_s2 + $0x2a0] sm:$0xff] }
  0xd0   :  { %843 = vmatmul.mubr.f32.gmra.mrb[80].mxu0 %v5989_v56  ;;  %4677 = vmatprep.mubr.msk.f32.mxu1 %vm297_vm1, %v5495_v61  ;;  %v6026_v61 = vld [vmem:[%s10039_s2 + $0x2b8] sm:$0xff] }
  0xd1   :  { %4634 = vmatprep.mubr.msk.f32.mxu0 %vm297_vm1, %v5994_v57 }
  0xd3   :  { %1249 = vmatmul.mubr.f32.gmra.mrb[8].mxu1 %v5503_v62  ;;  %v6037_v62 = vld [vmem:[%s10039_s2 + $0x2b0] sm:$0xff] }
  0xd4   :  { %849 = vmatmul.mubr.f32.gmra.mrb[82].mxu0 %v6005_v58  ;;  %4678 = vmatprep.mubr.msk.f32.mxu1 %vm297_vm1, %v5508_v63  ;;  %v6042_v63 = vld [vmem:[%s10039_s2 + $0x2c8] sm:$0xff] }
  0xd5   :  { %4635 = vmatprep.mubr.msk.f32.mxu0 %vm297_vm1, %v6010_v59 }
  0xd7   :  { %1254 = vmatmul.mubr.f32.gmra.mrb[10].mxu1 %v5516_v0  ;;  %v6053_v0 = vld [vmem:[%s10039_s2 + $0x2c0] sm:$0xff] }
  0xd8   :  { %4679 = vmatprep.mubr.msk.f32.mxu1 %vm297_vm1, %v5521_v1  ;;  %855 = vmatmul.mubr.f32.gmra.mrb[84].mxu0 %v6021_v60  ;;  %v6058_v1 = vld [vmem:[%s10039_s2 + $0x2d8] sm:$0xff] }
  0xd9   :  { %4636 = vmatprep.mubr.msk.f32.mxu0 %vm297_vm1, %v6026_v61 }
  0xdb   :  { %1259 = vmatmul.mubr.f32.gmra.mrb[12].mxu1 %v5529_v2  ;;  %v6069_v2 = vld [vmem:[%s10039_s2 + $0x2d0] sm:$0xff] }
  0xdc   :  { %4680 = vmatprep.mubr.msk.f32.mxu1 %vm297_vm1, %v5534_v3  ;;  %861 = vmatmul.mubr.f32.gmra.mrb[86].mxu0 %v6037_v62  ;;  %v6090_v3 = vld [vmem:[%s10039_s2 + $0x2e8] sm:$0xff] }
  0xdd   :  { %4637 = vmatprep.mubr.msk.f32.mxu0 %vm297_vm1, %v6042_v63 }
  0xdf   :  { %1264 = vmatmul.mubr.f32.gmra.mrb[14].mxu1 %v5542_v4  ;;  %v6097_v4 = vld [vmem:[%s10039_s2 + $0x2e0] sm:$0xff] }
  0xe0   :  { %4681 = vmatprep.mubr.msk.f32.mxu1 %vm297_vm1, %v5547_v5  ;;  %867 = vmatmul.mubr.f32.gmra.mrb[88].mxu0 %v6053_v0 }
  0xe1   :  { %4638 = vmatprep.mubr.msk.f32.mxu0 %vm297_vm1, %v6058_v1 }
  0xe3   :  { %1269 = vmatmul.mubr.f32.gmra.mrb[16].mxu1 %v5555_v6  ;;  %v6115_v6 = vld [vmem:[%s10039_s2 + $0x2f8] sm:$0xff] }
  0xe4   :  { %4682 = vmatprep.mubr.msk.f32.mxu1 %vm297_vm1, %v5560_v7  ;;  %873 = vmatmul.mubr.f32.gmra.mrb[90].mxu0 %v6069_v2 }
  0xe5   :  { %4639 = vmatprep.mubr.msk.f32.mxu0 %vm297_vm1, %v6090_v3 }
  0xe7   :  { %1274 = vmatmul.mubr.f32.gmra.mrb[18].mxu1 %v5568_v8  ;;  %v6126_v8 = vld [vmem:[%s10039_s2 + $0x2f0] sm:$0xff] }
  0xe8   :  { %4683 = vmatprep.mubr.msk.f32.mxu1 %vm297_vm1, %v5573_v9  ;;  %879 = vmatmul.mubr.f32.gmra.mrb[92].mxu0 %v6097_v4 }
  0xe9   :  { %4640 = vmatprep.mubr.msk.f32.mxu0 %vm297_vm1, %v6115_v6 }
  0xeb   :  { %1279 = vmatmul.mubr.f32.gmra.mrb[20].mxu1 %v5581_v10 }
  0xec   :  { %4684 = vmatprep.mubr.msk.f32.mxu1 %vm297_vm1, %v5586_v11  ;;  %885 = vmatmul.mubr.f32.gmra.mrb[94].mxu0 %v6126_v8 }
  0xef   :  { %1284 = vmatmul.mubr.f32.gmra.mrb[22].mxu1 %v5594_v12 }
  0xf0   :  { %4685 = vmatprep.mubr.msk.f32.mxu1 %vm297_vm1, %v5599_v13 }
  0xf3   :  { %1289 = vmatmul.mubr.f32.gmra.mrb[24].mxu1 %v5607_v14 }
  0xf4   :  { %4686 = vmatprep.mubr.msk.f32.mxu1 %vm297_vm1, %v5612_v15 }
  0xf7   :  { %1294 = vmatmul.mubr.f32.gmra.mrb[26].mxu1 %v5620_v16 }
  0xf8   :  { %4687 = vmatprep.mubr.msk.f32.mxu1 %vm297_vm1, %v5625_v17 }
  0xfb   :  { %1299 = vmatmul.mubr.f32.gmra.mrb[28].mxu1 %v5633_v18 }
  0xfc   :  { %4688 = vmatprep.mubr.msk.f32.mxu1 %vm297_vm1, %v5638_v19 }
  0xff   :  { %1304 = vmatmul.mubr.f32.gmra.mrb[30].mxu1 %v5646_v20 }
 0x100   :  { %4689 = vmatprep.mubr.msk.f32.mxu1 %vm297_vm1, %v5651_v21 }
 0x103   :  { %v6109_v5 = vpop.f32.mrb[0].mxu0  ;;  %1309 = vmatmul.mubr.f32.gmra.mrb[32].mxu1 %v5659_v22 }
 0x104   :  { %v6117_v7 = vpop.f32.mrb[1].mxu0  ;;  %4690 = vmatprep.mubr.msk.f32.mxu1 %vm297_vm1, %v5664_v24  ;;  %v1709_v10 = vmul.f32 %v6109_v5, %v6109_v5 }
 0x105   :  { %v1710_v9 = vmul.f32 %v6117_v7, %v6117_v7 }
 0x107   :  { %v6133_v11 = vpop.f32.mrb[2].mxu0  ;;  %1314 = vmatmul.mubr.f32.gmra.mrb[34].mxu1 %v5672_v25  ;;  %v1869_v12 = vsel %vm1083_vm0, %v1710_v9, 0.0 }
 0x108   :  { %v6137_v13 = vpop.f32.mrb[3].mxu0  ;;  %v1870_v14 = vadd.f32 %v1869_v12, %v1709_v10  ;;  %4691 = vmatprep.mubr.msk.f32.mxu1 %vm297_vm1, %v5677_v26  ;;  %v1711_v16 = vmul.f32 %v6133_v11, %v6133_v11 }
 0x109   :  { %v1712_v15 = vmul.f32 %v6137_v13, %v6137_v13 }
 0x10a   :  { %1871 = vadd.xlane.f32.xlu0 %v1870_v14 }
 0x10b   :  { %v6145_v17 = vpop.f32.mrb[4].mxu0  ;;  %1319 = vmatmul.mubr.f32.gmra.mrb[36].mxu1 %v5685_v27  ;;  %v1873_v18 = vsel %vm1083_vm0, %v1712_v15, 0.0 }
 0x10c   :  { %v6149_v19 = vpop.f32.mrb[5].mxu0  ;;  %v1874_v20 = vadd.f32 %v1873_v18, %v1711_v16  ;;  %4692 = vmatprep.mubr.msk.f32.mxu1 %vm297_vm1, %v5690_v28  ;;  %v1713_v22 = vmul.f32 %v6145_v17, %v6145_v17 }
 0x10d   :  { %v1714_v21 = vmul.f32 %v6149_v19, %v6149_v19 }
 0x10e   :  { %1875 = vadd.xlane.f32.xlu1 %v1874_v20 }
 0x10f   :  { %v6157_v24 = vpop.f32.mrb[6].mxu0  ;;  %1324 = vmatmul.mubr.f32.gmra.mrb[38].mxu1 %v5698_v29  ;;  %v1877_v25 = vsel %vm1083_vm0, %v1714_v21, 0.0 }
 0x110   :  { %v6161_v26 = vpop.f32.mrb[7].mxu0  ;;  %v1878_v27 = vadd.f32 %v1877_v25, %v1713_v22  ;;  %4693 = vmatprep.mubr.msk.f32.mxu1 %vm297_vm1, %v5703_v30  ;;  %v1715_v43 = vmul.f32 %v6157_v24, %v6157_v24 }
 0x111   :  { %v1716_v28 = vmul.f32 %v6161_v26, %v6161_v26 }
 0x112   :  { %1879 = vadd.xlane.f32.xlu0 %v1878_v27 }
 0x113   :  { %v6169_v9 = vpop.f32.mrb[8].mxu0  ;;  %1329 = vmatmul.mubr.f32.gmra.mrb[40].mxu1 %v5711_v31  ;;  %v1881_v29 = vsel %vm1083_vm0, %v1716_v28, 0.0 }
 0x114   :  { %10265 = vst [vmem:[#allocation17_spill] sm:$0xff] %v6169_v9  ;;  %v6173_v10 = vpop.f32.mrb[9].mxu0  ;;  %v1882_v12 = vadd.f32 %v1881_v29, %v1715_v43  ;;  %4694 = vmatprep.mubr.msk.f32.mxu1 %vm297_vm1, %v5716_v32  ;;  %v1717_v14 = vmul.f32 %v6169_v9, %v6169_v9 }
 0x115   :  { %10266 = vst [vmem:[#allocation18_spill] sm:$0xff] %v6173_v10  ;;  %v1718_v30 = vmul.f32 %v6173_v10, %v6173_v10 }
 0x116   :  { %1883 = vadd.xlane.f32.xlu1 %v1882_v12 }
 0x117   :  { %v6181_v15 = vpop.f32.mrb[10].mxu0  ;;  %1334 = vmatmul.mubr.f32.gmra.mrb[42].mxu1 %v5724_v33  ;;  %v1885_v31 = vsel %vm1083_vm0, %v1718_v30, 0.0 }
 0x118   :  { %10267 = vst [vmem:[#allocation19_spill] sm:$0xff] %v6181_v15  ;;  %v6185_v16 = vpop.f32.mrb[11].mxu0  ;;  %v1886_v18 = vadd.f32 %v1885_v31, %v1717_v14  ;;  %4695 = vmatprep.mubr.msk.f32.mxu1 %vm297_vm1, %v5729_v34  ;;  %v1719_v20 = vmul.f32 %v6181_v15, %v6181_v15 }
 0x119   :  { %10268 = vst [vmem:[#allocation20_spill] sm:$0xff] %v6185_v16  ;;  %v1720_v32 = vmul.f32 %v6185_v16, %v6185_v16 }
 0x11a   :  { %1887 = vadd.xlane.f32.xlu0 %v1886_v18 }
 0x11b   :  { %v6193_v21 = vpop.f32.mrb[12].mxu0  ;;  %1339 = vmatmul.mubr.f32.gmra.mrb[44].mxu1 %v5737_v35  ;;  %v1889_v33 = vsel %vm1083_vm0, %v1720_v32, 0.0 }
 0x11c   :  { %10269 = vst [vmem:[#allocation21_spill] sm:$0xff] %v6193_v21  ;;  %v6197_v22 = vpop.f32.mrb[13].mxu0  ;;  %v1890_v25 = vadd.f32 %v1889_v33, %v1719_v20  ;;  %4696 = vmatprep.mubr.msk.f32.mxu1 %vm297_vm1, %v5742_v36  ;;  %v1721_v27 = vmul.f32 %v6193_v21, %v6193_v21 }
 0x11d   :  { %10270 = vst [vmem:[#allocation22_spill] sm:$0xff] %v6197_v22  ;;  %v1722_v34 = vmul.f32 %v6197_v22, %v6197_v22 }
 0x11e   :  { %1891 = vadd.xlane.f32.xlu1 %v1890_v25 }
 0x11f   :  { %v6205_v28 = vpop.f32.mrb[14].mxu0  ;;  %1344 = vmatmul.mubr.f32.gmra.mrb[46].mxu1 %v5750_v37  ;;  %v1893_v35 = vsel %vm1083_vm0, %v1722_v34, 0.0 }
 0x120   :  { %10271 = vst [vmem:[#allocation23_spill] sm:$0xff] %v6205_v28  ;;  %v6209_v43 = vpop.f32.mrb[15].mxu0  ;;  %v1894_v29 = vadd.f32 %v1893_v35, %v1721_v27  ;;  %4697 = vmatprep.mubr.msk.f32.mxu1 %vm297_vm1, %v5755_v38  ;;  %v1723_v12 = vmul.f32 %v6205_v28, %v6205_v28 }
 0x121   :  { %10272 = vst [vmem:[#allocation24_spill] sm:$0xff] %v6209_v43  ;;  %v1724_v36 = vmul.f32 %v6209_v43, %v6209_v43 }
 0x122   :  { %1895 = vadd.xlane.f32.xlu0 %v1894_v29 }
 0x123   :  { %v6217_v30 = vpop.f32.mrb[16].mxu0  ;;  %1349 = vmatmul.mubr.f32.gmra.mrb[48].mxu1 %v5763_v39  ;;  %v1897_v37 = vsel %vm1083_vm0, %v1724_v36, 0.0  ;;  %v6256_v36 = vld [vmem:[%s10039_s2 + $0x308] sm:$0xff] }
 0x124   :  { %10273 = vst [vmem:[#allocation25_spill] sm:$0xff] %v6217_v30  ;;  %v6221_v14 = vpop.f32.mrb[17].mxu0  ;;  %v1898_v31 = vadd.f32 %v1897_v37, %v1723_v12  ;;  %4698 = vmatprep.mubr.msk.f32.mxu1 %vm297_vm1, %v5768_v40  ;;  %v1725_v18 = vmul.f32 %v6217_v30, %v6217_v30  ;;  %v10280_v12 = vld [vmem:[#allocation2_spill] sm:$0xff]  ;;  %4641 = vmatprep.mubr.msk.f32.mxu0 %vm297_vm1, %v6256_v36 }
 0x125   :  { %10274 = vst [vmem:[#allocation26_spill] sm:$0xff] %v6221_v14  ;;  %v1726_v38 = vmul.f32 %v6221_v14, %v6221_v14 }
 0x126   :  { %1899 = vadd.xlane.f32.xlu1 %v1898_v31 }
 0x127   :  { %v6229_v32 = vpop.f32.mrb[18].mxu0  ;;  %1354 = vmatmul.mubr.f32.gmra.mrb[50].mxu1 %v5776_v41  ;;  %v1901_v39 = vsel %vm1083_vm0, %v1726_v38, 0.0 }
 0x128   :  { %10275 = vst [vmem:[#allocation27_spill] sm:$0xff] %v6229_v32  ;;  %v6233_v20 = vpop.f32.mrb[19].mxu0  ;;  %v1902_v33 = vadd.f32 %v1901_v39, %v1725_v18  ;;  %4699 = vmatprep.mubr.msk.f32.mxu1 %vm297_vm1, %v5781_v42  ;;  %v1727_v25 = vmul.f32 %v6229_v32, %v6229_v32  ;;  %v10282_v18 = vld [vmem:[#allocation3_spill] sm:$0xff] }
 0x129   :  { %10276 = vst [vmem:[#allocation28_spill] sm:$0xff] %v6233_v20  ;;  %v1728_v40 = vmul.f32 %v6233_v20, %v6233_v20 }
 0x12a   :  { %1903 = vadd.xlane.f32.xlu0 %v1902_v33 }
 0x12b   :  { %v6241_v34 = vpop.f32.mrb[20].mxu0  ;;  %1359 = vmatmul.mubr.f32.gmra.mrb[52].mxu1 %v5789_v44  ;;  %v1905_v41 = vsel %vm1083_vm0, %v1728_v40, 0.0 }
 0x12c   :  { %10277 = vst [vmem:[#allocation29_spill] sm:$0xff] %v6241_v34  ;;  %v6245_v27 = vpop.f32.mrb[21].mxu0  ;;  %v1906_v35 = vadd.f32 %v1905_v41, %v1727_v25  ;;  %4700 = vmatprep.mubr.msk.f32.mxu1 %vm297_vm1, %v5794_v45  ;;  %v1729_v29 = vmul.f32 %v6241_v34, %v6241_v34  ;;  %v6267_v45 = vld [vmem:[%s10039_s2 + $0x300] sm:$0xff]  ;;  %v10284_v25 = vld [vmem:[#allocation4_spill] sm:$0xff] }
 0x12d   :  { %10278 = vst [vmem:[#allocation30_spill] sm:$0xff] %v6245_v27  ;;  %v1730_v42 = vmul.f32 %v6245_v27, %v6245_v27  ;;  %891 = vmatmul.mubr.f32.gmra.mrb[96].mxu0 %v6267_v45 }
 0x12e   :  { %1907 = vadd.xlane.f32.xlu1 %v1906_v35 }
 0x12f   :  { %v6258_v44 = vpop.f32.mrb[22].mxu0  ;;  %1364 = vmatmul.mubr.f32.gmra.mrb[54].mxu1 %v10280_v12  ;;  %v1909_v37 = vsel %vm1083_vm0, %v1730_v42, 0.0 }
 0x130   :  { %10279 = vst [vmem:[#allocation31_spill] sm:$0xff] %v6258_v44  ;;  %v6269_v31 = vpop.f32.mrb[23].mxu0  ;;  %v1910_v38 = vadd.f32 %v1909_v37, %v1729_v29  ;;  %4701 = vmatprep.mubr.msk.f32.mxu1 %vm297_vm1, %v10282_v18  ;;  %v1731_v33 = vmul.f32 %v6258_v44, %v6258_v44  ;;  %v10286_v29 = vld [vmem:[#allocation5_spill] sm:$0xff]  ;;  %v10288_v18 = vld [vmem:[#allocation6_spill] sm:$0xff]  ;;  %v10292_v44 = vld [vmem:[#allocation8_spill] sm:$0xff] }
 0x131   :  { %10281 = vst [vmem:[#allocation2_spill] sm:$0xff] %v6269_v31  ;;  %v1732_v39 = vmul.f32 %v6269_v31, %v6269_v31 }
 0x132   :  { %1911 = vadd.xlane.f32.xlu0 %v1910_v38 }
 0x133   :  { %v6278_v40 = vpop.f32.mrb[24].mxu0  ;;  %1369 = vmatmul.mubr.f32.gmra.mrb[56].mxu1 %v10284_v25  ;;  %v1913_v41 = vsel %vm1083_vm0, %v1732_v39, 0.0 }
 0x134   :  { %10283 = vst [vmem:[#allocation3_spill] sm:$0xff] %v6278_v40  ;;  %v6282_v35 = vpop.f32.mrb[25].mxu0  ;;  %v1914_v42 = vadd.f32 %v1913_v41, %v1731_v33  ;;  %4702 = vmatprep.mubr.msk.f32.mxu1 %vm297_vm1, %v10286_v29  ;;  %v1733_v37 = vmul.f32 %v6278_v40, %v6278_v40  ;;  %v10290_v33 = vld [vmem:[#allocation7_spill] sm:$0xff] }
 0x135   :  { %10285 = vst [vmem:[#allocation4_spill] sm:$0xff] %v6282_v35  ;;  %v1734_v12 = vmul.f32 %v6282_v35, %v6282_v35 }
 0x136   :  { %1915 = vadd.xlane.f32.xlu1 %v1914_v42 }
 0x137   :  { %v6290_v38 = vpop.f32.mrb[26].mxu0  ;;  %1374 = vmatmul.mubr.f32.gmra.mrb[58].mxu1 %v10288_v18  ;;  %v1917_v25 = vsel %vm1083_vm0, %v1734_v12, 0.0 }
 0x138   :  { %10287 = vst [vmem:[#allocation5_spill] sm:$0xff] %v6290_v38  ;;  %v6294_v39 = vpop.f32.mrb[27].mxu0  ;;  %v1918_v31 = vadd.f32 %v1917_v25, %v1733_v37  ;;  %4703 = vmatprep.mubr.msk.f32.mxu1 %vm297_vm1, %v10290_v33  ;;  %v1735_v29 = vmul.f32 %v6290_v38, %v6290_v38  ;;  %v10294_v37 = vld [vmem:[#allocation9_spill] sm:$0xff] }
 0x139   :  { %10289 = vst [vmem:[#allocation6_spill] sm:$0xff] %v6294_v39  ;;  %v1736_v41 = vmul.f32 %v6294_v39, %v6294_v39  ;;  %v6313_v25 = vld [vmem:[%s10039_s2 + $0x318] sm:$0xff] }
 0x13a   :  { %1919 = vadd.xlane.f32.xlu0 %v1918_v31  ;;  %4642 = vmatprep.mubr.msk.f32.mxu0 %vm297_vm1, %v6313_v25 }
 0x13b   :  { %v6302_v42 = vpop.f32.mrb[28].mxu0  ;;  %1379 = vmatmul.mubr.f32.gmra.mrb[60].mxu1 %v10292_v44  ;;  %v1921_v18 = vsel %vm1083_vm0, %v1736_v41, 0.0  ;;  %v6322_v44 = vld [vmem:[%s10039_s2 + $0x310] sm:$0xff] }
 0x13c   :  { %10291 = vst [vmem:[#allocation7_spill] sm:$0xff] %v6302_v42  ;;  %v6306_v12 = vpop.f32.mrb[29].mxu0  ;;  %v1922_v35 = vadd.f32 %v1921_v18, %v1735_v29  ;;  %4704 = vmatprep.mubr.msk.f32.mxu1 %vm297_vm1, %v10294_v37  ;;  %v1737_v33 = vmul.f32 %v6302_v42, %v6302_v42  ;;  %897 = vmatmul.mubr.f32.gmra.mrb[98].mxu0 %v6322_v44  ;;  %v10296_v29 = vld [vmem:[#allocation10_spill] sm:$0xff]  ;;  %v10066_v37 = vmov 0  }
 0x13d   :  { %10293 = vst [vmem:[#allocation8_spill] sm:$0xff] %v6306_v12  ;;  %v1738_v31 = vmul.f32 %v6306_v12, %v6306_v12  ;;  %4828 = vset.pattern.permute.xlu1 %v10066_v37  ;;  %v10298_v12 = vld [vmem:[#allocation11_spill] sm:$0xff]  ;;  %4827 = vset.pattern.permute.xlu0 %v10066_v37 }
 0x13e   :  { %1923 = vadd.xlane.f32.xlu1 %v1922_v35 }
 0x13f   :  { %v6327_v41 = vpop.f32.mrb[30].mxu0  ;;  %1384 = vmatmul.mubr.f32.gmra.mrb[62].mxu1 %v10296_v29  ;;  %v1925_v18 = vsel %vm1083_vm0, %v1738_v31, 0.0  ;;  %v10300_v31 = vld [vmem:[#allocation12_spill] sm:$0xff] }
 0x140   :  { %10295 = vst [vmem:[#allocation9_spill] sm:$0xff] %v6327_v41  ;;  %v6332_v39 = vpop.f32.mrb[31].mxu0  ;;  %v1926_v38 = vadd.f32 %v1925_v18, %v1737_v33  ;;  %4705 = vmatprep.mubr.msk.f32.mxu1 %vm297_vm1, %v10298_v12  ;;  %v1739_v42 = vmul.f32 %v6327_v41, %v6327_v41  ;;  %v10302_v18 = vld [vmem:[#allocation13_spill] sm:$0xff] }
 0x141   :  { %10297 = vst [vmem:[#allocation10_spill] sm:$0xff] %v6332_v39  ;;  %v1740_v35 = vmul.f32 %v6332_v39, %v6332_v39  ;;  %v10304_v39 = vld [vmem:[#allocation14_spill] sm:$0xff] }
 0x142   :  { %1927 = vadd.xlane.f32.xlu0 %v1926_v38 }
 0x143   :  { %v6341_v29 = vpop.f32.mrb[32].mxu0  ;;  %1389 = vmatmul.mubr.f32.gmra.mrb[64].mxu1 %v10300_v31  ;;  %v1929_v40 = vsel %vm1083_vm0, %v1740_v35, 0.0 }
 0x144   :  { %10299 = vst [vmem:[#allocation11_spill] sm:$0xff] %v6341_v29  ;;  %v6345_v20 = vpop.f32.mrb[33].mxu0  ;;  %v1930_v33 = vadd.f32 %v1929_v40, %v1739_v42  ;;  %4706 = vmatprep.mubr.msk.f32.mxu1 %vm297_vm1, %v10302_v18  ;;  %v1741_v37 = vmul.f32 %v6341_v29, %v6341_v29  ;;  %v10306_v40 = vld [vmem:[#allocation15_spill] sm:$0xff] }
 0x145   :  { %10301 = vst [vmem:[#allocation12_spill] sm:$0xff] %v6345_v20  ;;  %v1742_v12 = vmul.f32 %v6345_v20, %v6345_v20 }
 0x146   :  { %1931 = vadd.xlane.f32.xlu1 %v1930_v33 }
 0x147   :  { %v6353_v38 = vpop.f32.mrb[34].mxu0  ;;  %1394 = vmatmul.mubr.f32.gmra.mrb[66].mxu1 %v10304_v39  ;;  %v1933_v31 = vsel %vm1083_vm0, %v1742_v12, 0.0 }
 0x148   :  { %10303 = vst [vmem:[#allocation13_spill] sm:$0xff] %v6353_v38  ;;  %v6357_v35 = vpop.f32.mrb[35].mxu0  ;;  %v1934_v41 = vadd.f32 %v1933_v31, %v1741_v37  ;;  %4707 = vmatprep.mubr.msk.f32.mxu1 %vm297_vm1, %v10306_v40  ;;  %v1743_v18 = vmul.f32 %v6353_v38, %v6353_v38  ;;  %v10309_v37 = vld [vmem:[#allocation16_spill] sm:$0xff] }
 0x149   :  { %10305 = vst [vmem:[#allocation14_spill] sm:$0xff] %v6357_v35  ;;  %v1744_v42 = vmul.f32 %v6357_v35, %v6357_v35 }
 0x14a   :  { %1935 = vadd.xlane.f32.xlu0 %v1934_v41 }
 0x14b   :  { %v6365_v33 = vpop.f32.mrb[36].mxu0  ;;  %1399 = vmatmul.mubr.f32.gmra.mrb[68].mxu1 %v5899_v48  ;;  %v1937_v39 = vsel %vm1083_vm0, %v1744_v42, 0.0 }
 0x14c   :  { %10307 = vst [vmem:[#allocation15_spill] sm:$0xff] %v6365_v33  ;;  %v6369_v12 = vpop.f32.mrb[37].mxu0  ;;  %v1938_v20 = vadd.f32 %v1937_v39, %v1743_v18  ;;  %4708 = vmatprep.mubr.msk.f32.mxu1 %vm297_vm1, %v10309_v37  ;;  %v1745_v40 = vmul.f32 %v6365_v33, %v6365_v33 }
 0x14d   :  { %10308 = vst [vmem:[#allocation32_spill] sm:$0xff] %v6369_v12  ;;  %v1746_v31 = vmul.f32 %v6369_v12, %v6369_v12 }
 0x14e   :  { %1939 = vadd.xlane.f32.xlu1 %v1938_v20 }
 0x14f   :  { %v6377_v41 = vpop.f32.mrb[38].mxu0  ;;  %1404 = vmatmul.mubr.f32.gmra.mrb[70].mxu1 %v5913_v53  ;;  %v1941_v48 = vsel %vm1083_vm0, %v1746_v31, 0.0 }
 0x150   :  { %10310 = vst [vmem:[#allocation16_spill] sm:$0xff] %v6377_v41  ;;  %v6381_v42 = vpop.f32.mrb[39].mxu0  ;;  %v1942_v35 = vadd.f32 %v1941_v48, %v1745_v40  ;;  %4709 = vmatprep.mubr.msk.f32.mxu1 %vm297_vm1, %v5919_v47  ;;  %v1747_v39 = vmul.f32 %v6377_v41, %v6377_v41 }
 0x151   :  { %10311 = vst [vmem:[#allocation33_spill] sm:$0xff] %v6381_v42  ;;  %v1748_v18 = vmul.f32 %v6381_v42, %v6381_v42 }
 0x152   :  { %1943 = vadd.xlane.f32.xlu0 %v1942_v35 }
 0x153   :  { %v6389_v20 = vpop.f32.mrb[40].mxu0  ;;  %1409 = vmatmul.mubr.f32.gmra.mrb[72].mxu1 %v5927_v51  ;;  %v1945_v53 = vsel %vm1083_vm0, %v1748_v18, 0.0 }
 0x154   :  { %10312 = vst [vmem:[#allocation34_spill] sm:$0xff] %v6389_v20  ;;  %v6393_v37 = vpop.f32.mrb[41].mxu0  ;;  %v1946_v31 = vadd.f32 %v1945_v53, %v1747_v39  ;;  %4710 = vmatprep.mubr.msk.f32.mxu1 %vm297_vm1, %v5933_v50  ;;  %v1749_v40 = vmul.f32 %v6389_v20, %v6389_v20 }
 0x155   :  { %10313 = vst [vmem:[#allocation35_spill] sm:$0xff] %v6393_v37  ;;  %v1750_v47 = vmul.f32 %v6393_v37, %v6393_v37 }
 0x156   :  { %1947 = vadd.xlane.f32.xlu1 %v1946_v31 }
 0x157   :  { %v6401_v35 = vpop.f32.mrb[42].mxu0  ;;  %1414 = vmatmul.mubr.f32.gmra.mrb[74].mxu1 %v5941_v52  ;;  %v1949_v51 = vsel %vm1083_vm0, %v1750_v47, 0.0 }
 0x158   :  { %10314 = vst [vmem:[#allocation36_spill] sm:$0xff] %v6401_v35  ;;  %v6405_v48 = vpop.f32.mrb[43].mxu0  ;;  %v1950_v18 = vadd.f32 %v1949_v51, %v1749_v40  ;;  %4711 = vmatprep.mubr.msk.f32.mxu1 %vm297_vm1, %v5946_v23  ;;  %v1751_v39 = vmul.f32 %v6401_v35, %v6401_v35 }
 0x159   :  { %10315 = vst [vmem:[#allocation37_spill] sm:$0xff] %v6405_v48  ;;  %v1752_v50 = vmul.f32 %v6405_v48, %v6405_v48 }
 0x15a   :  { %1951 = vadd.xlane.f32.xlu0 %v1950_v18 }
 0x15b   :  { %v6413_v53 = vpop.f32.mrb[44].mxu0  ;;  %1419 = vmatmul.mubr.f32.gmra.mrb[76].mxu1 %v5957_v49  ;;  %v1953_v52 = vsel %vm1083_vm0, %v1752_v50, 0.0 }
 0x15c   :  { %10316 = vst [vmem:[#allocation38_spill] sm:$0xff] %v6413_v53  ;;  %v6417_v31 = vpop.f32.mrb[45].mxu0  ;;  %v1954_v47 = vadd.f32 %v1953_v52, %v1751_v39  ;;  %4712 = vmatprep.mubr.msk.f32.mxu1 %vm297_vm1, %v5962_v46  ;;  %v1753_v40 = vmul.f32 %v6413_v53, %v6413_v53 }
 0x15d   :  { %10317 = vst [vmem:[#allocation39_spill] sm:$0xff] %v6417_v31  ;;  %v1754_v23 = vmul.f32 %v6417_v31, %v6417_v31 }
 0x15e   :  { %1955 = vadd.xlane.f32.xlu1 %v1954_v47 }
 0x15f   :  { %v6425_v51 = vpop.f32.mrb[46].mxu0  ;;  %1424 = vmatmul.mubr.f32.gmra.mrb[78].mxu1 %v5973_v54  ;;  %v1957_v49 = vsel %vm1083_vm0, %v1754_v23, 0.0 }
 0x160   :  { %10318 = vst [vmem:[#allocation40_spill] sm:$0xff] %v6425_v51  ;;  %v6429_v18 = vpop.f32.mrb[47].mxu0  ;;  %v1958_v50 = vadd.f32 %v1957_v49, %v1753_v40  ;;  %4713 = vmatprep.mubr.msk.f32.mxu1 %vm297_vm1, %v5978_v55  ;;  %v1755_v39 = vmul.f32 %v6425_v51, %v6425_v51 }
 0x161   :  { %10319 = vst [vmem:[#allocation41_spill] sm:$0xff] %v6429_v18  ;;  %v1756_v46 = vmul.f32 %v6429_v18, %v6429_v18 }
 0x162   :  { %1959 = vadd.xlane.f32.xlu0 %v1958_v50  ;;  %v6456_v50 = vld [vmem:[%s10039_s2 + $0x328] sm:$0xff] }
 0x163   :  { %v6437_v52 = vpop.f32.mrb[48].mxu0  ;;  %1429 = vmatmul.mubr.f32.gmra.mrb[80].mxu1 %v5989_v56  ;;  %v1961_v54 = vsel %vm1083_vm0, %v1756_v46, 0.0  ;;  %4643 = vmatprep.mubr.msk.f32.mxu0 %vm297_vm1, %v6456_v50 }
 0x164   :  { %10320 = vst [vmem:[#allocation42_spill] sm:$0xff] %v6437_v52  ;;  %v6441_v47 = vpop.f32.mrb[49].mxu0  ;;  %v1962_v23 = vadd.f32 %v1961_v54, %v1755_v39  ;;  %4714 = vmatprep.mubr.msk.f32.mxu1 %vm297_vm1, %v5994_v57  ;;  %v1757_v40 = vmul.f32 %v6437_v52, %v6437_v52 }
 0x165   :  { %10321 = vst [vmem:[#allocation43_spill] sm:$0xff] %v6441_v47  ;;  %v1758_v55 = vmul.f32 %v6441_v47, %v6441_v47 }
 0x166   :  { %1963 = vadd.xlane.f32.xlu1 %v1962_v23 }
 0x167   :  { %v6449_v49 = vpop.f32.mrb[50].mxu0  ;;  %1434 = vmatmul.mubr.f32.gmra.mrb[82].mxu1 %v6005_v58  ;;  %v1965_v56 = vsel %vm1083_vm0, %v1758_v55, 0.0  ;;  %v6467_v58 = vld [vmem:[%s10039_s2 + $0x320] sm:$0xff] }
 0x168   :  { %10322 = vst [vmem:[#allocation44_spill] sm:$0xff] %v6449_v49  ;;  %v6458_v46 = vpop.f32.mrb[51].mxu0  ;;  %v1966_v57 = vadd.f32 %v1965_v56, %v1757_v40  ;;  %4715 = vmatprep.mubr.msk.f32.mxu1 %vm297_vm1, %v6010_v59  ;;  %903 = vmatmul.mubr.f32.gmra.mrb[100].mxu0 %v6467_v58  ;;  %v1759_v54 = vmul.f32 %v6449_v49, %v6449_v49 }
 0x169   :  { %10323 = vst [vmem:[#allocation45_spill] sm:$0xff] %v6458_v46  ;;  %v1760_v39 = vmul.f32 %v6458_v46, %v6458_v46 }
 0x16a   :  { %1967 = vadd.xlane.f32.xlu0 %v1966_v57 }
 0x16b   :  { %v6474_v23 = vpop.f32.mrb[52].mxu0  ;;  %v1969_v59 = vsel %vm1083_vm0, %v1760_v39, 0.0  ;;  %1439 = vmatmul.mubr.f32.gmra.mrb[84].mxu1 %v6021_v60 }
 0x16c   :  { %10324 = vst [vmem:[#allocation46_spill] sm:$0xff] %v6474_v23  ;;  %v6478_v55 = vpop.f32.mrb[53].mxu0  ;;  %v1970_v40 = vadd.f32 %v1969_v59, %v1759_v54  ;;  %4716 = vmatprep.mubr.msk.f32.mxu1 %vm297_vm1, %v6026_v61  ;;  %v1761_v46 = vmul.f32 %v6474_v23, %v6474_v23 }
 0x16d   :  { %10325 = vst [vmem:[#allocation47_spill] sm:$0xff] %v6478_v55  ;;  %v1762_v56 = vmul.f32 %v6478_v55, %v6478_v55 }
 0x16e   :  { %1971 = vadd.xlane.f32.xlu1 %v1970_v40 }
 0x16f   :  { %v6486_v57 = vpop.f32.mrb[54].mxu0  ;;  %v1973_v49 = vsel %vm1083_vm0, %v1762_v56, 0.0  ;;  %1444 = vmatmul.mubr.f32.gmra.mrb[86].mxu1 %v6037_v62 }
 0x170   :  { %10326 = vst [vmem:[#allocation48_spill] sm:$0xff] %v6486_v57  ;;  %v6490_v60 = vpop.f32.mrb[55].mxu0  ;;  %v1974_v39 = vadd.f32 %v1973_v49, %v1761_v46  ;;  %4717 = vmatprep.mubr.msk.f32.mxu1 %vm297_vm1, %v6042_v63  ;;  %v1763_v54 = vmul.f32 %v6486_v57, %v6486_v57  ;;  %v240_v49 = vld [vmem:[%s10039_s2 + $0x338] sm:$0xff] }
 0x171   :  { %10327 = vst [vmem:[#allocation49_spill] sm:$0xff] %v6490_v60  ;;  %v1764_v61 = vmul.f32 %v6490_v60, %v6490_v60  ;;  %4644 = vmatprep.mubr.msk.f32.mxu0 %vm297_vm1, %v240_v49 }
 0x172   :  { %1975 = vadd.xlane.f32.xlu0 %v1974_v39 }
 0x173   :  { %v6498_v59 = vpop.f32.mrb[56].mxu0  ;;  %v1977_v40 = vsel %vm1083_vm0, %v1764_v61, 0.0  ;;  %1449 = vmatmul.mubr.f32.gmra.mrb[88].mxu1 %v6053_v0  ;;  %v239_v0 = vld [vmem:[%s10039_s2 + $0x330] sm:$0xff] }
 0x174   :  { %10328 = vst [vmem:[#allocation50_spill] sm:$0xff] %v6498_v59  ;;  %v6502_v62 = vpop.f32.mrb[57].mxu0  ;;  %v1978_v56 = vadd.f32 %v1977_v40, %v1763_v54  ;;  %4718 = vmatprep.mubr.msk.f32.mxu1 %vm297_vm1, %v6058_v1  ;;  %v1765_v46 = vmul.f32 %v6498_v59, %v6498_v59  ;;  %909 = vmatmul.mubr.f32.gmra.mrb[102].mxu0 %v239_v0 }
 0x175   :  { %10329 = vst [vmem:[#allocation51_spill] sm:$0xff] %v6502_v62  ;;  %v1766_v63 = vmul.f32 %v6502_v62, %v6502_v62 }
 0x176   :  { %1979 = vadd.xlane.f32.xlu1 %v1978_v56 }
 0x177   :  { %v6517_v39 = vpop.f32.mrb[58].mxu0  ;;  %v1981_v1 = vsel %vm1083_vm0, %v1766_v63, 0.0  ;;  %1454 = vmatmul.mubr.f32.gmra.mrb[90].mxu1 %v6069_v2 }
 0x178   :  { %10330 = vst [vmem:[#allocation52_spill] sm:$0xff] %v6517_v39  ;;  %v6521_v61 = vpop.f32.mrb[59].mxu0  ;;  %v1982_v54 = vadd.f32 %v1981_v1, %v1765_v46  ;;  %4719 = vmatprep.mubr.msk.f32.mxu1 %vm297_vm1, %v6090_v3  ;;  %v1767_v56 = vmul.f32 %v6517_v39, %v6517_v39 }
 0x179   :  { %10331 = vst [vmem:[#allocation53_spill] sm:$0xff] %v6521_v61  ;;  %v1768_v40 = vmul.f32 %v6521_v61, %v6521_v61 }
 0x17a   :  { %1983 = vadd.xlane.f32.xlu0 %v1982_v54 }
 0x17b   :  { %v6529_v60 = vpop.f32.mrb[60].mxu0  ;;  %v1985_v63 = vsel %vm1083_vm0, %v1768_v40, 0.0  ;;  %1459 = vmatmul.mubr.f32.gmra.mrb[92].mxu1 %v6097_v4 }
 0x17c   :  { %10332 = vst [vmem:[#allocation54_spill] sm:$0xff] %v6529_v60  ;;  %v6533_v2 = vpop.f32.mrb[61].mxu0  ;;  %v1986_v57 = vadd.f32 %v1985_v63, %v1767_v56  ;;  %4720 = vmatprep.mubr.msk.f32.mxu1 %vm297_vm1, %v6115_v6  ;;  %v1769_v46 = vmul.f32 %v6529_v60, %v6529_v60 }
 0x17d   :  { %10333 = vst [vmem:[#allocation55_spill] sm:$0xff] %v6533_v2  ;;  %v1770_v3 = vmul.f32 %v6533_v2, %v6533_v2 }
 0x17e   :  { %1987 = vadd.xlane.f32.xlu1 %v1986_v57 }
 0x17f   :  { %v6541_v1 = vpop.f32.mrb[62].mxu0  ;;  %v1989_v54 = vsel %vm1083_vm0, %v1770_v3, 0.0  ;;  %1464 = vmatmul.mubr.f32.gmra.mrb[94].mxu1 %v6126_v8 }
 0x180   :  { %10334 = vst [vmem:[#allocation56_spill] sm:$0xff] %v6541_v1  ;;  %v6545_v4 = vpop.f32.mrb[63].mxu0  ;;  %v1990_v40 = vadd.f32 %v1989_v54, %v1769_v46  ;;  %4721 = vmatprep.mubr.msk.f32.mxu1 %vm297_vm1, %v6256_v36  ;;  %v1771_v56 = vmul.f32 %v6541_v1, %v6541_v1 }
 0x181   :  { %10335 = vst [vmem:[#allocation57_spill] sm:$0xff] %v6545_v4  ;;  %v1772_v6 = vmul.f32 %v6545_v4, %v6545_v4 }
 0x182   :  { %1991 = vadd.xlane.f32.xlu0 %v1990_v40 }
 0x183   :  { %v6553_v57 = vpop.f32.mrb[64].mxu0  ;;  %v1993_v63 = vsel %vm1083_vm0, %v1772_v6, 0.0  ;;  %1469 = vmatmul.mubr.f32.gmra.mrb[96].mxu1 %v6267_v45 }
 0x184   :  { %10336 = vst [vmem:[#allocation58_spill] sm:$0xff] %v6553_v57  ;;  %v6557_v8 = vpop.f32.mrb[65].mxu0  ;;  %v1994_v3 = vadd.f32 %v1993_v63, %v1771_v56  ;;  %4722 = vmatprep.mubr.msk.f32.mxu1 %vm297_vm1, %v6313_v25  ;;  %v1773_v46 = vmul.f32 %v6553_v57, %v6553_v57 }
 0x185   :  { %10337 = vst [vmem:[#allocation59_spill] sm:$0xff] %v6557_v8  ;;  %v1774_v36 = vmul.f32 %v6557_v8, %v6557_v8 }
 0x186   :  { %1995 = vadd.xlane.f32.xlu1 %v1994_v3 }
 0x187   :  { %v6565_v54 = vpop.f32.mrb[66].mxu0  ;;  %v1997_v40 = vsel %vm1083_vm0, %v1774_v36, 0.0  ;;  %1474 = vmatmul.mubr.f32.gmra.mrb[98].mxu1 %v6322_v44 }
 0x188   :  { %10338 = vst [vmem:[#allocation60_spill] sm:$0xff] %v6565_v54  ;;  %v6569_v45 = vpop.f32.mrb[67].mxu0  ;;  %v1998_v6 = vadd.f32 %v1997_v40, %v1773_v46  ;;  %4723 = vmatprep.mubr.msk.f32.mxu1 %vm297_vm1, %v6456_v50  ;;  %v1775_v56 = vmul.f32 %v6565_v54, %v6565_v54 }
 0x189   :  { %10339 = vst [vmem:[#allocation61_spill] sm:$0xff] %v6569_v45  ;;  %v1776_v25 = vmul.f32 %v6569_v45, %v6569_v45 }
 0x18a   :  { %1999 = vadd.xlane.f32.xlu0 %v1998_v6 }
 0x18b   :  { %v6577_v63 = vpop.f32.mrb[68].mxu0  ;;  %v2001_v3 = vsel %vm1083_vm0, %v1776_v25, 0.0  ;;  %1479 = vmatmul.mubr.f32.gmra.mrb[100].mxu1 %v6467_v58 }
 0x18c   :  { %10340 = vst [vmem:[#allocation62_spill] sm:$0xff] %v6577_v63  ;;  %v6581_v44 = vpop.f32.mrb[69].mxu0  ;;  %v2002_v36 = vadd.f32 %v2001_v3, %v1775_v56  ;;  %4724 = vmatprep.mubr.msk.f32.mxu1 %vm297_vm1, %v240_v49  ;;  %v1777_v46 = vmul.f32 %v6577_v63, %v6577_v63 }
 0x18d   :  { %10341 = vst [vmem:[#allocation63_spill] sm:$0xff] %v6581_v44  ;;  %v1778_v50 = vmul.f32 %v6581_v44, %v6581_v44 }
 0x18e   :  { %2003 = vadd.xlane.f32.xlu1 %v2002_v36 }
 0x18f   :  { %v6588_v40 = vpop.f32.mrb[70].mxu0  ;;  %v2005_v6 = vsel %vm1083_vm0, %v1778_v50, 0.0  ;;  %1484 = vmatmul.mubr.f32.gmra.mrb[102].mxu1 %v239_v0 }
 0x190   :  { %10342 = vst [vmem:[#allocation64_spill] sm:$0xff] %v6588_v40  ;;  %v6591_v25 = vpop.f32.mrb[71].mxu0  ;;  %v2006_v58 = vadd.f32 %v2005_v6, %v1777_v46  ;;  %v1779_v49 = vmul.f32 %v6588_v40, %v6588_v40 }
 0x191   :  { %10343 = vst [vmem:[#allocation65_spill] sm:$0xff] %v6591_v25  ;;  %v1780_v56 = vmul.f32 %v6591_v25, %v6591_v25 }
 0x192   :  { %2007 = vadd.xlane.f32.xlu0 %v2006_v58 }
 0x193   :  { %v6597_v3 = vpop.f32.mrb[72].mxu0  ;;  %v2009_v45 = vsel %vm1083_vm0, %v1780_v56, 0.0 }
 0x194   :  { %10344 = vst [vmem:[#allocation66_spill] sm:$0xff] %v6597_v3  ;;  %v6600_v36 = vpop.f32.mrb[73].mxu0  ;;  %v2010_v54 = vadd.f32 %v2009_v45, %v1779_v49  ;;  %v1781_v50 = vmul.f32 %v6597_v3, %v6597_v3 }
 0x195   :  { %10345 = vst [vmem:[#allocation67_spill] sm:$0xff] %v6600_v36  ;;  %v1782_v0 = vmul.f32 %v6600_v36, %v6600_v36 }
 0x196   :  { %2011 = vadd.xlane.f32.xlu1 %v2010_v54  ;;  %v1230_v46 = vpop.f32.mrb[0].mxu1 }
 0x197   :  { %v6606_v6 = vpop.f32.mrb[74].mxu0  ;;  %v2013_v25 = vsel %vm1083_vm0, %v1782_v0, 0.0  ;;  %v1232_v40 = vpop.f32.mrb[1].mxu1 }
 0x198   :  { %10346 = vst [vmem:[#allocation68_spill] sm:$0xff] %v6606_v6  ;;  %v6609_v58 = vpop.f32.mrb[75].mxu0  ;;  %v2014_v44 = vadd.f32 %v2013_v25, %v1781_v50  ;;  %v1783_v45 = vmul.f32 %v6606_v6, %v6606_v6  ;;  %v1872_v36 = vpop.xlane.xlu0 %1871  ;;  %v6622_v25 = vmul.f32 0.0051020407, %v1230_v46 }
 0x199   :  { %10347 = vst [vmem:[#allocation69_spill] sm:$0xff] %v6609_v58  ;;  %v1784_v56 = vmul.f32 %v6609_v58, %v6609_v58 }
 0x19a   :  { %2015 = vadd.xlane.f32.xlu0 %v2014_v44  ;;  %v1235_v49 = vpop.f32.mrb[2].mxu1 }
 0x19b   :  { %v6615_v3 = vpop.f32.mrb[76].mxu0  ;;  %v2017_v54 = vsel %vm1083_vm0, %v1784_v56, 0.0  ;;  %v6618_v63 = vmul.f32 0.0051020407, %v1235_v49  ;;  %v1237_v4 = vpop.f32.mrb[3].mxu1 }
 0x19c   :  { %10348 = vst [vmem:[#allocation70_spill] sm:$0xff] %v6615_v3  ;;  %v6620_v0 = vpop.f32.mrb[77].mxu0  ;;  %v2018_v40 = vadd.f32 %v2017_v54, %v1783_v45  ;;  %v1876_v58 = vpop.xlane.xlu1 %1875  ;;  %v1785_v44 = vmul.f32 %v6615_v3, %v6615_v3 }
 0x19d   :  { %10349 = vst [vmem:[#allocation71_spill] sm:$0xff] %v6620_v0  ;;  %v1786_v50 = vmul.f32 %v6620_v0, %v6620_v0  ;;  %v2270_v4 = vmul.f32 %v6618_v63, %v6618_v63  ;;  %v242_v0 = vld [vmem:[%s10039_s2 + $0x348] sm:$0xff] }
 0x19e   :  { %2019 = vadd.xlane.f32.xlu1 %v2018_v40  ;;  %v1240_v6 = vpop.f32.mrb[4].mxu1  ;;  %4645 = vmatprep.mubr.msk.f32.mxu0 %vm297_vm1, %v242_v0 }
 0x19f   :  { %v6628_v1 = vmul.f32 0.0051020407, %v1240_v6  ;;  %v1880_v56 = vpop.xlane.xlu0 %1879  ;;  %v6630_v49 = vpop.f32.mrb[78].mxu0  ;;  %v2021_v8 = vsel %vm1083_vm0, %v1786_v50, 0.0  ;;  %v2269_v6 = vmul.f32 %v6622_v25, %v6622_v25  ;;  %4725 = vmatprep.mubr.msk.f32.mxu1 %vm297_vm1, %v242_v0 }
 0x1a0   :  { %10350 = vst [vmem:[#allocation72_spill] sm:$0xff] %v6630_v49  ;;  %v6635_v46 = vpop.f32.mrb[79].mxu0  ;;  %v1242_v45 = vpop.f32.mrb[5].mxu1  ;;  %v2022_v54 = vadd.f32 %v2021_v8, %v1785_v44  ;;  %v2191_v3 = vmul.f32 0.0051020407, %v1880_v56  ;;  %v241_v8 = vld [vmem:[%s10039_s2 + $0x340] sm:$0xff] }
 0x1a1   :  { %10351 = vst [vmem:[#allocation73_spill] sm:$0xff] %v6635_v46  ;;  %v2271_v40 = vmul.f32 %v6628_v1, %v6628_v1  ;;  %v1788_v50 = vmul.f32 %v6635_v46, %v6635_v46  ;;  %v2190_v44 = vmul.f32 0.0051020407, %v1876_v58  ;;  %v1787_v45 = vmul.f32 %v6630_v49, %v6630_v49  ;;  %915 = vmatmul.mubr.f32.gmra.mrb[104].mxu0 %v241_v8 }
 0x1a2   :  { %2023 = vadd.xlane.f32.xlu0 %v2022_v54  ;;  %v6653_v57 = vpop.f32.mrb[6].mxu1  ;;  %v2189_v56 = vmul.f32 0.0051020407, %v1872_v36  ;;  %1489 = vmatmul.mubr.f32.gmra.mrb[104].mxu1 %v241_v8 }
 0x1a3   :  { %v2351_v61 = vsub.f32 %v2191_v3, %v2271_v40  ;;  %v6655_v39 = vpop.f32.mrb[80].mxu0  ;;  %v2025_v46 = vsel %vm1083_vm0, %v1788_v50, 0.0  ;;  %v2350_v2 = vsub.f32 %v2190_v44, %v2270_v4  ;;  %v1247_v62 = vpop.f32.mrb[7].mxu1 }
 0x1a4   :  { %10352 = vst [vmem:[#allocation74_spill] sm:$0xff] %v6655_v39  ;;  %v6658_v60 = vpop.f32.mrb[81].mxu0  ;;  %v2026_v0 = vadd.f32 %v2025_v46, %v1787_v45  ;;  %v2349_v58 = vsub.f32 %v2189_v56, %v2269_v6  ;;  %v1789_v49 = vmul.f32 %v6655_v39, %v6655_v39 }
 0x1a5   :  { %10353 = vst [vmem:[#allocation75_spill] sm:$0xff] %v6658_v60  ;;  %v2431_v59 = vmax.f32 %v2351_v61, 0.0  ;;  %v1790_v54 = vmul.f32 %v6658_v60, %v6658_v60  ;;  %v2430_v50 = vmax.f32 %v2350_v2, 0.0 }
 0x1a6   :  { %2027 = vadd.xlane.f32.xlu1 %v2026_v0  ;;  %v6664_v3 = vpop.f32.mrb[8].mxu1  ;;  %v2429_v61 = vmax.f32 %v2349_v58, 0.0 }
 0x1a7   :  { %v2591_v36 = vadd.f32 0.001, %v2431_v59  ;;  %v6666_v40 = vpop.f32.mrb[82].mxu0  ;;  %v2029_v4 = vsel %vm1083_vm0, %v1790_v54, 0.0  ;;  %v1252_v62 = vpop.f32.mrb[9].mxu1 }
 0x1a8   :  { %10354 = vst [vmem:[#allocation76_spill] sm:$0xff] %v6666_v40  ;;  %v6669_v8 = vpop.f32.mrb[83].mxu0  ;;  %v2030_v46 = vadd.f32 %v2029_v4, %v1789_v49  ;;  %v1791_v44 = vmul.f32 %v6666_v40, %v6666_v40  ;;  %v2590_v0 = vadd.f32 0.001, %v2430_v50  ;;  %v2589_v62 = vadd.f32 0.001, %v2429_v61 }
 0x1a9   :  { %10355 = vst [vmem:[#allocation77_spill] sm:$0xff] %v6669_v8  ;;  %4929 = vrsqrt.f32 %v2591_v36  ;;  %v1792_v6 = vmul.f32 %v6669_v8, %v6669_v8  ;;  %v243_v61 = vld [vmem:[%s10039_s2 + $0x350] sm:$0xff] }
 0x1aa   :  { %2031 = vadd.xlane.f32.xlu0 %v2030_v46  ;;  %v6675_v45 = vpop.f32.mrb[10].mxu1  ;;  %v244_v46 = vld [vmem:[%s10039_s2 + $0x358] sm:$0xff]  ;;  %4931 = vrsqrt.f32 %v2590_v0 }
 0x1ab   :  { %v1257_v59 = vpop.f32.mrb[11].mxu1  ;;  %v2033_v56 = vsel %vm1083_vm0, %v1792_v6, 0.0  ;;  %v6678_v54 = vpop.f32.mrb[84].mxu0  ;;  %4646 = vmatprep.mubr.msk.f32.mxu0 %vm297_vm1, %v244_v46  ;;  %4726 = vmatprep.mubr.msk.f32.mxu1 %vm297_vm1, %v244_v46  ;;  %4933 = vrsqrt.f32 %v2589_v62 }
 0x1ac   :  { %v2034_v2 = vadd.f32 %v2033_v56, %v1791_v44  ;;  %10356 = vst [vmem:[#allocation78_spill] sm:$0xff] %v6678_v54  ;;  %v6680_v49 = vpop.f32.mrb[85].mxu0  ;;  %v1793_v36 = vmul.f32 %v6678_v54, %v6678_v54  ;;  %921 = vmatmul.mubr.f32.gmra.mrb[106].mxu0 %v243_v61  ;;  %1494 = vmatmul.mubr.f32.gmra.mrb[106].mxu1 %v243_v61  ;;  %v2511_v59 = vld [vmem:[%s10040_s3 + $0x10] sm:$0xff] }
 0x1ad   :  { %10357 = vst [vmem:[#allocation79_spill] sm:$0xff] %v6680_v49  ;;  %v1794_v4 = vmul.f32 %v6680_v49, %v6680_v49 }
 0x1ae   :  { %2035 = vadd.xlane.f32.xlu1 %v2034_v2  ;;  %v6682_v58 = vpop.f32.mrb[12].mxu1 }
 0x1af   :  { %v1262_v50 = vpop.f32.mrb[13].mxu1  ;;  %v6696_v6 = vpop.f32.mrb[86].mxu0  ;;  %v2037_v44 = vsel %vm1083_vm0, %v1794_v4, 0.0 }
 0x1b0   :  { %10358 = vst [vmem:[#allocation80_spill] sm:$0xff] %v6696_v6  ;;  %v1795_v56 = vmul.f32 %v6696_v6, %v6696_v6  ;;  %v6704_v2 = vpop.f32.mrb[87].mxu0  ;;  %v6708_v46 = vadd.f32 %v2037_v44, %v1793_v36 }
 0x1b1   :  { %10359 = vst [vmem:[#allocation81_spill] sm:$0xff] %v6704_v2  ;;  %v1796_v0 = vmul.f32 %v6704_v2, %v6704_v2 }
 0x1b2   :  { %v6706_v50 = vpop.f32.mrb[14].mxu1 }
 0x1b3   :  { %v4930_v4 = vpop.eup %4929  ;;  %v1267_v8 = vpop.f32.mrb[15].mxu1  ;;  %v2041_v62 = vsel %vm1083_vm0, %v1796_v0, 0.0 }
 0x1b4   :  { %v2751_v61 = vmul.f32 %v4930_v4, %v2511_v59  ;;  %v6713_v40 = vpop.f32.mrb[88].mxu0  ;;  %v6715_v49 = vadd.f32 %v2041_v62, %v1795_v56  ;;  %v4932_v62 = vpop.eup %4931 }
 0x1b5   :  { %10360 = vst [vmem:[#allocation82_spill] sm:$0xff] %v6713_v40  ;;  %v6717_v54 = vpop.f32.mrb[89].mxu0  ;;  %v1797_v36 = vmul.f32 %v6713_v40, %v6713_v40 }
 0x1b6   :  { %10361 = vst [vmem:[#allocation83_spill] sm:$0xff] %v6717_v54  ;;  %v6719_v6 = vpop.f32.mrb[16].mxu1  ;;  %v6722_v60 = vmul.f32 %v2751_v61, %v6628_v1  ;;  %v1798_v8 = vmul.f32 %v6717_v54, %v6717_v54  ;;  %v2510_v1 = vld [vmem:[%s10040_s3 + $0x8] sm:$0xff] }
 0x1b7   :  { %v1272_v44 = vpop.f32.mrb[17].mxu1  ;;  %v6729_v0 = vpop.f32.mrb[90].mxu0  ;;  %v2750_v39 = vmul.f32 %v4932_v62, %v2510_v1 }
 0x1b8   :  { %v2045_v59 = vsel %vm1083_vm0, %v1798_v8, 0.0  ;;  %10362 = vst [vmem:[#allocation84_spill] sm:$0xff] %v6729_v0  ;;  %v6733_v4 = vpop.f32.mrb[91].mxu0  ;;  %v1799_v40 = vmul.f32 %v6729_v0, %v6729_v0  ;;  %v4934_v8 = vpop.eup %4933 }
 0x1b9   :  { %v6731_v56 = vadd.f32 %v2045_v59, %v1797_v36  ;;  %10363 = vst [vmem:[#allocation85_spill] sm:$0xff] %v6733_v4  ;;  %v1800_v44 = vmul.f32 %v6733_v4, %v6733_v4  ;;  %v2509_v36 = vld [vmem:[%s10040_s3] sm:$0xff]  ;;  %v2830_v0 = vmul.f32 %v2750_v39, %v6618_v63 }
 0x1ba   :  { %v6735_v2 = vpop.f32.mrb[18].mxu1  ;;  %v2749_v18 = vmul.f32 %v4934_v8, %v2509_v36  ;;  %v246_v8 = vld [vmem:[%s10039_s2 + $0x368] sm:$0xff]  ;;  %v245_v36 = vld [vmem:[%s10039_s2 + $0x360] sm:$0xff] }
 0x1bb   :  { %v1277_v54 = vpop.f32.mrb[19].mxu1  ;;  %v2049_v59 = vsel %vm1083_vm0, %v1800_v44, 0.0  ;;  %4647 = vmatprep.mubr.msk.f32.mxu0 %vm297_vm1, %v246_v8  ;;  %4727 = vmatprep.mubr.msk.f32.mxu1 %vm297_vm1, %v246_v8 }
 0x1bc   :  { %v6748_v55 = vadd.f32 %v2049_v59, %v1799_v40  ;;  %v2829_v54 = vmul.f32 %v2749_v18, %v6622_v25  ;;  %927 = vmatmul.mubr.f32.gmra.mrb[108].mxu0 %v245_v36  ;;  %1499 = vmatmul.mubr.f32.gmra.mrb[108].mxu1 %v245_v36 }
 0x1be   :  { %v6750_v23 = vpop.f32.mrb[20].mxu1 }
 0x1bf   :  { %3316 = vperm.xlu1 %4828, %v2750_v39   ;;  %v1282_v51 = vpop.f32.mrb[21].mxu1 }
 0x1c0   :  { %3311 = vperm.xlu0 %4827, %v2749_v18   ;;  %v6762_v51 = vpop.f32.mrb[92].mxu0 }
 0x1c1   :  { %10364 = vst [vmem:[#allocation86_spill] sm:$0xff] %v6762_v51  ;;  %v1801_v39 = vmul.f32 %v6762_v51, %v6762_v51  ;;  %v6766_v63 = vpop.f32.mrb[93].mxu0 }
 0x1c2   :  { %v6753_v4 = vpop.f32.mrb[22].mxu1  ;;  %10365 = vst [vmem:[#allocation87_spill] sm:$0xff] %v6766_v63  ;;  %v1802_v18 = vmul.f32 %v6766_v63, %v6766_v63 }
 0x1c3   :  { %2991 = vrot.lane.b32.xlu1 %v2830_v0, %s5155_s17  ;;  %v1287_v47 = vpop.f32.mrb[23].mxu1 }
 0x1c4   :  { %2989 = vrot.lane.b32.xlu0 %v2829_v54, %s5155_s17  ;;  %v2053_v0 = vsel %vm1083_vm0, %v1802_v18, 0.0  ;;  %v6788_v18 = vpop.f32.mrb[94].mxu0 }
 0x1c5   :  { %10366 = vst [vmem:[#allocation88_spill] sm:$0xff] %v6788_v18  ;;  %v6792_v63 = vpop.f32.mrb[95].mxu0 }
 0x1c6   :  { %v6758_v40 = vpop.f32.mrb[24].mxu1  ;;  %10367 = vst [vmem:[#allocation89_spill] sm:$0xff] %v6792_v63  ;;  %v1804_v8 = vmul.f32 %v6792_v63, %v6792_v63  ;;  %v1888_v63 = vpop.xlane.xlu0 %1887 }
 0x1c7   :  { %3321 = vperm.xlu1 %4828, %v2751_v61   ;;  %v1292_v62 = vpop.f32.mrb[25].mxu1  ;;  %v6773_v61 = vadd.f32 %v2053_v0, %v1801_v39  ;;  %v1803_v0 = vmul.f32 %v6788_v18, %v6788_v18  ;;  %v6804_v18 = vmul.f32 0.0051020407, %v6664_v3  ;;  %v247_v3 = vld [vmem:[%s10039_s2 + $0x370] sm:$0xff] }
 0x1c8   :  { %v1632_v62 = vmul.f32 0.0051020407, %v6653_v57  ;;  %v2057_v57 = vsel %vm1083_vm0, %v1804_v8, 0.0 }
 0x1c9   :  { %v6799_v48 = vadd.f32 %v2057_v57, %v1803_v0 }
 0x1ca   :  { %v6760_v1 = vpop.f32.mrb[26].mxu1  ;;  %v2272_v51 = vmul.f32 %v1632_v62, %v1632_v62  ;;  %v1896_v28 = vpop.xlane.xlu0 %1895 }
 0x1cb   :  { %v1297_v44 = vpop.f32.mrb[27].mxu1 }
 0x1ce   :  { %v6770_v47 = vpop.f32.mrb[28].mxu1 }
 0x1cf   :  { %v1302_v25 = vpop.f32.mrb[29].mxu1 }
 0x1d0   :  { %v1884_v25 = vpop.xlane.xlu1 %1883 }
 0x1d2   :  { %v6781_v59 = vpop.f32.mrb[30].mxu1 }
 0x1d3   :  { %v1307_v54 = vpop.f32.mrb[31].mxu1 }
 0x1d4   :  { %v2192_v54 = vmul.f32 0.0051020407, %v1884_v25  ;;  %v2273_v25 = vmul.f32 %v6804_v18, %v6804_v18 }
 0x1d6   :  { %v6786_v44 = vpop.f32.mrb[32].mxu1 }
 0x1d7   :  { %v1312_v39 = vpop.f32.mrb[33].mxu1 }
 0x1d8   :  { %v2352_v39 = vsub.f32 %v2192_v54, %v2272_v51  ;;  %v2193_v51 = vmul.f32 0.0051020407, %v1888_v63 }
 0x1da   :  { %v6794_v52 = vpop.f32.mrb[34].mxu1  ;;  %v2432_v53 = vmax.f32 %v2352_v39, 0.0 }
 0x1db   :  { %v1317_v36 = vpop.f32.mrb[35].mxu1 }
 0x1dc   :  { %v2592_v8 = vadd.f32 0.001, %v2432_v53 }
 0x1de   :  { %v6801_v35 = vpop.f32.mrb[36].mxu1  ;;  %4935 = vrsqrt.f32 %v2592_v8 }
 0x1df   :  { %v1322_v31 = vpop.f32.mrb[37].mxu1 }
 0x1e0   :  { %v248_v31 = vld [vmem:[%s10039_s2 + $0x378] sm:$0xff] }
 0x1e1   :  { %4648 = vmatprep.mubr.msk.f32.mxu0 %vm297_vm1, %v248_v31  ;;  %4728 = vmatprep.mubr.msk.f32.mxu1 %vm297_vm1, %v248_v31 }
 0x1e2   :  { %v6806_v42 = vpop.f32.mrb[38].mxu1  ;;  %933 = vmatmul.mubr.f32.gmra.mrb[110].mxu0 %v247_v3  ;;  %1504 = vmatmul.mubr.f32.gmra.mrb[110].mxu1 %v247_v3 }
 0x1e3   :  { %2039 = vadd.xlane.f32.xlu0 %v6708_v46  ;;  %v1327_v41 = vpop.f32.mrb[39].mxu1 }
 0x1e4   :  { %v2353_v41 = vsub.f32 %v2193_v51, %v2273_v25  ;;  %v2512_v25 = vld [vmem:[%s10040_s3 + $0x18] sm:$0xff] }
 0x1e6   :  { %v6811_v0 = vpop.f32.mrb[40].mxu1  ;;  %v2433_v63 = vmax.f32 %v2353_v41, 0.0 }
 0x1e7   :  { %v1332_v36 = vpop.f32.mrb[41].mxu1 }
 0x1e8   :  { %v2593_v39 = vadd.f32 0.001, %v2433_v63  ;;  %v4936_v20 = vpop.eup %4935 }
 0x1e9   :  { %v2752_v51 = vmul.f32 %v4936_v20, %v2512_v25 }
 0x1ea   :  { %v6821_v53 = vpop.f32.mrb[42].mxu1  ;;  %4937 = vrsqrt.f32 %v2593_v39 }
 0x1eb   :  { %2043 = vadd.xlane.f32.xlu1 %v6715_v49  ;;  %v1337_v46 = vpop.f32.mrb[43].mxu1 }
 0x1ee   :  { %v6824_v54 = vpop.f32.mrb[44].mxu1 }
 0x1ef   :  { %v1342_v57 = vpop.f32.mrb[45].mxu1 }
 0x1f0   :  { %v2513_v57 = vld [vmem:[%s10040_s3 + $0x20] sm:$0xff] }
 0x1f2   :  { %v6826_v36 = vpop.f32.mrb[46].mxu1 }
 0x1f3   :  { %v1347_v37 = vpop.f32.mrb[47].mxu1 }
 0x1f4   :  { %v2832_v37 = vmul.f32 %v2752_v51, %v1632_v62  ;;  %v4938_v46 = vpop.eup %4937 }
 0x1f5   :  { %v6845_v39 = vmul.f32 %v4938_v46, %v2513_v57 }
 0x1f6   :  { %v6831_v8 = vpop.f32.mrb[48].mxu1 }
 0x1f7   :  { %v1352_v31 = vpop.f32.mrb[49].mxu1 }
 0x1f9   :  { %3326 = vperm.xlu0 %4827, %v2752_v51  }
 0x1fa   :  { %v6833_v49 = vpop.f32.mrb[50].mxu1 }
 0x1fb   :  { %v1357_v3 = vpop.f32.mrb[51].mxu1 }
 0x1fc   :  { %2993 = vrot.lane.b32.xlu1 %v6722_v60, %s5155_s17 }
 0x1fe   :  { %v6837_v41 = vpop.f32.mrb[52].mxu1 }
 0x1ff   :  { %v1362_v63 = vpop.f32.mrb[53].mxu1 }
 0x200   :  { %2995 = vrot.lane.b32.xlu1 %v2832_v37, %s5155_s17  ;;  %v6848_v31 = vpop.f32.mrb[96].mxu0 }
 0x201   :  { %10368 = vst [vmem:[#allocation90_spill] sm:$0xff] %v6848_v31  ;;  %v1805_v60 = vmul.f32 %v6848_v31, %v6848_v31  ;;  %v6852_v62 = vpop.f32.mrb[97].mxu0  ;;  %v249_v31 = vld [vmem:[%s10039_s2 + $0x380] sm:$0xff] }
 0x202   :  { %v6843_v20 = vpop.f32.mrb[54].mxu1  ;;  %10369 = vst [vmem:[#allocation91_spill] sm:$0xff] %v6852_v62  ;;  %v1806_v3 = vmul.f32 %v6852_v62, %v6852_v62 }
 0x203   :  { %v1367_v25 = vpop.f32.mrb[55].mxu1 }
 0x204   :  { %3331 = vperm.xlu1 %4828, %v6845_v39   ;;  %v2061_v63 = vsel %vm1083_vm0, %v1806_v3, 0.0  ;;  %v250_v25 = vld [vmem:[%s10039_s2 + $0x388] sm:$0xff] }
 0x205   :  { %v6859_v46 = vadd.f32 %v2061_v63, %v1805_v60  ;;  %4649 = vmatprep.mubr.msk.f32.mxu0 %vm297_vm1, %v250_v25  ;;  %4729 = vmatprep.mubr.msk.f32.mxu1 %vm297_vm1, %v250_v25  ;;  %v1634_v60 = vmul.f32 0.0051020407, %v6675_v45  ;;  %v1892_v63 = vpop.xlane.xlu1 %1891 }
 0x206   :  { %v6854_v51 = vpop.f32.mrb[56].mxu1  ;;  %939 = vmatmul.mubr.f32.gmra.mrb[112].mxu0 %v249_v31  ;;  %1509 = vmatmul.mubr.f32.gmra.mrb[112].mxu1 %v249_v31  ;;  %v2194_v25 = vmul.f32 0.0051020407, %v1892_v63 }
 0x207   :  { %v1372_v37 = vpop.f32.mrb[57].mxu1  ;;  %v2274_v29 = vmul.f32 %v1634_v60, %v1634_v60 }
 0x209   :  { %v2354_v34 = vsub.f32 %v2194_v25, %v2274_v29  ;;  %v251_v29 = vld [vmem:[%s10039_s2 + $0x390] sm:$0xff] }
 0x20a   :  { %v6861_v57 = vpop.f32.mrb[58].mxu1 }
 0x20b   :  { %v1377_v38 = vpop.f32.mrb[59].mxu1 }
 0x20e   :  { %v6871_v3 = vpop.f32.mrb[60].mxu1 }
 0x20f   :  { %v1382_v37 = vpop.f32.mrb[61].mxu1  ;;  %v6874_v62 = vpop.f32.mrb[98].mxu0 }
 0x210   :  { %10370 = vst [vmem:[#allocation92_spill] sm:$0xff] %v6874_v62  ;;  %v1807_v33 = vmul.f32 %v6874_v62, %v6874_v62  ;;  %v6880_v38 = vpop.f32.mrb[99].mxu0  ;;  %v6891_v62 = vmul.f32 0.0051020407, %v6682_v58 }
 0x211   :  { %10371 = vst [vmem:[#allocation93_spill] sm:$0xff] %v6880_v38  ;;  %v1808_v31 = vmul.f32 %v6880_v38, %v6880_v38 }
 0x212   :  { %v6876_v12 = vpop.f32.mrb[62].mxu1  ;;  %v2275_v63 = vmul.f32 %v6891_v62, %v6891_v62 }
 0x213   :  { %v1387_v32 = vpop.f32.mrb[63].mxu1  ;;  %v2065_v27 = vsel %vm1083_vm0, %v1808_v31, 0.0 }
 0x214   :  { %v6887_v37 = vadd.f32 %v2065_v27, %v1807_v33  ;;  %v2434_v32 = vmax.f32 %v2354_v34, 0.0  ;;  %v2195_v33 = vmul.f32 0.0051020407, %v1896_v28 }
 0x216   :  { %v6885_v45 = vpop.f32.mrb[64].mxu1  ;;  %v2594_v38 = vadd.f32 0.001, %v2434_v32 }
 0x217   :  { %v1392_v14 = vpop.f32.mrb[65].mxu1 }
 0x218   :  { %2047 = vadd.xlane.f32.xlu0 %v6731_v56  ;;  %v252_v14 = vld [vmem:[%s10039_s2 + $0x398] sm:$0xff]  ;;  %4939 = vrsqrt.f32 %v2594_v38 }
 0x219   :  { %4650 = vmatprep.mubr.msk.f32.mxu0 %vm297_vm1, %v252_v14  ;;  %4730 = vmatprep.mubr.msk.f32.mxu1 %vm297_vm1, %v252_v14  ;;  %v2833_v14 = vmul.f32 %v6845_v39, %v6804_v18 }
 0x21a   :  { %v6893_v30 = vpop.f32.mrb[66].mxu1  ;;  %945 = vmatmul.mubr.f32.gmra.mrb[114].mxu0 %v251_v29  ;;  %1514 = vmatmul.mubr.f32.gmra.mrb[114].mxu1 %v251_v29 }
 0x21b   :  { %v1397_v43 = vpop.f32.mrb[67].mxu1 }
 0x21c   :  { %v2355_v43 = vsub.f32 %v2195_v33, %v2275_v63  ;;  %v2514_v33 = vld [vmem:[%s10040_s3 + $0x28] sm:$0xff] }
 0x21e   :  { %v6897_v31 = vpop.f32.mrb[68].mxu1  ;;  %v2435_v28 = vmax.f32 %v2355_v43, 0.0 }
 0x21f   :  { %v1402_v27 = vpop.f32.mrb[69].mxu1 }
 0x220   :  { %v2595_v32 = vadd.f32 0.001, %v2435_v28 }
 0x222   :  { %v6907_v34 = vpop.f32.mrb[70].mxu1  ;;  %v4940_v63 = vpop.eup %4939  ;;  %4941 = vrsqrt.f32 %v2595_v32 }
 0x223   :  { %v1407_v58 = vpop.f32.mrb[71].mxu1  ;;  %v2754_v43 = vmul.f32 %v4940_v63, %v2514_v33 }
 0x225   :  { %v2834_v28 = vmul.f32 %v2754_v43, %v1634_v60 }
 0x226   :  { %v6909_v56 = vpop.f32.mrb[72].mxu1 }
 0x227   :  { %v1412_v25 = vpop.f32.mrb[73].mxu1 }
 0x228   :  { %2051 = vadd.xlane.f32.xlu1 %v6748_v55  ;;  %v2515_v25 = vld [vmem:[%s10040_s3 + $0x30] sm:$0xff] }
 0x22a   :  { %v6912_v27 = vpop.f32.mrb[74].mxu1 }
 0x22b   :  { %v1417_v22 = vpop.f32.mrb[75].mxu1 }
 0x22c   :  { %v4942_v39 = vpop.eup %4941 }
 0x22e   :  { %2997 = vrot.lane.b32.xlu0 %v2833_v14, %s5155_s17  ;;  %v6920_v38 = vpop.f32.mrb[76].mxu1  ;;  %v2755_v14 = vmul.f32 %v4942_v39, %v2515_v25  ;;  %v254_v25 = vld [vmem:[%s10039_s2 + $0x3a8] sm:$0xff] }
 0x22f   :  { %v1422_v29 = vpop.f32.mrb[77].mxu1  ;;  %4651 = vmatprep.mubr.msk.f32.mxu0 %vm297_vm1, %v254_v25  ;;  %4731 = vmatprep.mubr.msk.f32.mxu1 %vm297_vm1, %v254_v25 }
 0x232   :  { %3336 = vperm.xlu0 %4827, %v2754_v43   ;;  %v6922_v55 = vpop.f32.mrb[78].mxu1 }
 0x233   :  { %v1427_v58 = vpop.f32.mrb[79].mxu1 }
 0x236   :  { %v6924_v22 = vpop.f32.mrb[80].mxu1 }
 0x237   :  { %v1432_v18 = vpop.f32.mrb[81].mxu1 }
 0x239   :  { %2999 = vrot.lane.b32.xlu1 %v2834_v28, %s5155_s17 }
 0x23a   :  { %v6930_v32 = vpop.f32.mrb[82].mxu1 }
 0x23b   :  { %10372 = vst [vmem:[#allocation94_spill] sm:$0xff] %v6930_v32  ;;  %v1437_v29 = vpop.f32.mrb[83].mxu1  ;;  %v6932_v63 = vpop.f32.mrb[100].mxu0 }
 0x23c   :  { %10373 = vst [vmem:[#allocation95_spill] sm:$0xff] %v6932_v63  ;;  %v6934_v33 = vpop.f32.mrb[101].mxu0  ;;  %v1809_v60 = vmul.f32 %v6932_v63, %v6932_v63  ;;  %v253_v29 = vld [vmem:[%s10039_s2 + $0x3a0] sm:$0xff] }
 0x23d   :  { %3341 = vperm.xlu1 %4828, %v2755_v14   ;;  %10374 = vst [vmem:[#allocation96_spill] sm:$0xff] %v6934_v33  ;;  %v1810_v43 = vmul.f32 %v6934_v33, %v6934_v33  ;;  %951 = vmatmul.mubr.f32.gmra.mrb[116].mxu0 %v253_v29 }
 0x23e   :  { %v6936_v58 = vpop.f32.mrb[84].mxu1  ;;  %1519 = vmatmul.mubr.f32.gmra.mrb[116].mxu1 %v253_v29 }
 0x23f   :  { %10375 = vst [vmem:[#allocation97_spill] sm:$0xff] %v6936_v58  ;;  %v1442_v18 = vpop.f32.mrb[85].mxu1  ;;  %v2069_v28 = vsel %vm1083_vm0, %v1810_v43, 0.0 }
 0x240   :  { %v6945_v39 = vadd.f32 %v2069_v28, %v1809_v60  ;;  %v1636_v60 = vmul.f32 0.0051020407, %v6706_v50  ;;  %v1900_v28 = vpop.xlane.xlu1 %1899 }
 0x241   :  { %v2196_v29 = vmul.f32 0.0051020407, %v1900_v28  ;;  %v256_v28 = vld [vmem:[%s10039_s2 + $0x3b8] sm:$0xff] }
 0x242   :  { %v6943_v21 = vpop.f32.mrb[86].mxu1  ;;  %v2276_v9 = vmul.f32 %v1636_v60, %v1636_v60  ;;  %4652 = vmatprep.mubr.msk.f32.mxu0 %vm297_vm1, %v256_v28  ;;  %4732 = vmatprep.mubr.msk.f32.mxu1 %vm297_vm1, %v256_v28 }
 0x243   :  { %10376 = vst [vmem:[#allocation98_spill] sm:$0xff] %v6943_v21  ;;  %v1447_v16 = vpop.f32.mrb[87].mxu1 }
 0x244   :  { %v2356_v50 = vsub.f32 %v2196_v29, %v2276_v9  ;;  %v255_v9 = vld [vmem:[%s10039_s2 + $0x3b0] sm:$0xff] }
 0x245   :  { %957 = vmatmul.mubr.f32.gmra.mrb[118].mxu0 %v255_v9  ;;  %1524 = vmatmul.mubr.f32.gmra.mrb[118].mxu1 %v255_v9 }
 0x246   :  { %v6955_v43 = vpop.f32.mrb[88].mxu1  ;;  %v2436_v21 = vmax.f32 %v2356_v50, 0.0 }
 0x247   :  { %10377 = vst [vmem:[#allocation99_spill] sm:$0xff] %v6955_v43  ;;  %v1452_v18 = vpop.f32.mrb[89].mxu1  ;;  %v6960_v63 = vpop.f32.mrb[102].mxu0 }
 0x248   :  { %10379 = vst [vmem:[#allocation101_spill] sm:$0xff] %v6960_v63  ;;  %v1811_v15 = vmul.f32 %v6960_v63, %v6960_v63  ;;  %v6964_v16 = vpop.f32.mrb[103].mxu0  ;;  %v1904_v63 = vpop.xlane.xlu0 %1903  ;;  %v2596_v58 = vadd.f32 0.001, %v2436_v21 }
 0x249   :  { %10380 = vst [vmem:[#allocation102_spill] sm:$0xff] %v6964_v16  ;;  %v1812_v25 = vmul.f32 %v6964_v16, %v6964_v16  ;;  %v2197_v32 = vmul.f32 0.0051020407, %v1904_v63  ;;  %v2835_v63 = vmul.f32 %v2755_v14, %v6891_v62  ;;  %v2517_v62 = vld [vmem:[%s10040_s3 + $0x40] sm:$0xff] }
 0x24a   :  { %v6958_v33 = vpop.f32.mrb[90].mxu1  ;;  %4943 = vrsqrt.f32 %v2596_v58 }
 0x24b   :  { %10378 = vst [vmem:[#allocation100_spill] sm:$0xff] %v6958_v33  ;;  %v1457_v10 = vpop.f32.mrb[91].mxu1  ;;  %v2073_v18 = vsel %vm1083_vm0, %v1812_v25, 0.0  ;;  %v6973_v33 = vmul.f32 0.0051020407, %v6719_v6 }
 0x24c   :  { %v6969_v43 = vadd.f32 %v2073_v18, %v1811_v15  ;;  %v2516_v18 = vld [vmem:[%s10040_s3 + $0x38] sm:$0xff]  ;;  %v1912_v16 = vpop.xlane.xlu0 %1911 }
 0x24d   :  { %v2277_v10 = vmul.f32 %v6973_v33, %v6973_v33 }
 0x24f   :  { %v2357_v15 = vsub.f32 %v2197_v32, %v2277_v10 }
 0x251   :  { %2055 = vadd.xlane.f32.xlu0 %v6773_v61  ;;  %v2437_v6 = vmax.f32 %v2357_v15, 0.0  ;;  %v6986_v61 = vpop.f32.mrb[92].mxu1 }
 0x252   :  { %10381 = vst [vmem:[#allocation103_spill] sm:$0xff] %v6986_v61  ;;  %v1462_v25 = vpop.f32.mrb[93].mxu1 }
 0x253   :  { %v2597_v21 = vadd.f32 0.001, %v2437_v6  ;;  %v6993_v58 = vpop.f32.mrb[94].mxu1  ;;  %v257_v25 = vld [vmem:[%s10039_s2 + $0x3c0] sm:$0xff] }
 0x254   :  { %v4944_v29 = vpop.eup %4943  ;;  %10382 = vst [vmem:[#allocation104_spill] sm:$0xff] %v6993_v58  ;;  %v1467_v50 = vpop.f32.mrb[95].mxu1 }
 0x255   :  { %4945 = vrsqrt.f32 %v2597_v21  ;;  %v2756_v32 = vmul.f32 %v4944_v29, %v2516_v18  ;;  %v1638_v29 = vmul.f32 0.0051020407, %v6735_v2  ;;  %v7032_v2 = vmul.f32 0.0051020407, %v6750_v23 }
 0x25f   :  { %v4946_v10 = vpop.eup %4945 }
 0x260   :  { %v2757_v14 = vmul.f32 %v4946_v10, %v2517_v62  ;;  %v2278_v10 = vmul.f32 %v1638_v29, %v1638_v29 }
 0x261   :  { %2059 = vadd.xlane.f32.xlu1 %v6799_v48  ;;  %v2836_v48 = vmul.f32 %v2756_v32, %v1636_v60 }
 0x267   :  { %3001 = vrot.lane.b32.xlu0 %v2835_v63, %s5155_s17  ;;  %v258_v63 = vld [vmem:[%s10039_s2 + $0x3c8] sm:$0xff] }
 0x268   :  { %4653 = vmatprep.mubr.msk.f32.mxu0 %vm297_vm1, %v258_v63  ;;  %4733 = vmatprep.mubr.msk.f32.mxu1 %vm297_vm1, %v258_v63 }
 0x269   :  { %963 = vmatmul.mubr.f32.gmra.mrb[120].mxu0 %v257_v25  ;;  %1529 = vmatmul.mubr.f32.gmra.mrb[120].mxu1 %v257_v25 }
 0x26b   :  { %3346 = vperm.xlu0 %4827, %v2756_v32   ;;  %v1908_v32 = vpop.xlane.xlu1 %1907 }
 0x272   :  { %3003 = vrot.lane.b32.xlu1 %v2836_v48, %s5155_s17 }
 0x274   :  { %v6999_v28 = vpop.f32.mrb[104].mxu0 }
 0x275   :  { %10383 = vst [vmem:[#allocation105_spill] sm:$0xff] %v6999_v28  ;;  %v7001_v9 = vpop.f32.mrb[105].mxu0  ;;  %v1813_v15 = vmul.f32 %v6999_v28, %v6999_v28  ;;  %v2199_v28 = vmul.f32 0.0051020407, %v1912_v16 }
 0x276   :  { %3351 = vperm.xlu1 %4828, %v2757_v14   ;;  %10384 = vst [vmem:[#allocation106_spill] sm:$0xff] %v7001_v9  ;;  %v1814_v6 = vmul.f32 %v7001_v9, %v7001_v9 }
 0x278   :  { %v2077_v60 = vsel %vm1083_vm0, %v1814_v6, 0.0 }
 0x279   :  { %v7008_v21 = vadd.f32 %v2077_v60, %v1813_v15  ;;  %v2198_v15 = vmul.f32 0.0051020407, %v1908_v32  ;;  %v260_v32 = vld [vmem:[%s10039_s2 + $0x3d8] sm:$0xff] }
 0x27a   :  { %4654 = vmatprep.mubr.msk.f32.mxu0 %vm297_vm1, %v260_v32  ;;  %4734 = vmatprep.mubr.msk.f32.mxu1 %vm297_vm1, %v260_v32 }
 0x27b   :  { %v2358_v63 = vsub.f32 %v2198_v15, %v2278_v10  ;;  %v7045_v10 = vpop.f32.mrb[96].mxu1 }
 0x27c   :  { %10387 = vst [vmem:[#allocation109_spill] sm:$0xff] %v7045_v10  ;;  %v1472_v15 = vpop.f32.mrb[97].mxu1 }
 0x27d   :  { %v2438_v25 = vmax.f32 %v2358_v63, 0.0  ;;  %v2518_v63 = vld [vmem:[%s10040_s3 + $0x48] sm:$0xff]  ;;  %v261_v15 = vld [vmem:[%s10039_s2 + $0x3e0] sm:$0xff] }
 0x27f   :  { %v7019_v18 = vpop.f32.mrb[106].mxu0  ;;  %v2598_v9 = vadd.f32 0.001, %v2438_v25 }
 0x280   :  { %10385 = vst [vmem:[#allocation107_spill] sm:$0xff] %v7019_v18  ;;  %v1815_v50 = vmul.f32 %v7019_v18, %v7019_v18  ;;  %v7023_v48 = vpop.f32.mrb[107].mxu0  ;;  %v2279_v18 = vmul.f32 %v7032_v2, %v7032_v2 }
 0x281   :  { %10386 = vst [vmem:[#allocation108_spill] sm:$0xff] %v7023_v48  ;;  %v1816_v62 = vmul.f32 %v7023_v48, %v7023_v48  ;;  %4947 = vrsqrt.f32 %v2598_v9  ;;  %v7052_v9 = vpop.f32.mrb[98].mxu1  ;;  %v1920_v48 = vpop.xlane.xlu0 %1919 }
 0x282   :  { %v2359_v23 = vsub.f32 %v2199_v28, %v2279_v18  ;;  %10388 = vst [vmem:[#allocation110_spill] sm:$0xff] %v7052_v9  ;;  %v1477_v18 = vpop.f32.mrb[99].mxu1 }
 0x283   :  { %v2081_v6 = vsel %vm1083_vm0, %v1816_v62, 0.0  ;;  %v2837_v62 = vmul.f32 %v2757_v14, %v6973_v33  ;;  %v2519_v33 = vld [vmem:[%s10040_s3 + $0x50] sm:$0xff] }
 0x284   :  { %v7028_v60 = vadd.f32 %v2081_v6, %v1815_v50  ;;  %v259_v50 = vld [vmem:[%s10039_s2 + $0x3d0] sm:$0xff] }
 0x285   :  { %969 = vmatmul.mubr.f32.gmra.mrb[122].mxu0 %v259_v50  ;;  %1534 = vmatmul.mubr.f32.gmra.mrb[122].mxu1 %v259_v50 }
 0x28a   :  { %2063 = vadd.xlane.f32.xlu0 %v6859_v46  ;;  %v2439_v46 = vmax.f32 %v2359_v23, 0.0 }
 0x28b   :  { %v4948_v6 = vpop.eup %4947 }
 0x28c   :  { %v2599_v16 = vadd.f32 0.001, %v2439_v46  ;;  %v2758_v28 = vmul.f32 %v4948_v6, %v2518_v63  ;;  %v1640_v6 = vmul.f32 0.0051020407, %v6753_v4  ;;  %v7091_v4 = vmul.f32 0.0051020407, %v6758_v40 }
 0x28e   :  { %4949 = vrsqrt.f32 %v2599_v16 }
 0x28f   :  { %v7058_v32 = vpop.f32.mrb[108].mxu0 }
 0x290   :  { %10389 = vst [vmem:[#allocation111_spill] sm:$0xff] %v7058_v32  ;;  %v7060_v50 = vpop.f32.mrb[109].mxu0  ;;  %v1817_v23 = vmul.f32 %v7058_v32, %v7058_v32  ;;  %v2201_v32 = vmul.f32 0.0051020407, %v1920_v48 }
 0x291   :  { %10390 = vst [vmem:[#allocation112_spill] sm:$0xff] %v7060_v50  ;;  %v1818_v46 = vmul.f32 %v7060_v50, %v7060_v50 }
 0x298   :  { %v4950_v25 = vpop.eup %4949 }
 0x299   :  { %v2759_v14 = vmul.f32 %v4950_v25, %v2519_v33  ;;  %v2280_v25 = vmul.f32 %v1640_v6, %v1640_v6 }
 0x29a   :  { %2067 = vadd.xlane.f32.xlu1 %v6887_v37  ;;  %v2838_v37 = vmul.f32 %v2758_v28, %v1638_v29  ;;  %v2085_v29 = vsel %vm1083_vm0, %v1818_v46, 0.0 }
 0x29b   :  { %v7067_v16 = vadd.f32 %v2085_v29, %v1817_v23 }
 0x2a0   :  { %3005 = vrot.lane.b32.xlu0 %v2837_v62, %s5155_s17  ;;  %v262_v62 = vld [vmem:[%s10039_s2 + $0x3e8] sm:$0xff] }
 0x2a1   :  { %4655 = vmatprep.mubr.msk.f32.mxu0 %vm297_vm1, %v262_v62  ;;  %4735 = vmatprep.mubr.msk.f32.mxu1 %vm297_vm1, %v262_v62 }
 0x2a2   :  { %975 = vmatmul.mubr.f32.gmra.mrb[124].mxu0 %v261_v15  ;;  %1539 = vmatmul.mubr.f32.gmra.mrb[124].mxu1 %v261_v15 }
 0x2a4   :  { %3356 = vperm.xlu0 %4827, %v2758_v28   ;;  %v1916_v28 = vpop.xlane.xlu1 %1915 }
 0x2a5   :  { %v2200_v23 = vmul.f32 0.0051020407, %v1916_v28  ;;  %v264_v28 = vld [vmem:[%s10039_s2 + $0x3f8] sm:$0xff] }
 0x2a6   :  { %4656 = vmatprep.mubr.msk.f32.mxu0 %vm297_vm1, %v264_v28  ;;  %4736 = vmatprep.mubr.msk.f32.mxu1 %vm297_vm1, %v264_v28 }
 0x2a7   :  { %v2360_v62 = vsub.f32 %v2200_v23, %v2280_v25  ;;  %v7104_v25 = vpop.f32.mrb[100].mxu1 }
 0x2a8   :  { %10393 = vst [vmem:[#allocation115_spill] sm:$0xff] %v7104_v25  ;;  %v1482_v23 = vpop.f32.mrb[101].mxu1 }
 0x2a9   :  { %v2440_v15 = vmax.f32 %v2360_v62, 0.0  ;;  %v2520_v62 = vld [vmem:[%s10040_s3 + $0x58] sm:$0xff]  ;;  %v265_v23 = vld [vmem:[%s10039_s2 + $0x400] sm:$0xff] }
 0x2ab   :  { %3007 = vrot.lane.b32.xlu1 %v2838_v37, %s5155_s17  ;;  %v2600_v50 = vadd.f32 0.001, %v2440_v15 }
 0x2ad   :  { %4951 = vrsqrt.f32 %v2600_v50  ;;  %v7111_v50 = vpop.f32.mrb[102].mxu1 }
 0x2ae   :  { %10394 = vst [vmem:[#allocation116_spill] sm:$0xff] %v7111_v50 }
 0x2af   :  { %3361 = vperm.xlu1 %4828, %v2759_v14  }
 0x2b5   :  { %v7078_v63 = vpop.f32.mrb[110].mxu0 }
 0x2b6   :  { %10391 = vst [vmem:[#allocation113_spill] sm:$0xff] %v7078_v63  ;;  %v1819_v18 = vmul.f32 %v7078_v63, %v7078_v63  ;;  %v7082_v37 = vpop.f32.mrb[111].mxu0  ;;  %v2281_v63 = vmul.f32 %v7091_v4, %v7091_v4 }
 0x2b7   :  { %10392 = vst [vmem:[#allocation114_spill] sm:$0xff] %v7082_v37  ;;  %v1820_v33 = vmul.f32 %v7082_v37, %v7082_v37  ;;  %v1928_v37 = vpop.xlane.xlu0 %1927 }
 0x2b8   :  { %v2361_v40 = vsub.f32 %v2201_v32, %v2281_v63  ;;  %v1487_v63 = vpop.f32.mrb[103].mxu1 }
 0x2b9   :  { %v2089_v46 = vsel %vm1083_vm0, %v1820_v33, 0.0  ;;  %v2839_v33 = vmul.f32 %v2759_v14, %v7032_v2  ;;  %v2521_v2 = vld [vmem:[%s10040_s3 + $0x60] sm:$0xff] }
 0x2ba   :  { %v7087_v29 = vadd.f32 %v2089_v46, %v1819_v18  ;;  %v263_v18 = vld [vmem:[%s10039_s2 + $0x3f0] sm:$0xff]  ;;  %v4952_v46 = vpop.eup %4951 }
 0x2bb   :  { %981 = vmatmul.mubr.f32.gmra.mrb[126].mxu0 %v263_v18  ;;  %1544 = vmatmul.mubr.f32.gmra.mrb[126].mxu1 %v263_v18  ;;  %v2760_v32 = vmul.f32 %v4952_v46, %v2520_v62  ;;  %v1642_v46 = vmul.f32 0.0051020407, %v6760_v1  ;;  %v7150_v1 = vmul.f32 0.0051020407, %v6770_v47 }
 0x2c3   :  { %2071 = vadd.xlane.f32.xlu0 %v6945_v39  ;;  %v2441_v39 = vmax.f32 %v2361_v40, 0.0 }
 0x2c5   :  { %v2601_v48 = vadd.f32 0.001, %v2441_v39 }
 0x2c7   :  { %4953 = vrsqrt.f32 %v2601_v48 }
 0x2d1   :  { %v4954_v15 = vpop.eup %4953 }
 0x2d2   :  { %v2761_v14 = vmul.f32 %v4954_v15, %v2521_v2  ;;  %v2282_v15 = vmul.f32 %v1642_v46, %v1642_v46 }
 0x2d3   :  { %2075 = vadd.xlane.f32.xlu1 %v6969_v43  ;;  %v2840_v43 = vmul.f32 %v2760_v32, %v1640_v6 }
 0x2d9   :  { %3009 = vrot.lane.b32.xlu0 %v2839_v33, %s5155_s17  ;;  %v7117_v28 = vpop.f32.mrb[112].mxu0  ;;  %v266_v33 = vld [vmem:[%s10039_s2 + $0x408] sm:$0xff] }
 0x2da   :  { %10395 = vst [vmem:[#allocation117_spill] sm:$0xff] %v7117_v28  ;;  %v7119_v18 = vpop.f32.mrb[113].mxu0  ;;  %v1821_v40 = vmul.f32 %v7117_v28, %v7117_v28  ;;  %4657 = vmatprep.mubr.msk.f32.mxu0 %vm297_vm1, %v266_v33  ;;  %4737 = vmatprep.mubr.msk.f32.mxu1 %vm297_vm1, %v266_v33 }
 0x2db   :  { %10396 = vst [vmem:[#allocation118_spill] sm:$0xff] %v7119_v18  ;;  %v1822_v39 = vmul.f32 %v7119_v18, %v7119_v18  ;;  %987 = vmatmul.mubr.f32.gmra.mrb[128].mxu0 %v265_v23  ;;  %1549 = vmatmul.mubr.f32.gmra.mrb[128].mxu1 %v265_v23  ;;  %v2283_v18 = vmul.f32 %v7150_v1, %v7150_v1 }
 0x2dd   :  { %3366 = vperm.xlu0 %4827, %v2760_v32   ;;  %v2093_v6 = vsel %vm1083_vm0, %v1822_v39, 0.0  ;;  %v1924_v32 = vpop.xlane.xlu1 %1923 }
 0x2de   :  { %v7126_v48 = vadd.f32 %v2093_v6, %v1821_v40  ;;  %v2202_v40 = vmul.f32 0.0051020407, %v1924_v32  ;;  %v268_v32 = vld [vmem:[%s10039_s2 + $0x418] sm:$0xff] }
 0x2df   :  { %4658 = vmatprep.mubr.msk.f32.mxu0 %vm297_vm1, %v268_v32  ;;  %4738 = vmatprep.mubr.msk.f32.mxu1 %vm297_vm1, %v268_v32 }
 0x2e0   :  { %v2362_v33 = vsub.f32 %v2202_v40, %v2282_v15  ;;  %v7163_v15 = vpop.f32.mrb[104].mxu1 }
 0x2e1   :  { %10399 = vst [vmem:[#allocation121_spill] sm:$0xff] %v7163_v15  ;;  %v1492_v40 = vpop.f32.mrb[105].mxu1 }
 0x2e2   :  { %v2442_v23 = vmax.f32 %v2362_v33, 0.0  ;;  %v2522_v33 = vld [vmem:[%s10040_s3 + $0x68] sm:$0xff]  ;;  %v269_v40 = vld [vmem:[%s10039_s2 + $0x420] sm:$0xff] }
 0x2e4   :  { %3011 = vrot.lane.b32.xlu1 %v2840_v43, %s5155_s17  ;;  %v2602_v28 = vadd.f32 0.001, %v2442_v23 }
 0x2e6   :  { %4955 = vrsqrt.f32 %v2602_v28  ;;  %v7170_v28 = vpop.f32.mrb[106].mxu1 }
 0x2e7   :  { %10400 = vst [vmem:[#allocation122_spill] sm:$0xff] %v7170_v28 }
 0x2e8   :  { %3371 = vperm.xlu1 %4828, %v2761_v14  }
 0x2ed   :  { %v7137_v62 = vpop.f32.mrb[114].mxu0 }
 0x2ee   :  { %10397 = vst [vmem:[#allocation119_spill] sm:$0xff] %v7137_v62  ;;  %v1823_v63 = vmul.f32 %v7137_v62, %v7137_v62  ;;  %v7141_v43 = vpop.f32.mrb[115].mxu0  ;;  %v2203_v62 = vmul.f32 0.0051020407, %v1928_v37 }
 0x2ef   :  { %10398 = vst [vmem:[#allocation120_spill] sm:$0xff] %v7141_v43  ;;  %v1824_v2 = vmul.f32 %v7141_v43, %v7141_v43 }
 0x2f0   :  { %v2363_v47 = vsub.f32 %v2203_v62, %v2283_v18  ;;  %v1497_v62 = vpop.f32.mrb[107].mxu1 }
 0x2f1   :  { %v2097_v39 = vsel %vm1083_vm0, %v1824_v2, 0.0  ;;  %v2841_v2 = vmul.f32 %v2761_v14, %v7091_v4  ;;  %v2523_v4 = vld [vmem:[%s10040_s3 + $0x70] sm:$0xff] }
 0x2f2   :  { %v7146_v6 = vadd.f32 %v2097_v39, %v1823_v63  ;;  %v267_v63 = vld [vmem:[%s10039_s2 + $0x410] sm:$0xff]  ;;  %v4956_v39 = vpop.eup %4955 }
 0x2f3   :  { %993 = vmatmul.mubr.f32.gmra.mrb[130].mxu0 %v267_v63  ;;  %1554 = vmatmul.mubr.f32.gmra.mrb[130].mxu1 %v267_v63  ;;  %v2762_v18 = vmul.f32 %v4956_v39, %v2522_v33  ;;  %v1644_v39 = vmul.f32 0.0051020407, %v6781_v59  ;;  %v7209_v59 = vmul.f32 0.0051020407, %v6786_v44 }
 0x2fc   :  { %2079 = vadd.xlane.f32.xlu0 %v7008_v21  ;;  %v2443_v21 = vmax.f32 %v2363_v47, 0.0 }
 0x2fe   :  { %v2603_v37 = vadd.f32 0.001, %v2443_v21 }
 0x300   :  { %4957 = vrsqrt.f32 %v2603_v37 }
 0x30a   :  { %v4958_v23 = vpop.eup %4957 }
 0x30b   :  { %v2763_v14 = vmul.f32 %v4958_v23, %v2523_v4  ;;  %v2284_v23 = vmul.f32 %v1644_v39, %v1644_v39 }
 0x30c   :  { %2083 = vadd.xlane.f32.xlu1 %v7028_v60  ;;  %v2842_v60 = vmul.f32 %v2762_v18, %v1642_v46 }
 0x310   :  { %v7176_v32 = vpop.f32.mrb[116].mxu0 }
 0x311   :  { %10401 = vst [vmem:[#allocation123_spill] sm:$0xff] %v7176_v32  ;;  %v7178_v63 = vpop.f32.mrb[117].mxu0  ;;  %v1825_v47 = vmul.f32 %v7176_v32, %v7176_v32  ;;  %v2285_v32 = vmul.f32 %v7209_v59, %v7209_v59 }
 0x312   :  { %3013 = vrot.lane.b32.xlu0 %v2841_v2, %s5155_s17  ;;  %10402 = vst [vmem:[#allocation124_spill] sm:$0xff] %v7178_v63  ;;  %v1826_v21 = vmul.f32 %v7178_v63, %v7178_v63  ;;  %v270_v2 = vld [vmem:[%s10039_s2 + $0x428] sm:$0xff]  ;;  %v1936_v63 = vpop.xlane.xlu0 %1935 }
 0x313   :  { %4659 = vmatprep.mubr.msk.f32.mxu0 %vm297_vm1, %v270_v2  ;;  %4739 = vmatprep.mubr.msk.f32.mxu1 %vm297_vm1, %v270_v2  ;;  %v2205_v43 = vmul.f32 0.0051020407, %v1936_v63 }
 0x314   :  { %v2101_v46 = vsel %vm1083_vm0, %v1826_v21, 0.0  ;;  %999 = vmatmul.mubr.f32.gmra.mrb[132].mxu0 %v269_v40  ;;  %1559 = vmatmul.mubr.f32.gmra.mrb[132].mxu1 %v269_v40 }
 0x315   :  { %v7185_v37 = vadd.f32 %v2101_v46, %v1825_v47  ;;  %v2365_v44 = vsub.f32 %v2205_v43, %v2285_v32 }
 0x316   :  { %3376 = vperm.xlu0 %4827, %v2762_v18   ;;  %v1932_v18 = vpop.xlane.xlu1 %1931 }
 0x317   :  { %v2204_v47 = vmul.f32 0.0051020407, %v1932_v18  ;;  %v272_v18 = vld [vmem:[%s10039_s2 + $0x438] sm:$0xff] }
 0x318   :  { %v7196_v33 = vpop.f32.mrb[118].mxu0  ;;  %4660 = vmatprep.mubr.msk.f32.mxu0 %vm297_vm1, %v272_v18  ;;  %4740 = vmatprep.mubr.msk.f32.mxu1 %vm297_vm1, %v272_v18 }
 0x319   :  { %10403 = vst [vmem:[#allocation125_spill] sm:$0xff] %v7196_v33  ;;  %v1827_v62 = vmul.f32 %v7196_v33, %v7196_v33  ;;  %v2364_v2 = vsub.f32 %v2204_v47, %v2284_v23  ;;  %v7222_v23 = vpop.f32.mrb[108].mxu1 }
 0x31a   :  { %10405 = vst [vmem:[#allocation127_spill] sm:$0xff] %v7222_v23  ;;  %v1502_v47 = vpop.f32.mrb[109].mxu1 }
 0x31b   :  { %v2444_v40 = vmax.f32 %v2364_v2, 0.0  ;;  %v2524_v2 = vld [vmem:[%s10040_s3 + $0x78] sm:$0xff]  ;;  %v7229_v32 = vpop.f32.mrb[110].mxu1  ;;  %v273_v47 = vld [vmem:[%s10039_s2 + $0x440] sm:$0xff] }
 0x31c   :  { %10406 = vst [vmem:[#allocation128_spill] sm:$0xff] %v7229_v32 }
 0x31d   :  { %3015 = vrot.lane.b32.xlu1 %v2842_v60, %s5155_s17  ;;  %v7200_v60 = vpop.f32.mrb[119].mxu0  ;;  %v2604_v33 = vadd.f32 0.001, %v2444_v40 }
 0x31e   :  { %10404 = vst [vmem:[#allocation126_spill] sm:$0xff] %v7200_v60  ;;  %v1828_v4 = vmul.f32 %v7200_v60, %v7200_v60 }
 0x31f   :  { %4959 = vrsqrt.f32 %v2604_v33  ;;  %v1507_v33 = vpop.f32.mrb[111].mxu1 }
 0x320   :  { %v2105_v21 = vsel %vm1083_vm0, %v1828_v4, 0.0  ;;  %v2843_v4 = vmul.f32 %v2763_v14, %v7150_v1  ;;  %v2525_v1 = vld [vmem:[%s10040_s3 + $0x80] sm:$0xff] }
 0x321   :  { %3381 = vperm.xlu1 %4828, %v2763_v14   ;;  %v7205_v46 = vadd.f32 %v2105_v21, %v1827_v62  ;;  %v271_v62 = vld [vmem:[%s10039_s2 + $0x430] sm:$0xff] }
 0x322   :  { %1005 = vmatmul.mubr.f32.gmra.mrb[134].mxu0 %v271_v62  ;;  %1564 = vmatmul.mubr.f32.gmra.mrb[134].mxu1 %v271_v62 }
 0x329   :  { %v4960_v21 = vpop.eup %4959 }
 0x32a   :  { %v2764_v43 = vmul.f32 %v4960_v21, %v2524_v2  ;;  %v1646_v21 = vmul.f32 0.0051020407, %v6794_v52  ;;  %v7268_v52 = vmul.f32 0.0051020407, %v6801_v35 }
 0x335   :  { %2087 = vadd.xlane.f32.xlu0 %v7067_v16  ;;  %v2445_v16 = vmax.f32 %v2365_v44, 0.0 }
 0x337   :  { %v2605_v63 = vadd.f32 0.001, %v2445_v16 }
 0x339   :  { %4961 = vrsqrt.f32 %v2605_v63 }
 0x33c   :  { %v7235_v18 = vpop.f32.mrb[120].mxu0 }
 0x33d   :  { %10407 = vst [vmem:[#allocation129_spill] sm:$0xff] %v7235_v18  ;;  %v7237_v62 = vpop.f32.mrb[121].mxu0  ;;  %v1829_v44 = vmul.f32 %v7235_v18, %v7235_v18  ;;  %v2287_v18 = vmul.f32 %v7268_v52, %v7268_v52 }
 0x33e   :  { %10408 = vst [vmem:[#allocation130_spill] sm:$0xff] %v7237_v62  ;;  %v1830_v16 = vmul.f32 %v7237_v62, %v7237_v62  ;;  %v1944_v62 = vpop.xlane.xlu0 %1943 }
 0x33f   :  { %v2207_v60 = vmul.f32 0.0051020407, %v1944_v62 }
 0x341   :  { %v2367_v35 = vsub.f32 %v2207_v60, %v2287_v18 }
 0x343   :  { %v4962_v40 = vpop.eup %4961 }
 0x344   :  { %v2765_v14 = vmul.f32 %v4962_v40, %v2525_v1  ;;  %v2286_v40 = vmul.f32 %v1646_v21, %v1646_v21 }
 0x345   :  { %2091 = vadd.xlane.f32.xlu1 %v7087_v29  ;;  %v2844_v29 = vmul.f32 %v2764_v43, %v1644_v39  ;;  %v2109_v39 = vsel %vm1083_vm0, %v1830_v16, 0.0 }
 0x346   :  { %v7244_v63 = vadd.f32 %v2109_v39, %v1829_v44 }
 0x34b   :  { %3017 = vrot.lane.b32.xlu0 %v2843_v4, %s5155_s17  ;;  %v274_v4 = vld [vmem:[%s10039_s2 + $0x448] sm:$0xff] }
 0x34c   :  { %4661 = vmatprep.mubr.msk.f32.mxu0 %vm297_vm1, %v274_v4  ;;  %4741 = vmatprep.mubr.msk.f32.mxu1 %vm297_vm1, %v274_v4 }
 0x34d   :  { %1011 = vmatmul.mubr.f32.gmra.mrb[136].mxu0 %v273_v47  ;;  %1569 = vmatmul.mubr.f32.gmra.mrb[136].mxu1 %v273_v47 }
 0x34f   :  { %3386 = vperm.xlu0 %4827, %v2764_v43   ;;  %v1940_v43 = vpop.xlane.xlu1 %1939 }
 0x350   :  { %v2206_v44 = vmul.f32 0.0051020407, %v1940_v43  ;;  %v276_v43 = vld [vmem:[%s10039_s2 + $0x458] sm:$0xff] }
 0x351   :  { %4662 = vmatprep.mubr.msk.f32.mxu0 %vm297_vm1, %v276_v43  ;;  %4742 = vmatprep.mubr.msk.f32.mxu1 %vm297_vm1, %v276_v43 }
 0x352   :  { %v2366_v4 = vsub.f32 %v2206_v44, %v2286_v40  ;;  %v7281_v40 = vpop.f32.mrb[112].mxu1 }
 0x353   :  { %10411 = vst [vmem:[#allocation133_spill] sm:$0xff] %v7281_v40  ;;  %v1512_v44 = vpop.f32.mrb[113].mxu1 }
 0x354   :  { %v2446_v47 = vmax.f32 %v2366_v4, 0.0  ;;  %v2526_v4 = vld [vmem:[%s10040_s3 + $0x88] sm:$0xff]  ;;  %v7288_v18 = vpop.f32.mrb[114].mxu1  ;;  %v277_v44 = vld [vmem:[%s10039_s2 + $0x460] sm:$0xff] }
 0x355   :  { %10412 = vst [vmem:[#allocation134_spill] sm:$0xff] %v7288_v18 }
 0x356   :  { %3019 = vrot.lane.b32.xlu1 %v2844_v29, %s5155_s17 }
 0x358   :  { %v7255_v2 = vpop.f32.mrb[122].mxu0 }
 0x359   :  { %10409 = vst [vmem:[#allocation131_spill] sm:$0xff] %v7255_v2  ;;  %v1831_v33 = vmul.f32 %v7255_v2, %v7255_v2  ;;  %v7259_v29 = vpop.f32.mrb[123].mxu0  ;;  %v2606_v2 = vadd.f32 0.001, %v2446_v47 }
 0x35a   :  { %3391 = vperm.xlu1 %4828, %v2765_v14   ;;  %10410 = vst [vmem:[#allocation132_spill] sm:$0xff] %v7259_v29  ;;  %v1832_v1 = vmul.f32 %v7259_v29, %v7259_v29 }
 0x35b   :  { %4963 = vrsqrt.f32 %v2606_v2  ;;  %v1517_v2 = vpop.f32.mrb[115].mxu1 }
 0x35c   :  { %v2113_v16 = vsel %vm1083_vm0, %v1832_v1, 0.0  ;;  %v2845_v1 = vmul.f32 %v2765_v14, %v7209_v59  ;;  %v2527_v59 = vld [vmem:[%s10040_s3 + $0x90] sm:$0xff] }
 0x35d   :  { %v7264_v39 = vadd.f32 %v2113_v16, %v1831_v33  ;;  %v275_v33 = vld [vmem:[%s10039_s2 + $0x450] sm:$0xff] }
 0x35e   :  { %1017 = vmatmul.mubr.f32.gmra.mrb[138].mxu0 %v275_v33  ;;  %1574 = vmatmul.mubr.f32.gmra.mrb[138].mxu1 %v275_v33 }
 0x365   :  { %v4964_v16 = vpop.eup %4963 }
 0x366   :  { %v2766_v60 = vmul.f32 %v4964_v16, %v2526_v4  ;;  %v1648_v16 = vmul.f32 0.0051020407, %v6806_v42  ;;  %v7327_v42 = vmul.f32 0.0051020407, %v6811_v0  ;;  %v279_v0 = vld [vmem:[%s10039_s2 + $0x470] sm:$0xff] }
 0x36e   :  { %2095 = vadd.xlane.f32.xlu0 %v7126_v48  ;;  %v2447_v48 = vmax.f32 %v2367_v35, 0.0 }
 0x370   :  { %v2607_v62 = vadd.f32 0.001, %v2447_v48 }
 0x372   :  { %4965 = vrsqrt.f32 %v2607_v62 }
 0x375   :  { %v7294_v43 = vpop.f32.mrb[124].mxu0 }
 0x376   :  { %10413 = vst [vmem:[#allocation135_spill] sm:$0xff] %v7294_v43  ;;  %v7296_v33 = vpop.f32.mrb[125].mxu0  ;;  %v1833_v35 = vmul.f32 %v7294_v43, %v7294_v43  ;;  %v2289_v43 = vmul.f32 %v7327_v42, %v7327_v42 }
 0x377   :  { %10414 = vst [vmem:[#allocation136_spill] sm:$0xff] %v7296_v33  ;;  %v1834_v48 = vmul.f32 %v7296_v33, %v7296_v33  ;;  %v1952_v33 = vpop.xlane.xlu0 %1951 }
 0x378   :  { %v2209_v29 = vmul.f32 0.0051020407, %v1952_v33 }
 0x37a   :  { %v2369_v18 = vsub.f32 %v2209_v29, %v2289_v43  ;;  %v7340_v29 = vpop.f32.mrb[116].mxu1 }
 0x37b   :  { %10417 = vst [vmem:[#allocation139_spill] sm:$0xff] %v7340_v29  ;;  %v1522_v33 = vpop.f32.mrb[117].mxu1 }
 0x37c   :  { %v4966_v47 = vpop.eup %4965  ;;  %v1650_v33 = vmul.f32 0.0051020407, %v6821_v53  ;;  %v7386_v53 = vmul.f32 0.0051020407, %v6824_v54  ;;  %v283_v54 = vld [vmem:[%s10039_s2 + $0x490] sm:$0xff] }
 0x37d   :  { %v2767_v14 = vmul.f32 %v4966_v47, %v2527_v59  ;;  %v2288_v47 = vmul.f32 %v1648_v16, %v1648_v16 }
 0x37e   :  { %2099 = vadd.xlane.f32.xlu1 %v7146_v6  ;;  %v2846_v6 = vmul.f32 %v2766_v60, %v1646_v21  ;;  %v2117_v21 = vsel %vm1083_vm0, %v1834_v48, 0.0 }
 0x37f   :  { %v7303_v62 = vadd.f32 %v2117_v21, %v1833_v35  ;;  %v2847_v43 = vmul.f32 %v2767_v14, %v7268_v52  ;;  %v2529_v52 = vld [vmem:[%s10040_s3 + $0xa0] sm:$0xff] }
 0x384   :  { %3021 = vrot.lane.b32.xlu0 %v2845_v1, %s5155_s17  ;;  %v278_v1 = vld [vmem:[%s10039_s2 + $0x468] sm:$0xff] }
 0x385   :  { %4663 = vmatprep.mubr.msk.f32.mxu0 %vm297_vm1, %v278_v1  ;;  %4743 = vmatprep.mubr.msk.f32.mxu1 %vm297_vm1, %v278_v1 }
 0x386   :  { %1023 = vmatmul.mubr.f32.gmra.mrb[140].mxu0 %v277_v44  ;;  %1579 = vmatmul.mubr.f32.gmra.mrb[140].mxu1 %v277_v44 }
 0x388   :  { %3396 = vperm.xlu0 %4827, %v2766_v60   ;;  %v1948_v60 = vpop.xlane.xlu1 %1947 }
 0x389   :  { %v2208_v35 = vmul.f32 0.0051020407, %v1948_v60  ;;  %v280_v60 = vld [vmem:[%s10039_s2 + $0x478] sm:$0xff] }
 0x38a   :  { %4664 = vmatprep.mubr.msk.f32.mxu0 %vm297_vm1, %v280_v60  ;;  %4744 = vmatprep.mubr.msk.f32.mxu1 %vm297_vm1, %v280_v60 }
 0x38b   :  { %v2368_v1 = vsub.f32 %v2208_v35, %v2288_v47  ;;  %1029 = vmatmul.mubr.f32.gmra.mrb[142].mxu0 %v279_v0  ;;  %1584 = vmatmul.mubr.f32.gmra.mrb[142].mxu1 %v279_v0 }
 0x38d   :  { %v2448_v44 = vmax.f32 %v2368_v1, 0.0 }
 0x38e   :  { %v7314_v4 = vpop.f32.mrb[126].mxu0 }
 0x38f   :  { %3023 = vrot.lane.b32.xlu1 %v2846_v6, %s5155_s17  ;;  %10415 = vst [vmem:[#allocation137_spill] sm:$0xff] %v7314_v4  ;;  %v1835_v2 = vmul.f32 %v7314_v4, %v7314_v4  ;;  %v7318_v6 = vpop.f32.mrb[127].mxu0  ;;  %v2608_v4 = vadd.f32 0.001, %v2448_v44 }
 0x390   :  { %10416 = vst [vmem:[#allocation138_spill] sm:$0xff] %v7318_v6  ;;  %v1836_v59 = vmul.f32 %v7318_v6, %v7318_v6 }
 0x391   :  { %4967 = vrsqrt.f32 %v2608_v4 }
 0x392   :  { %v2121_v48 = vsel %vm1083_vm0, %v1836_v59, 0.0  ;;  %v7347_v59 = vpop.f32.mrb[118].mxu1 }
 0x393   :  { %3401 = vperm.xlu1 %4828, %v2767_v14   ;;  %v7323_v21 = vadd.f32 %v2121_v48, %v1835_v2  ;;  %v2449_v2 = vmax.f32 %v2369_v18, 0.0  ;;  %v2528_v18 = vld [vmem:[%s10040_s3 + $0x98] sm:$0xff]  ;;  %10418 = vst [vmem:[#allocation140_spill] sm:$0xff] %v7347_v59  ;;  %v1527_v35 = vpop.f32.mrb[119].mxu1 }
 0x39b   :  { %v4968_v4 = vpop.eup %4967 }
 0x39c   :  { %v2768_v47 = vmul.f32 %v4968_v4, %v2528_v18  ;;  %v1956_v18 = vpop.xlane.xlu1 %1955 }
 0x3a7   :  { %2103 = vadd.xlane.f32.xlu0 %v7185_v37  ;;  %v2609_v37 = vadd.f32 0.001, %v2449_v2 }
 0x3a9   :  { %4969 = vrsqrt.f32 %v2609_v37  ;;  %v282_v37 = vld [vmem:[%s10039_s2 + $0x488] sm:$0xff] }
 0x3aa   :  { %4665 = vmatprep.mubr.msk.f32.mxu0 %vm297_vm1, %v282_v37  ;;  %4745 = vmatprep.mubr.msk.f32.mxu1 %vm297_vm1, %v282_v37 }
 0x3ae   :  { %v7353_v1 = vpop.f32.mrb[128].mxu0 }
 0x3af   :  { %10419 = vst [vmem:[#allocation141_spill] sm:$0xff] %v7353_v1  ;;  %v7355_v44 = vpop.f32.mrb[129].mxu0  ;;  %v1837_v60 = vmul.f32 %v7353_v1, %v7353_v1 }
 0x3b0   :  { %10420 = vst [vmem:[#allocation142_spill] sm:$0xff] %v7355_v44  ;;  %v1838_v2 = vmul.f32 %v7355_v44, %v7355_v44  ;;  %v2291_v44 = vmul.f32 %v7386_v53, %v7386_v53 }
 0x3b3   :  { %v4970_v48 = vpop.eup %4969 }
 0x3b4   :  { %v2769_v14 = vmul.f32 %v4970_v48, %v2529_v52  ;;  %v2210_v52 = vmul.f32 0.0051020407, %v1956_v18 }
 0x3b7   :  { %2107 = vadd.xlane.f32.xlu1 %v7205_v46  ;;  %v2848_v46 = vmul.f32 %v2768_v47, %v1648_v16  ;;  %v2125_v16 = vsel %vm1083_vm0, %v1838_v2, 0.0 }
 0x3b8   :  { %v7362_v0 = vadd.f32 %v2125_v16, %v1837_v60 }
 0x3bd   :  { %3025 = vrot.lane.b32.xlu0 %v2847_v43, %s5155_s17  ;;  %v281_v43 = vld [vmem:[%s10039_s2 + $0x480] sm:$0xff] }
 0x3be   :  { %1035 = vmatmul.mubr.f32.gmra.mrb[144].mxu0 %v281_v43  ;;  %1589 = vmatmul.mubr.f32.gmra.mrb[144].mxu1 %v281_v43  ;;  %v1960_v43 = vpop.xlane.xlu0 %1959 }
 0x3c1   :  { %3406 = vperm.xlu0 %4827, %v2768_v47  }
 0x3c6   :  { %v7373_v4 = vpop.f32.mrb[130].mxu0 }
 0x3c7   :  { %10421 = vst [vmem:[#allocation143_spill] sm:$0xff] %v7373_v4  ;;  %v1839_v47 = vmul.f32 %v7373_v4, %v7373_v4  ;;  %v7377_v35 = vpop.f32.mrb[131].mxu0  ;;  %v2211_v4 = vmul.f32 0.0051020407, %v1960_v43 }
 0x3c8   :  { %3027 = vrot.lane.b32.xlu1 %v2848_v46, %s5155_s17  ;;  %10422 = vst [vmem:[#allocation144_spill] sm:$0xff] %v7377_v35  ;;  %v2290_v46 = vmul.f32 %v1650_v33, %v1650_v33  ;;  %v1840_v48 = vmul.f32 %v7377_v35, %v7377_v35 }
 0x3c9   :  { %v2371_v6 = vsub.f32 %v2211_v4, %v2291_v44  ;;  %v2530_v44 = vld [vmem:[%s10040_s3 + $0xa8] sm:$0xff] }
 0x3ca   :  { %v2129_v60 = vsel %vm1083_vm0, %v1840_v48, 0.0  ;;  %v2370_v16 = vsub.f32 %v2210_v52, %v2290_v46  ;;  %v7398_v46 = vpop.f32.mrb[120].mxu1 }
 0x3cb   :  { %v7382_v2 = vadd.f32 %v2129_v60, %v1839_v47  ;;  %v2451_v18 = vmax.f32 %v2371_v6, 0.0  ;;  %10423 = vst [vmem:[#allocation145_spill] sm:$0xff] %v7398_v46  ;;  %v1532_v6 = vpop.f32.mrb[121].mxu1 }
 0x3cc   :  { %3411 = vperm.xlu1 %4828, %v2769_v14   ;;  %v2450_v37 = vmax.f32 %v2370_v16, 0.0  ;;  %v7406_v48 = vpop.f32.mrb[122].mxu1  ;;  %v1652_v6 = vmul.f32 0.0051020407, %v6826_v36  ;;  %v7445_v36 = vmul.f32 0.0051020407, %v6831_v8 }
 0x3cd   :  { %v2611_v47 = vadd.f32 0.001, %v2451_v18  ;;  %10424 = vst [vmem:[#allocation146_spill] sm:$0xff] %v7406_v48  ;;  %v1537_v52 = vpop.f32.mrb[123].mxu1 }
 0x3ce   :  { %v2610_v1 = vadd.f32 0.001, %v2450_v37 }
 0x3d0   :  { %4971 = vrsqrt.f32 %v2610_v1  ;;  %v2849_v1 = vmul.f32 %v2769_v14, %v7327_v42  ;;  %v2531_v42 = vld [vmem:[%s10040_s3 + $0xb0] sm:$0xff] }
 0x3d1   :  { %4973 = vrsqrt.f32 %v2611_v47 }
 0x3e0   :  { %2111 = vadd.xlane.f32.xlu0 %v7244_v63  ;;  %v284_v63 = vld [vmem:[%s10039_s2 + $0x498] sm:$0xff] }
 0x3e1   :  { %4666 = vmatprep.mubr.msk.f32.mxu0 %vm297_vm1, %v284_v63  ;;  %4746 = vmatprep.mubr.msk.f32.mxu1 %vm297_vm1, %v284_v63 }
 0x3e2   :  { %1041 = vmatmul.mubr.f32.gmra.mrb[146].mxu0 %v283_v54  ;;  %1594 = vmatmul.mubr.f32.gmra.mrb[146].mxu1 %v283_v54  ;;  %v286_v54 = vld [vmem:[%s10039_s2 + $0x4a8] sm:$0xff] }
 0x3e3   :  { %4667 = vmatprep.mubr.msk.f32.mxu0 %vm297_vm1, %v286_v54  ;;  %4747 = vmatprep.mubr.msk.f32.mxu1 %vm297_vm1, %v286_v54 }
 0x3e7   :  { %v7412_v37 = vpop.f32.mrb[132].mxu0 }
 0x3e8   :  { %10425 = vst [vmem:[#allocation147_spill] sm:$0xff] %v7412_v37  ;;  %v7414_v43 = vpop.f32.mrb[133].mxu0  ;;  %v1841_v18 = vmul.f32 %v7412_v37, %v7412_v37 }
 0x3e9   :  { %10426 = vst [vmem:[#allocation148_spill] sm:$0xff] %v7414_v43  ;;  %v1842_v47 = vmul.f32 %v7414_v43, %v7414_v43  ;;  %v2293_v43 = vmul.f32 %v7445_v36, %v7445_v36 }
 0x3f0   :  { %2115 = vadd.xlane.f32.xlu1 %v7264_v39  ;;  %v4972_v39 = vpop.eup %4971 }
 0x3f1   :  { %v2770_v4 = vmul.f32 %v4972_v39, %v2530_v44  ;;  %v4974_v16 = vpop.eup %4973  ;;  %v1964_v44 = vpop.xlane.xlu1 %1963 }
 0x3f2   :  { %v2771_v14 = vmul.f32 %v4974_v16, %v2531_v42  ;;  %v2212_v42 = vmul.f32 0.0051020407, %v1964_v44 }
 0x3f3   :  { %v2850_v60 = vmul.f32 %v2770_v4, %v1650_v33  ;;  %v2133_v33 = vsel %vm1083_vm0, %v1842_v47, 0.0 }
 0x3f4   :  { %v7421_v63 = vadd.f32 %v2133_v33, %v1841_v18 }
 0x3f5   :  { %v7432_v39 = vpop.f32.mrb[134].mxu0 }
 0x3f6   :  { %3029 = vrot.lane.b32.xlu0 %v2849_v1, %s5155_s17  ;;  %v285_v1 = vld [vmem:[%s10039_s2 + $0x4a0] sm:$0xff]  ;;  %10427 = vst [vmem:[#allocation149_spill] sm:$0xff] %v7432_v39  ;;  %v7436_v52 = vpop.f32.mrb[135].mxu0 }
 0x3f7   :  { %1047 = vmatmul.mubr.f32.gmra.mrb[148].mxu0 %v285_v1  ;;  %1599 = vmatmul.mubr.f32.gmra.mrb[148].mxu1 %v285_v1  ;;  %10428 = vst [vmem:[#allocation150_spill] sm:$0xff] %v7436_v52  ;;  %v1844_v16 = vmul.f32 %v7436_v52, %v7436_v52  ;;  %v1968_v1 = vpop.xlane.xlu0 %1967 }
 0x3f9   :  { %v2137_v18 = vsel %vm1083_vm0, %v1844_v16, 0.0  ;;  %v7450_v16 = vpop.f32.mrb[124].mxu1 }
 0x3fa   :  { %3416 = vperm.xlu0 %4827, %v2770_v4   ;;  %v1843_v4 = vmul.f32 %v7432_v39, %v7432_v39  ;;  %v2213_v39 = vmul.f32 0.0051020407, %v1968_v1  ;;  %10429 = vst [vmem:[#allocation151_spill] sm:$0xff] %v7450_v16 }
 0x3fc   :  { %v7441_v47 = vadd.f32 %v2137_v18, %v1843_v4  ;;  %v2373_v35 = vsub.f32 %v2213_v39, %v2293_v43  ;;  %v2533_v18 = vld [vmem:[%s10040_s3 + $0xc0] sm:$0xff] }
 0x3fe   :  { %v2453_v44 = vmax.f32 %v2373_v35, 0.0  ;;  %v288_v35 = vld [vmem:[%s10039_s2 + $0x4b8] sm:$0xff] }
 0x3ff   :  { %4668 = vmatprep.mubr.msk.f32.mxu0 %vm297_vm1, %v288_v35  ;;  %4748 = vmatprep.mubr.msk.f32.mxu1 %vm297_vm1, %v288_v35 }
 0x400   :  { %v2613_v4 = vadd.f32 0.001, %v2453_v44 }
 0x401   :  { %3031 = vrot.lane.b32.xlu1 %v2850_v60, %s5155_s17  ;;  %v2292_v60 = vmul.f32 %v1652_v6, %v1652_v6 }
 0x403   :  { %v2372_v33 = vsub.f32 %v2212_v42, %v2292_v60  ;;  %v1542_v60 = vpop.f32.mrb[125].mxu1  ;;  %v2532_v42 = vld [vmem:[%s10040_s3 + $0xb8] sm:$0xff] }
 0x404   :  { %v1654_v60 = vmul.f32 0.0051020407, %v6833_v49  ;;  %v7496_v49 = vmul.f32 0.0051020407, %v6837_v41 }
 0x405   :  { %3421 = vperm.xlu1 %4828, %v2771_v14   ;;  %v2452_v54 = vmax.f32 %v2372_v33, 0.0 }
 0x406   :  { %v2295_v41 = vmul.f32 %v7496_v49, %v7496_v49 }
 0x407   :  { %v2612_v37 = vadd.f32 0.001, %v2452_v54 }
 0x409   :  { %4975 = vrsqrt.f32 %v2612_v37 }
 0x40a   :  { %4977 = vrsqrt.f32 %v2613_v4 }
 0x413   :  { %v4976_v8 = vpop.eup %4975 }
 0x414   :  { %v4978_v39 = vpop.eup %4977 }
 0x415   :  { %v2773_v33 = vmul.f32 %v4978_v39, %v2533_v18 }
 0x419   :  { %2119 = vadd.xlane.f32.xlu0 %v7303_v62  ;;  %v2851_v62 = vmul.f32 %v2771_v14, %v7386_v53  ;;  %v2772_v53 = vmul.f32 %v4976_v8, %v2532_v42  ;;  %v7465_v14 = vpop.f32.mrb[126].mxu1  ;;  %v1972_v42 = vpop.xlane.xlu1 %1971 }
 0x41a   :  { %10430 = vst [vmem:[#allocation152_spill] sm:$0xff] %v7465_v14  ;;  %v1547_v37 = vpop.f32.mrb[127].mxu1 }
 0x41b   :  { %v2852_v43 = vmul.f32 %v2772_v53, %v1652_v6 }
 0x420   :  { %v7471_v54 = vpop.f32.mrb[136].mxu0 }
 0x421   :  { %10431 = vst [vmem:[#allocation153_spill] sm:$0xff] %v7471_v54  ;;  %v7473_v1 = vpop.f32.mrb[137].mxu0  ;;  %v1845_v44 = vmul.f32 %v7471_v54, %v7471_v54 }
 0x422   :  { %10432 = vst [vmem:[#allocation154_spill] sm:$0xff] %v7473_v1  ;;  %v1846_v4 = vmul.f32 %v7473_v1, %v7473_v1 }
 0x424   :  { %v2141_v6 = vsel %vm1083_vm0, %v1846_v4, 0.0  ;;  %v290_v4 = vld [vmem:[%s10039_s2 + $0x4c8] sm:$0xff] }
 0x429   :  { %2123 = vadd.xlane.f32.xlu1 %v7323_v21  ;;  %v287_v21 = vld [vmem:[%s10039_s2 + $0x4b0] sm:$0xff] }
 0x42a   :  { %1053 = vmatmul.mubr.f32.gmra.mrb[150].mxu0 %v287_v21  ;;  %1604 = vmatmul.mubr.f32.gmra.mrb[150].mxu1 %v287_v21 }
 0x42b   :  { %4669 = vmatprep.mubr.msk.f32.mxu0 %vm297_vm1, %v290_v4  ;;  %4749 = vmatprep.mubr.msk.f32.mxu1 %vm297_vm1, %v290_v4 }
 0x42f   :  { %3033 = vrot.lane.b32.xlu0 %v2851_v62, %s5155_s17  ;;  %v7480_v62 = vadd.f32 %v2141_v6, %v1845_v44  ;;  %v289_v6 = vld [vmem:[%s10039_s2 + $0x4c0] sm:$0xff] }
 0x430   :  { %1059 = vmatmul.mubr.f32.gmra.mrb[152].mxu0 %v289_v6  ;;  %1609 = vmatmul.mubr.f32.gmra.mrb[152].mxu1 %v289_v6  ;;  %v7515_v6 = vpop.f32.mrb[128].mxu1 }
 0x431   :  { %v7483_v8 = vpop.f32.mrb[138].mxu0  ;;  %10435 = vst [vmem:[#allocation157_spill] sm:$0xff] %v7515_v6 }
 0x432   :  { %10433 = vst [vmem:[#allocation155_spill] sm:$0xff] %v7483_v8  ;;  %v1847_v35 = vmul.f32 %v7483_v8, %v7483_v8  ;;  %v7487_v21 = vpop.f32.mrb[139].mxu0  ;;  %v1552_v8 = vpop.f32.mrb[129].mxu1 }
 0x433   :  { %3426 = vperm.xlu0 %4827, %v2772_v53   ;;  %10434 = vst [vmem:[#allocation156_spill] sm:$0xff] %v7487_v21  ;;  %v2294_v53 = vmul.f32 %v1654_v60, %v1654_v60  ;;  %v1848_v37 = vmul.f32 %v7487_v21, %v7487_v21  ;;  %v2853_v21 = vmul.f32 %v2773_v33, %v7445_v36  ;;  %v7530_v36 = vpop.f32.mrb[130].mxu1 }
 0x434   :  { %10436 = vst [vmem:[#allocation158_spill] sm:$0xff] %v7530_v36  ;;  %v1557_v8 = vpop.f32.mrb[131].mxu1 }
 0x435   :  { %v2145_v39 = vsel %vm1083_vm0, %v1848_v37, 0.0 }
 0x436   :  { %v7492_v18 = vadd.f32 %v2145_v39, %v1847_v35  ;;  %v1980_v35 = vpop.xlane.xlu1 %1979 }
 0x437   :  { %v2216_v14 = vmul.f32 0.0051020407, %v1980_v35 }
 0x43a   :  { %3035 = vrot.lane.b32.xlu1 %v2852_v43, %s5155_s17  ;;  %v2214_v43 = vmul.f32 0.0051020407, %v1972_v42  ;;  %v1976_v42 = vpop.xlane.xlu0 %1975 }
 0x43c   :  { %v2374_v44 = vsub.f32 %v2214_v43, %v2294_v53  ;;  %v2215_v53 = vmul.f32 0.0051020407, %v1976_v42  ;;  %v7508_v43 = vpop.xlane.xlu1 %1987  ;;  %v2534_v42 = vld [vmem:[%s10040_s3 + $0xc8] sm:$0xff] }
 0x43d   :  { %v2218_v50 = vmul.f32 0.0051020407, %v7508_v43 }
 0x43e   :  { %3431 = vperm.xlu1 %4828, %v2773_v33   ;;  %v2454_v1 = vmax.f32 %v2374_v44, 0.0  ;;  %v2375_v37 = vsub.f32 %v2215_v53, %v2295_v41  ;;  %v291_v33 = vld [vmem:[%s10039_s2 + $0x4d0] sm:$0xff] }
 0x440   :  { %v2455_v39 = vmax.f32 %v2375_v37, 0.0  ;;  %v7510_v54 = vpop.xlane.xlu1 %1995 }
 0x442   :  { %v2615_v44 = vadd.f32 0.001, %v2455_v39 }
 0x444   :  { %v7513_v4 = vpop.xlane.xlu1 %2003 }
 0x448   :  { %v7522_v41 = vpop.xlane.xlu1 %2011 }
 0x44c   :  { %v7527_v53 = vpop.xlane.xlu1 %2019 }
 0x452   :  { %2127 = vadd.xlane.f32.xlu0 %v7362_v0  ;;  %v2614_v0 = vadd.f32 0.001, %v2454_v1 }
 0x454   :  { %4979 = vrsqrt.f32 %v2614_v0 }
 0x455   :  { %4981 = vrsqrt.f32 %v2615_v44  ;;  %v2535_v44 = vld [vmem:[%s10040_s3 + $0xd0] sm:$0xff] }
 0x459   :  { %v7544_v52 = vpop.f32.mrb[140].mxu0 }
 0x45a   :  { %10437 = vst [vmem:[#allocation159_spill] sm:$0xff] %v7544_v52 }
 0x45e   :  { %v4980_v1 = vpop.eup %4979 }
 0x45f   :  { %v2774_v0 = vmul.f32 %v4980_v1, %v2534_v42  ;;  %v4982_v39 = vpop.eup %4981 }
 0x460   :  { %v2775_v42 = vmul.f32 %v4982_v39, %v2535_v44  ;;  %v1656_v39 = vmul.f32 0.0051020407, %v6843_v20  ;;  %v7574_v20 = vmul.f32 0.0051020407, %v6854_v51  ;;  %v293_v51 = vld [vmem:[%s10039_s2 + $0x4e0] sm:$0xff] }
 0x461   :  { %v2854_v37 = vmul.f32 %v2774_v0, %v1654_v60 }
 0x462   :  { %2131 = vadd.xlane.f32.xlu1 %v7382_v2  ;;  %v292_v2 = vld [vmem:[%s10039_s2 + $0x4d8] sm:$0xff]  ;;  %v2296_v44 = vmul.f32 %v1656_v39, %v1656_v39  ;;  %v2855_v40 = vmul.f32 %v2775_v42, %v7496_v49 }
 0x463   :  { %4670 = vmatprep.mubr.msk.f32.mxu0 %vm297_vm1, %v292_v2  ;;  %4750 = vmatprep.mubr.msk.f32.mxu1 %vm297_vm1, %v292_v2  ;;  %v7546_v2 = vpop.f32.mrb[141].mxu0 }
 0x464   :  { %1065 = vmatmul.mubr.f32.gmra.mrb[154].mxu0 %v291_v33  ;;  %1614 = vmatmul.mubr.f32.gmra.mrb[154].mxu1 %v291_v33  ;;  %10438 = vst [vmem:[#allocation160_spill] sm:$0xff] %v7546_v2  ;;  %v1849_v33 = vmul.f32 %v7544_v52, %v7544_v52  ;;  %v1850_v60 = vmul.f32 %v7546_v2, %v7546_v2  ;;  %v7562_v16 = vpop.f32.mrb[142].mxu0 }
 0x465   :  { %10439 = vst [vmem:[#allocation161_spill] sm:$0xff] %v7562_v16  ;;  %v2376_v52 = vsub.f32 %v2216_v14, %v2296_v44  ;;  %v1851_v2 = vmul.f32 %v7562_v16, %v7562_v16  ;;  %v7566_v48 = vpop.f32.mrb[143].mxu0  ;;  %v1984_v14 = vpop.xlane.xlu0 %1983  ;;  %v2297_v44 = vmul.f32 %v7574_v20, %v7574_v20 }
 0x466   :  { %10440 = vst [vmem:[#allocation162_spill] sm:$0xff] %v7566_v48 }
 0x468   :  { %3037 = vrot.lane.b32.xlu0 %v2853_v21, %s5155_s17  ;;  %v7536_v21 = vpop.xlane.xlu1 %2027 }
 0x46c   :  { %3436 = vperm.xlu0 %4827, %v2774_v0   ;;  %v7542_v1 = vpop.xlane.xlu1 %2035  ;;  %v2149_v0 = vsel %vm1083_vm0, %v1850_v60, 0.0 }
 0x46d   :  { %v7555_v36 = vadd.f32 %v2149_v0, %v1849_v33  ;;  %v1852_v33 = vmul.f32 %v7566_v48, %v7566_v48  ;;  %v2456_v0 = vmax.f32 %v2376_v52, 0.0  ;;  %v2217_v48 = vmul.f32 0.0051020407, %v1984_v14  ;;  %v7596_v14 = vpop.f32.mrb[132].mxu1 }
 0x46e   :  { %10441 = vst [vmem:[#allocation163_spill] sm:$0xff] %v7596_v14  ;;  %v1562_v29 = vpop.f32.mrb[133].mxu1 }
 0x46f   :  { %v2153_v35 = vsel %vm1083_vm0, %v1852_v33, 0.0  ;;  %v2616_v59 = vadd.f32 0.001, %v2456_v0  ;;  %v2377_v52 = vsub.f32 %v2217_v48, %v2297_v44  ;;  %v296_v29 = vld [vmem:[%s10039_s2 + $0x4f8] sm:$0xff] }
 0x470   :  { %v7553_v8 = vpop.permute.xlu1 %3316  ;;  %v7577_v46 = vadd.f32 %v2153_v35, %v1851_v2 }
 0x471   :  { %4983 = vrsqrt.f32 %v2616_v59  ;;  %v2457_v33 = vmax.f32 %v2377_v52, 0.0  ;;  %v1992_v52 = vpop.xlane.xlu0 %1991 }
 0x472   :  { %v2219_v58 = vmul.f32 0.0051020407, %v1992_v52  ;;  %v2538_v52 = vld [vmem:[%s10040_s3 + $0xe8] sm:$0xff] }
 0x473   :  { %3039 = vrot.lane.b32.xlu1 %v2854_v37, %s5155_s17  ;;  %v2617_v35 = vadd.f32 0.001, %v2457_v33 }
 0x474   :  { %v7557_v37 = vpop.permute.xlu1 %2991 }
 0x475   :  { %4985 = vrsqrt.f32 %v2617_v35  ;;  %v7623_v35 = vpop.xlane.xlu0 %1999 }
 0x477   :  { %3441 = vperm.xlu1 %4828, %v2775_v42   ;;  %v295_v42 = vld [vmem:[%s10039_s2 + $0x4f0] sm:$0xff] }
 0x478   :  { %v7560_v6 = vpop.permute.xlu1 %3321 }
 0x47b   :  { %v4984_v32 = vpop.eup %4983 }
 0x47c   :  { %v7568_v60 = vpop.xlane.xlu1 %2043 }
 0x480   :  { %v7581_v16 = vpop.permute.xlu1 %2993 }
 0x484   :  { %v7591_v2 = vpop.permute.xlu1 %2995 }
 0x488   :  { %v7594_v0 = vpop.permute.xlu1 %3331 }
 0x48b   :  { %2135 = vadd.xlane.f32.xlu0 %v7421_v63  ;;  %v294_v63 = vld [vmem:[%s10039_s2 + $0x4e8] sm:$0xff] }
 0x48c   :  { %4671 = vmatprep.mubr.msk.f32.mxu0 %vm297_vm1, %v294_v63  ;;  %4751 = vmatprep.mubr.msk.f32.mxu1 %vm297_vm1, %v294_v63  ;;  %v2536_v63 = vld [vmem:[%s10040_s3 + $0xd8] sm:$0xff]  ;;  %v7602_v59 = vpop.xlane.xlu1 %2051 }
 0x48d   :  { %1071 = vmatmul.mubr.f32.gmra.mrb[156].mxu0 %v293_v51  ;;  %1619 = vmatmul.mubr.f32.gmra.mrb[156].mxu1 %v293_v51  ;;  %10442 = vst [vmem:[#allocation164_spill] sm:$0xff] %v7602_v59  ;;  %v2776_v48 = vmul.f32 %v4984_v32, %v2536_v63  ;;  %v4986_v32 = vpop.eup %4985 }
 0x48e   :  { %4672 = vmatprep.mubr.msk.f32.mxu0 %vm297_vm1, %v296_v29  ;;  %4752 = vmatprep.mubr.msk.f32.mxu1 %vm297_vm1, %v296_v29 }
 0x48f   :  { %v2856_v49 = vmul.f32 %v2776_v48, %v1656_v39 }
 0x490   :  { %v7607_v44 = vpop.permute.xlu1 %2999 }
 0x491   :  { %1077 = vmatmul.mubr.f32.gmra.mrb[158].mxu0 %v295_v42  ;;  %1624 = vmatmul.mubr.f32.gmra.mrb[158].mxu1 %v295_v42 }
 0x494   :  { %v7621_v33 = vpop.permute.xlu1 %3341 }
 0x495   :  { %10444 = vst [vmem:[#allocation166_spill] sm:$0xff] %v7621_v33 }
 0x498   :  { %v7625_v63 = vpop.xlane.xlu1 %2059 }
 0x499   :  { %10445 = vst [vmem:[#allocation167_spill] sm:$0xff] %v7625_v63 }
 0x49b   :  { %2139 = vadd.xlane.f32.xlu1 %v7441_v47  ;;  %v7605_v47 = vpop.f32.mrb[134].mxu1 }
 0x49c   :  { %10443 = vst [vmem:[#allocation165_spill] sm:$0xff] %v7605_v47  ;;  %v1567_v51 = vpop.f32.mrb[135].mxu1  ;;  %v7635_v47 = vpop.xlane.xlu0 %2007 }
 0x49d   :  { %v7641_v14 = vpop.permute.xlu1 %3003 }
 0x4a0   :  { %v7643_v23 = vpop.xlane.xlu0 %2015 }
 0x4a1   :  { %3041 = vrot.lane.b32.xlu0 %v2855_v40, %s5155_s17  ;;  %v2537_v40 = vld [vmem:[%s10040_s3 + $0xe0] sm:$0xff]  ;;  %v7648_v28 = vpop.permute.xlu1 %3351 }
 0x4a2   :  { %v2777_v39 = vmul.f32 %v4986_v32, %v2537_v40  ;;  %10448 = vst [vmem:[#allocation170_spill] sm:$0xff] %v7648_v28 }
 0x4a4   :  { %v7646_v33 = vpop.xlane.xlu0 %2023 }
 0x4a5   :  { %3446 = vperm.xlu0 %4827, %v2776_v48   ;;  %v7627_v48 = vpop.f32.mrb[144].mxu0 }
 0x4a6   :  { %10446 = vst [vmem:[#allocation168_spill] sm:$0xff] %v7627_v48  ;;  %v1853_v51 = vmul.f32 %v7627_v48, %v7627_v48  ;;  %v7631_v29 = vpop.f32.mrb[145].mxu0  ;;  %v1658_v48 = vmul.f32 0.0051020407, %v6861_v57 }
 0x4a7   :  { %10447 = vst [vmem:[#allocation169_spill] sm:$0xff] %v7631_v29  ;;  %v1854_v42 = vmul.f32 %v7631_v29, %v7631_v29 }
 0x4a8   :  { %v2298_v29 = vmul.f32 %v1658_v48, %v1658_v48  ;;  %v7650_v15 = vpop.xlane.xlu0 %2031 }
 0x4a9   :  { %v2157_v32 = vsel %vm1083_vm0, %v1854_v42, 0.0 }
 0x4aa   :  { %v7639_v40 = vadd.f32 %v2157_v32, %v1853_v51  ;;  %v2378_v42 = vsub.f32 %v2218_v50, %v2298_v29  ;;  %v7669_v50 = vmul.f32 0.0051020407, %v6871_v3 }
 0x4ac   :  { %3043 = vrot.lane.b32.xlu1 %v2856_v49, %s5155_s17  ;;  %v10198_v49 = vmov 1   ;;  %v7655_v51 = vpop.permute.xlu0 %3311  ;;  %v2458_v32 = vmax.f32 %v2378_v42, 0.0 }
 0x4b0   :  { %3451 = vperm.xlu1 %4828, %v2777_v39   ;;  %v2990_v10 = vpop.permute.xlu0 %2989 }
 0x4b4   :  { %4829 = vset.pattern.permute.xlu1 %v10198_v49  ;;  %v7653_v49 = vpop.xlane.xlu1 %2067  ;;  %v7676_v63 = vpop.xlane.xlu0 %2039 }
 0x4b5   :  { %10449 = vst [vmem:[#allocation171_spill] sm:$0xff] %v7653_v49  ;;  %v7660_v57 = vpop.f32.mrb[146].mxu0  ;;  %v2618_v49 = vadd.f32 0.001, %v2458_v32 }
 0x4b6   :  { %10451 = vst [vmem:[#allocation173_spill] sm:$0xff] %v7660_v57  ;;  %v1855_v28 = vmul.f32 %v7660_v57, %v7660_v57  ;;  %v7664_v9 = vpop.f32.mrb[147].mxu0  ;;  %v2299_v57 = vmul.f32 %v7669_v50, %v7669_v50 }
 0x4b7   :  { %10452 = vst [vmem:[#allocation174_spill] sm:$0xff] %v7664_v9  ;;  %v1856_v43 = vmul.f32 %v7664_v9, %v7664_v9  ;;  %4987 = vrsqrt.f32 %v2618_v49  ;;  %v2857_v49 = vmul.f32 %v2777_v39, %v7574_v20 }
 0x4b8   :  { %v7658_v25 = vpop.permute.xlu1 %3007  ;;  %v7682_v9 = vpop.permute.xlu0 %3326  ;;  %v2379_v32 = vsub.f32 %v2219_v58, %v2299_v57 }
 0x4b9   :  { %10450 = vst [vmem:[#allocation172_spill] sm:$0xff] %v7658_v25 }
 0x4bc   :  { %v7674_v42 = vpop.permute.xlu1 %3361  ;;  %v7685_v3 = vpop.xlane.xlu0 %2047 }
 0x4bd   :  { %10453 = vst [vmem:[#allocation175_spill] sm:$0xff] %v7674_v42  ;;  %10455 = vst [vmem:[#allocation177_spill] sm:$0xff] %v7685_v3 }
 0x4c0   :  { %v7680_v25 = vpop.xlane.xlu1 %2075  ;;  %v7696_v57 = vpop.permute.xlu0 %2997 }
 0x4c1   :  { %10454 = vst [vmem:[#allocation176_spill] sm:$0xff] %v7680_v25  ;;  %v4988_v61 = vpop.eup %4987 }
 0x4c4   :  { %2143 = vadd.xlane.f32.xlu0 %v7480_v62  ;;  %v2161_v62 = vsel %vm1083_vm0, %v1856_v43, 0.0  ;;  %v2459_v43 = vmax.f32 %v2379_v32, 0.0 }
 0x4c5   :  { %v7672_v29 = vadd.f32 %v2161_v62, %v1855_v28  ;;  %v7687_v28 = vpop.f32.mrb[136].mxu1  ;;  %v7689_v62 = vpop.permute.xlu1 %3011 }
 0x4c6   :  { %10456 = vst [vmem:[#allocation178_spill] sm:$0xff] %v7687_v28  ;;  %10457 = vst [vmem:[#allocation179_spill] sm:$0xff] %v7689_v62  ;;  %v1572_v42 = vpop.f32.mrb[137].mxu1  ;;  %v2619_v58 = vadd.f32 0.001, %v2459_v43  ;;  %v10462_v28 = vmov 1  }
 0x4c7   :  { %v7700_v32 = vpop.f32.mrb[138].mxu1  ;;  %v7702_v42 = vpop.permute.xlu0 %3336 }
 0x4c8   :  { %4989 = vrsqrt.f32 %v2619_v58  ;;  %10459 = vst [vmem:[#allocation181_spill] sm:$0xff] %v7700_v32  ;;  %10460 = vst [vmem:[#allocation182_spill] sm:$0xff] %v7702_v42  ;;  %v1577_v20 = vpop.f32.mrb[139].mxu1  ;;  %v2539_v58 = vld [vmem:[%s10040_s3 + $0xf0] sm:$0xff]  ;;  %v10466_v32 = vmov 0  }
 0x4c9   :  { %v7698_v25 = vpop.permute.xlu1 %3371 }
 0x4ca   :  { %10458 = vst [vmem:[#allocation180_spill] sm:$0xff] %v7698_v25 }
 0x4cb   :  { %v7707_v59 = vpop.xlane.xlu0 %2055 }
 0x4cc   :  { %10463 = vst [vmem:[#allocation184_spill] sm:$0xff] %v7707_v59 }
 0x4cd   :  { %v7704_v39 = vpop.xlane.xlu1 %2083 }
 0x4ce   :  { %10461 = vst [vmem:[#allocation183_spill] sm:$0xff] %v7704_v39 }
 0x4cf   :  { %v7718_v20 = vpop.permute.xlu0 %3001 }
 0x4d3   :  { %v7725_v25 = vpop.permute.xlu0 %3346 }
 0x4d4   :  { %2147 = vadd.xlane.f32.xlu1 %v7492_v18  ;;  %v2778_v18 = vmul.f32 %v4988_v61, %v2538_v52  ;;  %v5089_v61 = vld [vmem:[%s10040_s3] sm:$0xff]  ;;  %v4990_v52 = vpop.eup %4989  ;;  %10468 = vst [vmem:[#allocation188_spill] sm:$0xff] %v7725_v25 }
 0x4d5   :  { %v3229_v43 = vsub.f32 %v5089_v61, %v2990_v10 }
 0x4d6   :  { %v2858_v62 = vmul.f32 %v2778_v18, %v1658_v48  ;;  %v2779_v48 = vmul.f32 %v4990_v52, %v2539_v58 }
 0x4d7   :  { %v7736_v58 = vpop.xlane.xlu0 %2063 }
 0x4d8   :  { %10471 = vst [vmem:[#allocation191_spill] sm:$0xff] %v7736_v58 }
 0x4da   :  { %3045 = vrot.lane.b32.xlu0 %v2857_v49, %s5155_s17  ;;  %v7713_v49 = vpop.permute.xlu1 %3015 }
 0x4db   :  { %10464 = vst [vmem:[#allocation185_spill] sm:$0xff] %v7713_v49  ;;  %v7743_v49 = vpop.permute.xlu0 %3005 }
 0x4de   :  { %3456 = vperm.xlu0 %4827, %v2778_v18   ;;  %v7720_v18 = vpop.permute.xlu1 %3381 }
 0x4df   :  { %10465 = vst [vmem:[#allocation186_spill] sm:$0xff] %v7720_v18  ;;  %v7746_v42 = vpop.permute.xlu0 %3356 }
 0x4e0   :  { %10473 = vst [vmem:[#allocation193_spill] sm:$0xff] %v7746_v42 }
 0x4e2   :  { %4831 = vset.pattern.permute.xlu0 %v10462_v28  ;;  %v7733_v39 = vpop.xlane.xlu1 %2091 }
 0x4e3   :  { %10470 = vst [vmem:[#allocation190_spill] sm:$0xff] %v7733_v39  ;;  %v7752_v39 = vpop.xlane.xlu0 %2071 }
 0x4e4   :  { %10475 = vst [vmem:[#allocation195_spill] sm:$0xff] %v7752_v39 }
 0x4e5   :  { %3047 = vrot.lane.b32.xlu1 %v2858_v62, %s5155_s17  ;;  %v7723_v62 = vpop.f32.mrb[148].mxu0 }
 0x4e6   :  { %10467 = vst [vmem:[#allocation187_spill] sm:$0xff] %v7723_v62  ;;  %v1857_v10 = vmul.f32 %v7723_v62, %v7723_v62  ;;  %v7729_v61 = vpop.f32.mrb[149].mxu0  ;;  %v7741_v25 = vpop.permute.xlu1 %3019  ;;  %v1660_v62 = vmul.f32 0.0051020407, %v6876_v12 }
 0x4e7   :  { %10469 = vst [vmem:[#allocation189_spill] sm:$0xff] %v7729_v61  ;;  %10472 = vst [vmem:[#allocation192_spill] sm:$0xff] %v7741_v25  ;;  %v7762_v42 = vpop.permute.xlu0 %3009 }
 0x4e8   :  { %v2300_v59 = vmul.f32 %v1660_v62, %v1660_v62  ;;  %10479 = vst [vmem:[#allocation199_spill] sm:$0xff] %v7762_v42 }
 0x4e9   :  { %3871 = vperm.xlu1 %4829, %v3229_v43   ;;  %v1858_v43 = vmul.f32 %v7729_v61, %v7729_v61 }
 0x4ea   :  { %v7748_v61 = vpop.permute.xlu1 %3391 }
 0x4eb   :  { %v2165_v52 = vsel %vm1083_vm0, %v1858_v43, 0.0  ;;  %10474 = vst [vmem:[#allocation194_spill] sm:$0xff] %v7748_v61  ;;  %v2220_v43 = vmul.f32 0.0051020407, %v7510_v54 }
 0x4ec   :  { %v7739_v18 = vadd.f32 %v2165_v52, %v1857_v10 }
 0x4ed   :  { %4830 = vset.pattern.permute.xlu1 %v10466_v32  ;;  %v2380_v58 = vsub.f32 %v2220_v43, %v2300_v59  ;;  %v7770_v43 = vmul.f32 0.0051020407, %v6885_v45  ;;  %v2859_v45 = vmul.f32 %v2779_v48, %v7669_v50  ;;  %v2540_v50 = vld [vmem:[%s10040_s3 + $0xf8] sm:$0xff] }
 0x4ee   :  { %3461 = vperm.xlu1 %4830, %v2779_v48   ;;  %v7754_v10 = vpop.xlane.xlu1 %2099 }
 0x4ef   :  { %10476 = vst [vmem:[#allocation196_spill] sm:$0xff] %v7754_v10  ;;  %v2460_v25 = vmax.f32 %v2380_v58, 0.0  ;;  %v7774_v58 = vpop.permute.xlu0 %3366 }
 0x4f0   :  { %10481 = vst [vmem:[#allocation201_spill] sm:$0xff] %v7774_v58 }
 0x4f1   :  { %v2620_v59 = vadd.f32 0.001, %v2460_v25 }
 0x4f2   :  { %4833 = vset.pattern.permute.xlu1 %v10462_v28  ;;  %v7766_v61 = vpop.permute.xlu1 %3023 }
 0x4f3   :  { %10480 = vst [vmem:[#allocation200_spill] sm:$0xff] %v7766_v61  ;;  %4991 = vrsqrt.f32 %v2620_v59  ;;  %v7780_v42 = vpop.xlane.xlu0 %2079 }
 0x4f6   :  { %v7778_v39 = vpop.permute.xlu1 %3401 }
 0x4f7   :  { %10482 = vst [vmem:[#allocation202_spill] sm:$0xff] %v7778_v39  ;;  %v7788_v25 = vpop.permute.xlu0 %3013 }
 0x4fd   :  { %2151 = vadd.xlane.f32.xlu0 %v7555_v36  ;;  %v7756_v52 = vpop.f32.mrb[150].mxu0  ;;  %v4992_v39 = vpop.eup %4991 }
 0x4fe   :  { %10477 = vst [vmem:[#allocation197_spill] sm:$0xff] %v7756_v52  ;;  %v1859_v12 = vmul.f32 %v7756_v52, %v7756_v52  ;;  %v7760_v3 = vpop.f32.mrb[151].mxu0  ;;  %v2301_v52 = vmul.f32 %v7770_v43, %v7770_v43 }
 0x4ff   :  { %10478 = vst [vmem:[#allocation198_spill] sm:$0xff] %v7760_v3  ;;  %v1860_v36 = vmul.f32 %v7760_v3, %v7760_v3  ;;  %v2221_v3 = vmul.f32 0.0051020407, %v7623_v35 }
 0x501   :  { %v2169_v54 = vsel %vm1083_vm0, %v1860_v36, 0.0  ;;  %v2381_v61 = vsub.f32 %v2221_v3, %v2301_v52  ;;  %v7783_v36 = vpop.xlane.xlu1 %2107  ;;  %v7801_v3 = vpop.permute.xlu0 %3376  ;;  %v2780_v52 = vmul.f32 %v4992_v39, %v2540_v50  ;;  %v5091_v39 = vld [vmem:[%s10040_s3 + $0x10] sm:$0xff] }
 0x502   :  { %v7772_v10 = vadd.f32 %v2169_v54, %v1859_v12  ;;  %10483 = vst [vmem:[#allocation203_spill] sm:$0xff] %v7783_v36  ;;  %v5090_v54 = vld [vmem:[%s10040_s3 + $0x8] sm:$0xff]  ;;  %10486 = vst [vmem:[#allocation206_spill] sm:$0xff] %v7801_v3 }
 0x503   :  { %v2461_v12 = vmax.f32 %v2381_v61, 0.0  ;;  %v3230_v59 = vsub.f32 %v5090_v54, %v7557_v37  ;;  %v2860_v36 = vmul.f32 %v2780_v52, %v1660_v62  ;;  %v2541_v62 = vld [vmem:[%s10040_s3 + $0x100] sm:$0xff] }
 0x505   :  { %v7794_v35 = vpop.permute.xlu1 %3027  ;;  %v2621_v61 = vadd.f32 0.001, %v2461_v12  ;;  %v3231_v12 = vsub.f32 %v5091_v39, %v7581_v16 }
 0x506   :  { %10484 = vst [vmem:[#allocation204_spill] sm:$0xff] %v7794_v35 }
 0x507   :  { %4993 = vrsqrt.f32 %v2621_v61 }
 0x509   :  { %v7806_v37 = vpop.permute.xlu1 %3411 }
 0x50a   :  { %10487 = vst [vmem:[#allocation207_spill] sm:$0xff] %v7806_v37 }
 0x50d   :  { %v7810_v58 = vpop.xlane.xlu1 %2115 }
 0x50e   :  { %10489 = vst [vmem:[#allocation209_spill] sm:$0xff] %v7810_v58 }
 0x511   :  { %v7821_v61 = vpop.permute.xlu1 %3031 }
 0x512   :  { %2155 = vadd.xlane.f32.xlu1 %v7577_v46  ;;  %v7799_v46 = vpop.f32.mrb[140].mxu1  ;;  %10491 = vst [vmem:[#allocation211_spill] sm:$0xff] %v7821_v61 }
 0x513   :  { %3049 = vrot.lane.b32.xlu0 %v2859_v45, %s5155_s17  ;;  %10485 = vst [vmem:[#allocation205_spill] sm:$0xff] %v7799_v46  ;;  %v1582_v48 = vpop.f32.mrb[141].mxu1  ;;  %v7804_v45 = vpop.xlane.xlu0 %2087 }
 0x514   :  { %v7808_v54 = vpop.f32.mrb[142].mxu1  ;;  %v4994_v48 = vpop.eup %4993 }
 0x515   :  { %10488 = vst [vmem:[#allocation208_spill] sm:$0xff] %v7808_v54  ;;  %v7837_v37 = vpop.permute.xlu1 %3421 }
 0x516   :  { %10495 = vst [vmem:[#allocation215_spill] sm:$0xff] %v7837_v37 }
 0x517   :  { %3876 = vperm.xlu0 %4831, %v3230_v59   ;;  %v1587_v59 = vpop.f32.mrb[143].mxu1  ;;  %v7812_v46 = vpop.permute.xlu0 %3017 }
 0x518   :  { %v2781_v59 = vmul.f32 %v4994_v48, %v2541_v62 }
 0x519   :  { %v7845_v62 = vpop.xlane.xlu1 %2123 }
 0x51a   :  { %10496 = vst [vmem:[#allocation216_spill] sm:$0xff] %v7845_v62 }
 0x51b   :  { %4832 = vset.pattern.permute.xlu0 %v10466_v32  ;;  %v7819_v50 = vpop.permute.xlu0 %3386 }
 0x51c   :  { %3466 = vperm.xlu0 %4832, %v2780_v52   ;;  %10490 = vst [vmem:[#allocation210_spill] sm:$0xff] %v7819_v50 }
 0x51d   :  { %v7850_v61 = vpop.permute.xlu1 %3035 }
 0x51e   :  { %10498 = vst [vmem:[#allocation218_spill] sm:$0xff] %v7850_v61 }
 0x51f   :  { %v7826_v52 = vpop.xlane.xlu0 %2095 }
 0x520   :  { %10492 = vst [vmem:[#allocation212_spill] sm:$0xff] %v7826_v52 }
 0x523   :  { %3051 = vrot.lane.b32.xlu1 %v2860_v36, %s5155_s17  ;;  %v7828_v36 = vpop.f32.mrb[152].mxu0  ;;  %v7842_v48 = vpop.permute.xlu0 %3021 }
 0x524   :  { %10493 = vst [vmem:[#allocation213_spill] sm:$0xff] %v7828_v36  ;;  %v1861_v16 = vmul.f32 %v7828_v36, %v7828_v36  ;;  %v7833_v39 = vpop.f32.mrb[153].mxu0  ;;  %v1662_v36 = vmul.f32 0.0051020407, %v6893_v30 }
 0x525   :  { %10494 = vst [vmem:[#allocation214_spill] sm:$0xff] %v7833_v39 }
 0x526   :  { %v2302_v58 = vmul.f32 %v1662_v36, %v1662_v36 }
 0x527   :  { %3881 = vperm.xlu1 %4833, %v3231_v12   ;;  %v1862_v12 = vmul.f32 %v7833_v39, %v7833_v39  ;;  %v7848_v3 = vpop.permute.xlu0 %3396  ;;  %v2222_v39 = vmul.f32 0.0051020407, %v7513_v4 }
 0x528   :  { %10497 = vst [vmem:[#allocation217_spill] sm:$0xff] %v7848_v3 }
 0x529   :  { %v2173_v50 = vsel %vm1083_vm0, %v1862_v12, 0.0  ;;  %v2382_v12 = vsub.f32 %v2222_v39, %v2302_v58  ;;  %v7874_v39 = vmul.f32 0.0051020407, %v6897_v31 }
 0x52a   :  { %v7840_v54 = vadd.f32 %v2173_v50, %v1861_v16  ;;  %v7856_v50 = vpop.permute.xlu1 %3431 }
 0x52b   :  { %4834 = vset.pattern.permute.xlu1 %v10466_v32  ;;  %v7853_v37 = vpop.xlane.xlu0 %2103  ;;  %10500 = vst [vmem:[#allocation220_spill] sm:$0xff] %v7856_v50  ;;  %v2462_v16 = vmax.f32 %v2382_v12, 0.0 }
 0x52c   :  { %3471 = vperm.xlu1 %4834, %v2781_v59   ;;  %10499 = vst [vmem:[#allocation219_spill] sm:$0xff] %v7853_v37 }
 0x52d   :  { %v2622_v3 = vadd.f32 0.001, %v2462_v16 }
 0x52e   :  { %v7860_v62 = vpop.xlane.xlu1 %2131 }
 0x52f   :  { %v7858_v52 = vpop.permute.xlu0 %3025  ;;  %10501 = vst [vmem:[#allocation221_spill] sm:$0xff] %v7860_v62  ;;  %4995 = vrsqrt.f32 %v2622_v3  ;;  %v2861_v3 = vmul.f32 %v2781_v59, %v7770_v43 }
 0x530   :  { %4835 = vset.pattern.permute.xlu1 %v10462_v28 }
 0x532   :  { %v7880_v16 = vpop.permute.xlu1 %3039 }
 0x533   :  { %v7864_v35 = vpop.permute.xlu0 %3406  ;;  %10506 = vst [vmem:[#allocation226_spill] sm:$0xff] %v7880_v16 }
 0x534   :  { %10503 = vst [vmem:[#allocation223_spill] sm:$0xff] %v7864_v35  ;;  %v2223_v35 = vmul.f32 0.0051020407, %v7635_v47 }
 0x537   :  { %v7862_v30 = vpop.f32.mrb[154].mxu0  ;;  %v7876_v12 = vpop.xlane.xlu0 %2111 }
 0x538   :  { %10502 = vst [vmem:[#allocation222_spill] sm:$0xff] %v7862_v30  ;;  %v1863_v4 = vmul.f32 %v7862_v30, %v7862_v30  ;;  %v7868_v61 = vpop.f32.mrb[155].mxu0  ;;  %10505 = vst [vmem:[#allocation225_spill] sm:$0xff] %v7876_v12  ;;  %v2303_v30 = vmul.f32 %v7874_v39, %v7874_v39 }
 0x539   :  { %10504 = vst [vmem:[#allocation224_spill] sm:$0xff] %v7868_v61  ;;  %v4996_v31 = vpop.eup %4995 }
 0x53b   :  { %2159 = vadd.xlane.f32.xlu0 %v7639_v40  ;;  %v1864_v40 = vmul.f32 %v7868_v61, %v7868_v61  ;;  %v7885_v62 = vpop.permute.xlu0 %3029  ;;  %v7887_v61 = vpop.permute.xlu1 %3441 }
 0x53c   :  { %10507 = vst [vmem:[#allocation227_spill] sm:$0xff] %v7887_v61 }
 0x53d   :  { %v2177_v58 = vsel %vm1083_vm0, %v1864_v40, 0.0  ;;  %v2383_v40 = vsub.f32 %v2223_v35, %v2303_v30  ;;  %v7901_v35 = vpop.f32.mrb[144].mxu1 }
 0x53e   :  { %v7878_v50 = vadd.f32 %v2177_v58, %v1863_v4  ;;  %v2542_v4 = vld [vmem:[%s10040_s3 + $0x108] sm:$0xff]  ;;  %10510 = vst [vmem:[#allocation230_spill] sm:$0xff] %v7901_v35  ;;  %v1592_v59 = vpop.f32.mrb[145].mxu1 }
 0x53f   :  { %v7890_v37 = vpop.permute.xlu0 %3416  ;;  %v7896_v58 = vpop.xlane.xlu1 %2139  ;;  %v2463_v47 = vmax.f32 %v2383_v40, 0.0  ;;  %v2782_v16 = vmul.f32 %v4996_v31, %v2542_v4  ;;  %v5092_v31 = vld [vmem:[%s10040_s3 + $0x18] sm:$0xff] }
 0x540   :  { %10508 = vst [vmem:[#allocation228_spill] sm:$0xff] %v7890_v37  ;;  %10509 = vst [vmem:[#allocation229_spill] sm:$0xff] %v7896_v58  ;;  %v7908_v61 = vpop.f32.mrb[146].mxu1  ;;  %v3232_v4 = vsub.f32 %v5092_v31, %v7591_v2  ;;  %v3709_v2 = vmul.f32 %v7655_v51, %v6109_v5 }
 0x541   :  { %v2623_v43 = vadd.f32 0.001, %v2463_v47  ;;  %10511 = vst [vmem:[#allocation231_spill] sm:$0xff] %v7908_v61  ;;  %v1597_v40 = vpop.f32.mrb[147].mxu1 }
 0x543   :  { %v7899_v12 = vpop.xlane.xlu0 %2119  ;;  %v7903_v30 = vpop.permute.xlu1 %3043  ;;  %4997 = vrsqrt.f32 %v2623_v43  ;;  %v2862_v43 = vmul.f32 %v2782_v16, %v1662_v36  ;;  %v3710_v36 = vmul.f32 %v7655_v51, %v6117_v7  ;;  %v1664_v51 = vmul.f32 0.0051020407, %v6907_v34 }
 0x547   :  { %v7910_v37 = vpop.permute.xlu1 %3451 }
 0x548   :  { %10512 = vst [vmem:[#allocation232_spill] sm:$0xff] %v7910_v37  ;;  %v2543_v37 = vld [vmem:[%s10040_s3 + $0x110] sm:$0xff] }
 0x54d   :  { %v4998_v35 = vpop.eup %4997 }
 0x550   :  { %2163 = vadd.xlane.f32.xlu1 %v7672_v29  ;;  %v7906_v29 = vpop.permute.xlu0 %3033 }
 0x551   :  { %3053 = vrot.lane.b32.xlu0 %v2861_v3, %s5155_s17 }
 0x554   :  { %v7912_v3 = vpop.permute.xlu0 %3426 }
 0x555   :  { %3476 = vperm.xlu0 %4832, %v2782_v16   ;;  %10513 = vst [vmem:[#allocation233_spill] sm:$0xff] %v7912_v3  ;;  %v2783_v3 = vmul.f32 %v4998_v35, %v2543_v37 }
 0x558   :  { %v7920_v59 = vpop.xlane.xlu0 %2127 }
 0x559   :  { %4836 = vset.pattern.permute.xlu0 %v10462_v28 }
 0x55c   :  { %v7935_v16 = vpop.permute.xlu0 %3037 }
 0x560   :  { %v7929_v61 = vpop.f32.mrb[156].mxu0  ;;  %v7944_v5 = vpop.permute.xlu0 %3436 }
 0x561   :  { %v7918_v47 = vpop.xlane.xlu1 %2147  ;;  %3886 = vperm.xlu1 %4835, %v3232_v4   ;;  %10515 = vst [vmem:[#allocation235_spill] sm:$0xff] %v7929_v61  ;;  %v1865_v31 = vmul.f32 %v7929_v61, %v7929_v61  ;;  %v7939_v4 = vpop.f32.mrb[157].mxu0  ;;  %10517 = vst [vmem:[#allocation237_spill] sm:$0xff] %v7944_v5 }
 0x562   :  { %10514 = vst [vmem:[#allocation234_spill] sm:$0xff] %v7918_v47  ;;  %10516 = vst [vmem:[#allocation236_spill] sm:$0xff] %v7939_v4  ;;  %v1866_v37 = vmul.f32 %v7939_v4, %v7939_v4 }
 0x564   :  { %v2181_v58 = vsel %vm1083_vm0, %v1866_v37, 0.0 }
 0x565   :  { %v7925_v40 = vpop.permute.xlu1 %3047  ;;  %3055 = vrot.lane.b32.xlu1 %v2862_v43, %s5155_s17  ;;  %v7953_v7 = vadd.f32 %v2181_v58, %v1865_v31  ;;  %v7967_v58 = vpop.f32.mrb[158].mxu0 }
 0x566   :  { %4837 = vset.pattern.permute.xlu1 %v10466_v32  ;;  %10520 = vst [vmem:[#allocation240_spill] sm:$0xff] %v7967_v58  ;;  %v1867_v34 = vmul.f32 %v7967_v58, %v7967_v58  ;;  %v7971_v5 = vpop.f32.mrb[159].mxu0  ;;  %v5093_v58 = vld [vmem:[%s10040_s3 + $0x20] sm:$0xff] }
 0x567   :  { %10521 = vst [vmem:[#allocation241_spill] sm:$0xff] %v7971_v5 }
 0x569   :  { %v3872_v47 = vpop.permute.xlu1 %3871  ;;  %3481 = vperm.xlu1 %4837, %v2783_v3  }
 0x56a   :  { %v4269_v35 = vadd.f32 %v3872_v47, %v3709_v2  ;;  %v4270_v43 = vadd.f32 %v3872_v47, %v3710_v36  ;;  %v7957_v47 = vpop.xlane.xlu0 %2135  ;;  %v2304_v2 = vmul.f32 %v1664_v51, %v1664_v51  ;;  %v2224_v36 = vmul.f32 0.0051020407, %v7522_v41 }
 0x56c   :  { %4429 = vst [vmem:[%s10041_s4] sm:$0xff] %v4269_v35  ;;  %4430 = vst.msk [vmem:[%s10041_s4 + $0x8] sm:$0xff] %vm1083_vm0, %v4270_v43  ;;  %v2384_v35 = vsub.f32 %v2224_v36, %v2304_v2  ;;  %v7977_v2 = vmul.f32 0.0051020407, %v6909_v56 }
 0x56d   :  { %4838 = vset.pattern.permute.xlu1 %v10462_v28 }
 0x56e   :  { %v7961_v37 = vpop.permute.xlu0 %3041  ;;  %v2464_v61 = vmax.f32 %v2384_v35, 0.0 }
 0x570   :  { %v2624_v31 = vadd.f32 0.001, %v2464_v61  ;;  %v2305_v61 = vmul.f32 %v7977_v2, %v7977_v2 }
 0x572   :  { %v7963_v4 = vpop.permute.xlu0 %3446  ;;  %4999 = vrsqrt.f32 %v2624_v31  ;;  %v2225_v31 = vmul.f32 0.0051020407, %v7643_v23  ;;  %v8001_v23 = vpop.f32.mrb[148].mxu1 }
 0x573   :  { %10518 = vst [vmem:[#allocation238_spill] sm:$0xff] %v7963_v4  ;;  %v3233_v4 = vsub.f32 %v5093_v58, %v7696_v57 }
 0x574   :  { %2167 = vadd.xlane.f32.xlu0 %v7739_v18  ;;  %v1868_v18 = vmul.f32 %v7971_v5, %v7971_v5  ;;  %v2385_v56 = vsub.f32 %v2225_v31, %v2305_v61 }
 0x576   :  { %v7965_v43 = vpop.xlane.xlu0 %2143  ;;  %v2185_v41 = vsel %vm1083_vm0, %v1868_v18, 0.0  ;;  %v2465_v57 = vmax.f32 %v2385_v56, 0.0 }
 0x577   :  { %10519 = vst [vmem:[#allocation239_spill] sm:$0xff] %v7965_v43  ;;  %v7979_v36 = vadd.f32 %v2185_v41, %v1867_v34  ;;  %v2863_v34 = vmul.f32 %v2783_v3, %v7874_v39  ;;  %v2544_v43 = vld [vmem:[%s10040_s3 + $0x118] sm:$0xff]  ;;  %v3712_v3 = vmul.f32 %v7553_v8, %v6137_v13  ;;  %v5094_v13 = vld [vmem:[%s10040_s3 + $0x28] sm:$0xff] }
 0x578   :  { %v2625_v39 = vadd.f32 0.001, %v2465_v57 }
 0x57a   :  { %v7981_v35 = vpop.permute.xlu0 %3045  ;;  %5001 = vrsqrt.f32 %v2625_v39 }
 0x57c   :  { %v5000_v41 = vpop.eup %4999 }
 0x57d   :  { %v2784_v58 = vmul.f32 %v5000_v41, %v2544_v43 }
 0x57e   :  { %v7989_v5 = vpop.permute.xlu0 %3456 }
 0x584   :  { %v5002_v39 = vpop.eup %5001 }
 0x58a   :  { %3891 = vperm.xlu0 %4836, %v3233_v4   ;;  %v7992_v18 = vpop.xlane.xlu0 %2151  ;;  %v1602_v4 = vpop.f32.mrb[149].mxu1 }
 0x58b   :  { %v8010_v43 = vpop.f32.mrb[150].mxu1  ;;  %v2864_v4 = vmul.f32 %v2784_v58, %v1664_v51 }
 0x58c   :  { %v1607_v41 = vpop.f32.mrb[151].mxu1 }
 0x58d   :  { %2171 = vadd.xlane.f32.xlu1 %v7772_v10  ;;  %v3711_v10 = vmul.f32 %v7553_v8, %v6133_v11  ;;  %v8019_v11 = vpop.permute.xlu1 %3461  ;;  %v3234_v8 = vsub.f32 %v5094_v13, %v7607_v44  ;;  %v3714_v44 = vmul.f32 %v7560_v6, %v6149_v19  ;;  %v2226_v19 = vmul.f32 0.0051020407, %v7527_v53 }
 0x58e   :  { %3057 = vrot.lane.b32.xlu0 %v2863_v34, %s5155_s17  ;;  %v8003_v61 = vpop.permute.xlu0 %3049 }
 0x58f   :  { %4839 = vset.pattern.permute.xlu0 %v10466_v32 }
 0x592   :  { %3486 = vperm.xlu0 %4839, %v2784_v58  }
 0x596   :  { %v3877_v31 = vpop.permute.xlu0 %3876  ;;  %4840 = vset.pattern.permute.xlu0 %v10462_v28 }
 0x597   :  { %v4271_v56 = vadd.f32 %v3877_v31, %v3711_v10  ;;  %v4272_v34 = vadd.f32 %v3877_v31, %v3712_v3  ;;  %v2545_v10 = vld [vmem:[%s10040_s3 + $0x120] sm:$0xff] }
 0x598   :  { %v2785_v31 = vmul.f32 %v5002_v39, %v2545_v10  ;;  %v5095_v10 = vld [vmem:[%s10040_s3 + $0x30] sm:$0xff] }
 0x599   :  { %4431 = vst [vmem:[%s10041_s4 + $0x10] sm:$0xff] %v4271_v56  ;;  %4432 = vst.msk [vmem:[%s10041_s4 + $0x18] sm:$0xff] %vm1083_vm0, %v4272_v34  ;;  %v3713_v56 = vmul.f32 %v7560_v6, %v6145_v17  ;;  %v1666_v17 = vmul.f32 0.0051020407, %v6912_v27  ;;  %v3235_v27 = vsub.f32 %v5095_v10, %v7718_v20  ;;  %v8066_v20 = vpop.f32.mrb[152].mxu1  ;;  %v3715_v10 = vmul.f32 %v7682_v9, %v6157_v24 }
 0x59a   :  { %v8097_v24 = vmul.f32 0.0051020407, %v6922_v55 }
 0x59b   :  { %v2306_v41 = vmul.f32 %v1666_v17, %v1666_v17 }
 0x59d   :  { %v2386_v6 = vsub.f32 %v2226_v19, %v2306_v41 }
 0x59e   :  { %3896 = vperm.xlu1 %4838, %v3234_v8  }
 0x59f   :  { %v8025_v57 = vpop.xlane.xlu1 %2155  ;;  %v2466_v13 = vmax.f32 %v2386_v6, 0.0 }
 0x5a1   :  { %v2626_v8 = vadd.f32 0.001, %v2466_v13 }
 0x5a2   :  { %3059 = vrot.lane.b32.xlu1 %v2864_v4, %s5155_s17  ;;  %v8050_v4 = vmul.f32 0.0051020407, %v6920_v38  ;;  %v2546_v38 = vld [vmem:[%s10040_s3 + $0x128] sm:$0xff] }
 0x5a3   :  { %v8031_v3 = vpop.permute.xlu1 %3051  ;;  %4841 = vset.pattern.permute.xlu1 %v10466_v32  ;;  %5003 = vrsqrt.f32 %v2626_v8 }
 0x5a4   :  { %v2307_v39 = vmul.f32 %v8050_v4, %v8050_v4 }
 0x5a6   :  { %3491 = vperm.xlu1 %4841, %v2785_v31  }
 0x5a7   :  { %v3882_v51 = vpop.permute.xlu1 %3881 }
 0x5a8   :  { %v4273_v58 = vadd.f32 %v3882_v51, %v3713_v56  ;;  %v4274_v34 = vadd.f32 %v3882_v51, %v3714_v44  ;;  %v2865_v56 = vmul.f32 %v2785_v31, %v7977_v2  ;;  %v5096_v31 = vld [vmem:[%s10040_s3 + $0x38] sm:$0xff] }
 0x5a9   :  { %v3236_v41 = vsub.f32 %v5096_v31, %v7641_v14 }
 0x5aa   :  { %4433 = vst [vmem:[%s10041_s4 + $0x20] sm:$0xff] %v4273_v58  ;;  %4434 = vst.msk [vmem:[%s10041_s4 + $0x28] sm:$0xff] %vm1083_vm0, %v4274_v34  ;;  %4842 = vset.pattern.permute.xlu1 %v10462_v28 }
 0x5ab   :  { %v8075_v19 = vpop.permute.xlu1 %3471 }
 0x5ac   :  { %10522 = vst [vmem:[#allocation242_spill] sm:$0xff] %v8075_v19  ;;  %v10542_v19 = vld [vmem:[#allocation104_spill] sm:$0xff] }
 0x5ad   :  { %v5004_v44 = vpop.eup %5003 }
 0x5ae   :  { %v2786_v58 = vmul.f32 %v5004_v44, %v2546_v38  ;;  %v8106_v38 = vpop.permute.xlu0 %3466 }
 0x5af   :  { %10523 = vst [vmem:[#allocation243_spill] sm:$0xff] %v8106_v38 }
 0x5b0   :  { %v2866_v13 = vmul.f32 %v2786_v58, %v1666_v17  ;;  %v2228_v17 = vmul.f32 0.0051020407, %v7536_v21 }
 0x5b1   :  { %2175 = vadd.xlane.f32.xlu0 %v7840_v54  ;;  %v2227_v54 = vmul.f32 0.0051020407, %v7646_v33  ;;  %v1612_v33 = vpop.f32.mrb[153].mxu1 }
 0x5b2   :  { %v8069_v2 = vpop.f32.mrb[154].mxu1  ;;  %v10524_v33 = vld [vmem:[#allocation94_spill] sm:$0xff] }
 0x5b3   :  { %v2387_v53 = vsub.f32 %v2227_v54, %v2307_v39  ;;  %v2547_v39 = vld [vmem:[%s10040_s3 + $0x130] sm:$0xff] }
 0x5b5   :  { %v2467_v51 = vmax.f32 %v2387_v53, 0.0 }
 0x5b7   :  { %v2627_v34 = vadd.f32 0.001, %v2467_v51 }
 0x5b9   :  { %5005 = vrsqrt.f32 %v2627_v34  ;;  %v8112_v34 = vmul.f32 0.0051020407, %v10524_v33 }
 0x5c3   :  { %v5006_v8 = vpop.eup %5005 }
 0x5c4   :  { %v2787_v54 = vmul.f32 %v5006_v8, %v2547_v39  ;;  %v2230_v8 = vmul.f32 0.0051020407, %v7542_v1 }
 0x5c7   :  { %3901 = vperm.xlu0 %4840, %v3235_v27   ;;  %v3716_v27 = vmul.f32 %v7682_v9, %v6161_v26  ;;  %v2308_v26 = vmul.f32 %v8097_v24, %v8097_v24  ;;  %v8102_v9 = vmul.f32 0.0051020407, %v6924_v22 }
 0x5c9   :  { %v2388_v44 = vsub.f32 %v2228_v17, %v2308_v26  ;;  %v2309_v51 = vmul.f32 %v8102_v9, %v8102_v9  ;;  %v5097_v17 = vld [vmem:[%s10040_s3 + $0x40] sm:$0xff] }
 0x5ca   :  { %2179 = vadd.xlane.f32.xlu1 %v7878_v50  ;;  %v1617_v50 = vpop.f32.mrb[155].mxu1  ;;  %v3237_v1 = vsub.f32 %v5097_v17, %v7743_v49  ;;  %v2548_v49 = vld [vmem:[%s10040_s3 + $0x138] sm:$0xff] }
 0x5cb   :  { %3061 = vrot.lane.b32.xlu0 %v2865_v56, %s5155_s17  ;;  %v2468_v55 = vmax.f32 %v2388_v44, 0.0  ;;  %v8114_v50 = vpop.xlane.xlu0 %2159  ;;  %v10527_v44 = vld [vmem:[#allocation98_spill] sm:$0xff] }
 0x5cc   :  { %4843 = vset.pattern.permute.xlu0 %v10466_v32 }
 0x5cd   :  { %v2628_v31 = vadd.f32 0.001, %v2468_v55 }
 0x5cf   :  { %3496 = vperm.xlu0 %4843, %v2786_v58   ;;  %v2229_v58 = vmul.f32 0.0051020407, %v7650_v15  ;;  %v8122_v39 = vpop.permute.xlu0 %3053  ;;  %5007 = vrsqrt.f32 %v2628_v31 }
 0x5d1   :  { %v2389_v22 = vsub.f32 %v2229_v58, %v2309_v51  ;;  %v8134_v51 = vmul.f32 0.0051020407, %v10527_v44  ;;  %v10531_v44 = vld [vmem:[#allocation177_spill] sm:$0xff] }
 0x5d3   :  { %4844 = vset.pattern.permute.xlu0 %v10462_v28  ;;  %v2469_v21 = vmax.f32 %v2389_v22, 0.0  ;;  %v2312_v31 = vmul.f32 %v8134_v51, %v8134_v51 }
 0x5d9   :  { %v5008_v22 = vpop.eup %5007 }
 0x5db   :  { %3906 = vperm.xlu1 %4842, %v3236_v41   ;;  %v10525_v41 = vld [vmem:[#allocation97_spill] sm:$0xff] }
 0x5dd   :  { %v8077_v6 = vpop.xlane.xlu1 %2163 }
 0x5df   :  { %3063 = vrot.lane.b32.xlu1 %v2866_v13, %s5155_s17  ;;  %v8119_v13 = vmul.f32 0.0051020407, %v10525_v41 }
 0x5e0   :  { %4845 = vset.pattern.permute.xlu1 %v10466_v32 }
 0x5e1   :  { %v3887_v14 = vpop.permute.xlu1 %3886 }
 0x5e2   :  { %v4275_v53 = vadd.f32 %v3887_v14, %v3715_v10  ;;  %v4276_v56 = vadd.f32 %v3887_v14, %v3716_v27  ;;  %v2629_v10 = vadd.f32 0.001, %v2469_v21  ;;  %v2311_v27 = vmul.f32 %v8119_v13, %v8119_v13  ;;  %v10528_v21 = vld [vmem:[#allocation17_spill] sm:$0xff] }
 0x5e3   :  { %3501 = vperm.xlu1 %4845, %v2787_v54   ;;  %v2231_v14 = vmul.f32 0.0051020407, %v7676_v63  ;;  %v2867_v63 = vmul.f32 %v2787_v54, %v8050_v4  ;;  %v3717_v41 = vmul.f32 %v7594_v0, %v10528_v21 }
 0x5e4   :  { %4435 = vst [vmem:[%s10041_s4 + $0x30] sm:$0xff] %v4275_v53  ;;  %4436 = vst.msk [vmem:[%s10041_s4 + $0x38] sm:$0xff] %vm1083_vm0, %v4276_v56  ;;  %v8127_v53 = vpop.permute.xlu0 %3476  ;;  %5009 = vrsqrt.f32 %v2629_v10  ;;  %v10530_v10 = vld [vmem:[#allocation99_spill] sm:$0xff] }
 0x5e5   :  { %10526 = vst [vmem:[#allocation94_spill] sm:$0xff] %v8127_v53  ;;  %v2391_v26 = vsub.f32 %v2231_v14, %v2311_v27  ;;  %v8151_v4 = vmul.f32 0.0051020407, %v10530_v10  ;;  %v2788_v14 = vmul.f32 %v5008_v22, %v2548_v49  ;;  %v10532_v22 = vld [vmem:[#allocation199_spill] sm:$0xff] }
 0x5e7   :  { %4846 = vset.pattern.permute.xlu1 %v10462_v28  ;;  %v2471_v33 = vmax.f32 %v2391_v26, 0.0  ;;  %v2313_v21 = vmul.f32 %v8151_v4, %v8151_v4 }
 0x5ee   :  { %2183 = vadd.xlane.f32.xlu0 %v7953_v7  ;;  %v2310_v7 = vmul.f32 %v8112_v34, %v8112_v34 }
 0x5f0   :  { %v2390_v15 = vsub.f32 %v2230_v8, %v2310_v7  ;;  %v2232_v7 = vmul.f32 0.0051020407, %v7568_v60  ;;  %v10529_v8 = vld [vmem:[#allocation18_spill] sm:$0xff]  ;;  %v2631_v60 = vadd.f32 0.001, %v2471_v33 }
 0x5f2   :  { %v2470_v56 = vmax.f32 %v2390_v15, 0.0  ;;  %v3718_v15 = vmul.f32 %v7594_v0, %v10529_v8  ;;  %v2392_v26 = vsub.f32 %v2232_v7, %v2312_v31  ;;  %v2233_v0 = vmul.f32 0.0051020407, %v10531_v44 }
 0x5f4   :  { %v2630_v55 = vadd.f32 0.001, %v2470_v56  ;;  %v8155_v56 = vpop.f32.mrb[156].mxu1  ;;  %v2472_v33 = vmax.f32 %v2392_v26, 0.0  ;;  %v2393_v49 = vsub.f32 %v2233_v0, %v2313_v21  ;;  %v10535_v0 = vld [vmem:[#allocation103_spill] sm:$0xff] }
 0x5f5   :  { %v1622_v17 = vpop.f32.mrb[157].mxu1  ;;  %v8190_v21 = vmul.f32 0.0051020407, %v10535_v0  ;;  %v10538_v0 = vld [vmem:[#allocation184_spill] sm:$0xff] }
 0x5f6   :  { %5011 = vrsqrt.f32 %v2630_v55  ;;  %v2549_v55 = vld [vmem:[%s10040_s3 + $0x140] sm:$0xff]  ;;  %v2473_v26 = vmax.f32 %v2393_v49, 0.0  ;;  %v2235_v53 = vmul.f32 0.0051020407, %v10538_v0 }
 0x5f7   :  { %5013 = vrsqrt.f32 %v2631_v60 }
 0x601   :  { %v8136_v58 = vpop.xlane.xlu0 %2167 }
 0x604   :  { %3911 = vperm.xlu0 %4844, %v3237_v1   ;;  %v5010_v1 = vpop.eup %5009 }
 0x605   :  { %v2789_v7 = vmul.f32 %v5010_v1, %v2549_v55  ;;  %v5012_v10 = vpop.eup %5011  ;;  %v10534_v1 = vld [vmem:[#allocation164_spill] sm:$0xff] }
 0x606   :  { %v2234_v44 = vmul.f32 0.0051020407, %v10534_v1  ;;  %v5014_v49 = vpop.eup %5013 }
 0x607   :  { %2187 = vadd.xlane.f32.xlu1 %v7979_v36  ;;  %v2869_v60 = vmul.f32 %v2789_v7, %v8102_v9  ;;  %v5099_v9 = vld [vmem:[%s10040_s3 + $0x48] sm:$0xff] }
 0x608   :  { %3065 = vrot.lane.b32.xlu0 %v2867_v63, %s5155_s17  ;;  %v5098_v63 = vld [vmem:[%s10040_s3 + $0x50] sm:$0xff] }
 0x609   :  { %v3892_v54 = vpop.permute.xlu0 %3891  ;;  %4847 = vset.pattern.permute.xlu0 %v10466_v32  ;;  %v3239_v31 = vsub.f32 %v5098_v63, %v10532_v22 }
 0x60a   :  { %v4277_v36 = vadd.f32 %v3892_v54, %v3717_v41  ;;  %v4278_v27 = vadd.f32 %v3892_v54, %v3718_v15  ;;  %v10533_v41 = vld [vmem:[#allocation100_spill] sm:$0xff]  ;;  %v8177_v15 = vpop.permute.xlu1 %3055  ;;  %v2632_v54 = vadd.f32 0.001, %v2472_v33 }
 0x60b   :  { %v8175_v8 = vmul.f32 0.0051020407, %v10533_v41  ;;  %v10536_v33 = vld [vmem:[#allocation172_spill] sm:$0xff]  ;;  %v2633_v41 = vadd.f32 0.001, %v2473_v26  ;;  %v5100_v26 = vld [vmem:[%s10040_s3 + $0x60] sm:$0xff] }
 0x60c   :  { %4437 = vst [vmem:[%s10041_s4 + $0x40] sm:$0xff] %v4277_v36  ;;  %4438 = vst.msk [vmem:[%s10041_s4 + $0x48] sm:$0xff] %vm1083_vm0, %v4278_v27  ;;  %3506 = vperm.xlu0 %4847, %v2788_v14   ;;  %v2550_v36 = vld [vmem:[%s10040_s3 + $0x148] sm:$0xff]  ;;  %v8184_v27 = vpop.f32.mrb[158].mxu1  ;;  %v3238_v63 = vsub.f32 %v5099_v9, %v10536_v33  ;;  %5015 = vrsqrt.f32 %v2632_v54  ;;  %v2868_v33 = vmul.f32 %v2788_v14, %v8097_v24  ;;  %v8219_v24 = vmul.f32 0.0051020407, %v10542_v19 }
 0x60d   :  { %v2314_v17 = vmul.f32 %v8175_v8, %v8175_v8  ;;  %v1627_v55 = vpop.f32.mrb[159].mxu1  ;;  %5017 = vrsqrt.f32 %v2633_v41 }
 0x60e   :  { %v8197_v22 = vpop.permute.xlu1 %3481  ;;  %v2551_v55 = vld [vmem:[%s10040_s3 + $0x150] sm:$0xff] }
 0x60f   :  { %10537 = vst [vmem:[#allocation97_spill] sm:$0xff] %v8197_v22  ;;  %v2394_v1 = vsub.f32 %v2234_v44, %v2314_v17  ;;  %v2791_v54 = vmul.f32 %v5014_v49, %v2551_v55  ;;  %v3241_v17 = vsub.f32 %v5100_v26, %v7788_v25  ;;  %v10539_v44 = vld [vmem:[#allocation19_spill] sm:$0xff]  ;;  %v10541_v22 = vld [vmem:[#allocation20_spill] sm:$0xff] }
 0x610   :  { %4848 = vset.pattern.permute.xlu0 %v10462_v28  ;;  %v10543_v55 = vld [vmem:[#allocation167_spill] sm:$0xff] }
 0x611   :  { %3921 = vperm.xlu0 %4848, %v3239_v31   ;;  %v2790_v31 = vmul.f32 %v5012_v10, %v2550_v36  ;;  %v2474_v10 = vmax.f32 %v2394_v1, 0.0  ;;  %v2871_v1 = vmul.f32 %v2791_v54, %v8119_v13  ;;  %v2236_v19 = vmul.f32 0.0051020407, %v10543_v55  ;;  %v10544_v13 = vld [vmem:[#allocation109_spill] sm:$0xff] }
 0x613   :  { %v2634_v25 = vadd.f32 0.001, %v2474_v10  ;;  %v10545_v10 = vld [vmem:[#allocation179_spill] sm:$0xff] }
 0x615   :  { %3069 = vrot.lane.b32.xlu0 %v2869_v60, %s5155_s17  ;;  %v2315_v60 = vmul.f32 %v8190_v21, %v8190_v21  ;;  %5019 = vrsqrt.f32 %v2634_v25 }
 0x616   :  { %4851 = vset.pattern.permute.xlu0 %v10466_v32 }
 0x617   :  { %v2395_v36 = vsub.f32 %v2235_v53, %v2315_v60  ;;  %v5016_v60 = vpop.eup %5015 }
 0x618   :  { %3916 = vperm.xlu1 %4846, %v3238_v63   ;;  %v10540_v63 = vld [vmem:[#allocation182_spill] sm:$0xff] }
 0x619   :  { %3516 = vperm.xlu0 %4851, %v2790_v31   ;;  %v3719_v0 = vmul.f32 %v10540_v63, %v10539_v44  ;;  %v3720_v38 = vmul.f32 %v10540_v63, %v10541_v22  ;;  %v2475_v41 = vmax.f32 %v2395_v36, 0.0  ;;  %v2316_v22 = vmul.f32 %v8219_v24, %v8219_v24  ;;  %v5018_v63 = vpop.eup %5017 }
 0x61a   :  { %v8206_v9 = vpop.xlane.xlu1 %2171 }
 0x61b   :  { %v2635_v26 = vadd.f32 0.001, %v2475_v41  ;;  %v2396_v44 = vsub.f32 %v2236_v19, %v2316_v22  ;;  %v10547_v19 = vld [vmem:[#allocation110_spill] sm:$0xff] }
 0x61c   :  { %3067 = vrot.lane.b32.xlu1 %v2868_v33, %s5155_s17  ;;  %v5101_v33 = vld [vmem:[%s10040_s3 + $0x58] sm:$0xff] }
 0x61d   :  { %4852 = vset.pattern.permute.xlu0 %v10462_v28  ;;  %4849 = vset.pattern.permute.xlu1 %v10466_v32  ;;  %v3240_v36 = vsub.f32 %v5101_v33, %v10545_v10  ;;  %5021 = vrsqrt.f32 %v2635_v26  ;;  %v2476_v41 = vmax.f32 %v2396_v44, 0.0  ;;  %v10548_v10 = vld [vmem:[#allocation171_spill] sm:$0xff] }
 0x61e   :  { %v3897_v53 = vpop.permute.xlu1 %3896  ;;  %3931 = vperm.xlu0 %4852, %v3241_v17   ;;  %v10549_v26 = vld [vmem:[#allocation115_spill] sm:$0xff] }
 0x61f   :  { %v4279_v14 = vadd.f32 %v3897_v53, %v3719_v0  ;;  %v4280_v49 = vadd.f32 %v3897_v53, %v3720_v38  ;;  %v2552_v38 = vld [vmem:[%s10040_s3 + $0x158] sm:$0xff]  ;;  %v2553_v0 = vld [vmem:[%s10040_s3 + $0x160] sm:$0xff]  ;;  %v10546_v53 = vld [vmem:[#allocation191_spill] sm:$0xff]  ;;  %v8269_v44 = vmul.f32 0.0051020407, %v10549_v26 }
 0x620   :  { %3511 = vperm.xlu1 %4849, %v2789_v7   ;;  %v8238_v7 = vmul.f32 0.0051020407, %v10544_v13  ;;  %v2792_v17 = vmul.f32 %v5016_v60, %v2552_v38  ;;  %v2793_v25 = vmul.f32 %v5018_v63, %v2553_v0  ;;  %v5102_v60 = vld [vmem:[%s10040_s3 + $0x70] sm:$0xff]  ;;  %v8260_v38 = vmul.f32 0.0051020407, %v10547_v19  ;;  %v5020_v13 = vpop.eup %5019  ;;  %v2554_v63 = vld [vmem:[%s10040_s3 + $0x168] sm:$0xff] }
 0x621   :  { %4439 = vst [vmem:[%s10041_s4 + $0x50] sm:$0xff] %v4279_v14  ;;  %4440 = vst.msk [vmem:[%s10041_s4 + $0x58] sm:$0xff] %vm1083_vm0, %v4280_v49  ;;  %v2237_v14 = vmul.f32 0.0051020407, %v10546_v53  ;;  %v3243_v22 = vsub.f32 %v5102_v60, %v7812_v46  ;;  %v2794_v53 = vmul.f32 %v5020_v13, %v2554_v63  ;;  %v10551_v60 = vld [vmem:[#allocation195_spill] sm:$0xff] }
 0x622   :  { %3073 = vrot.lane.b32.xlu0 %v2871_v1, %s5155_s17  ;;  %v2317_v49 = vmul.f32 %v8238_v7, %v8238_v7  ;;  %v2870_v1 = vmul.f32 %v2790_v31, %v8112_v34  ;;  %v2873_v34 = vmul.f32 %v2793_v25, %v8151_v4  ;;  %v2636_v31 = vadd.f32 0.001, %v2476_v41  ;;  %v5103_v4 = vld [vmem:[%s10040_s3 + $0x68] sm:$0xff] }
 0x623   :  { %4855 = vset.pattern.permute.xlu0 %v10466_v32  ;;  %v2318_v46 = vmul.f32 %v8260_v38, %v8260_v38  ;;  %v2872_v19 = vmul.f32 %v2792_v17, %v8134_v51 }
 0x624   :  { %4850 = vset.pattern.permute.xlu1 %v10462_v28  ;;  %v2397_v55 = vsub.f32 %v2237_v14, %v2317_v49  ;;  %5023 = vrsqrt.f32 %v2636_v31  ;;  %v2555_v49 = vld [vmem:[%s10040_s3 + $0x170] sm:$0xff] }
 0x625   :  { %3926 = vperm.xlu1 %4850, %v3240_v36   ;;  %v2238_v36 = vmul.f32 0.0051020407, %v10548_v10  ;;  %v5104_v10 = vld [vmem:[%s10040_s3 + $0x80] sm:$0xff] }
 0x626   :  { %3526 = vperm.xlu0 %4855, %v2792_v17   ;;  %v2477_v33 = vmax.f32 %v2397_v55, 0.0  ;;  %v2319_v55 = vmul.f32 %v8269_v44, %v8269_v44 }
 0x627   :  { %v5022_v14 = vpop.eup %5021  ;;  %v2398_v41 = vsub.f32 %v2238_v36, %v2318_v46  ;;  %v8292_v46 = vpop.permute.xlu0 %3057  ;;  %v10552_v36 = vld [vmem:[#allocation116_spill] sm:$0xff] }
 0x628   :  { %v8296_v26 = vmul.f32 0.0051020407, %v10552_v36 }
 0x629   :  { %3071 = vrot.lane.b32.xlu1 %v2870_v1, %s5155_s17  ;;  %v2637_v1 = vadd.f32 0.001, %v2477_v33  ;;  %v2478_v31 = vmax.f32 %v2398_v41, 0.0  ;;  %v3245_v33 = vsub.f32 %v5104_v10, %v7842_v48  ;;  %v2241_v10 = vmul.f32 0.0051020407, %v7780_v42 }
 0x62a   :  { %4856 = vset.pattern.permute.xlu0 %v10462_v28  ;;  %4853 = vset.pattern.permute.xlu1 %v10466_v32  ;;  %v2320_v48 = vmul.f32 %v8296_v26, %v8296_v26 }
 0x62b   :  { %3941 = vperm.xlu0 %4856, %v3243_v22   ;;  %v2239_v22 = vmul.f32 0.0051020407, %v10551_v60  ;;  %5025 = vrsqrt.f32 %v2637_v1  ;;  %v2638_v17 = vadd.f32 0.001, %v2478_v31  ;;  %v8310_v41 = vpop.permute.xlu0 %3486 }
 0x62d   :  { %3521 = vperm.xlu1 %4853, %v2791_v54   ;;  %v10550_v54 = vld [vmem:[#allocation185_spill] sm:$0xff]  ;;  %v2399_v13 = vsub.f32 %v2239_v22, %v2319_v55  ;;  %5027 = vrsqrt.f32 %v2638_v17 }
 0x62e   :  { %v3242_v0 = vsub.f32 %v5103_v4, %v10550_v54  ;;  %v5024_v4 = vpop.eup %5023  ;;  %v10553_v54 = vld [vmem:[#allocation176_spill] sm:$0xff] }
 0x62f   :  { %3077 = vrot.lane.b32.xlu0 %v2873_v34, %s5155_s17  ;;  %v2795_v34 = vmul.f32 %v5022_v14, %v2555_v49  ;;  %v2479_v63 = vmax.f32 %v2399_v13, 0.0  ;;  %v2556_v14 = vld [vmem:[%s10040_s3 + $0x178] sm:$0xff]  ;;  %v2557_v13 = vld [vmem:[%s10040_s3 + $0x180] sm:$0xff] }
 0x630   :  { %4859 = vset.pattern.permute.xlu0 %v10466_v32  ;;  %v10554_v49 = vld [vmem:[#allocation121_spill] sm:$0xff]  ;;  %v2796_v55 = vmul.f32 %v5024_v4, %v2556_v14  ;;  %v5106_v4 = vld [vmem:[%s10040_s3 + $0x90] sm:$0xff] }
 0x631   :  { %4854 = vset.pattern.permute.xlu1 %v10462_v28  ;;  %v2875_v51 = vmul.f32 %v2795_v34, %v8190_v21  ;;  %v8308_v1 = vmul.f32 0.0051020407, %v10554_v49  ;;  %v5105_v21 = vld [vmem:[%s10040_s3 + $0x78] sm:$0xff]  ;;  %v2639_v22 = vadd.f32 0.001, %v2479_v63  ;;  %v10559_v49 = vld [vmem:[#allocation22_spill] sm:$0xff] }
 0x632   :  { %3936 = vperm.xlu1 %4854, %v3242_v0   ;;  %v2240_v0 = vmul.f32 0.0051020407, %v10553_v54  ;;  %v10556_v54 = vld [vmem:[#allocation122_spill] sm:$0xff] }
 0x633   :  { %3536 = vperm.xlu0 %4859, %v2794_v53   ;;  %5029 = vrsqrt.f32 %v2639_v22 }
 0x635   :  { %v5026_v31 = vpop.eup %5025 }
 0x636   :  { %3075 = vrot.lane.b32.xlu1 %v2872_v19, %s5155_s17  ;;  %v2400_v19 = vsub.f32 %v2240_v0, %v2320_v48  ;;  %v2797_v17 = vmul.f32 %v5026_v31, %v2557_v13  ;;  %v3247_v48 = vsub.f32 %v5106_v4, %v7858_v52  ;;  %v8334_v0 = vmul.f32 0.0051020407, %v10556_v54  ;;  %v10561_v4 = vld [vmem:[#allocation127_spill] sm:$0xff] }
 0x637   :  { %4860 = vset.pattern.permute.xlu0 %v10462_v28  ;;  %4857 = vset.pattern.permute.xlu1 %v10466_v32  ;;  %v5028_v31 = vpop.eup %5027  ;;  %v8347_v54 = vmul.f32 0.0051020407, %v10561_v4 }
 0x638   :  { %3951 = vperm.xlu0 %4860, %v3245_v33   ;;  %v2321_v33 = vmul.f32 %v8308_v1, %v8308_v1  ;;  %v2480_v63 = vmax.f32 %v2400_v19, 0.0  ;;  %v2877_v52 = vmul.f32 %v2797_v17, %v8238_v7  ;;  %v5107_v7 = vld [vmem:[%s10040_s3 + $0x88] sm:$0xff] }
 0x63a   :  { %3531 = vperm.xlu1 %4857, %v2793_v25   ;;  %v10555_v25 = vld [vmem:[#allocation192_spill] sm:$0xff]  ;;  %v2401_v42 = vsub.f32 %v2241_v10, %v2321_v33  ;;  %v2322_v10 = vmul.f32 %v8334_v0, %v8334_v0  ;;  %v10560_v33 = vld [vmem:[#allocation183_spill] sm:$0xff] }
 0x63b   :  { %v3244_v60 = vsub.f32 %v5105_v21, %v10555_v25 }
 0x63c   :  { %3081 = vrot.lane.b32.xlu0 %v2875_v51, %s5155_s17  ;;  %v2874_v51 = vmul.f32 %v2794_v53, %v8175_v8  ;;  %v10557_v8 = vld [vmem:[#allocation21_spill] sm:$0xff]  ;;  %v10558_v53 = vld [vmem:[#allocation166_spill] sm:$0xff]  ;;  %v2481_v13 = vmax.f32 %v2401_v42, 0.0 }
 0x63d   :  { %4863 = vset.pattern.permute.xlu0 %v10466_v32  ;;  %v3721_v14 = vmul.f32 %v10558_v53, %v10557_v8  ;;  %v3722_v21 = vmul.f32 %v10558_v53, %v10559_v49  ;;  %v5030_v8 = vpop.eup %5029  ;;  %v2559_v53 = vld [vmem:[%s10040_s3 + $0x190] sm:$0xff] }
 0x63e   :  { %4858 = vset.pattern.permute.xlu1 %v10462_v28  ;;  %v8325_v36 = vpop.xlane.xlu0 %2175 }
 0x63f   :  { %3946 = vperm.xlu1 %4858, %v3244_v60   ;;  %v2640_v60 = vadd.f32 0.001, %v2480_v63 }
 0x640   :  { %3546 = vperm.xlu0 %4863, %v2796_v55  }
 0x641   :  { %5031 = vrsqrt.f32 %v2640_v60  ;;  %v2876_v60 = vmul.f32 %v2796_v55, %v8219_v24 }
 0x643   :  { %3079 = vrot.lane.b32.xlu1 %v2874_v51, %s5155_s17  ;;  %v2242_v51 = vmul.f32 0.0051020407, %v10560_v33 }
 0x644   :  { %4864 = vset.pattern.permute.xlu0 %v10462_v28  ;;  %4861 = vset.pattern.permute.xlu1 %v10466_v32 }
 0x645   :  { %3961 = vperm.xlu0 %4864, %v3247_v48   ;;  %v2558_v48 = vld [vmem:[%s10040_s3 + $0x188] sm:$0xff]  ;;  %v2402_v49 = vsub.f32 %v2242_v51, %v2322_v10 }
 0x646   :  { %v3902_v25 = vpop.permute.xlu0 %3901  ;;  %v2798_v42 = vmul.f32 %v5028_v31, %v2558_v48 }
 0x647   :  { %v4281_v22 = vadd.f32 %v3902_v25, %v3721_v14  ;;  %v4282_v19 = vadd.f32 %v3902_v25, %v3722_v21  ;;  %3541 = vperm.xlu1 %4861, %v2795_v34   ;;  %v10562_v34 = vld [vmem:[#allocation200_spill] sm:$0xff]  ;;  %v2641_v14 = vadd.f32 0.001, %v2481_v13  ;;  %v2243_v21 = vmul.f32 0.0051020407, %v7804_v45  ;;  %v5108_v13 = vld [vmem:[%s10040_s3 + $0xa0] sm:$0xff] }
 0x648   :  { %v3246_v63 = vsub.f32 %v5107_v7, %v10562_v34  ;;  %v2323_v25 = vmul.f32 %v8347_v54, %v8347_v54  ;;  %v3249_v10 = vsub.f32 %v5108_v13, %v7885_v62  ;;  %v10563_v45 = vld [vmem:[#allocation128_spill] sm:$0xff]  ;;  %v10564_v7 = vld [vmem:[#allocation190_spill] sm:$0xff] }
 0x649   :  { %4441 = vst [vmem:[%s10041_s4 + $0x60] sm:$0xff] %v4281_v22  ;;  %4442 = vst.msk [vmem:[%s10041_s4 + $0x68] sm:$0xff] %vm1083_vm0, %v4282_v19  ;;  %3085 = vrot.lane.b32.xlu0 %v2877_v52, %s5155_s17  ;;  %v8372_v52 = vpop.permute.xlu1 %3059  ;;  %v2799_v22 = vmul.f32 %v5030_v8, %v2559_v53  ;;  %5033 = vrsqrt.f32 %v2641_v14  ;;  %v2482_v19 = vmax.f32 %v2402_v49, 0.0  ;;  %v8381_v33 = vmul.f32 0.0051020407, %v10563_v45  ;;  %v10565_v8 = vld [vmem:[#allocation133_spill] sm:$0xff] }
 0x64a   :  { %4867 = vset.pattern.permute.xlu0 %v10466_v32  ;;  %v2403_v31 = vsub.f32 %v2243_v21, %v2323_v25  ;;  %v2244_v34 = vmul.f32 0.0051020407, %v10564_v7  ;;  %v8395_v53 = vmul.f32 0.0051020407, %v10565_v8  ;;  %v10568_v13 = vld [vmem:[#allocation188_spill] sm:$0xff]  ;;  %v2561_v7 = vld [vmem:[%s10040_s3 + $0x1a0] sm:$0xff] }
 0x64b   :  { %4862 = vset.pattern.permute.xlu1 %v10462_v28  ;;  %v2879_v55 = vmul.f32 %v2799_v22, %v8269_v44  ;;  %v2642_v51 = vadd.f32 0.001, %v2482_v19  ;;  %v5032_v48 = vpop.eup %5031  ;;  %v2324_v62 = vmul.f32 %v8381_v33, %v8381_v33  ;;  %v5109_v44 = vld [vmem:[%s10040_s3 + $0x98] sm:$0xff]  ;;  %v10569_v45 = vld [vmem:[#allocation24_spill] sm:$0xff] }
 0x64c   :  { %3956 = vperm.xlu1 %4862, %v3246_v63   ;;  %v2483_v4 = vmax.f32 %v2403_v31, 0.0  ;;  %v2560_v63 = vld [vmem:[%s10040_s3 + $0x198] sm:$0xff]  ;;  %v10567_v31 = vld [vmem:[#allocation23_spill] sm:$0xff]  ;;  %v10570_v8 = vld [vmem:[#allocation212_spill] sm:$0xff] }
 0x64d   :  { %3556 = vperm.xlu0 %4867, %v2798_v42   ;;  %v8385_v24 = vpop.permute.xlu1 %3491  ;;  %5035 = vrsqrt.f32 %v2642_v51  ;;  %v2800_v25 = vmul.f32 %v5032_v48, %v2560_v63  ;;  %v2325_v51 = vmul.f32 %v8395_v53, %v8395_v53  ;;  %v2878_v48 = vmul.f32 %v2798_v42, %v8260_v38 }
 0x64e   :  { %v2643_v21 = vadd.f32 0.001, %v2483_v4 }
 0x650   :  { %3083 = vrot.lane.b32.xlu1 %v2876_v60, %s5155_s17  ;;  %v2404_v60 = vsub.f32 %v2244_v34, %v2324_v62  ;;  %5037 = vrsqrt.f32 %v2643_v21 }
 0x651   :  { %4868 = vset.pattern.permute.xlu0 %v10462_v28  ;;  %4865 = vset.pattern.permute.xlu1 %v10466_v32 }
 0x652   :  { %3971 = vperm.xlu0 %4868, %v3249_v10   ;;  %v3723_v10 = vmul.f32 %v10568_v13, %v10567_v31 }
 0x653   :  { %v5034_v19 = vpop.eup %5033 }
 0x654   :  { %3551 = vperm.xlu1 %4865, %v2797_v17   ;;  %v10566_v17 = vld [vmem:[#allocation204_spill] sm:$0xff]  ;;  %v2801_v63 = vmul.f32 %v5034_v19, %v2561_v7 }
 0x655   :  { %v3248_v14 = vsub.f32 %v5109_v44, %v10566_v17  ;;  %v2245_v44 = vmul.f32 0.0051020407, %v10570_v8  ;;  %v2484_v17 = vmax.f32 %v2404_v60, 0.0  ;;  %v10572_v19 = vld [vmem:[#allocation196_spill] sm:$0xff] }
 0x656   :  { %3089 = vrot.lane.b32.xlu0 %v2879_v55, %s5155_s17  ;;  %v3724_v55 = vmul.f32 %v10568_v13, %v10569_v45  ;;  %v10571_v45 = vld [vmem:[#allocation134_spill] sm:$0xff] }
 0x657   :  { %v8402_v49 = vpop.xlane.xlu1 %2179  ;;  %4871 = vset.pattern.permute.xlu0 %v10466_v32  ;;  %v2405_v13 = vsub.f32 %v2245_v44, %v2325_v51  ;;  %v8423_v8 = vmul.f32 0.0051020407, %v10571_v45  ;;  %v2644_v38 = vadd.f32 0.001, %v2484_v17  ;;  %v5036_v42 = vpop.eup %5035  ;;  %v2562_v44 = vld [vmem:[%s10040_s3 + $0x1a8] sm:$0xff]  ;;  %v2880_v45 = vmul.f32 %v2800_v25, %v8296_v26 }
 0x658   :  { %4866 = vset.pattern.permute.xlu1 %v10462_v28 }
 0x659   :  { %3966 = vperm.xlu1 %4866, %v3248_v14   ;;  %v5110_v14 = vld [vmem:[%s10040_s3 + $0xb0] sm:$0xff]  ;;  %v2485_v21 = vmax.f32 %v2405_v13, 0.0  ;;  %v2326_v60 = vmul.f32 %v8423_v8, %v8423_v8  ;;  %5039 = vrsqrt.f32 %v2644_v38 }
 0x65a   :  { %3566 = vperm.xlu0 %4871, %v2800_v25   ;;  %v3251_v31 = vsub.f32 %v5110_v14, %v7906_v29  ;;  %v2881_v29 = vmul.f32 %v2801_v63, %v8308_v1  ;;  %v5111_v1 = vld [vmem:[%s10040_s3 + $0xa8] sm:$0xff] }
 0x65b   :  { %v3907_v4 = vpop.permute.xlu1 %3906  ;;  %v10575_v14 = vld [vmem:[#allocation219_spill] sm:$0xff] }
 0x65c   :  { %v4283_v62 = vadd.f32 %v3907_v4, %v3723_v10  ;;  %v4284_v34 = vadd.f32 %v3907_v4, %v3724_v55  ;;  %v2246_v10 = vmul.f32 0.0051020407, %v10572_v19  ;;  %v10573_v55 = vld [vmem:[#allocation139_spill] sm:$0xff]  ;;  %v2802_v4 = vmul.f32 %v5036_v42, %v2562_v44  ;;  %v5112_v19 = vld [vmem:[%s10040_s3 + $0xc0] sm:$0xff] }
 0x65d   :  { %3087 = vrot.lane.b32.xlu1 %v2878_v48, %s5155_s17  ;;  %v8439_v7 = vmul.f32 0.0051020407, %v10573_v55  ;;  %v5038_v48 = vpop.eup %5037 }
 0x65e   :  { %4443 = vst [vmem:[%s10041_s4 + $0x70] sm:$0xff] %v4283_v62  ;;  %4444 = vst.msk [vmem:[%s10041_s4 + $0x78] sm:$0xff] %vm1083_vm0, %v4284_v34  ;;  %4872 = vset.pattern.permute.xlu0 %v10462_v28  ;;  %4869 = vset.pattern.permute.xlu1 %v10466_v32  ;;  %v2563_v62 = vld [vmem:[%s10040_s3 + $0x1b0] sm:$0xff]  ;;  %v2645_v34 = vadd.f32 0.001, %v2485_v21  ;;  %v2406_v17 = vsub.f32 %v2246_v10, %v2326_v60  ;;  %v3253_v21 = vsub.f32 %v5112_v19, %v7935_v16  ;;  %v10577_v16 = vld [vmem:[#allocation203_spill] sm:$0xff] }
 0x65f   :  { %3981 = vperm.xlu0 %4872, %v3251_v31   ;;  %v2247_v31 = vmul.f32 0.0051020407, %v10575_v14  ;;  %v2327_v13 = vmul.f32 %v8439_v7, %v8439_v7  ;;  %v10576_v60 = vld [vmem:[#allocation140_spill] sm:$0xff] }
 0x660   :  { %5041 = vrsqrt.f32 %v2645_v34  ;;  %v2486_v38 = vmax.f32 %v2406_v17, 0.0  ;;  %v8464_v10 = vmul.f32 0.0051020407, %v10576_v60  ;;  %v2882_v60 = vmul.f32 %v2802_v4, %v8334_v0 }
 0x661   :  { %3561 = vperm.xlu1 %4869, %v2799_v22   ;;  %v10574_v22 = vld [vmem:[#allocation211_spill] sm:$0xff]  ;;  %v2407_v42 = vsub.f32 %v2247_v31, %v2327_v13  ;;  %v10580_v13 = vld [vmem:[#allocation225_spill] sm:$0xff] }
 0x662   :  { %v3250_v51 = vsub.f32 %v5111_v1, %v10574_v22  ;;  %v2646_v25 = vadd.f32 0.001, %v2486_v38  ;;  %v2328_v1 = vmul.f32 %v8464_v10, %v8464_v10  ;;  %v2248_v22 = vmul.f32 0.0051020407, %v10577_v16  ;;  %v5114_v16 = vld [vmem:[%s10040_s3 + $0xd0] sm:$0xff] }
 0x663   :  { %3093 = vrot.lane.b32.xlu0 %v2881_v29, %s5155_s17  ;;  %v2803_v29 = vmul.f32 %v5038_v48, %v2563_v62  ;;  %v2487_v55 = vmax.f32 %v2407_v42, 0.0  ;;  %v5040_v44 = vpop.eup %5039  ;;  %v2564_v62 = vld [vmem:[%s10040_s3 + $0x1b8] sm:$0xff]  ;;  %v8488_v42 = vpop.permute.xlu0 %3061 }
 0x664   :  { %4875 = vset.pattern.permute.xlu0 %v10466_v32  ;;  %5043 = vrsqrt.f32 %v2646_v25  ;;  %v2804_v14 = vmul.f32 %v5040_v44, %v2564_v62  ;;  %v2408_v31 = vsub.f32 %v2248_v22, %v2328_v1  ;;  %v3255_v22 = vsub.f32 %v5114_v16, %v7961_v37 }
 0x665   :  { %4870 = vset.pattern.permute.xlu1 %v10462_v28  ;;  %v2883_v26 = vmul.f32 %v2803_v29, %v8347_v54  ;;  %v5113_v54 = vld [vmem:[%s10040_s3 + $0xb8] sm:$0xff]  ;;  %v2647_v17 = vadd.f32 0.001, %v2487_v55 }
 0x666   :  { %3976 = vperm.xlu1 %4870, %v3250_v51   ;;  %v10578_v51 = vld [vmem:[#allocation145_spill] sm:$0xff]  ;;  %v2488_v44 = vmax.f32 %v2408_v31, 0.0 }
 0x667   :  { %3576 = vperm.xlu0 %4875, %v2802_v4   ;;  %v8473_v48 = vmul.f32 0.0051020407, %v10578_v51  ;;  %5045 = vrsqrt.f32 %v2647_v17  ;;  %v8504_v0 = vpop.permute.xlu0 %3496  ;;  %v10584_v17 = vld [vmem:[#allocation151_spill] sm:$0xff] }
 0x668   :  { %10582 = vst [vmem:[#allocation98_spill] sm:$0xff] %v8504_v0  ;;  %v2648_v62 = vadd.f32 0.001, %v2488_v44  ;;  %v8511_v31 = vmul.f32 0.0051020407, %v10584_v17  ;;  %v2567_v44 = vld [vmem:[%s10040_s3 + $0x1d0] sm:$0xff] }
 0x669   :  { %v2329_v38 = vmul.f32 %v8473_v48, %v8473_v48  ;;  %v10589_v17 = vld [vmem:[#allocation152_spill] sm:$0xff] }
 0x66a   :  { %3091 = vrot.lane.b32.xlu1 %v2880_v45, %s5155_s17  ;;  %v2249_v45 = vmul.f32 0.0051020407, %v10580_v13  ;;  %v5042_v19 = vpop.eup %5041  ;;  %v2566_v13 = vld [vmem:[%s10040_s3 + $0x1c8] sm:$0xff]  ;;  %5047 = vrsqrt.f32 %v2648_v62  ;;  %v2331_v16 = vmul.f32 %v8511_v31, %v8511_v31 }
 0x66b   :  { %4876 = vset.pattern.permute.xlu0 %v10462_v28  ;;  %4873 = vset.pattern.permute.xlu1 %v10466_v32 }
 0x66c   :  { %3991 = vperm.xlu0 %4876, %v3253_v21   ;;  %v2565_v21 = vld [vmem:[%s10040_s3 + $0x1c0] sm:$0xff]  ;;  %v2409_v1 = vsub.f32 %v2249_v45, %v2329_v38 }
 0x66d   :  { %v2805_v55 = vmul.f32 %v5042_v19, %v2565_v21  ;;  %v10585_v38 = vld [vmem:[#allocation226_spill] sm:$0xff] }
 0x66e   :  { %3571 = vperm.xlu1 %4873, %v2801_v63   ;;  %v10579_v63 = vld [vmem:[#allocation218_spill] sm:$0xff]  ;;  %v5044_v37 = vpop.eup %5043 }
 0x66f   :  { %v3252_v34 = vsub.f32 %v5113_v54, %v10579_v63  ;;  %v2885_v51 = vmul.f32 %v2805_v55, %v8395_v53  ;;  %v2489_v54 = vmax.f32 %v2409_v1, 0.0  ;;  %v10583_v63 = vld [vmem:[#allocation209_spill] sm:$0xff]  ;;  %v5115_v53 = vld [vmem:[%s10040_s3 + $0xc8] sm:$0xff]  ;;  %v2251_v1 = vmul.f32 0.0051020407, %v7899_v12 }
 0x670   :  { %3097 = vrot.lane.b32.xlu0 %v2883_v26, %s5155_s17  ;;  %v10581_v26 = vld [vmem:[#allocation146_spill] sm:$0xff]  ;;  %v3254_v19 = vsub.f32 %v5115_v53, %v10585_v38 }
 0x671   :  { %4879 = vset.pattern.permute.xlu0 %v10466_v32  ;;  %v8495_v25 = vmul.f32 0.0051020407, %v10581_v26  ;;  %v5046_v26 = vpop.eup %5045  ;;  %v2411_v53 = vsub.f32 %v2251_v1, %v2331_v16  ;;  %v5116_v38 = vld [vmem:[%s10040_s3 + $0xe0] sm:$0xff]  ;;  %v10591_v16 = vld [vmem:[#allocation157_spill] sm:$0xff] }
 0x672   :  { %4874 = vset.pattern.permute.xlu1 %v10462_v28 }
 0x673   :  { %3986 = vperm.xlu1 %4874, %v3252_v34   ;;  %v2330_v4 = vmul.f32 %v8495_v25, %v8495_v25  ;;  %v2250_v34 = vmul.f32 0.0051020407, %v10583_v63  ;;  %v2884_v63 = vmul.f32 %v2804_v14, %v8381_v33 }
 0x674   :  { %3586 = vperm.xlu0 %4879, %v2804_v14   ;;  %v5048_v1 = vpop.eup %5047 }
 0x675   :  { %v2410_v21 = vsub.f32 %v2250_v34, %v2330_v4  ;;  %v8536_v34 = vmul.f32 %v5046_v26, %v2567_v44  ;;  %v10590_v26 = vld [vmem:[#allocation216_spill] sm:$0xff] }
 0x676   :  { %v2252_v44 = vmul.f32 0.0051020407, %v10590_v26 }
 0x677   :  { %3095 = vrot.lane.b32.xlu1 %v2882_v60, %s5155_s17  ;;  %v2806_v60 = vmul.f32 %v5044_v37, %v2566_v13  ;;  %v2490_v37 = vmax.f32 %v2410_v21, 0.0  ;;  %v8539_v13 = vmul.f32 0.0051020407, %v10589_v17  ;;  %v2887_v14 = vmul.f32 %v8536_v34, %v8439_v7  ;;  %v5117_v7 = vld [vmem:[%s10040_s3 + $0xd8] sm:$0xff] }
 0x678   :  { %4880 = vset.pattern.permute.xlu0 %v10462_v28  ;;  %4877 = vset.pattern.permute.xlu1 %v10466_v32 }
 0x679   :  { %4001 = vperm.xlu0 %4880, %v3255_v22   ;;  %v10586_v22 = vld [vmem:[#allocation25_spill] sm:$0xff]  ;;  %v2650_v33 = vadd.f32 0.001, %v2490_v37  ;;  %v2332_v21 = vmul.f32 %v8539_v13, %v8539_v13 }
 0x67b   :  { %3581 = vperm.xlu1 %4877, %v2803_v29   ;;  %v8517_v45 = vpop.xlane.xlu0 %2183  ;;  %v2649_v29 = vadd.f32 0.001, %v2489_v54  ;;  %v10588_v54 = vld [vmem:[#allocation26_spill] sm:$0xff] }
 0x67d   :  { %3101 = vrot.lane.b32.xlu0 %v2885_v51, %s5155_s17  ;;  %v10587_v51 = vld [vmem:[#allocation170_spill] sm:$0xff]  ;;  %5049 = vrsqrt.f32 %v2649_v29  ;;  %v2491_v29 = vmax.f32 %v2411_v53, 0.0  ;;  %v2253_v53 = vmul.f32 0.0051020407, %v7920_v59 }
 0x67e   :  { %4883 = vset.pattern.permute.xlu0 %v10466_v32  ;;  %v3725_v62 = vmul.f32 %v10587_v51, %v10586_v22  ;;  %v3726_v4 = vmul.f32 %v10587_v51, %v10588_v54  ;;  %v8563_v51 = vmul.f32 0.0051020407, %v10591_v16  ;;  %5051 = vrsqrt.f32 %v2650_v33  ;;  %v10595_v33 = vld [vmem:[#allocation30_spill] sm:$0xff] }
 0x67f   :  { %4878 = vset.pattern.permute.xlu1 %v10462_v28  ;;  %v3256_v54 = vsub.f32 %v5117_v7, %v7903_v30  ;;  %v5118_v7 = vld [vmem:[%s10040_s3 + $0xf0] sm:$0xff] }
 0x680   :  { %3996 = vperm.xlu1 %4878, %v3254_v19   ;;  %v3257_v19 = vsub.f32 %v5116_v38, %v7981_v35  ;;  %v2333_v30 = vmul.f32 %v8563_v51, %v8563_v51  ;;  %v10593_v38 = vld [vmem:[#allocation29_spill] sm:$0xff] }
 0x681   :  { %3596 = vperm.xlu0 %4883, %v2806_v60  }
 0x683   :  { %v3912_v12 = vpop.permute.xlu0 %3911 }
 0x684   :  { %v4285_v22 = vadd.f32 %v3912_v12, %v3725_v62  ;;  %v4286_v0 = vadd.f32 %v3912_v12, %v3726_v4  ;;  %3099 = vrot.lane.b32.xlu1 %v2884_v63, %s5155_s17  ;;  %v8568_v62 = vpop.permute.xlu1 %3063  ;;  %v2651_v4 = vadd.f32 0.001, %v2491_v29  ;;  %v2412_v63 = vsub.f32 %v2252_v44, %v2332_v21  ;;  %v2569_v12 = vld [vmem:[%s10040_s3 + $0x1e0] sm:$0xff] }
 0x685   :  { %4884 = vset.pattern.permute.xlu0 %v10462_v28  ;;  %4881 = vset.pattern.permute.xlu1 %v10466_v32  ;;  %v2886_v29 = vmul.f32 %v2806_v60, %v8423_v8  ;;  %v10596_v44 = vld [vmem:[#allocation158_spill] sm:$0xff] }
 0x686   :  { %4445 = vst [vmem:[%s10041_s4 + $0x80] sm:$0xff] %v4285_v22  ;;  %4446 = vst.msk [vmem:[%s10041_s4 + $0x88] sm:$0xff] %vm1083_vm0, %v4286_v0  ;;  %4011 = vperm.xlu0 %4884, %v3257_v19   ;;  %v2568_v0 = vld [vmem:[%s10040_s3 + $0x1d8] sm:$0xff]  ;;  %v10594_v19 = vld [vmem:[#allocation175_spill] sm:$0xff]  ;;  %5053 = vrsqrt.f32 %v2651_v4  ;;  %v2492_v26 = vmax.f32 %v2412_v63, 0.0 }
 0x687   :  { %v8555_v35 = vpop.permute.xlu0 %3065  ;;  %v8579_v37 = vmul.f32 %v5048_v1, %v2568_v0  ;;  %v5050_v17 = vpop.eup %5049  ;;  %v3729_v22 = vmul.f32 %v10594_v19, %v10593_v38  ;;  %v8596_v59 = vmul.f32 0.0051020407, %v10596_v44  ;;  %v2413_v0 = vsub.f32 %v2253_v53, %v2333_v30  ;;  %v10597_v53 = vld [vmem:[#allocation221_spill] sm:$0xff] }
 0x688   :  { %3591 = vperm.xlu1 %4881, %v2805_v55   ;;  %v8593_v21 = vmul.f32 %v5050_v17, %v2569_v12  ;;  %v8598_v1 = vpop.permute.xlu1 %3501  ;;  %v5052_v4 = vpop.eup %5051  ;;  %v2652_v17 = vadd.f32 0.001, %v2492_v26  ;;  %v2254_v30 = vmul.f32 0.0051020407, %v10597_v53  ;;  %v10600_v44 = vld [vmem:[#allocation193_spill] sm:$0xff]  ;;  %v5119_v26 = vld [vmem:[%s10040_s3 + $0xe8] sm:$0xff] }
 0x689   :  { %v2493_v12 = vmax.f32 %v2413_v0, 0.0 }
 0x68a   :  { %3105 = vrot.lane.b32.xlu0 %v2887_v14, %s5155_s17  ;;  %v3730_v14 = vmul.f32 %v10594_v19, %v10595_v33  ;;  %v2889_v63 = vmul.f32 %v8593_v21, %v8473_v48  ;;  %v10598_v33 = vld [vmem:[#allocation163_spill] sm:$0xff]  ;;  %5055 = vrsqrt.f32 %v2652_v17 }
 0x68b   :  { %v8575_v55 = vpop.permute.xlu0 %3506  ;;  %4887 = vset.pattern.permute.xlu0 %v10466_v32 }
 0x68c   :  { %10592 = vst [vmem:[#allocation17_spill] sm:$0xff] %v8575_v55  ;;  %4882 = vset.pattern.permute.xlu1 %v10462_v28 }
 0x68d   :  { %4006 = vperm.xlu1 %4882, %v3256_v54   ;;  %v3259_v54 = vsub.f32 %v5118_v7, %v8003_v61  ;;  %v2334_v61 = vmul.f32 %v8596_v59, %v8596_v59  ;;  %v10601_v7 = vld [vmem:[#allocation28_spill] sm:$0xff] }
 0x68e   :  { %3606 = vperm.xlu0 %4887, %v8579_v37   ;;  %v3728_v48 = vmul.f32 %v10600_v44, %v10601_v7 }
 0x68f   :  { %v2414_v53 = vsub.f32 %v2254_v30, %v2334_v61  ;;  %v10603_v61 = vld [vmem:[#allocation3_spill] sm:$0xff] }
 0x690   :  { %v3922_v16 = vpop.permute.xlu0 %3921 }
 0x691   :  { %v4289_v38 = vadd.f32 %v3922_v16, %v3729_v22  ;;  %v4290_v19 = vadd.f32 %v3922_v16, %v3730_v14  ;;  %3103 = vrot.lane.b32.xlu1 %v2886_v29, %s5155_s17  ;;  %v2570_v22 = vld [vmem:[%s10040_s3 + $0x1e8] sm:$0xff]  ;;  %v8628_v14 = vmul.f32 0.0051020407, %v10598_v33  ;;  %v5054_v33 = vpop.eup %5053 }
 0x692   :  { %4888 = vset.pattern.permute.xlu0 %v10462_v28  ;;  %4885 = vset.pattern.permute.xlu1 %v10466_v32  ;;  %v10599_v29 = vld [vmem:[#allocation27_spill] sm:$0xff] }
 0x693   :  { %4449 = vst [vmem:[%s10041_s4 + $0xa0] sm:$0xff] %v4289_v38  ;;  %4450 = vst.msk [vmem:[%s10041_s4 + $0xa8] sm:$0xff] %vm1083_vm0, %v4290_v19  ;;  %4021 = vperm.xlu0 %4888, %v3259_v54   ;;  %v3727_v16 = vmul.f32 %v10600_v44, %v10599_v29  ;;  %v8642_v38 = vmul.f32 %v5052_v4, %v2570_v22  ;;  %v2653_v19 = vadd.f32 0.001, %v2493_v12  ;;  %v2571_v29 = vld [vmem:[%s10040_s3 + $0x1f0] sm:$0xff] }
 0x694   :  { %v8616_v8 = vpop.permute.xlu0 %3069  ;;  %v8618_v60 = vpop.xlane.xlu1 %2187  ;;  %v2335_v44 = vmul.f32 %v8628_v14, %v8628_v14  ;;  %v10604_v4 = vld [vmem:[#allocation180_spill] sm:$0xff]  ;;  %v2888_v22 = vmul.f32 %v8579_v37, %v8464_v10 }
 0x695   :  { %3601 = vperm.xlu1 %4885, %v8536_v34   ;;  %v3258_v34 = vsub.f32 %v5119_v26, %v7925_v40  ;;  %v2255_v40 = vmul.f32 0.0051020407, %v7957_v47  ;;  %v3733_v17 = vmul.f32 %v10604_v4, %v10603_v61  ;;  %v10605_v12 = vld [vmem:[#allocation4_spill] sm:$0xff]  ;;  %5057 = vrsqrt.f32 %v2653_v19  ;;  %v10606_v26 = vld [vmem:[#allocation165_spill] sm:$0xff]  ;;  %v5120_v61 = vld [vmem:[%s10040_s3 + $0x100] sm:$0xff] }
 0x696   :  { %v3734_v30 = vmul.f32 %v10604_v4, %v10605_v12 }
 0x697   :  { %3109 = vrot.lane.b32.xlu0 %v2889_v63, %s5155_s17 }
 0x698   :  { %v8639_v0 = vpop.permute.xlu0 %3516  ;;  %v3917_v54 = vpop.permute.xlu1 %3916  ;;  %4891 = vset.pattern.permute.xlu0 %v10466_v32 }
 0x699   :  { %10602 = vst [vmem:[#allocation18_spill] sm:$0xff] %v8639_v0  ;;  %v4287_v63 = vadd.f32 %v3917_v54, %v3727_v16  ;;  %4886 = vset.pattern.permute.xlu1 %v10462_v28  ;;  %v4288_v7 = vadd.f32 %v3917_v54, %v3728_v48  ;;  %v8667_v16 = vmul.f32 %v5054_v33, %v2571_v29  ;;  %v2494_v48 = vmax.f32 %v2414_v53, 0.0  ;;  %v10607_v29 = vld [vmem:[#allocation229_spill] sm:$0xff] }
 0x69a   :  { %4016 = vperm.xlu1 %4886, %v3258_v34   ;;  %v8670_v34 = vmul.f32 0.0051020407, %v10606_v26  ;;  %v10610_v26 = vld [vmem:[#allocation2_spill] sm:$0xff] }
 0x69b   :  { %4447 = vst [vmem:[%s10041_s4 + $0x90] sm:$0xff] %v4287_v63  ;;  %3616 = vperm.xlu0 %4891, %v8642_v38   ;;  %4448 = vst.msk [vmem:[%s10041_s4 + $0x98] sm:$0xff] %vm1083_vm0, %v4288_v7  ;;  %v2415_v63 = vsub.f32 %v2255_v40, %v2335_v44  ;;  %v3261_v7 = vsub.f32 %v5120_v61, %v8122_v39  ;;  %v2891_v19 = vmul.f32 %v8667_v16, %v8511_v31  ;;  %v5056_v44 = vpop.eup %5055  ;;  %v10611_v61 = vld [vmem:[#allocation178_spill] sm:$0xff]  ;;  %v2572_v31 = vld [vmem:[%s10040_s3 + $0x1f8] sm:$0xff] }
 0x69c   :  { %v8663_v47 = vpop.permute.xlu1 %3067  ;;  %v2336_v39 = vmul.f32 %v8670_v34, %v8670_v34  ;;  %v2654_v53 = vadd.f32 0.001, %v2494_v48  ;;  %v2256_v40 = vmul.f32 0.0051020407, %v10607_v29 }
 0x69d   :  { %v3932_v54 = vpop.permute.xlu0 %3931  ;;  %v2495_v33 = vmax.f32 %v2415_v63, 0.0 }
 0x69e   :  { %v4293_v4 = vadd.f32 %v3932_v54, %v3733_v17  ;;  %v4294_v12 = vadd.f32 %v3932_v54, %v3734_v30  ;;  %3107 = vrot.lane.b32.xlu1 %v2888_v22, %s5155_s17  ;;  %v10608_v17 = vld [vmem:[#allocation31_spill] sm:$0xff]  ;;  %v10609_v30 = vld [vmem:[#allocation201_spill] sm:$0xff]  ;;  %5059 = vrsqrt.f32 %v2654_v53 }
 0x69f   :  { %4892 = vset.pattern.permute.xlu0 %v10462_v28  ;;  %4889 = vset.pattern.permute.xlu1 %v10466_v32  ;;  %v3731_v22 = vmul.f32 %v10609_v30, %v10608_v17  ;;  %v3732_v54 = vmul.f32 %v10609_v30, %v10610_v26  ;;  %v2655_v17 = vadd.f32 0.001, %v2495_v33  ;;  %v2416_v30 = vsub.f32 %v2256_v40, %v2336_v39  ;;  %v10614_v53 = vld [vmem:[#allocation7_spill] sm:$0xff]  ;;  %v10615_v33 = vld [vmem:[#allocation186_spill] sm:$0xff] }
 0x6a0   :  { %4453 = vst [vmem:[%s10041_s4 + $0xc0] sm:$0xff] %v4293_v4  ;;  %4454 = vst.msk [vmem:[%s10041_s4 + $0xc8] sm:$0xff] %vm1083_vm0, %v4294_v12  ;;  %4031 = vperm.xlu0 %4892, %v3261_v7   ;;  %v8686_v10 = vpop.permute.xlu1 %3511  ;;  %v8701_v7 = vmul.f32 0.0051020407, %v10611_v61  ;;  %v8715_v26 = vmul.f32 %v5056_v44, %v2572_v31  ;;  %v8720_v61 = vld [vmem:[%s10040_s3 + $0x200] sm:$0xff]  ;;  %v3737_v40 = vmul.f32 %v10615_v33, %v10614_v53  ;;  %v10616_v44 = vld [vmem:[#allocation8_spill] sm:$0xff] }
 0x6a1   :  { %v8690_v37 = vpop.permute.xlu0 %3073  ;;  %v3738_v31 = vmul.f32 %v10615_v33, %v10616_v44  ;;  %5061 = vrsqrt.f32 %v2655_v17  ;;  %v5122_v53 = vld [vmem:[%s10040_s3 + $0x110] sm:$0xff] }
 0x6a2   :  { %3611 = vperm.xlu1 %4889, %v8593_v21   ;;  %v5121_v21 = vld [vmem:[%s10040_s3 + $0xf8] sm:$0xff]  ;;  %v3263_v0 = vsub.f32 %v5122_v53, %v8292_v46 }
 0x6a3   :  { %v3260_v63 = vsub.f32 %v5121_v21, %v8031_v3  ;;  %v10613_v3 = vld [vmem:[#allocation239_spill] sm:$0xff]  ;;  %v10623_v53 = vld [vmem:[#allocation205_spill] sm:$0xff] }
 0x6a4   :  { %3113 = vrot.lane.b32.xlu0 %v2891_v19, %s5155_s17  ;;  %v3927_v48 = vpop.permute.xlu1 %3926  ;;  %v5058_v19 = vpop.eup %5057 }
 0x6a5   :  { %v4291_v4 = vadd.f32 %v3927_v48, %v3731_v22  ;;  %v4292_v12 = vadd.f32 %v3927_v48, %v3732_v54  ;;  %v8711_v29 = vpop.permute.xlu0 %3526  ;;  %4895 = vset.pattern.permute.xlu0 %v10466_v32  ;;  %v2257_v22 = vmul.f32 0.0051020407, %v10613_v3  ;;  %v2337_v54 = vmul.f32 %v8701_v7, %v8701_v7 }
 0x6a6   :  { %10612 = vst [vmem:[#allocation99_spill] sm:$0xff] %v8711_v29  ;;  %4890 = vset.pattern.permute.xlu1 %v10462_v28  ;;  %v2890_v48 = vmul.f32 %v8642_v38, %v8495_v25  ;;  %v8742_v21 = vmul.f32 %v5058_v19, %v8720_v61 }
 0x6a7   :  { %4451 = vst [vmem:[%s10041_s4 + $0xb0] sm:$0xff] %v4291_v4  ;;  %4452 = vst.msk [vmem:[%s10041_s4 + $0xb8] sm:$0xff] %vm1083_vm0, %v4292_v12  ;;  %4026 = vperm.xlu1 %4890, %v3260_v63   ;;  %v2496_v4 = vmax.f32 %v2416_v30, 0.0  ;;  %v10617_v12 = vld [vmem:[#allocation181_spill] sm:$0xff]  ;;  %v2417_v29 = vsub.f32 %v2257_v22, %v2337_v54  ;;  %v10619_v22 = vld [vmem:[#allocation234_spill] sm:$0xff] }
 0x6a8   :  { %3626 = vperm.xlu0 %4895, %v8715_v26   ;;  %v8733_v39 = vpop.permute.xlu1 %3071  ;;  %v8745_v63 = vmul.f32 0.0051020407, %v10617_v12  ;;  %v2893_v17 = vmul.f32 %v8742_v21, %v8563_v51  ;;  %v2258_v54 = vmul.f32 0.0051020407, %v10619_v22  ;;  %v8781_v51 = vld [vmem:[%s10040_s3 + $0x208] sm:$0xff] }
 0x6a9   :  { %v2656_v30 = vadd.f32 0.001, %v2496_v4  ;;  %v2497_v19 = vmax.f32 %v2417_v29, 0.0 }
 0x6aa   :  { %v3942_v3 = vpop.permute.xlu0 %3941  ;;  %v2338_v46 = vmul.f32 %v8745_v63, %v8745_v63 }
 0x6ab   :  { %v4297_v33 = vadd.f32 %v3942_v3, %v3737_v40  ;;  %v4298_v44 = vadd.f32 %v3942_v3, %v3738_v31  ;;  %3111 = vrot.lane.b32.xlu1 %v2890_v48, %s5155_s17  ;;  %v5060_v40 = vpop.eup %5059  ;;  %v10620_v31 = vld [vmem:[#allocation5_spill] sm:$0xff]  ;;  %v10621_v48 = vld [vmem:[#allocation206_spill] sm:$0xff]  ;;  %5063 = vrsqrt.f32 %v2656_v30  ;;  %v10625_v30 = vld [vmem:[#allocation11_spill] sm:$0xff] }
 0x6ac   :  { %4896 = vset.pattern.permute.xlu0 %v10462_v28  ;;  %v8753_v25 = vpop.permute.xlu1 %3521  ;;  %4893 = vset.pattern.permute.xlu1 %v10466_v32  ;;  %v3735_v12 = vmul.f32 %v10621_v48, %v10620_v31  ;;  %v10622_v3 = vld [vmem:[#allocation6_spill] sm:$0xff] }
 0x6ad   :  { %10618 = vst [vmem:[#allocation177_spill] sm:$0xff] %v8753_v25  ;;  %4457 = vst [vmem:[%s10041_s4 + $0xe0] sm:$0xff] %v4297_v33  ;;  %4041 = vperm.xlu0 %4896, %v3263_v0   ;;  %v3736_v0 = vmul.f32 %v10621_v48, %v10622_v3  ;;  %v8776_v33 = vmul.f32 0.0051020407, %v10623_v53  ;;  %v2657_v48 = vadd.f32 0.001, %v2497_v19  ;;  %v2418_v3 = vsub.f32 %v2258_v54, %v2338_v46  ;;  %v5062_v53 = vpop.eup %5061 }
 0x6ae   :  { %4458 = vst.msk [vmem:[%s10041_s4 + $0xe8] sm:$0xff] %vm1083_vm0, %v4298_v44  ;;  %v8765_v38 = vpop.permute.xlu0 %3077  ;;  %v8798_v25 = vld [vmem:[%s10040_s3 + $0x210] sm:$0xff]  ;;  %v10626_v19 = vld [vmem:[#allocation194_spill] sm:$0xff] }
 0x6af   :  { %3621 = vperm.xlu1 %4893, %v8667_v16   ;;  %v5123_v16 = vld [vmem:[%s10040_s3 + $0x108] sm:$0xff]  ;;  %v10627_v54 = vld [vmem:[#allocation12_spill] sm:$0xff]  ;;  %5065 = vrsqrt.f32 %v2657_v48 }
 0x6b0   :  { %v3262_v4 = vsub.f32 %v5123_v16, %v8177_v15  ;;  %v2259_v15 = vmul.f32 0.0051020407, %v7992_v18  ;;  %v3741_v18 = vmul.f32 %v10626_v19, %v10625_v30  ;;  %v2498_v16 = vmax.f32 %v2418_v3, 0.0  ;;  %v5124_v30 = vld [vmem:[%s10040_s3 + $0x120] sm:$0xff] }
 0x6b1   :  { %3117 = vrot.lane.b32.xlu0 %v2893_v17, %s5155_s17  ;;  %v3937_v29 = vpop.permute.xlu1 %3936  ;;  %v8793_v17 = vmul.f32 %v5060_v40, %v8781_v51  ;;  %v3742_v40 = vmul.f32 %v10626_v19, %v10627_v54  ;;  %v3265_v55 = vsub.f32 %v5124_v30, %v8488_v42 }
 0x6b2   :  { %v4295_v44 = vadd.f32 %v3937_v29, %v3735_v12  ;;  %v4296_v22 = vadd.f32 %v3937_v29, %v3736_v0  ;;  %v8788_v31 = vpop.permute.xlu0 %3536  ;;  %4899 = vset.pattern.permute.xlu0 %v10466_v32  ;;  %v2339_v12 = vmul.f32 %v8776_v33, %v8776_v33  ;;  %v2892_v0 = vmul.f32 %v8715_v26, %v8539_v13 }
 0x6b3   :  { %10624 = vst [vmem:[#allocation199_spill] sm:$0xff] %v8788_v31  ;;  %4894 = vset.pattern.permute.xlu1 %v10462_v28  ;;  %v8820_v29 = vmul.f32 %v5062_v53, %v8798_v25  ;;  %v2658_v3 = vadd.f32 0.001, %v2498_v16 }
 0x6b4   :  { %4455 = vst [vmem:[%s10041_s4 + $0xd0] sm:$0xff] %v4295_v44  ;;  %4456 = vst.msk [vmem:[%s10041_s4 + $0xd8] sm:$0xff] %vm1083_vm0, %v4296_v22  ;;  %4036 = vperm.xlu1 %4894, %v3262_v4   ;;  %v10628_v44 = vld [vmem:[#allocation208_spill] sm:$0xff]  ;;  %v2419_v31 = vsub.f32 %v2259_v15, %v2339_v12  ;;  %v2260_v15 = vmul.f32 0.0051020407, %v8025_v57 }
 0x6b5   :  { %3636 = vperm.xlu0 %4899, %v8793_v17   ;;  %v8811_v46 = vpop.permute.xlu1 %3075  ;;  %v8823_v4 = vmul.f32 0.0051020407, %v10628_v44  ;;  %v2895_v48 = vmul.f32 %v8820_v29, %v8628_v14  ;;  %v5064_v12 = vpop.eup %5063  ;;  %v10632_v44 = vld [vmem:[#allocation10_spill] sm:$0xff]  ;;  %v8859_v14 = vld [vmem:[%s10040_s3 + $0x218] sm:$0xff]  ;;  %5067 = vrsqrt.f32 %v2658_v3  ;;  %v10635_v3 = vld [vmem:[#allocation15_spill] sm:$0xff] }
 0x6b6   :  { %v2499_v53 = vmax.f32 %v2419_v31, 0.0 }
 0x6b7   :  { %v3952_v22 = vpop.permute.xlu0 %3951  ;;  %v2340_v42 = vmul.f32 %v8823_v4, %v8823_v4 }
 0x6b8   :  { %v4301_v19 = vadd.f32 %v3952_v22, %v3741_v18  ;;  %v4302_v54 = vadd.f32 %v3952_v22, %v3742_v40  ;;  %3115 = vrot.lane.b32.xlu1 %v2892_v0, %s5155_s17  ;;  %v10630_v18 = vld [vmem:[#allocation9_spill] sm:$0xff]  ;;  %v10631_v40 = vld [vmem:[#allocation210_spill] sm:$0xff] }
 0x6b9   :  { %4900 = vset.pattern.permute.xlu0 %v10462_v28  ;;  %v8831_v13 = vpop.permute.xlu1 %3531  ;;  %4897 = vset.pattern.permute.xlu1 %v10466_v32  ;;  %v3739_v0 = vmul.f32 %v10631_v40, %v10630_v18  ;;  %v10633_v22 = vld [vmem:[#allocation230_spill] sm:$0xff]  ;;  %v2659_v18 = vadd.f32 0.001, %v2499_v53 }
 0x6ba   :  { %10629 = vst [vmem:[#allocation100_spill] sm:$0xff] %v8831_v13  ;;  %4461 = vst [vmem:[%s10041_s4 + $0x100] sm:$0xff] %v4301_v19  ;;  %4051 = vperm.xlu0 %4900, %v3265_v55   ;;  %v3740_v55 = vmul.f32 %v10631_v40, %v10632_v44  ;;  %v8854_v30 = vmul.f32 0.0051020407, %v10633_v22  ;;  %v2420_v40 = vsub.f32 %v2260_v15, %v2340_v42  ;;  %v5066_v44 = vpop.eup %5065  ;;  %v8876_v22 = vld [vmem:[%s10040_s3 + $0x220] sm:$0xff]  ;;  %v10637_v15 = vld [vmem:[#allocation32_spill] sm:$0xff] }
 0x6bb   :  { %4462 = vst.msk [vmem:[%s10041_s4 + $0x108] sm:$0xff] %vm1083_vm0, %v4302_v54  ;;  %v8843_v26 = vpop.permute.xlu0 %3081  ;;  %v10636_v53 = vld [vmem:[#allocation202_spill] sm:$0xff]  ;;  %5069 = vrsqrt.f32 %v2659_v18 }
 0x6bc   :  { %3631 = vperm.xlu1 %4897, %v8742_v21   ;;  %v5125_v21 = vld [vmem:[%s10040_s3 + $0x118] sm:$0xff] }
 0x6bd   :  { %v3264_v31 = vsub.f32 %v5125_v21, %v8372_v52  ;;  %v2261_v52 = vmul.f32 0.0051020407, %v8114_v50  ;;  %v3745_v50 = vmul.f32 %v10636_v53, %v10635_v3  ;;  %v2500_v21 = vmax.f32 %v2420_v40, 0.0  ;;  %v5126_v3 = vld [vmem:[%s10040_s3 + $0x130] sm:$0xff] }
 0x6be   :  { %3121 = vrot.lane.b32.xlu0 %v2895_v48, %s5155_s17  ;;  %v3947_v57 = vpop.permute.xlu1 %3946  ;;  %v8871_v48 = vmul.f32 %v5064_v12, %v8859_v14  ;;  %v3746_v12 = vmul.f32 %v10636_v53, %v10637_v15  ;;  %v3267_v13 = vsub.f32 %v5126_v3, %v8555_v35 }
 0x6bf   :  { %v4299_v16 = vadd.f32 %v3947_v57, %v3739_v0  ;;  %v4300_v19 = vadd.f32 %v3947_v57, %v3740_v55  ;;  %v8866_v54 = vpop.permute.xlu0 %3546  ;;  %4903 = vset.pattern.permute.xlu0 %v10466_v32  ;;  %v2341_v0 = vmul.f32 %v8854_v30, %v8854_v30  ;;  %v2894_v55 = vmul.f32 %v8793_v17, %v8596_v59 }
 0x6c0   :  { %10634 = vst [vmem:[#allocation164_spill] sm:$0xff] %v8866_v54  ;;  %4898 = vset.pattern.permute.xlu1 %v10462_v28  ;;  %v8898_v57 = vmul.f32 %v5066_v44, %v8876_v22  ;;  %v2660_v40 = vadd.f32 0.001, %v2500_v21 }
 0x6c1   :  { %4459 = vst [vmem:[%s10041_s4 + $0xf0] sm:$0xff] %v4299_v16  ;;  %4460 = vst.msk [vmem:[%s10041_s4 + $0xf8] sm:$0xff] %vm1083_vm0, %v4300_v19  ;;  %4046 = vperm.xlu1 %4898, %v3264_v31   ;;  %v10638_v16 = vld [vmem:[#allocation231_spill] sm:$0xff]  ;;  %v2421_v54 = vsub.f32 %v2261_v52, %v2341_v0  ;;  %v2262_v52 = vmul.f32 0.0051020407, %v8077_v6  ;;  %v5068_v0 = vpop.eup %5067 }
 0x6c2   :  { %3646 = vperm.xlu0 %4903, %v8871_v48   ;;  %v8889_v42 = vpop.permute.xlu1 %3079  ;;  %v8901_v31 = vmul.f32 0.0051020407, %v10638_v16  ;;  %v2897_v18 = vmul.f32 %v8898_v57, %v8701_v7  ;;  %v10641_v16 = vld [vmem:[#allocation14_spill] sm:$0xff]  ;;  %v8937_v7 = vld [vmem:[%s10040_s3 + $0x228] sm:$0xff]  ;;  %5071 = vrsqrt.f32 %v2660_v40 }
 0x6c3   :  { %v2501_v44 = vmax.f32 %v2421_v54, 0.0  ;;  %v10642_v40 = vld [vmem:[#allocation34_spill] sm:$0xff] }
 0x6c4   :  { %v3962_v19 = vpop.permute.xlu0 %3961  ;;  %v2342_v35 = vmul.f32 %v8901_v31, %v8901_v31 }
 0x6c5   :  { %v4305_v53 = vadd.f32 %v3962_v19, %v3745_v50  ;;  %v4306_v15 = vadd.f32 %v3962_v19, %v3746_v12  ;;  %3119 = vrot.lane.b32.xlu1 %v2894_v55, %s5155_s17  ;;  %v10639_v50 = vld [vmem:[#allocation13_spill] sm:$0xff]  ;;  %v8932_v19 = vmul.f32 0.0051020407, %v8001_v23  ;;  %v2661_v23 = vadd.f32 0.001, %v2501_v44  ;;  %v10643_v44 = vld [vmem:[#allocation207_spill] sm:$0xff] }
 0x6c6   :  { %4904 = vset.pattern.permute.xlu0 %v10462_v28  ;;  %v8909_v59 = vpop.permute.xlu1 %3541  ;;  %4901 = vset.pattern.permute.xlu1 %v10466_v32  ;;  %v10640_v12 = vld [vmem:[#allocation217_spill] sm:$0xff] }
 0x6c7   :  { %4465 = vst [vmem:[%s10041_s4 + $0x120] sm:$0xff] %v4305_v53  ;;  %4466 = vst.msk [vmem:[%s10041_s4 + $0x128] sm:$0xff] %vm1083_vm0, %v4306_v15  ;;  %4061 = vperm.xlu0 %4904, %v3267_v13   ;;  %v3743_v55 = vmul.f32 %v10640_v12, %v10639_v50  ;;  %v3744_v13 = vmul.f32 %v10640_v12, %v10641_v16  ;;  %v2422_v15 = vsub.f32 %v2262_v52, %v2342_v35  ;;  %v5070_v50 = vpop.eup %5069  ;;  %v8954_v12 = vld [vmem:[%s10040_s3 + $0x230] sm:$0xff]  ;;  %v10644_v52 = vld [vmem:[#allocation35_spill] sm:$0xff] }
 0x6c8   :  { %v8921_v17 = vpop.permute.xlu0 %3085  ;;  %v2896_v16 = vmul.f32 %v8871_v48, %v8670_v34  ;;  %5073 = vrsqrt.f32 %v2661_v23 }
 0x6c9   :  { %3641 = vperm.xlu1 %4901, %v8820_v29   ;;  %v5127_v29 = vld [vmem:[%s10040_s3 + $0x128] sm:$0xff] }
 0x6ca   :  { %v3266_v54 = vsub.f32 %v5127_v29, %v8568_v62  ;;  %v2263_v62 = vmul.f32 0.0051020407, %v8136_v58  ;;  %v3749_v58 = vmul.f32 %v10643_v44, %v10642_v40  ;;  %v8979_v29 = vmul.f32 0.0051020407, %v8010_v43 }
 0x6cb   :  { %3125 = vrot.lane.b32.xlu0 %v2897_v18, %s5155_s17  ;;  %v3957_v6 = vpop.permute.xlu1 %3956  ;;  %v8949_v18 = vmul.f32 %v5068_v0, %v8937_v7  ;;  %v3750_v0 = vmul.f32 %v10643_v44, %v10644_v52 }
 0x6cc   :  { %v4303_v21 = vadd.f32 %v3957_v6, %v3743_v55  ;;  %v4304_v3 = vadd.f32 %v3957_v6, %v3744_v13  ;;  %v8944_v53 = vpop.permute.xlu0 %3556  ;;  %4907 = vset.pattern.permute.xlu0 %v10466_v32  ;;  %v2343_v55 = vmul.f32 %v8932_v19, %v8932_v19  ;;  %v8976_v13 = vmul.f32 %v5070_v50, %v8954_v12 }
 0x6cd   :  { %4902 = vset.pattern.permute.xlu1 %v10462_v28  ;;  %v2502_v6 = vmax.f32 %v2422_v15, 0.0  ;;  %v2344_v43 = vmul.f32 %v8979_v29, %v8979_v29  ;;  %v2264_v50 = vmul.f32 0.0051020407, %v8206_v9 }
 0x6ce   :  { %4463 = vst [vmem:[%s10041_s4 + $0x110] sm:$0xff] %v4303_v21  ;;  %4464 = vst.msk [vmem:[%s10041_s4 + $0x118] sm:$0xff] %vm1083_vm0, %v4304_v3  ;;  %4056 = vperm.xlu1 %4902, %v3266_v54   ;;  %v2423_v21 = vsub.f32 %v2263_v62, %v2343_v55  ;;  %v5128_v3 = vld [vmem:[%s10040_s3 + $0x140] sm:$0xff]  ;;  %v2899_v48 = vmul.f32 %v8976_v13, %v8776_v33  ;;  %v5072_v62 = vpop.eup %5071  ;;  %v10645_v55 = vld [vmem:[#allocation16_spill] sm:$0xff] }
 0x6cf   :  { %3656 = vperm.xlu0 %4907, %v8949_v18   ;;  %v8967_v35 = vpop.permute.xlu1 %3083  ;;  %v3269_v40 = vsub.f32 %v5128_v3, %v8616_v8  ;;  %v2662_v23 = vadd.f32 0.001, %v2502_v6  ;;  %v9010_v3 = vmul.f32 0.0051020407, %v8066_v20  ;;  %v9015_v33 = vld [vmem:[%s10040_s3 + $0x238] sm:$0xff] }
 0x6d0   :  { %v2503_v15 = vmax.f32 %v2423_v21, 0.0 }
 0x6d1   :  { %v3972_v54 = vpop.permute.xlu0 %3971  ;;  %5075 = vrsqrt.f32 %v2662_v23  ;;  %v10648_v23 = vld [vmem:[#allocation38_spill] sm:$0xff] }
 0x6d2   :  { %v4309_v44 = vadd.f32 %v3972_v54, %v3749_v58  ;;  %v4310_v52 = vadd.f32 %v3972_v54, %v3750_v0  ;;  %3123 = vrot.lane.b32.xlu1 %v2896_v16, %s5155_s17  ;;  %v10646_v58 = vld [vmem:[#allocation223_spill] sm:$0xff]  ;;  %v10647_v16 = vld [vmem:[#allocation33_spill] sm:$0xff]  ;;  %v2663_v20 = vadd.f32 0.001, %v2503_v15 }
 0x6d3   :  { %4908 = vset.pattern.permute.xlu0 %v10462_v28  ;;  %v8987_v34 = vpop.permute.xlu1 %3551  ;;  %4905 = vset.pattern.permute.xlu1 %v10466_v32  ;;  %v3747_v0 = vmul.f32 %v10646_v58, %v10645_v55  ;;  %v3748_v54 = vmul.f32 %v10646_v58, %v10647_v16  ;;  %v5074_v55 = vpop.eup %5073  ;;  %v9032_v58 = vld [vmem:[%s10040_s3 + $0x240] sm:$0xff]  ;;  %v10649_v15 = vld [vmem:[#allocation215_spill] sm:$0xff]  ;;  %v2898_v16 = vmul.f32 %v8949_v18, %v8745_v63 }
 0x6d4   :  { %4469 = vst [vmem:[%s10041_s4 + $0x140] sm:$0xff] %v4309_v44  ;;  %4470 = vst.msk [vmem:[%s10041_s4 + $0x148] sm:$0xff] %vm1083_vm0, %v4310_v52  ;;  %4071 = vperm.xlu0 %4908, %v3269_v40   ;;  %v2424_v52 = vsub.f32 %v2264_v50, %v2344_v43  ;;  %v10650_v50 = vld [vmem:[#allocation39_spill] sm:$0xff]  ;;  %5077 = vrsqrt.f32 %v2663_v20 }
 0x6d5   :  { %v8999_v8 = vpop.permute.xlu0 %3089 }
 0x6d6   :  { %3651 = vperm.xlu1 %4905, %v8898_v57   ;;  %v5129_v57 = vld [vmem:[%s10040_s3 + $0x138] sm:$0xff] }
 0x6d7   :  { %v3268_v6 = vsub.f32 %v5129_v57, %v8663_v47  ;;  %v2265_v47 = vmul.f32 0.0051020407, %v8325_v36  ;;  %v3753_v36 = vmul.f32 %v10649_v15, %v10648_v23  ;;  %v9057_v57 = vmul.f32 0.0051020407, %v8069_v2 }
 0x6d8   :  { %3129 = vrot.lane.b32.xlu0 %v2899_v48, %s5155_s17  ;;  %v3967_v9 = vpop.permute.xlu1 %3966  ;;  %v9027_v48 = vmul.f32 %v5072_v62, %v9015_v33  ;;  %v3754_v62 = vmul.f32 %v10649_v15, %v10650_v50 }
 0x6d9   :  { %v4307_v21 = vadd.f32 %v3967_v9, %v3747_v0  ;;  %v4308_v40 = vadd.f32 %v3967_v9, %v3748_v54  ;;  %v9022_v44 = vpop.permute.xlu0 %3566  ;;  %4911 = vset.pattern.permute.xlu0 %v10466_v32  ;;  %v2345_v0 = vmul.f32 %v9010_v3, %v9010_v3  ;;  %v9054_v54 = vmul.f32 %v5074_v55, %v9032_v58 }
 0x6da   :  { %4906 = vset.pattern.permute.xlu1 %v10462_v28  ;;  %v2504_v9 = vmax.f32 %v2424_v52, 0.0  ;;  %v2346_v2 = vmul.f32 %v9057_v57, %v9057_v57  ;;  %v2266_v55 = vmul.f32 0.0051020407, %v8402_v49 }
 0x6db   :  { %4467 = vst [vmem:[%s10041_s4 + $0x130] sm:$0xff] %v4307_v21  ;;  %4468 = vst.msk [vmem:[%s10041_s4 + $0x138] sm:$0xff] %vm1083_vm0, %v4308_v40  ;;  %4066 = vperm.xlu1 %4906, %v3268_v6   ;;  %v2425_v21 = vsub.f32 %v2265_v47, %v2345_v0  ;;  %v5130_v40 = vld [vmem:[%s10040_s3 + $0x150] sm:$0xff]  ;;  %v2901_v18 = vmul.f32 %v9054_v54, %v8854_v30  ;;  %v5076_v47 = vpop.eup %5075  ;;  %v9093_v30 = vld [vmem:[%s10040_s3 + $0x248] sm:$0xff] }
 0x6dc   :  { %3666 = vperm.xlu0 %4911, %v9027_v48   ;;  %v9045_v43 = vpop.permute.xlu1 %3087  ;;  %v3271_v23 = vsub.f32 %v5130_v40, %v8690_v37  ;;  %v2664_v20 = vadd.f32 0.001, %v2504_v9  ;;  %v10651_v0 = vld [vmem:[#allocation36_spill] sm:$0xff]  ;;  %v9088_v40 = vmul.f32 0.0051020407, %v8155_v56 }
 0x6dd   :  { %v2505_v52 = vmax.f32 %v2425_v21, 0.0 }
 0x6de   :  { %v3982_v6 = vpop.permute.xlu0 %3981  ;;  %5079 = vrsqrt.f32 %v2664_v20  ;;  %v10655_v20 = vld [vmem:[#allocation42_spill] sm:$0xff] }
 0x6df   :  { %v4313_v15 = vadd.f32 %v3982_v6, %v3753_v36  ;;  %v4314_v50 = vadd.f32 %v3982_v6, %v3754_v62  ;;  %3127 = vrot.lane.b32.xlu1 %v2898_v16, %s5155_s17  ;;  %v10652_v36 = vld [vmem:[#allocation228_spill] sm:$0xff]  ;;  %v10653_v16 = vld [vmem:[#allocation37_spill] sm:$0xff]  ;;  %v2665_v56 = vadd.f32 0.001, %v2505_v52 }
 0x6e0   :  { %4912 = vset.pattern.permute.xlu0 %v10462_v28  ;;  %v9065_v63 = vpop.permute.xlu1 %3561  ;;  %4909 = vset.pattern.permute.xlu1 %v10466_v32  ;;  %v3751_v62 = vmul.f32 %v10652_v36, %v10651_v0  ;;  %v3752_v6 = vmul.f32 %v10652_v36, %v10653_v16  ;;  %v5078_v0 = vpop.eup %5077  ;;  %v9110_v36 = vld [vmem:[%s10040_s3 + $0x250] sm:$0xff]  ;;  %v2900_v16 = vmul.f32 %v9027_v48, %v8823_v4 }
 0x6e1   :  { %4473 = vst [vmem:[%s10041_s4 + $0x160] sm:$0xff] %v4313_v15  ;;  %4474 = vst.msk [vmem:[%s10041_s4 + $0x168] sm:$0xff] %vm1083_vm0, %v4314_v50  ;;  %4081 = vperm.xlu0 %4912, %v3271_v23   ;;  %v2426_v50 = vsub.f32 %v2266_v55, %v2346_v2  ;;  %v10656_v52 = vld [vmem:[#allocation220_spill] sm:$0xff]  ;;  %v10657_v55 = vld [vmem:[#allocation43_spill] sm:$0xff]  ;;  %5081 = vrsqrt.f32 %v2665_v56 }
 0x6e2   :  { %v9077_v37 = vpop.permute.xlu0 %3093 }
 0x6e3   :  { %3661 = vperm.xlu1 %4909, %v8976_v13   ;;  %v5131_v13 = vld [vmem:[%s10040_s3 + $0x148] sm:$0xff] }
 0x6e4   :  { %v3270_v9 = vsub.f32 %v5131_v13, %v8733_v39  ;;  %v2267_v39 = vmul.f32 0.0051020407, %v8517_v45  ;;  %v3757_v45 = vmul.f32 %v10656_v52, %v10655_v20 }
 0x6e5   :  { %3133 = vrot.lane.b32.xlu0 %v2901_v18, %s5155_s17  ;;  %v3977_v49 = vpop.permute.xlu1 %3976  ;;  %v9105_v18 = vmul.f32 %v5076_v47, %v9093_v30  ;;  %v3758_v47 = vmul.f32 %v10656_v52, %v10657_v55  ;;  %v9140_v52 = vmul.f32 0.0051020407, %v8184_v27 }
 0x6e6   :  { %v4311_v21 = vadd.f32 %v3977_v49, %v3751_v62  ;;  %v4312_v23 = vadd.f32 %v3977_v49, %v3752_v6  ;;  %v9100_v15 = vpop.permute.xlu0 %3576  ;;  %4915 = vset.pattern.permute.xlu0 %v10466_v32  ;;  %v2347_v62 = vmul.f32 %v9088_v40, %v9088_v40  ;;  %v9132_v6 = vmul.f32 %v5078_v0, %v9110_v36  ;;  %v10658_v0 = vld [vmem:[#allocation40_spill] sm:$0xff] }
 0x6e7   :  { %10654 = vst [vmem:[#allocation103_spill] sm:$0xff] %v9100_v15  ;;  %4910 = vset.pattern.permute.xlu1 %v10462_v28  ;;  %v2506_v49 = vmax.f32 %v2426_v50, 0.0 }
 0x6e8   :  { %4471 = vst [vmem:[%s10041_s4 + $0x150] sm:$0xff] %v4311_v21  ;;  %4472 = vst.msk [vmem:[%s10041_s4 + $0x158] sm:$0xff] %vm1083_vm0, %v4312_v23  ;;  %4076 = vperm.xlu1 %4910, %v3270_v9   ;;  %v2427_v9 = vsub.f32 %v2267_v39, %v2347_v62  ;;  %v5132_v21 = vld [vmem:[%s10040_s3 + $0x160] sm:$0xff]  ;;  %v2903_v27 = vmul.f32 %v9132_v6, %v8932_v19  ;;  %v5080_v50 = vpop.eup %5079  ;;  %v10659_v39 = vld [vmem:[#allocation233_spill] sm:$0xff] }
 0x6e9   :  { %3676 = vperm.xlu0 %4915, %v9105_v18   ;;  %v9123_v2 = vpop.permute.xlu1 %3091  ;;  %v3273_v23 = vsub.f32 %v5132_v21, %v8765_v38  ;;  %v2666_v48 = vadd.f32 0.001, %v2506_v49  ;;  %v3755_v62 = vmul.f32 %v10659_v39, %v10658_v0  ;;  %v9168_v19 = vld [vmem:[%s10040_s3 + $0x258] sm:$0xff] }
 0x6ea   :  { %v2507_v56 = vmax.f32 %v2427_v9, 0.0 }
 0x6eb   :  { %v3992_v13 = vpop.permute.xlu0 %3991  ;;  %5083 = vrsqrt.f32 %v2666_v48  ;;  %v10661_v48 = vld [vmem:[#allocation46_spill] sm:$0xff] }
 0x6ec   :  { %v4317_v20 = vadd.f32 %v3992_v13, %v3757_v45  ;;  %v4318_v15 = vadd.f32 %v3992_v13, %v3758_v47  ;;  %3131 = vrot.lane.b32.xlu1 %v2900_v16, %s5155_s17  ;;  %v10660_v45 = vld [vmem:[#allocation41_spill] sm:$0xff]  ;;  %v2268_v47 = vmul.f32 0.0051020407, %v8618_v60  ;;  %v2667_v60 = vadd.f32 0.001, %v2507_v56  ;;  %v10662_v56 = vld [vmem:[#allocation227_spill] sm:$0xff] }
 0x6ed   :  { %4916 = vset.pattern.permute.xlu0 %v10462_v28  ;;  %v9143_v4 = vpop.permute.xlu1 %3571  ;;  %4913 = vset.pattern.permute.xlu1 %v10466_v32  ;;  %v3756_v55 = vmul.f32 %v10659_v39, %v10660_v45  ;;  %v5133_v16 = vld [vmem:[%s10040_s3 + $0x158] sm:$0xff]  ;;  %v10663_v39 = vld [vmem:[#allocation47_spill] sm:$0xff]  ;;  %v2902_v45 = vmul.f32 %v9105_v18, %v8901_v31 }
 0x6ee   :  { %4477 = vst [vmem:[%s10041_s4 + $0x180] sm:$0xff] %v4317_v20  ;;  %4478 = vst.msk [vmem:[%s10041_s4 + $0x188] sm:$0xff] %vm1083_vm0, %v4318_v15  ;;  %4091 = vperm.xlu0 %4916, %v3273_v23   ;;  %v2348_v15 = vmul.f32 %v9140_v52, %v9140_v52  ;;  %v3272_v49 = vsub.f32 %v5133_v16, %v8811_v46  ;;  %v2824_v23 = vmul.f32 %v5080_v50, %v9168_v19  ;;  %v5082_v20 = vpop.eup %5081 }
 0x6ef   :  { %v9153_v38 = vpop.permute.xlu0 %3097  ;;  %v3761_v50 = vmul.f32 %v10662_v56, %v10661_v48  ;;  %5085 = vrsqrt.f32 %v2667_v60 }
 0x6f0   :  { %3671 = vperm.xlu1 %4913, %v9054_v54   ;;  %v2428_v0 = vsub.f32 %v2268_v47, %v2348_v15 }
 0x6f2   :  { %3137 = vrot.lane.b32.xlu0 %v2903_v27, %s5155_s17  ;;  %v3987_v54 = vpop.permute.xlu1 %3986  ;;  %v9183_v27 = vld [vmem:[%s10040_s3 + $0x260] sm:$0xff]  ;;  %v2508_v47 = vmax.f32 %v2428_v0, 0.0  ;;  %v10665_v0 = vld [vmem:[#allocation237_spill] sm:$0xff] }
 0x6f3   :  { %v4315_v13 = vadd.f32 %v3987_v54, %v3755_v62  ;;  %v4316_v9 = vadd.f32 %v3987_v54, %v3756_v55  ;;  %v9175_v21 = vpop.permute.xlu0 %3586  ;;  %4919 = vset.pattern.permute.xlu0 %v10466_v32  ;;  %v3762_v62 = vmul.f32 %v10662_v56, %v10663_v39  ;;  %v2825_v55 = vmul.f32 %v5082_v20, %v9183_v27  ;;  %v5134_v54 = vld [vmem:[%s10040_s3 + $0x170] sm:$0xff]  ;;  %v10666_v56 = vld [vmem:[#allocation45_spill] sm:$0xff]  ;;  %v9228_v39 = vld [vmem:[%s10040_s3 + $0x268] sm:$0xff] }
 0x6f4   :  { %4914 = vset.pattern.permute.xlu1 %v10462_v28  ;;  %v3275_v16 = vsub.f32 %v5134_v54, %v8843_v26  ;;  %v2668_v18 = vadd.f32 0.001, %v2508_v47  ;;  %v10664_v20 = vld [vmem:[#allocation44_spill] sm:$0xff]  ;;  %v10667_v54 = vld [vmem:[#allocation119_spill] sm:$0xff] }
 0x6f5   :  { %4475 = vst [vmem:[%s10041_s4 + $0x170] sm:$0xff] %v4315_v13  ;;  %4476 = vst.msk [vmem:[%s10041_s4 + $0x178] sm:$0xff] %vm1083_vm0, %v4316_v9  ;;  %4086 = vperm.xlu1 %4914, %v3272_v49   ;;  %v2905_v31 = vmul.f32 %v2825_v55, %v9010_v3  ;;  %v5084_v60 = vpop.eup %5083  ;;  %v3759_v48 = vmul.f32 %v10665_v0, %v10664_v20  ;;  %v5135_v3 = vld [vmem:[%s10040_s3 + $0x168] sm:$0xff] }
 0x6f6   :  { %3686 = vperm.xlu0 %4919, %v2824_v23   ;;  %v9192_v46 = vpop.permute.xlu1 %3095  ;;  %5087 = vrsqrt.f32 %v2668_v18 }
 0x6f8   :  { %v4002_v15 = vpop.permute.xlu0 %4001 }
 0x6f9   :  { %v4321_v49 = vadd.f32 %v4002_v15, %v3761_v50  ;;  %v4322_v13 = vadd.f32 %v4002_v15, %v3762_v62  ;;  %3135 = vrot.lane.b32.xlu1 %v2902_v45, %s5155_s17  ;;  %v3760_v50 = vmul.f32 %v10665_v0, %v10666_v56  ;;  %v5086_v20 = vpop.eup %5085  ;;  %v10670_v0 = vld [vmem:[#allocation232_spill] sm:$0xff]  ;;  %v10671_v56 = vld [vmem:[#allocation51_spill] sm:$0xff] }
 0x6fa   :  { %4920 = vset.pattern.permute.xlu0 %v10462_v28  ;;  %v9207_v9 = vpop.permute.xlu1 %3581  ;;  %4917 = vset.pattern.permute.xlu1 %v10466_v32 }
 0x6fb   :  { %4481 = vst [vmem:[%s10041_s4 + $0x1a0] sm:$0xff] %v4321_v49  ;;  %4482 = vst.msk [vmem:[%s10041_s4 + $0x1a8] sm:$0xff] %vm1083_vm0, %v4322_v13  ;;  %4101 = vperm.xlu0 %4920, %v3275_v16   ;;  %v10668_v49 = vld [vmem:[#allocation120_spill] sm:$0xff] }
 0x6fc   :  { %v9217_v26 = vpop.permute.xlu0 %3101 }
 0x6fd   :  { %3681 = vperm.xlu1 %4917, %v9132_v6   ;;  %v3274_v6 = vsub.f32 %v5135_v3, %v8889_v42  ;;  %v9254_v42 = vld [vmem:[%s10040_s3 + $0x270] sm:$0xff] }
 0x6ff   :  { %3141 = vrot.lane.b32.xlu0 %v2905_v31, %s5155_s17  ;;  %v3997_v62 = vpop.permute.xlu1 %3996  ;;  %v2826_v31 = vmul.f32 %v5084_v60, %v9228_v39  ;;  %v10669_v60 = vld [vmem:[#allocation50_spill] sm:$0xff] }
 0x700   :  { %v4319_v45 = vadd.f32 %v3997_v62, %v3759_v48  ;;  %v4320_v15 = vadd.f32 %v3997_v62, %v3760_v50  ;;  %v3597_v47 = vpop.permute.xlu0 %3596  ;;  %4923 = vset.pattern.permute.xlu0 %v10466_v32  ;;  %v3765_v48 = vmul.f32 %v10670_v0, %v10669_v60  ;;  %v3766_v50 = vmul.f32 %v10670_v0, %v10671_v56  ;;  %v10673_v60 = vld [vmem:[#allocation238_spill] sm:$0xff] }
 0x701   :  { %v9237_v16 = vmul.f32 %v3597_v47, %v10667_v54  ;;  %v9240_v13 = vmul.f32 %v3597_v47, %v10668_v49  ;;  %4918 = vset.pattern.permute.xlu1 %v10462_v28  ;;  %v2904_v62 = vmul.f32 %v2824_v23, %v8979_v29  ;;  %v5088_v23 = vpop.eup %5087 }
 0x702   :  { %4479 = vst [vmem:[%s10041_s4 + $0x190] sm:$0xff] %v4319_v45  ;;  %4480 = vst.msk [vmem:[%s10041_s4 + $0x198] sm:$0xff] %vm1083_vm0, %v4320_v15  ;;  %4096 = vperm.xlu1 %4918, %v3274_v6   ;;  %v2827_v45 = vmul.f32 %v5086_v20, %v9254_v42  ;;  %v5136_v6 = vld [vmem:[%s10040_s3 + $0x180] sm:$0xff]  ;;  %v10672_v20 = vld [vmem:[#allocation48_spill] sm:$0xff] }
 0x703   :  { %3696 = vperm.xlu0 %4923, %v2826_v31   ;;  %v9256_v18 = vpop.permute.xlu1 %3099  ;;  %v3277_v15 = vsub.f32 %v5136_v6, %v8921_v17  ;;  %v3763_v0 = vmul.f32 %v10673_v60, %v10672_v20  ;;  %v10676_v20 = vld [vmem:[#allocation126_spill] sm:$0xff] }
 0x704   :  { %v2907_v29 = vmul.f32 %v2827_v45, %v9088_v40  ;;  %v5137_v40 = vld [vmem:[%s10040_s3 + $0x178] sm:$0xff] }
 0x705   :  { %v4012_v3 = vpop.permute.xlu0 %4011 }
 0x706   :  { %v4325_v47 = vadd.f32 %v4012_v3, %v3765_v48  ;;  %v4326_v54 = vadd.f32 %v4012_v3, %v3766_v50  ;;  %3139 = vrot.lane.b32.xlu1 %v2904_v62, %s5155_s17  ;;  %v10674_v48 = vld [vmem:[#allocation49_spill] sm:$0xff] }
 0x707   :  { %4924 = vset.pattern.permute.xlu0 %v10462_v28  ;;  %v9270_v49 = vpop.permute.xlu1 %3591  ;;  %4921 = vset.pattern.permute.xlu1 %v10466_v32  ;;  %v3764_v56 = vmul.f32 %v10673_v60, %v10674_v48  ;;  %v9290_v50 = vld [vmem:[%s10040_s3 + $0x278] sm:$0xff] }
 0x708   :  { %4485 = vst [vmem:[%s10041_s4 + $0x1c0] sm:$0xff] %v4325_v47  ;;  %4486 = vst.msk [vmem:[%s10041_s4 + $0x1c8] sm:$0xff] %vm1083_vm0, %v4326_v54  ;;  %4111 = vperm.xlu0 %4924, %v3277_v15   ;;  %v10675_v47 = vld [vmem:[#allocation125_spill] sm:$0xff] }
 0x709   :  { %v9280_v17 = vpop.permute.xlu0 %3105 }
 0x70a   :  { %3691 = vperm.xlu1 %4921, %v2825_v55   ;;  %v3276_v55 = vsub.f32 %v5137_v40, %v8967_v35 }
 0x70c   :  { %3145 = vrot.lane.b32.xlu0 %v2907_v29, %s5155_s17  ;;  %v4007_v62 = vpop.permute.xlu1 %4006  ;;  %v2828_v29 = vmul.f32 %v5088_v23, %v9290_v50  ;;  %v2906_v23 = vmul.f32 %v2826_v31, %v9057_v57  ;;  %v10680_v57 = vld [vmem:[#allocation124_spill] sm:$0xff] }
 0x70d   :  { %v4323_v3 = vadd.f32 %v4007_v62, %v3763_v0  ;;  %v4324_v6 = vadd.f32 %v4007_v62, %v3764_v56  ;;  %v3607_v15 = vpop.permute.xlu0 %3606  ;;  %4927 = vset.pattern.permute.xlu0 %v10466_v32  ;;  %v10677_v0 = vld [vmem:[#allocation54_spill] sm:$0xff]  ;;  %v10678_v56 = vld [vmem:[#allocation55_spill] sm:$0xff] }
 0x70e   :  { %v9299_v54 = vmul.f32 %v3607_v15, %v10675_v47  ;;  %v9302_v60 = vmul.f32 %v3607_v15, %v10676_v20  ;;  %4922 = vset.pattern.permute.xlu1 %v10462_v28  ;;  %v3769_v48 = vmul.f32 %v8019_v11, %v10677_v0  ;;  %v3770_v62 = vmul.f32 %v8019_v11, %v10678_v56  ;;  %v10679_v11 = vld [vmem:[#allocation123_spill] sm:$0xff] }
 0x70f   :  { %4483 = vst [vmem:[%s10041_s4 + $0x1b0] sm:$0xff] %v4323_v3  ;;  %4484 = vst.msk [vmem:[%s10041_s4 + $0x1b8] sm:$0xff] %vm1083_vm0, %v4324_v6  ;;  %4106 = vperm.xlu1 %4922, %v3276_v55   ;;  %v5138_v3 = vld [vmem:[%s10040_s3 + $0x190] sm:$0xff] }
 0x710   :  { %3706 = vperm.xlu0 %4927, %v2828_v29   ;;  %v9313_v35 = vpop.permute.xlu1 %3103  ;;  %v3279_v15 = vsub.f32 %v5138_v3, %v8999_v8  ;;  %v5140_v3 = vld [vmem:[%s10040_s3 + $0x188] sm:$0xff] }
 0x712   :  { %v4022_v40 = vpop.permute.xlu0 %4021 }
 0x713   :  { %v4329_v6 = vadd.f32 %v4022_v40, %v3769_v48  ;;  %v4330_v55 = vadd.f32 %v4022_v40, %v3770_v62  ;;  %3143 = vrot.lane.b32.xlu1 %v2906_v23, %s5155_s17  ;;  %v10681_v48 = vld [vmem:[#allocation52_spill] sm:$0xff]  ;;  %v10682_v62 = vld [vmem:[#allocation53_spill] sm:$0xff] }
 0x714   :  { %4928 = vset.pattern.permute.xlu0 %v10462_v28  ;;  %v3602_v47 = vpop.permute.xlu1 %3601  ;;  %4925 = vset.pattern.permute.xlu1 %v10466_v32  ;;  %v5139_v32 = vld [vmem:[%s10040_s3 + $0x1a0] sm:$0xff]  ;;  %v3767_v56 = vmul.f32 %v7989_v5, %v10681_v48  ;;  %v3768_v23 = vmul.f32 %v7989_v5, %v10682_v62  ;;  %v10684_v5 = vld [vmem:[#allocation132_spill] sm:$0xff] }
 0x715   :  { %4489 = vst [vmem:[%s10041_s4 + $0x1e0] sm:$0xff] %v4329_v6  ;;  %4490 = vst.msk [vmem:[%s10041_s4 + $0x1e8] sm:$0xff] %vm1083_vm0, %v4330_v55  ;;  %v9335_v8 = vmul.f32 %v3602_v47, %v10679_v11  ;;  %v9338_v31 = vmul.f32 %v3602_v47, %v10680_v57  ;;  %4121 = vperm.xlu0 %4928, %v3279_v15   ;;  %v3281_v0 = vsub.f32 %v5139_v32, %v9077_v37  ;;  %v5141_v37 = vld [vmem:[%s10040_s3 + $0x1b0] sm:$0xff]  ;;  %v10683_v11 = vld [vmem:[#allocation131_spill] sm:$0xff] }
 0x716   :  { %v3110_v20 = vpop.permute.xlu0 %3109  ;;  %v3278_v15 = vsub.f32 %v5140_v3, %v9045_v43 }
 0x717   :  { %3701 = vperm.xlu1 %4925, %v2827_v45   ;;  %v3283_v45 = vsub.f32 %v5141_v37, %v9153_v38  ;;  %v10685_v38 = vld [vmem:[#allocation58_spill] sm:$0xff] }
 0x719   :  { %4131 = vperm.xlu0 %4928, %v3281_v0   ;;  %v4017_v40 = vpop.permute.xlu1 %4016  ;;  %v10686_v0 = vld [vmem:[#allocation242_spill] sm:$0xff] }
 0x71a   :  { %v4327_v6 = vadd.f32 %v4017_v40, %v3767_v56  ;;  %v4328_v55 = vadd.f32 %v4017_v40, %v3768_v23  ;;  %v3617_v47 = vpop.permute.xlu0 %3616  ;;  %v3773_v48 = vmul.f32 %v10686_v0, %v10685_v38  ;;  %v10687_v56 = vld [vmem:[#allocation59_spill] sm:$0xff]  ;;  %v5142_v23 = vld [vmem:[%s10040_s3 + $0x1c0] sm:$0xff]  ;;  %v10690_v38 = vld [vmem:[#allocation56_spill] sm:$0xff] }
 0x71b   :  { %v9357_v57 = vmul.f32 %v3617_v47, %v10683_v11  ;;  %v9360_v32 = vmul.f32 %v3617_v47, %v10684_v5  ;;  %4926 = vset.pattern.permute.xlu1 %v10462_v28  ;;  %v3774_v62 = vmul.f32 %v10686_v0, %v10687_v56  ;;  %v2908_v28 = vmul.f32 %v2828_v29, %v9140_v52  ;;  %v5143_v47 = vld [vmem:[%s10040_s3 + $0x198] sm:$0xff]  ;;  %v10689_v29 = vld [vmem:[#allocation130_spill] sm:$0xff]  ;;  %v5144_v11 = vld [vmem:[%s10040_s3 + $0x1d0] sm:$0xff] }
 0x71c   :  { %4487 = vst [vmem:[%s10041_s4 + $0x1d0] sm:$0xff] %v4327_v6  ;;  %4488 = vst.msk [vmem:[%s10041_s4 + $0x1d8] sm:$0xff] %vm1083_vm0, %v4328_v55  ;;  %4116 = vperm.xlu1 %4926, %v3278_v15   ;;  %v3285_v40 = vsub.f32 %v5142_v23, %v9217_v26  ;;  %v3280_v37 = vsub.f32 %v5143_v47, %v9123_v2  ;;  %v10688_v52 = vld [vmem:[#allocation129_spill] sm:$0xff]  ;;  %v3287_v2 = vsub.f32 %v5144_v11, %v9280_v17  ;;  %v10691_v0 = vld [vmem:[#allocation243_spill] sm:$0xff] }
 0x71d   :  { %4141 = vperm.xlu0 %4928, %v3283_v45   ;;  %v9370_v43 = vpop.permute.xlu1 %3107  ;;  %v10692_v56 = vld [vmem:[#allocation57_spill] sm:$0xff]  ;;  %v5146_v17 = vld [vmem:[%s10040_s3 + $0x1e0] sm:$0xff] }
 0x71e   :  { %v10693_v47 = vld [vmem:[#allocation137_spill] sm:$0xff] }
 0x71f   :  { %v4032_v3 = vpop.permute.xlu0 %4031 }
 0x720   :  { %v4333_v6 = vadd.f32 %v4032_v3, %v3773_v48  ;;  %v4334_v15 = vadd.f32 %v4032_v3, %v3774_v62  ;;  %3147 = vrot.lane.b32.xlu1 %v2908_v28, %s5155_s17  ;;  %v3771_v48 = vmul.f32 %v10691_v0, %v10690_v38  ;;  %v3772_v62 = vmul.f32 %v10691_v0, %v10692_v56  ;;  %v5145_v28 = vld [vmem:[%s10040_s3 + $0x1a8] sm:$0xff]  ;;  %v10696_v38 = vld [vmem:[#allocation97_spill] sm:$0xff] }
 0x721   :  { %4151 = vperm.xlu0 %4928, %v3285_v40   ;;  %v3612_v55 = vpop.permute.xlu1 %3611  ;;  %v3282_v23 = vsub.f32 %v5145_v28, %v9192_v46  ;;  %v3289_v3 = vsub.f32 %v5146_v17, %v3110_v20  ;;  %v5147_v46 = vld [vmem:[%s10040_s3 + $0x1b8] sm:$0xff] }
 0x722   :  { %4493 = vst [vmem:[%s10041_s4 + $0x200] sm:$0xff] %v4333_v6  ;;  %4494 = vst.msk [vmem:[%s10041_s4 + $0x208] sm:$0xff] %vm1083_vm0, %v4334_v15  ;;  %v9394_v26 = vmul.f32 %v3612_v55, %v10688_v52  ;;  %v9397_v45 = vmul.f32 %v3612_v55, %v10689_v29  ;;  %v10694_v52 = vld [vmem:[#allocation138_spill] sm:$0xff]  ;;  %v3284_v20 = vsub.f32 %v5147_v46, %v9256_v18  ;;  %v5149_v18 = vld [vmem:[%s10040_s3 + $0x1c8] sm:$0xff] }
 0x723   :  { %v3114_v5 = vpop.permute.xlu0 %3113  ;;  %v10700_v46 = vld [vmem:[#allocation60_spill] sm:$0xff] }
 0x724   :  { %4126 = vperm.xlu1 %4926, %v3280_v37  }
 0x725   :  { %4161 = vperm.xlu0 %4928, %v3287_v2   ;;  %v10695_v2 = vld [vmem:[#allocation62_spill] sm:$0xff] }
 0x726   :  { %v4027_v40 = vpop.permute.xlu1 %4026  ;;  %v3777_v0 = vmul.f32 %v10696_v38, %v10695_v2 }
 0x727   :  { %v4331_v6 = vadd.f32 %v4027_v40, %v3771_v48  ;;  %v4332_v15 = vadd.f32 %v4027_v40, %v3772_v62  ;;  %v3627_v55 = vpop.permute.xlu0 %3626  ;;  %v10697_v48 = vld [vmem:[#allocation63_spill] sm:$0xff]  ;;  %v5148_v62 = vld [vmem:[%s10040_s3 + $0x1f0] sm:$0xff] }
 0x728   :  { %v9415_v37 = vmul.f32 %v3627_v55, %v10693_v47  ;;  %v9418_v29 = vmul.f32 %v3627_v55, %v10694_v52  ;;  %4136 = vperm.xlu1 %4926, %v3282_v23   ;;  %v3778_v56 = vmul.f32 %v10696_v38, %v10697_v48  ;;  %v3291_v28 = vsub.f32 %v5148_v62, %v3114_v5  ;;  %v10698_v5 = vld [vmem:[#allocation135_spill] sm:$0xff]  ;;  %v10699_v55 = vld [vmem:[#allocation136_spill] sm:$0xff]  ;;  %v10702_v38 = vld [vmem:[#allocation61_spill] sm:$0xff] }
 0x729   :  { %4491 = vst [vmem:[%s10041_s4 + $0x1f0] sm:$0xff] %v4331_v6  ;;  %4492 = vst.msk [vmem:[%s10041_s4 + $0x1f8] sm:$0xff] %vm1083_vm0, %v4332_v15  ;;  %4171 = vperm.xlu0 %4928, %v3289_v3   ;;  %v3286_v3 = vsub.f32 %v5149_v18, %v9313_v35  ;;  %v5150_v48 = vld [vmem:[%s10040_s3 + $0x1d8] sm:$0xff]  ;;  %v10704_v18 = vld [vmem:[#allocation144_spill] sm:$0xff] }
 0x72a   :  { %v3112_v11 = vpop.permute.xlu1 %3111 }
 0x72c   :  { %v4042_v23 = vpop.permute.xlu0 %4041  ;;  %4146 = vperm.xlu1 %4926, %v3284_v20   ;;  %v10701_v20 = vld [vmem:[#allocation94_spill] sm:$0xff] }
 0x72d   :  { %v4337_v40 = vadd.f32 %v4042_v23, %v3777_v0  ;;  %v4338_v17 = vadd.f32 %v4042_v23, %v3778_v56  ;;  %4181 = vperm.xlu0 %4928, %v3291_v28   ;;  %v3775_v2 = vmul.f32 %v10701_v20, %v10700_v46  ;;  %v3776_v0 = vmul.f32 %v10701_v20, %v10702_v38 }
 0x72e   :  { %v3622_v6 = vpop.permute.xlu1 %3621  ;;  %v3288_v56 = vsub.f32 %v5150_v48, %v9370_v43 }
 0x72f   :  { %4497 = vst [vmem:[%s10041_s4 + $0x220] sm:$0xff] %v4337_v40  ;;  %4498 = vst.msk [vmem:[%s10041_s4 + $0x228] sm:$0xff] %vm1083_vm0, %v4338_v17  ;;  %v9450_v15 = vmul.f32 %v3622_v6, %v10698_v5  ;;  %v9453_v47 = vmul.f32 %v3622_v6, %v10699_v55  ;;  %v10703_v17 = vld [vmem:[#allocation143_spill] sm:$0xff]  ;;  %v10705_v55 = vld [vmem:[#allocation66_spill] sm:$0xff] }
 0x730   :  { %v3118_v52 = vpop.permute.xlu0 %3117  ;;  %4156 = vperm.xlu1 %4926, %v3286_v3   ;;  %v5151_v6 = vld [vmem:[%s10040_s3 + $0x1e8] sm:$0xff] }
 0x731   :  { %v3293_v35 = vsub.f32 %v8720_v61, %v3118_v52  ;;  %v3290_v5 = vsub.f32 %v5151_v6, %v3112_v11  ;;  %v3781_v52 = vmul.f32 %v8385_v24, %v10705_v55  ;;  %v5152_v11 = vld [vmem:[%s10040_s3 + $0x1f8] sm:$0xff] }
 0x732   :  { %v10710_v6 = vld [vmem:[#allocation65_spill] sm:$0xff] }
 0x733   :  { %4191 = vperm.xlu0 %4928, %v3293_v35   ;;  %v4037_v62 = vpop.permute.xlu1 %4036  ;;  %v10706_v35 = vld [vmem:[#allocation67_spill] sm:$0xff] }
 0x734   :  { %v4335_v28 = vadd.f32 %v4037_v62, %v3775_v2  ;;  %v4336_v23 = vadd.f32 %v4037_v62, %v3776_v0  ;;  %v3637_v40 = vpop.permute.xlu0 %3636  ;;  %4166 = vperm.xlu1 %4926, %v3288_v56   ;;  %v3782_v46 = vmul.f32 %v8385_v24, %v10706_v35  ;;  %v10707_v24 = vld [vmem:[#allocation141_spill] sm:$0xff]  ;;  %v10708_v62 = vld [vmem:[#allocation142_spill] sm:$0xff] }
 0x735   :  { %v9465_v61 = vmul.f32 %v3637_v40, %v10703_v17  ;;  %v9468_v3 = vmul.f32 %v3637_v40, %v10704_v18  ;;  %v10709_v17 = vld [vmem:[#allocation64_spill] sm:$0xff] }
 0x736   :  { %4495 = vst [vmem:[%s10041_s4 + $0x210] sm:$0xff] %v4335_v28  ;;  %4496 = vst.msk [vmem:[%s10041_s4 + $0x218] sm:$0xff] %vm1083_vm0, %v4336_v23  ;;  %v3779_v18 = vmul.f32 %v8310_v41, %v10709_v17 }
 0x737   :  { %v3116_v43 = vpop.permute.xlu1 %3115 }
 0x738   :  { %4176 = vperm.xlu1 %4926, %v3290_v5   ;;  %v3292_v2 = vsub.f32 %v5152_v11, %v3116_v43  ;;  %v3780_v5 = vmul.f32 %v8310_v41, %v10710_v6  ;;  %v10712_v11 = vld [vmem:[#allocation150_spill] sm:$0xff] }
 0x739   :  { %v4052_v20 = vpop.permute.xlu0 %4051 }
 0x73a   :  { %v4341_v38 = vadd.f32 %v4052_v20, %v3781_v52  ;;  %v4342_v0 = vadd.f32 %v4052_v20, %v3782_v46  ;;  %v10711_v46 = vld [vmem:[#allocation149_spill] sm:$0xff] }
 0x73b   :  { %v3632_v48 = vpop.permute.xlu1 %3631 }
 0x73c   :  { %4501 = vst [vmem:[%s10041_s4 + $0x240] sm:$0xff] %v4341_v38  ;;  %4502 = vst.msk [vmem:[%s10041_s4 + $0x248] sm:$0xff] %vm1083_vm0, %v4342_v0  ;;  %v9495_v56 = vmul.f32 %v3632_v48, %v10707_v24  ;;  %v9498_v28 = vmul.f32 %v3632_v48, %v10708_v62  ;;  %4186 = vperm.xlu1 %4926, %v3292_v2   ;;  %v10714_v0 = vld [vmem:[#allocation71_spill] sm:$0xff] }
 0x73d   :  { %v3122_v23 = vpop.permute.xlu0 %3121  ;;  %v3786_v48 = vmul.f32 %v8598_v1, %v10714_v0 }
 0x73e   :  { %v3295_v40 = vsub.f32 %v8798_v25, %v3122_v23  ;;  %v10713_v25 = vld [vmem:[#allocation70_spill] sm:$0xff] }
 0x73f   :  { %v3785_v2 = vmul.f32 %v8598_v1, %v10713_v25  ;;  %v10716_v1 = vld [vmem:[#allocation148_spill] sm:$0xff] }
 0x740   :  { %4201 = vperm.xlu0 %4928, %v3295_v40   ;;  %v4047_v43 = vpop.permute.xlu1 %4046 }
 0x741   :  { %v4339_v55 = vadd.f32 %v4047_v43, %v3779_v18  ;;  %v4340_v52 = vadd.f32 %v4047_v43, %v3780_v5  ;;  %v3647_v35 = vpop.permute.xlu0 %3646  ;;  %v10715_v18 = vld [vmem:[#allocation147_spill] sm:$0xff] }
 0x742   :  { %v9506_v20 = vmul.f32 %v3647_v35, %v10711_v46  ;;  %v9509_v38 = vmul.f32 %v3647_v35, %v10712_v11  ;;  %v10719_v46 = vld [vmem:[#allocation69_spill] sm:$0xff] }
 0x743   :  { %4499 = vst [vmem:[%s10041_s4 + $0x230] sm:$0xff] %v4339_v55  ;;  %4500 = vst.msk [vmem:[%s10041_s4 + $0x238] sm:$0xff] %vm1083_vm0, %v4340_v52  ;;  %v10717_v55 = vld [vmem:[#allocation68_spill] sm:$0xff]  ;;  %v10718_v52 = vld [vmem:[#allocation98_spill] sm:$0xff] }
 0x744   :  { %v3120_v41 = vpop.permute.xlu1 %3119  ;;  %v3783_v35 = vmul.f32 %v10718_v52, %v10717_v55  ;;  %v3784_v11 = vmul.f32 %v10718_v52, %v10719_v46  ;;  %v10724_v46 = vld [vmem:[#allocation153_spill] sm:$0xff] }
 0x745   :  { %v3294_v24 = vsub.f32 %v8781_v51, %v3120_v41 }
 0x746   :  { %v4062_v62 = vpop.permute.xlu0 %4061 }
 0x747   :  { %v4345_v23 = vadd.f32 %v4062_v62, %v3785_v2  ;;  %v4346_v40 = vadd.f32 %v4062_v62, %v3786_v48  ;;  %4196 = vperm.xlu1 %4926, %v3294_v24   ;;  %v10720_v48 = vld [vmem:[#allocation155_spill] sm:$0xff]  ;;  %v10721_v62 = vld [vmem:[#allocation156_spill] sm:$0xff] }
 0x748   :  { %v3642_v17 = vpop.permute.xlu1 %3641 }
 0x749   :  { %4505 = vst [vmem:[%s10041_s4 + $0x260] sm:$0xff] %v4345_v23  ;;  %4506 = vst.msk [vmem:[%s10041_s4 + $0x268] sm:$0xff] %vm1083_vm0, %v4346_v40  ;;  %v9531_v6 = vmul.f32 %v3642_v17, %v10715_v18  ;;  %v9534_v5 = vmul.f32 %v3642_v17, %v10716_v1  ;;  %v10722_v40 = vld [vmem:[#allocation74_spill] sm:$0xff]  ;;  %v10723_v18 = vld [vmem:[#allocation75_spill] sm:$0xff] }
 0x74a   :  { %v3126_v51 = vpop.permute.xlu0 %3125  ;;  %v3789_v17 = vmul.f32 %v8686_v10, %v10722_v40  ;;  %v3790_v1 = vmul.f32 %v8686_v10, %v10723_v18  ;;  %v10725_v10 = vld [vmem:[#allocation154_spill] sm:$0xff] }
 0x74b   :  { %v3297_v43 = vsub.f32 %v8876_v22, %v3126_v51 }
 0x74d   :  { %4211 = vperm.xlu0 %4928, %v3297_v43   ;;  %v4057_v41 = vpop.permute.xlu1 %4056 }
 0x74e   :  { %v4343_v25 = vadd.f32 %v4057_v41, %v3783_v35  ;;  %v4344_v2 = vadd.f32 %v4057_v41, %v3784_v11  ;;  %v3657_v0 = vpop.permute.xlu0 %3656 }
 0x74f   :  { %v9542_v24 = vmul.f32 %v3657_v0, %v10720_v48  ;;  %v9545_v23 = vmul.f32 %v3657_v0, %v10721_v62  ;;  %v10727_v0 = vld [vmem:[#allocation17_spill] sm:$0xff] }
 0x750   :  { %4503 = vst [vmem:[%s10041_s4 + $0x250] sm:$0xff] %v4343_v25  ;;  %4504 = vst.msk [vmem:[%s10041_s4 + $0x258] sm:$0xff] %vm1083_vm0, %v4344_v2  ;;  %v10726_v2 = vld [vmem:[#allocation72_spill] sm:$0xff]  ;;  %v10728_v62 = vld [vmem:[#allocation73_spill] sm:$0xff] }
 0x751   :  { %v3124_v22 = vpop.permute.xlu1 %3123  ;;  %v3787_v48 = vmul.f32 %v10727_v0, %v10726_v2 }
 0x752   :  { %v3296_v51 = vsub.f32 %v8859_v14, %v3124_v22  ;;  %v3788_v22 = vmul.f32 %v10727_v0, %v10728_v62 }
 0x753   :  { %v4072_v43 = vpop.permute.xlu0 %4071 }
 0x754   :  { %v4349_v55 = vadd.f32 %v4072_v43, %v3789_v17  ;;  %v4350_v52 = vadd.f32 %v4072_v43, %v3790_v1  ;;  %4206 = vperm.xlu1 %4926, %v3296_v51   ;;  %v10729_v51 = vld [vmem:[#allocation161_spill] sm:$0xff] }
 0x755   :  { %v3652_v35 = vpop.permute.xlu1 %3651 }
 0x756   :  { %4509 = vst [vmem:[%s10041_s4 + $0x280] sm:$0xff] %v4349_v55  ;;  %4510 = vst.msk [vmem:[%s10041_s4 + $0x288] sm:$0xff] %vm1083_vm0, %v4350_v52  ;;  %v9567_v11 = vmul.f32 %v3652_v35, %v10724_v46  ;;  %v9570_v41 = vmul.f32 %v3652_v35, %v10725_v10  ;;  %v10730_v55 = vld [vmem:[#allocation162_spill] sm:$0xff]  ;;  %v10732_v46 = vld [vmem:[#allocation177_spill] sm:$0xff] }
 0x757   :  { %v3130_v14 = vpop.permute.xlu0 %3129  ;;  %v10731_v35 = vld [vmem:[#allocation78_spill] sm:$0xff] }
 0x758   :  { %v3299_v25 = vsub.f32 %v8954_v12, %v3130_v14  ;;  %v3793_v10 = vmul.f32 %v10732_v46, %v10731_v35  ;;  %v10733_v14 = vld [vmem:[#allocation79_spill] sm:$0xff] }
 0x75a   :  { %4221 = vperm.xlu0 %4928, %v3299_v25   ;;  %v4067_v40 = vpop.permute.xlu1 %4066  ;;  %v3794_v25 = vmul.f32 %v10732_v46, %v10733_v14  ;;  %v10738_v46 = vld [vmem:[#allocation77_spill] sm:$0xff] }
 0x75b   :  { %v4347_v17 = vadd.f32 %v4067_v40, %v3787_v48  ;;  %v4348_v18 = vadd.f32 %v4067_v40, %v3788_v22  ;;  %v3667_v1 = vpop.permute.xlu0 %3666  ;;  %v10734_v40 = vld [vmem:[#allocation159_spill] sm:$0xff] }
 0x75c   :  { %v9578_v43 = vmul.f32 %v3667_v1, %v10729_v51  ;;  %v9581_v52 = vmul.f32 %v3667_v1, %v10730_v55  ;;  %v10736_v55 = vld [vmem:[#allocation76_spill] sm:$0xff] }
 0x75d   :  { %4507 = vst [vmem:[%s10041_s4 + $0x270] sm:$0xff] %v4347_v17  ;;  %4508 = vst.msk [vmem:[%s10041_s4 + $0x278] sm:$0xff] %vm1083_vm0, %v4348_v18  ;;  %v10735_v18 = vld [vmem:[#allocation160_spill] sm:$0xff] }
 0x75e   :  { %v3128_v12 = vpop.permute.xlu1 %3127 }
 0x75f   :  { %v3298_v2 = vsub.f32 %v8937_v7, %v3128_v12  ;;  %v10737_v12 = vld [vmem:[#allocation18_spill] sm:$0xff] }
 0x760   :  { %v4082_v0 = vpop.permute.xlu0 %4081  ;;  %v3791_v35 = vmul.f32 %v10737_v12, %v10736_v55  ;;  %v10745_v55 = vld [vmem:[#allocation83_spill] sm:$0xff] }
 0x761   :  { %v4353_v48 = vadd.f32 %v4082_v0, %v3793_v10  ;;  %v4354_v62 = vadd.f32 %v4082_v0, %v3794_v25  ;;  %4216 = vperm.xlu1 %4926, %v3298_v2   ;;  %v3792_v10 = vmul.f32 %v10737_v12, %v10738_v46 }
 0x762   :  { %v3662_v22 = vpop.permute.xlu1 %3661 }
 0x763   :  { %4513 = vst [vmem:[%s10041_s4 + $0x2a0] sm:$0xff] %v4353_v48  ;;  %4514 = vst.msk [vmem:[%s10041_s4 + $0x2a8] sm:$0xff] %vm1083_vm0, %v4354_v62  ;;  %v9603_v17 = vmul.f32 %v3662_v22, %v10734_v40  ;;  %v9606_v1 = vmul.f32 %v3662_v22, %v10735_v18  ;;  %v10739_v48 = vld [vmem:[#allocation173_spill] sm:$0xff]  ;;  %v10741_v40 = vld [vmem:[#allocation174_spill] sm:$0xff] }
 0x764   :  { %v3134_v7 = vpop.permute.xlu0 %3133  ;;  %v10743_v18 = vld [vmem:[#allocation82_spill] sm:$0xff] }
 0x765   :  { %v3301_v51 = vsub.f32 %v9032_v58, %v3134_v7  ;;  %v10744_v7 = vld [vmem:[#allocation100_spill] sm:$0xff] }
 0x766   :  { %v3798_v12 = vmul.f32 %v10744_v7, %v10745_v55  ;;  %v10750_v55 = vld [vmem:[#allocation81_spill] sm:$0xff] }
 0x767   :  { %4231 = vperm.xlu0 %4928, %v3301_v51   ;;  %v4077_v14 = vpop.permute.xlu1 %4076  ;;  %v3797_v51 = vmul.f32 %v10744_v7, %v10743_v18  ;;  %v10748_v18 = vld [vmem:[#allocation80_spill] sm:$0xff]  ;;  %v10749_v7 = vld [vmem:[#allocation99_spill] sm:$0xff] }
 0x768   :  { %v4351_v25 = vadd.f32 %v4077_v14, %v3791_v35  ;;  %v4352_v2 = vadd.f32 %v4077_v14, %v3792_v10  ;;  %v3677_v0 = vpop.permute.xlu0 %3676 }
 0x769   :  { %v9614_v62 = vmul.f32 %v3677_v0, %v10739_v48  ;;  %v9617_v22 = vmul.f32 %v3677_v0, %v10741_v40  ;;  %v10747_v48 = vld [vmem:[#allocation169_spill] sm:$0xff] }
 0x76a   :  { %4511 = vst [vmem:[%s10041_s4 + $0x290] sm:$0xff] %v4351_v25  ;;  %4512 = vst.msk [vmem:[%s10041_s4 + $0x298] sm:$0xff] %vm1083_vm0, %v4352_v2  ;;  %v10746_v25 = vld [vmem:[#allocation168_spill] sm:$0xff] }
 0x76b   :  { %10740 = vst [vmem:[#allocation172_spill] sm:$0xff] %v9614_v62  ;;  %10742 = vst [vmem:[#allocation184_spill] sm:$0xff] %v9617_v22  ;;  %v3132_v58 = vpop.permute.xlu1 %3131  ;;  %v10751_v22 = vld [vmem:[#allocation197_spill] sm:$0xff]  ;;  %v10752_v62 = vld [vmem:[#allocation198_spill] sm:$0xff] }
 0x76c   :  { %v3300_v35 = vsub.f32 %v9015_v33, %v3132_v58 }
 0x76d   :  { %v4092_v46 = vpop.permute.xlu0 %4091 }
 0x76e   :  { %v4357_v10 = vadd.f32 %v4092_v46, %v3797_v51  ;;  %v4358_v14 = vadd.f32 %v4092_v46, %v3798_v12  ;;  %4226 = vperm.xlu1 %4926, %v3300_v35   ;;  %v3795_v51 = vmul.f32 %v10749_v7, %v10748_v18  ;;  %v3796_v12 = vmul.f32 %v10749_v7, %v10750_v55 }
 0x76f   :  { %v3672_v0 = vpop.permute.xlu1 %3671 }
 0x770   :  { %4517 = vst [vmem:[%s10041_s4 + $0x2c0] sm:$0xff] %v4357_v10  ;;  %4518 = vst.msk [vmem:[%s10041_s4 + $0x2c8] sm:$0xff] %vm1083_vm0, %v4358_v14  ;;  %v9639_v2 = vmul.f32 %v3672_v0, %v10746_v25  ;;  %v9642_v40 = vmul.f32 %v3672_v0, %v10747_v48  ;;  %v10754_v48 = vld [vmem:[#allocation86_spill] sm:$0xff] }
 0x771   :  { %v3138_v33 = vpop.permute.xlu0 %3137 }
 0x772   :  { %v3303_v58 = vsub.f32 %v9110_v36, %v3138_v33  ;;  %v3801_v33 = vmul.f32 %v8909_v59, %v10754_v48 }
 0x774   :  { %4241 = vperm.xlu0 %4928, %v3303_v58   ;;  %v4087_v35 = vpop.permute.xlu1 %4086  ;;  %v10755_v58 = vld [vmem:[#allocation87_spill] sm:$0xff] }
 0x775   :  { %v4355_v46 = vadd.f32 %v4087_v35, %v3795_v51  ;;  %v4356_v10 = vadd.f32 %v4087_v35, %v3796_v12  ;;  %v3687_v14 = vpop.permute.xlu0 %3686  ;;  %v10756_v12 = vld [vmem:[#allocation187_spill] sm:$0xff] }
 0x776   :  { %v9650_v25 = vmul.f32 %v3687_v14, %v10751_v22  ;;  %v9653_v0 = vmul.f32 %v3687_v14, %v10752_v62  ;;  %v3802_v22 = vmul.f32 %v8909_v59, %v10755_v58  ;;  %v10757_v59 = vld [vmem:[#allocation189_spill] sm:$0xff]  ;;  %v10758_v14 = vld [vmem:[#allocation84_spill] sm:$0xff] }
 0x777   :  { %4515 = vst [vmem:[%s10041_s4 + $0x2b0] sm:$0xff] %v4355_v46  ;;  %4516 = vst.msk [vmem:[%s10041_s4 + $0x2b8] sm:$0xff] %vm1083_vm0, %v4356_v10 }
 0x778   :  { %10753 = vst [vmem:[#allocation19_spill] sm:$0xff] %v9653_v0  ;;  %v3136_v36 = vpop.permute.xlu1 %3135  ;;  %v10762_v0 = vld [vmem:[#allocation224_spill] sm:$0xff] }
 0x779   :  { %v3302_v18 = vsub.f32 %v9093_v30, %v3136_v36  ;;  %v10759_v36 = vld [vmem:[#allocation199_spill] sm:$0xff] }
 0x77a   :  { %v4102_v62 = vpop.permute.xlu0 %4101  ;;  %v3799_v48 = vmul.f32 %v10759_v36, %v10758_v14 }
 0x77b   :  { %v4361_v7 = vadd.f32 %v4102_v62, %v3801_v33  ;;  %v4362_v51 = vadd.f32 %v4102_v62, %v3802_v22  ;;  %4236 = vperm.xlu1 %4926, %v3302_v18   ;;  %v10760_v33 = vld [vmem:[#allocation85_spill] sm:$0xff] }
 0x77c   :  { %v3682_v55 = vpop.permute.xlu1 %3681  ;;  %v3800_v58 = vmul.f32 %v10759_v36, %v10760_v33 }
 0x77d   :  { %4521 = vst [vmem:[%s10041_s4 + $0x2e0] sm:$0xff] %v4361_v7  ;;  %4522 = vst.msk [vmem:[%s10041_s4 + $0x2e8] sm:$0xff] %vm1083_vm0, %v4362_v51  ;;  %v9675_v35 = vmul.f32 %v3682_v55, %v10756_v12  ;;  %v9678_v46 = vmul.f32 %v3682_v55, %v10757_v59  ;;  %v10761_v51 = vld [vmem:[#allocation222_spill] sm:$0xff] }
 0x77e   :  { %v3142_v30 = vpop.permute.xlu0 %3141  ;;  %v10764_v59 = vld [vmem:[#allocation90_spill] sm:$0xff] }
 0x77f   :  { %v3305_v10 = vsub.f32 %v9183_v27, %v3142_v30  ;;  %v3805_v30 = vmul.f32 %v8987_v34, %v10764_v59 }
 0x781   :  { %4251 = vperm.xlu0 %4928, %v3305_v10   ;;  %v4097_v22 = vpop.permute.xlu1 %4096  ;;  %v10765_v10 = vld [vmem:[#allocation91_spill] sm:$0xff] }
 0x782   :  { %v4359_v18 = vadd.f32 %v4097_v22, %v3799_v48  ;;  %v4360_v62 = vadd.f32 %v4097_v22, %v3800_v58  ;;  %v3697_v7 = vpop.permute.xlu0 %3696  ;;  %v3806_v14 = vmul.f32 %v8987_v34, %v10765_v10  ;;  %v10766_v22 = vld [vmem:[#allocation213_spill] sm:$0xff]  ;;  %v10767_v34 = vld [vmem:[#allocation214_spill] sm:$0xff] }
 0x783   :  { %v9686_v12 = vmul.f32 %v3697_v7, %v10761_v51  ;;  %v9689_v55 = vmul.f32 %v3697_v7, %v10762_v0  ;;  %v10768_v51 = vld [vmem:[#allocation88_spill] sm:$0xff] }
 0x784   :  { %4519 = vst [vmem:[%s10041_s4 + $0x2d0] sm:$0xff] %v4359_v18  ;;  %4520 = vst.msk [vmem:[%s10041_s4 + $0x2d8] sm:$0xff] %vm1083_vm0, %v4360_v62 }
 0x785   :  { %10763 = vst [vmem:[#allocation182_spill] sm:$0xff] %v9689_v55  ;;  %v3140_v27 = vpop.permute.xlu1 %3139  ;;  %v10772_v55 = vld [vmem:[#allocation241_spill] sm:$0xff] }
 0x786   :  { %v3304_v36 = vsub.f32 %v9168_v19, %v3140_v27  ;;  %v10769_v27 = vld [vmem:[#allocation164_spill] sm:$0xff] }
 0x787   :  { %v4112_v0 = vpop.permute.xlu0 %4111  ;;  %v3803_v59 = vmul.f32 %v10769_v27, %v10768_v51 }
 0x788   :  { %v4365_v48 = vadd.f32 %v4112_v0, %v3805_v30  ;;  %v4366_v33 = vadd.f32 %v4112_v0, %v3806_v14  ;;  %4246 = vperm.xlu1 %4926, %v3304_v36   ;;  %v10770_v30 = vld [vmem:[#allocation89_spill] sm:$0xff] }
 0x789   :  { %v3692_v58 = vpop.permute.xlu1 %3691  ;;  %v3804_v10 = vmul.f32 %v10769_v27, %v10770_v30 }
 0x78a   :  { %4525 = vst [vmem:[%s10041_s4 + $0x300] sm:$0xff] %v4365_v48  ;;  %4526 = vst.msk [vmem:[%s10041_s4 + $0x308] sm:$0xff] %vm1083_vm0, %v4366_v33  ;;  %v9711_v18 = vmul.f32 %v3692_v58, %v10766_v22  ;;  %v9714_v62 = vmul.f32 %v3692_v58, %v10767_v34  ;;  %v10771_v33 = vld [vmem:[#allocation240_spill] sm:$0xff]  ;;  %v10773_v34 = vld [vmem:[#allocation95_spill] sm:$0xff] }
 0x78b   :  { %v3146_v19 = vpop.permute.xlu0 %3145 }
 0x78c   :  { %v3307_v7 = vsub.f32 %v9254_v42, %v3146_v19  ;;  %v3809_v19 = vmul.f32 %v9065_v63, %v10773_v34 }
 0x78e   :  { %4261 = vperm.xlu0 %4928, %v3307_v7   ;;  %v4107_v14 = vpop.permute.xlu1 %4106  ;;  %v10774_v7 = vld [vmem:[#allocation96_spill] sm:$0xff] }
 0x78f   :  { %v4363_v36 = vadd.f32 %v4107_v14, %v3803_v59  ;;  %v4364_v0 = vadd.f32 %v4107_v14, %v3804_v10  ;;  %v3707_v48 = vpop.permute.xlu0 %3706  ;;  %v3810_v51 = vmul.f32 %v9065_v63, %v10774_v7  ;;  %v10775_v14 = vld [vmem:[#allocation105_spill] sm:$0xff]  ;;  %v10777_v63 = vld [vmem:[#allocation235_spill] sm:$0xff] }
 0x790   :  { %v9722_v22 = vmul.f32 %v3707_v48, %v10771_v33  ;;  %v9725_v58 = vmul.f32 %v3707_v48, %v10772_v55  ;;  %v10776_v48 = vld [vmem:[#allocation106_spill] sm:$0xff]  ;;  %v10778_v33 = vld [vmem:[#allocation236_spill] sm:$0xff] }
 0x791   :  { %4523 = vst [vmem:[%s10041_s4 + $0x2f0] sm:$0xff] %v4363_v36  ;;  %4524 = vst.msk [vmem:[%s10041_s4 + $0x2f8] sm:$0xff] %vm1083_vm0, %v4364_v0  ;;  %v3813_v36 = vmul.f32 %v9143_v4, %v10775_v14  ;;  %v3814_v0 = vmul.f32 %v9143_v4, %v10776_v48  ;;  %v10782_v48 = vld [vmem:[#allocation112_spill] sm:$0xff] }
 0x792   :  { %v3144_v42 = vpop.permute.xlu1 %3143 }
 0x793   :  { %v3306_v27 = vsub.f32 %v9228_v39, %v3144_v42 }
 0x794   :  { %v4122_v55 = vpop.permute.xlu0 %4121 }
 0x795   :  { %v4369_v59 = vadd.f32 %v4122_v55, %v3809_v19  ;;  %v4370_v30 = vadd.f32 %v4122_v55, %v3810_v51  ;;  %4256 = vperm.xlu1 %4926, %v3306_v27   ;;  %v10779_v51 = vld [vmem:[#allocation92_spill] sm:$0xff]  ;;  %v10780_v27 = vld [vmem:[#allocation93_spill] sm:$0xff] }
 0x796   :  { %v3702_v10 = vpop.permute.xlu1 %3701  ;;  %v3807_v4 = vmul.f32 %v8944_v53, %v10779_v51  ;;  %v3808_v55 = vmul.f32 %v8944_v53, %v10780_v27 }
 0x797   :  { %4529 = vst [vmem:[%s10041_s4 + $0x320] sm:$0xff] %v4369_v59  ;;  %4530 = vst.msk [vmem:[%s10041_s4 + $0x328] sm:$0xff] %vm1083_vm0, %v4370_v30  ;;  %v9751_v39 = vmul.f32 %v3702_v10, %v10777_v63  ;;  %v9754_v42 = vmul.f32 %v3702_v10, %v10778_v33  ;;  %v10781_v59 = vld [vmem:[#allocation111_spill] sm:$0xff]  ;;  %v3818_v30 = vmul.f32 %v9207_v9, %v10782_v48 }
 0x798   :  { %v4132_v34 = vpop.permute.xlu0 %4131  ;;  %v3817_v14 = vmul.f32 %v9207_v9, %v10781_v59  ;;  %v10783_v9 = vld [vmem:[#allocation117_spill] sm:$0xff] }
 0x799   :  { %v4373_v19 = vadd.f32 %v4132_v34, %v3813_v36  ;;  %v4374_v7 = vadd.f32 %v4132_v34, %v3814_v0  ;;  %v3821_v34 = vmul.f32 %v9270_v49, %v10783_v9 }
 0x79b   :  { %4533 = vst [vmem:[%s10041_s4 + $0x340] sm:$0xff] %v4373_v19  ;;  %4534 = vst.msk [vmem:[%s10041_s4 + $0x348] sm:$0xff] %vm1083_vm0, %v4374_v7  ;;  %v4117_v10 = vpop.permute.xlu1 %4116  ;;  %v10784_v19 = vld [vmem:[#allocation118_spill] sm:$0xff] }
 0x79c   :  { %v4367_v36 = vadd.f32 %v4117_v10, %v3807_v4  ;;  %v4368_v0 = vadd.f32 %v4117_v10, %v3808_v55  ;;  %v4142_v63 = vpop.permute.xlu0 %4141  ;;  %v3822_v7 = vmul.f32 %v9270_v49, %v10784_v19 }
 0x79d   :  { %v4377_v53 = vadd.f32 %v4142_v63, %v3817_v14  ;;  %v4378_v33 = vadd.f32 %v4142_v63, %v3818_v30  ;;  %v10785_v14 = vld [vmem:[#allocation101_spill] sm:$0xff]  ;;  %v10786_v30 = vld [vmem:[#allocation102_spill] sm:$0xff] }
 0x79e   :  { %4527 = vst [vmem:[%s10041_s4 + $0x310] sm:$0xff] %v4367_v36  ;;  %4528 = vst.msk [vmem:[%s10041_s4 + $0x318] sm:$0xff] %vm1083_vm0, %v4368_v0  ;;  %v3811_v48 = vmul.f32 %v9022_v44, %v10785_v14  ;;  %v3812_v49 = vmul.f32 %v9022_v44, %v10786_v30  ;;  %v10788_v44 = vld [vmem:[#allocation103_spill] sm:$0xff]  ;;  %v10791_v14 = vld [vmem:[#allocation114_spill] sm:$0xff] }
 0x79f   :  { %4537 = vst [vmem:[%s10041_s4 + $0x360] sm:$0xff] %v4377_v53  ;;  %4538 = vst.msk [vmem:[%s10041_s4 + $0x368] sm:$0xff] %vm1083_vm0, %v4378_v33  ;;  %v3148_v51 = vpop.permute.xlu1 %3147  ;;  %v10787_v33 = vld [vmem:[#allocation107_spill] sm:$0xff] }
 0x7a0   :  { %v3308_v4 = vsub.f32 %v9290_v50, %v3148_v51  ;;  %v4152_v27 = vpop.permute.xlu0 %4151  ;;  %v3815_v9 = vmul.f32 %v10788_v44, %v10787_v33 }
 0x7a1   :  { %v4381_v55 = vadd.f32 %v4152_v27, %v3821_v34  ;;  %v4382_v59 = vadd.f32 %v4152_v27, %v3822_v7  ;;  %v10789_v34 = vld [vmem:[#allocation108_spill] sm:$0xff] }
 0x7a2   :  { %4266 = vperm.xlu1 %4926, %v3308_v4   ;;  %v3816_v19 = vmul.f32 %v10788_v44, %v10789_v34 }
 0x7a3   :  { %4541 = vst [vmem:[%s10041_s4 + $0x380] sm:$0xff] %v4381_v55  ;;  %4542 = vst.msk [vmem:[%s10041_s4 + $0x388] sm:$0xff] %vm1083_vm0, %v4382_v59  ;;  %v4127_v50 = vpop.permute.xlu1 %4126  ;;  %v10790_v55 = vld [vmem:[#allocation113_spill] sm:$0xff] }
 0x7a4   :  { %v4371_v10 = vadd.f32 %v4127_v50, %v3811_v48  ;;  %v4372_v36 = vadd.f32 %v4127_v50, %v3812_v49  ;;  %v4162_v0 = vpop.permute.xlu0 %4161  ;;  %v3819_v59 = vmul.f32 %v9175_v21, %v10790_v55  ;;  %v3820_v48 = vmul.f32 %v9175_v21, %v10791_v14 }
 0x7a5   :  { %v4385_v63 = vadd.f32 %v4162_v0, %v9335_v8  ;;  %v4386_v53 = vadd.f32 %v4162_v0, %v9338_v31 }
 0x7a6   :  { %4531 = vst [vmem:[%s10041_s4 + $0x330] sm:$0xff] %v4371_v10  ;;  %4532 = vst.msk [vmem:[%s10041_s4 + $0x338] sm:$0xff] %vm1083_vm0, %v4372_v36 }
 0x7a7   :  { %4545 = vst [vmem:[%s10041_s4 + $0x3a0] sm:$0xff] %v4385_v63  ;;  %4546 = vst.msk [vmem:[%s10041_s4 + $0x3a8] sm:$0xff] %vm1083_vm0, %v4386_v53  ;;  %v4137_v8 = vpop.permute.xlu1 %4136 }
 0x7a8   :  { %v4375_v31 = vadd.f32 %v4137_v8, %v3815_v9  ;;  %v4376_v7 = vadd.f32 %v4137_v8, %v3816_v19  ;;  %v4172_v51 = vpop.permute.xlu0 %4171 }
 0x7a9   :  { %v4389_v4 = vadd.f32 %v4172_v51, %v9394_v26  ;;  %v4390_v27 = vadd.f32 %v4172_v51, %v9397_v45 }
 0x7aa   :  { %4535 = vst [vmem:[%s10041_s4 + $0x350] sm:$0xff] %v4375_v31  ;;  %4536 = vst.msk [vmem:[%s10041_s4 + $0x358] sm:$0xff] %vm1083_vm0, %v4376_v7 }
 0x7ab   :  { %4549 = vst [vmem:[%s10041_s4 + $0x3c0] sm:$0xff] %v4389_v4  ;;  %4550 = vst.msk [vmem:[%s10041_s4 + $0x3c8] sm:$0xff] %vm1083_vm0, %v4390_v27  ;;  %v4147_v26 = vpop.permute.xlu1 %4146 }
 0x7ac   :  { %v4379_v21 = vadd.f32 %v4147_v26, %v3819_v59  ;;  %v4380_v45 = vadd.f32 %v4147_v26, %v3820_v48  ;;  %v4182_v30 = vpop.permute.xlu0 %4181  ;;  %v10793_v59 = vld [vmem:[#allocation184_spill] sm:$0xff] }
 0x7ad   :  { %v4393_v49 = vadd.f32 %v4182_v30, %v9450_v15  ;;  %v4394_v50 = vadd.f32 %v4182_v30, %v9453_v47 }
 0x7ae   :  { %4539 = vst [vmem:[%s10041_s4 + $0x370] sm:$0xff] %v4379_v21  ;;  %4540 = vst.msk [vmem:[%s10041_s4 + $0x378] sm:$0xff] %vm1083_vm0, %v4380_v45  ;;  %v10794_v45 = vld [vmem:[#allocation19_spill] sm:$0xff] }
 0x7af   :  { %4553 = vst [vmem:[%s10041_s4 + $0x3e0] sm:$0xff] %v4393_v49  ;;  %4554 = vst.msk [vmem:[%s10041_s4 + $0x3e8] sm:$0xff] %vm1083_vm0, %v4394_v50  ;;  %v4157_v15 = vpop.permute.xlu1 %4156 }
 0x7b0   :  { %v4383_v47 = vadd.f32 %v4157_v15, %v9237_v16  ;;  %v4384_v10 = vadd.f32 %v4157_v15, %v9240_v13  ;;  %v10795_v15 = vld [vmem:[#allocation182_spill] sm:$0xff] }
 0x7b2   :  { %4543 = vst [vmem:[%s10041_s4 + $0x390] sm:$0xff] %v4383_v47  ;;  %4544 = vst.msk [vmem:[%s10041_s4 + $0x398] sm:$0xff] %vm1083_vm0, %v4384_v10  ;;  %v4192_v36 = vpop.permute.xlu0 %4191 }
 0x7b3   :  { %v4397_v0 = vadd.f32 %v4192_v36, %v9495_v56  ;;  %v4398_v63 = vadd.f32 %v4192_v36, %v9498_v28  ;;  %v4167_v53 = vpop.permute.xlu1 %4166 }
 0x7b4   :  { %v4387_v33 = vadd.f32 %v4167_v53, %v9299_v54  ;;  %v4388_v16 = vadd.f32 %v4167_v53, %v9302_v60 }
 0x7b5   :  { %4557 = vst [vmem:[%s10041_s4 + $0x400] sm:$0xff] %v4397_v0  ;;  %4558 = vst.msk [vmem:[%s10041_s4 + $0x408] sm:$0xff] %vm1083_vm0, %v4398_v63 }
 0x7b6   :  { %4547 = vst [vmem:[%s10041_s4 + $0x3b0] sm:$0xff] %v4387_v33  ;;  %4548 = vst.msk [vmem:[%s10041_s4 + $0x3b8] sm:$0xff] %vm1083_vm0, %v4388_v16 }
 0x7b7   :  { %v4177_v13 = vpop.permute.xlu1 %4176 }
 0x7b8   :  { %v4391_v54 = vadd.f32 %v4177_v13, %v9357_v57  ;;  %v4392_v60 = vadd.f32 %v4177_v13, %v9360_v32 }
 0x7ba   :  { %4551 = vst [vmem:[%s10041_s4 + $0x3d0] sm:$0xff] %v4391_v54  ;;  %4552 = vst.msk [vmem:[%s10041_s4 + $0x3d8] sm:$0xff] %vm1083_vm0, %v4392_v60 }
 0x7bb   :  { %v4187_v56 = vpop.permute.xlu1 %4186 }
 0x7bc   :  { %v4395_v28 = vadd.f32 %v4187_v56, %v9415_v37  ;;  %v4396_v44 = vadd.f32 %v4187_v56, %v9418_v29 }
 0x7be   :  { %4555 = vst [vmem:[%s10041_s4 + $0x3f0] sm:$0xff] %v4395_v28  ;;  %4556 = vst.msk [vmem:[%s10041_s4 + $0x3f8] sm:$0xff] %vm1083_vm0, %v4396_v44 }
 0x7bf   :  { %v4202_v57 = vpop.permute.xlu0 %4201 }
 0x7c0   :  { %v4401_v32 = vadd.f32 %v4202_v57, %v9531_v6  ;;  %v4402_v9 = vadd.f32 %v4202_v57, %v9534_v5 }
 0x7c2   :  { %4561 = vst [vmem:[%s10041_s4 + $0x420] sm:$0xff] %v4401_v32  ;;  %4562 = vst.msk [vmem:[%s10041_s4 + $0x428] sm:$0xff] %vm1083_vm0, %v4402_v9 }
 0x7c6   :  { %v4197_v37 = vpop.permute.xlu1 %4196 }
 0x7c7   :  { %v4399_v29 = vadd.f32 %v4197_v37, %v9465_v61  ;;  %v4400_v34 = vadd.f32 %v4197_v37, %v9468_v3 }
 0x7c9   :  { %4559 = vst [vmem:[%s10041_s4 + $0x410] sm:$0xff] %v4399_v29  ;;  %4560 = vst.msk [vmem:[%s10041_s4 + $0x418] sm:$0xff] %vm1083_vm0, %v4400_v34 }
 0x7cc   :  { %v4212_v6 = vpop.permute.xlu0 %4211 }
 0x7cd   :  { %v4405_v5 = vadd.f32 %v4212_v6, %v9567_v11  ;;  %v4406_v19 = vadd.f32 %v4212_v6, %v9570_v41 }
 0x7cf   :  { %4565 = vst [vmem:[%s10041_s4 + $0x440] sm:$0xff] %v4405_v5  ;;  %4566 = vst.msk [vmem:[%s10041_s4 + $0x448] sm:$0xff] %vm1083_vm0, %v4406_v19 }
 0x7d3   :  { %v4207_v61 = vpop.permute.xlu1 %4206 }
 0x7d4   :  { %v4403_v3 = vadd.f32 %v4207_v61, %v9506_v20  ;;  %v4404_v8 = vadd.f32 %v4207_v61, %v9509_v38 }
 0x7d6   :  { %4563 = vst [vmem:[%s10041_s4 + $0x430] sm:$0xff] %v4403_v3  ;;  %4564 = vst.msk [vmem:[%s10041_s4 + $0x438] sm:$0xff] %vm1083_vm0, %v4404_v8 }
 0x7d9   :  { %v4222_v11 = vpop.permute.xlu0 %4221 }
 0x7da   :  { %v4409_v41 = vadd.f32 %v4222_v11, %v9603_v17  ;;  %v4410_v31 = vadd.f32 %v4222_v11, %v9606_v1 }
 0x7dc   :  { %4569 = vst [vmem:[%s10041_s4 + $0x460] sm:$0xff] %v4409_v41  ;;  %4570 = vst.msk [vmem:[%s10041_s4 + $0x468] sm:$0xff] %vm1083_vm0, %v4410_v31 }
 0x7e0   :  { %v4217_v20 = vpop.permute.xlu1 %4216 }
 0x7e1   :  { %v4407_v38 = vadd.f32 %v4217_v20, %v9542_v24  ;;  %v4408_v7 = vadd.f32 %v4217_v20, %v9545_v23 }
 0x7e3   :  { %4567 = vst [vmem:[%s10041_s4 + $0x450] sm:$0xff] %v4407_v38  ;;  %4568 = vst.msk [vmem:[%s10041_s4 + $0x458] sm:$0xff] %vm1083_vm0, %v4408_v7 }
 0x7e6   :  { %v4232_v17 = vpop.permute.xlu0 %4231 }
 0x7e7   :  { %v4413_v1 = vadd.f32 %v4232_v17, %v9639_v2  ;;  %v4414_v51 = vadd.f32 %v4232_v17, %v9642_v40 }
 0x7e9   :  { %4573 = vst [vmem:[%s10041_s4 + $0x480] sm:$0xff] %v4413_v1  ;;  %4574 = vst.msk [vmem:[%s10041_s4 + $0x488] sm:$0xff] %vm1083_vm0, %v4414_v51 }
 0x7ed   :  { %v4227_v24 = vpop.permute.xlu1 %4226 }
 0x7ee   :  { %v4411_v23 = vadd.f32 %v4227_v24, %v9578_v43  ;;  %v4412_v4 = vadd.f32 %v4227_v24, %v9581_v52  ;;  %v10792_v52 = vld [vmem:[#allocation172_spill] sm:$0xff] }
 0x7f0   :  { %4571 = vst [vmem:[%s10041_s4 + $0x470] sm:$0xff] %v4411_v23  ;;  %4572 = vst.msk [vmem:[%s10041_s4 + $0x478] sm:$0xff] %vm1083_vm0, %v4412_v4 }
 0x7f3   :  { %v4242_v2 = vpop.permute.xlu0 %4241 }
 0x7f4   :  { %v4417_v40 = vadd.f32 %v4242_v2, %v9675_v35  ;;  %v4418_v27 = vadd.f32 %v4242_v2, %v9678_v46 }
 0x7f6   :  { %4577 = vst [vmem:[%s10041_s4 + $0x4a0] sm:$0xff] %v4417_v40  ;;  %4578 = vst.msk [vmem:[%s10041_s4 + $0x4a8] sm:$0xff] %vm1083_vm0, %v4418_v27 }
 0x7fa   :  { %v4237_v43 = vpop.permute.xlu1 %4236 }
 0x7fb   :  { %v4415_v55 = vadd.f32 %v4237_v43, %v10792_v52  ;;  %v4416_v14 = vadd.f32 %v4237_v43, %v10793_v59 }
 0x7fd   :  { %4575 = vst [vmem:[%s10041_s4 + $0x490] sm:$0xff] %v4415_v55  ;;  %4576 = vst.msk [vmem:[%s10041_s4 + $0x498] sm:$0xff] %vm1083_vm0, %v4416_v14 }
 0x800   :  { %v4252_v35 = vpop.permute.xlu0 %4251 }
 0x801   :  { %v4421_v46 = vadd.f32 %v4252_v35, %v9711_v18  ;;  %v4422_v48 = vadd.f32 %v4252_v35, %v9714_v62 }
 0x803   :  { %4581 = vst [vmem:[%s10041_s4 + $0x4c0] sm:$0xff] %v4421_v46  ;;  %4582 = vst.msk [vmem:[%s10041_s4 + $0x4c8] sm:$0xff] %vm1083_vm0, %v4422_v48 }
 0x807   :  { %v4247_v26 = vpop.permute.xlu1 %4246 }
 0x808   :  { %v4419_v21 = vadd.f32 %v4247_v26, %v9650_v25  ;;  %v4420_v30 = vadd.f32 %v4247_v26, %v10794_v45 }
 0x80a   :  { %4579 = vst [vmem:[%s10041_s4 + $0x4b0] sm:$0xff] %v4419_v21  ;;  %4580 = vst.msk [vmem:[%s10041_s4 + $0x4b8] sm:$0xff] %vm1083_vm0, %v4420_v30 }
 0x80d   :  { %v4262_v18 = vpop.permute.xlu0 %4261 }
 0x80e   :  { %v4425_v62 = vadd.f32 %v4262_v18, %v9751_v39  ;;  %v4426_v49 = vadd.f32 %v4262_v18, %v9754_v42 }
 0x810   :  { %4585 = vst [vmem:[%s10041_s4 + $0x4e0] sm:$0xff] %v4425_v62  ;;  %4586 = vst.msk [vmem:[%s10041_s4 + $0x4e8] sm:$0xff] %vm1083_vm0, %v4426_v49 }
 0x814   :  { %v4257_v25 = vpop.permute.xlu1 %4256 }
 0x815   :  { %v4423_v50 = vadd.f32 %v4257_v25, %v9686_v12  ;;  %v4424_v47 = vadd.f32 %v4257_v25, %v10795_v15 }
 0x817   :  { %4583 = vst [vmem:[%s10041_s4 + $0x4d0] sm:$0xff] %v4423_v50  ;;  %4584 = vst.msk [vmem:[%s10041_s4 + $0x4d8] sm:$0xff] %vm1083_vm0, %v4424_v47 }
 0x821   :  { %v4267_v39 = vpop.permute.xlu1 %4266 }
 0x822   :  { %v4427_v42 = vadd.f32 %v4267_v39, %v9722_v22  ;;  %v4428_v10 = vadd.f32 %v4267_v39, %v9725_v58 }
 0x824   :  { %4587 = vst [vmem:[%s10041_s4 + $0x4f0] sm:$0xff] %v4427_v42  ;;  %4588 = vst.msk [vmem:[%s10041_s4 + $0x4f8] sm:$0xff] %vm1083_vm0, %v4428_v10 }

</bundles_post_ra>
